<compile_context>
chip_gen: v6e
topology: v6e:2x2x1
jax: 0.10.0
libtpu: 0.0.40
codegen_flags: <defaults>
</compile_context>

<pallas_src>
import functools
import math

import jax
import jax.numpy as jnp
from jax.experimental import pallas as pl
from jax.experimental.pallas import tpu as pltpu

EPS = 1e-5
BN_SCALE = 1.0 / math.sqrt(1.0 + EPS)   # eval-mode BN: gamma=1, var=1, mean=0, beta=0

LANE = 128                               # lane-dense channel padding
SUBLANE = 16                             # bf16-friendly row tiling unit
VMEM_LIMIT = 48 * 1024 * 1024            # fits v7x (64 MiB) as well as v5e/v6e


def _make_divisible(v, divisor, min_value=None):
    if min_value is None:
        min_value = divisor
    new_v = max(min_value, int(v + divisor / 2) // divisor * divisor)
    if new_v < 0.9 * v:
        new_v += divisor
    return new_v


def _round_up(x, m):
    return (x + m - 1) // m * m


def _pick_tile(dim, cap, unit):
    """Largest tile <= cap (stepping by `unit`) that divides `dim`."""
    t = min(dim, cap)
    while t > 0 and dim % t:
        t -= unit
    return t if t > 0 else dim


def _pick_m_tile(m, cap=256):
    """Row tile; prefer >=2 blocks so both v7x TensorCores get work."""
    t = _pick_tile(m, cap, SUBLANE)
    if t == m and m % (2 * SUBLANE) == 0:
        t = m // 2
    return t


# ---------------------------------------------------------------------------
# Pallas kernels
# ---------------------------------------------------------------------------

def _mm_kernel(*refs, act, has_se, has_res, nk):
    """Tiled matmul: o = act(((a*se) @ b) + bias) [+ res]; bf16 in, bf16 out.

    Refs: a(tm,tk), b(tk,tn), bias(1,tn), [se(tm,tk)], [res(tm,tn)], out(tm,tn),
          [acc scratch(tm,tn) f32 iff nk > 1].
    """
    a_ref, b_ref, bias_ref = refs[0], refs[1], refs[2]
    pos = 3
    se_ref = refs[pos] if has_se else None
    pos += int(has_se)
    res_ref = refs[pos] if has_res else None
    pos += int(has_res)
    o_ref = refs[pos]

    a = a_ref[...]
    if has_se:                       # per-row (batch,channel) SE scale fused in
        a = a * se_ref[...]
    part = jnp.dot(a, b_ref[...], preferred_element_type=jnp.float32)

    def _epilogue(y):
        y = y + bias_ref[...]                 # folded-BN bias (f32 epilogue)
        if act == "silu":
            y = y * jax.nn.sigmoid(y)
        if has_res:
            y = y + res_ref[...].astype(jnp.float32)
        o_ref[...] = y.astype(o_ref.dtype)    # bf16 writeback

    if nk == 1:
        _epilogue(part)                       # fast path: no acc round trip
    else:
        acc_ref = refs[pos + 1]
        k = pl.program_id(2)

        @pl.when(k == 0)
        def _init():
            acc_ref[...] = jnp.zeros_like(acc_ref)

        acc_ref[...] += part

        @pl.when(k == nk - 1)
        def _fin():
            _epilogue(acc_ref[...])


def _conv3x3_kernel(x_ref, w_ref, b_ref, o_ref, *, taps, l_out):
    """Direct 3x3 conv: 9 shifted flat slices of x, one matmul per tap.

    x_ref: (1, P, Lin, Cin) bf16 flat padded activation (P=1 stride1, 4 stride2)
    w_ref: (9, Cin, tn) bf16, b_ref: (1, tn) f32, o_ref: (1, l_out, tn) bf16.
    """
    acc = None
    for t, (p, sh) in enumerate(taps):
        a = x_ref[0, p, sh:sh + l_out, :]                         # (l_out, Cin)
        d = jnp.dot(a, w_ref[t], preferred_element_type=jnp.float32)
        acc = d if acc is None else acc + d
    y = acc + b_ref[...]
    y = y * jax.nn.sigmoid(y)                                     # SiLU
    o_ref[0] = y.astype(o_ref.dtype)


def _dw3x3_kernel(x_ref, w_ref, b_ref, o_ref, pool_ref, *, taps, l_out, wg, wo):
    """Depthwise 3x3 conv (9 shifted flat slices) + BN + SiLU + SE pool sum."""
    acc = None
    for t, (p, sh) in enumerate(taps):
        a = x_ref[0, p, sh:sh + l_out, :].astype(jnp.float32)
        contrib = a * w_ref[t]
        acc = contrib if acc is None else acc + contrib
    y = acc + b_ref[...]
    y = y * jax.nn.sigmoid(y)
    o_ref[0] = y.astype(o_ref.dtype)

    # Global-average-pool numerator over the VALID flat-grid columns only.
    col = jax.lax.broadcasted_iota(jnp.int32, (l_out, 1), 0) % wg
    pool_ref[0] = jnp.sum(jnp.where(col < wo, y, 0.0), axis=0, keepdims=True)


def _se_fc_kernel(pool_ref, w1_ref, b1_ref, w2_ref, b2_ref, o_ref, *, inv_m):
    """SE excitation: mean-pool -> FC -> SiLU -> FC -> sigmoid (tiny kernel)."""
    p = pool_ref[...][:, 0, :] * inv_m                                  # (B, C)
    h = jnp.dot(p, w1_ref[...], preferred_element_type=jnp.float32) + b1_ref[...]
    h = h * jax.nn.sigmoid(h)
    s = jnp.dot(h, w2_ref[...], preferred_element_type=jnp.float32) + b2_ref[...]
    o_ref[...] = jax.nn.sigmoid(s)[:, None, :]


def _head_kernel(x_ref, w_ref, b_ref, o_ref, *, inv_m):
    """Global avgpool + Linear classifier (f32 weights)."""
    # TODO(synk): grid/tile this reduction for large batch/width (v7x 64 MiB).
    pooled = jnp.sum(x_ref[...].astype(jnp.float32), axis=1) * inv_m    # (B, C)
    o_ref[...] = jnp.dot(pooled, w_ref[...],
                         preferred_element_type=jnp.float32) + b_ref[...]


# ---------------------------------------------------------------------------
# Flat-shift geometry helpers (no im2col, no tap stacks in HBM)
# ---------------------------------------------------------------------------

def _conv_taps(H, W, stride):
    """Static tap table: (plane_idx, flat shift) per (kh, kw), plus geometry."""
    if stride == 1:
        wg = W + 2                                   # flat-grid row width
        taps = tuple((0, kh * wg + kw) for kh in range(3) for kw in range(3))
        lin = (H + 3) * wg
        return taps, 1, lin, wg, H, W, H * wg
    assert stride == 2
    wh = (W + 2) // 2
    taps = tuple(((kh % 2) * 2 + (kw % 2), (kh // 2) * wh + (kw // 2))
                 for kh in range(3) for kw in range(3))
    lin = ((H + 4) // 2) * wh
    ho, wo = H // 2, W // 2
    return taps, 4, lin, wh, ho, wo, ho * wh


def _flat_pad_input(x_sp, stride):
    """(B,H,W,C) -> (B, P, Lflat, C) zero-padded flat form used by the kernels."""
    B, H, W, C = x_sp.shape
    if stride == 1:
        xp = jnp.pad(x_sp, ((0, 0), (1, 2), (1, 1), (0, 0)))
        return xp.reshape(B, 1, (H + 3) * (W + 2), C)
    assert H % 2 == 0 and W % 2 == 0, "stride-2 conv expects even H, W"
    xp = jnp.pad(x_sp, ((0, 0), (1, 3), (1, 1), (0, 0)))        # (B, H+4, W+2, C)
    hh, wh = (H + 4) // 2, (W + 2) // 2
    xp = xp.reshape(B, hh, 2, wh, 2, C)
    xp = jnp.transpose(xp, (0, 2, 4, 1, 3, 5))                  # (B, 2, 2, hh, wh, C)
    return xp.reshape(B, 4, hh * wh, C)


def _cols_to_rows(y, B, ho, wg, wo):
    """Drop the flat-grid garbage columns: (B, ho*wg, N) -> (B*ho*wo, N)."""
    N = y.shape[-1]
    y = y.reshape(B, ho, wg, N)[:, :, :wo, :]
    return y.reshape(B * ho * wo, N)


# ---------------------------------------------------------------------------
# Kernel wrappers
# ---------------------------------------------------------------------------

def fused_matmul(a, b, bias, *, act="none", se=None, res=None,
                 out_dtype=jnp.bfloat16):
    """o = act((a*se) @ b + bias) [+ res]; 2-D, batch already folded into rows."""
    M, Kp = a.shape
    Np = b.shape[1]
    tm = _pick_m_tile(M, 256)
    tn = _pick_tile(Np, 256, LANE)
    tk = _pick_tile(Kp, 512, LANE)
    nk = Kp // tk
    grid = (M // tm, Np // tn, nk)

    in_specs = [
        pl.BlockSpec((tm, tk), lambda i, j, k: (i, k)),
        pl.BlockSpec((tk, tn), lambda i, j, k: (k, j)),
        pl.BlockSpec((1, tn), lambda i, j, k: (0, j)),
    ]
    args = [a, b, bias]
    if se is not None:
        in_specs.append(pl.BlockSpec((tm, tk), lambda i, j, k: (i, k)))
        args.append(se)
    if res is not None:
        in_specs.append(pl.BlockSpec((tm, tn), lambda i, j, k: (i, j)))
        args.append(res)

    scratch = (pltpu.VMEM((tm, tn), jnp.float32),) if nk > 1 else ()

    bytes_accessed = int(
        a.size * a.dtype.itemsize + b.size * b.dtype.itemsize + bias.size * 4
        + M * Np * jnp.dtype(out_dtype).itemsize
        + (res.size * res.dtype.itemsize if res is not None else 0)
        + (se.size * se.dtype.itemsize if se is not None else 0))
    cost = pl.CostEstimate(flops=2 * M * Np * Kp,
                           transcendentals=(M * Np if act == "silu" else 0),
                           bytes_accessed=bytes_accessed)

    return pl.pallas_call(
        functools.partial(_mm_kernel, act=act, has_se=se is not None,
                          has_res=res is not None, nk=nk),
        out_shape=jax.ShapeDtypeStruct((M, Np), out_dtype),
        grid=grid,
        in_specs=in_specs,
        out_specs=pl.BlockSpec((tm, tn), lambda i, j, k: (i, j)),
        scratch_shapes=scratch,
        compiler_params=pltpu.CompilerParams(
            dimension_semantics=("parallel", "parallel", "arbitrary"),
            vmem_limit_bytes=VMEM_LIMIT),
        cost_estimate=cost,
    )(*args)


def conv3x3_direct(x_sp, w, bias, stride):
    """Full 3x3 conv (pad=1) + folded BN + SiLU, no im2col.  x: (B,H,W,Cin)."""
    B, H, W, Cin = x_sp.shape
    taps, P, lin, wg, ho, wo, l_out = _conv_taps(H, W, stride)
    xf = _flat_pad_input(x_sp.astype(jnp.bfloat16), stride)     # (B, P, lin, Cin)
    Np = w.shape[-1]
    tn = _pick_tile(Np, 256, LANE)

    out = pl.pallas_call(
        functools.partial(_conv3x3_kernel, taps=taps, l_out=l_out),
        out_shape=jax.ShapeDtypeStruct((B, l_out, Np), jnp.bfloat16),
        grid=(B, Np // tn),
        in_specs=[pl.BlockSpec((1, P, lin, Cin), lambda n, j: (n, 0, 0, 0)),
                  pl.BlockSpec((9, Cin, tn), lambda n, j: (0, 0, j)),
                  pl.BlockSpec((1, tn), lambda n, j: (0, j))],
        out_specs=pl.BlockSpec((1, l_out, tn), lambda n, j: (n, 0, j)),
        compiler_params=pltpu.CompilerParams(
            dimension_semantics=("parallel", "parallel"),
            vmem_limit_bytes=VMEM_LIMIT),
    )(xf, w, bias)

    rows = _cols_to_rows(out, B, ho, wg, wo)                    # (B*ho*wo, Np) bf16
    return dict(t=rows, h=ho, w=wo, b=B)


def dwconv3x3(rec, w, bias, stride):
    """Depthwise 3x3 conv + folded BN + SiLU; also returns the SE pool sums."""
    B, H, W = rec["b"], rec["h"], rec["w"]
    Cp = rec["t"].shape[-1]
    x_sp = rec["t"].reshape(B, H, W, Cp)
    taps, P, lin, wg, ho, wo, l_out = _conv_taps(H, W, stride)
    xf = _flat_pad_input(x_sp, stride)
    tc = _pick_tile(Cp, 512, LANE)                              # channel-tiled (v7x VMEM)

    y, pool = pl.pallas_call(
        functools.partial(_dw3x3_kernel, taps=taps, l_out=l_out, wg=wg, wo=wo),
        out_shape=(jax.ShapeDtypeStruct((B, l_out, Cp), jnp.bfloat16),
                   jax.ShapeDtypeStruct((B, 1, Cp), jnp.float32)),
        grid=(B, Cp // tc),
        in_specs=[pl.BlockSpec((1, P, lin, tc), lambda n, c: (n, 0, 0, c)),
                  pl.BlockSpec((9, 1, tc), lambda n, c: (0, 0, c)),
                  pl.BlockSpec((1, tc), lambda n, c: (0, c))],
        out_specs=(pl.BlockSpec((1, l_out, tc), lambda n, c: (n, 0, c)),
                   pl.BlockSpec((1, 1, tc), lambda n, c: (n, 0, c))),
        compiler_params=pltpu.CompilerParams(
            dimension_semantics=("parallel", "parallel"),
            vmem_limit_bytes=VMEM_LIMIT),
    )(xf, w, bias)

    rows = _cols_to_rows(y, B, ho, wg, wo)
    return dict(t=rows, h=ho, w=wo, b=B), pool


def se_scale(pool, m_true, w1, b1, w2, b2):
    B, _, Cp = pool.shape
    return pl.pallas_call(
        functools.partial(_se_fc_kernel, inv_m=1.0 / m_true),
        out_shape=jax.ShapeDtypeStruct((B, 1, Cp), jnp.float32),
        in_specs=[pl.BlockSpec(memory_space=pltpu.MemorySpace.VMEM)] * 5,
        out_specs=pl.BlockSpec(memory_space=pltpu.MemorySpace.VMEM),
    )(pool, w1, b1, w2, b2)


def classifier_head(rec, w, b):
    B, M = rec["b"], rec["h"] * rec["w"]
    Cp = rec["t"].shape[-1]
    x = rec["t"].reshape(B, M, Cp)
    return pl.pallas_call(
        functools.partial(_head_kernel, inv_m=1.0 / M),
        out_shape=jax.ShapeDtypeStruct((B, w.shape[1]), jnp.float32),
        in_specs=[pl.BlockSpec(memory_space=pltpu.MemorySpace.VMEM)] * 3,
        out_specs=pl.BlockSpec(memory_space=pltpu.MemorySpace.VMEM),
    )(x, w, b)


# ---------------------------------------------------------------------------
# Parameter init (mirrors EffNetV2._initialize_weights; eval-mode BN folded,
# weights pre-padded lane-dense, matmul/conv weights pre-cast to bf16)
# ---------------------------------------------------------------------------

def _prep_matmul_weight(w2d, bn_scale=None, dtype=jnp.bfloat16):
    K, N = w2d.shape
    if bn_scale is not None:
        w2d = w2d * bn_scale[None, :]
    Kp, Np = _round_up(K, LANE), _round_up(N, LANE)
    return jnp.pad(w2d, ((0, Kp - K), (0, Np - N))).astype(dtype)


def _prep_conv3x3_weight(w4d, bn_scale, cin_pad):
    _, _, cin, cout = w4d.shape
    w = (w4d * bn_scale[None, None, None, :]).reshape(9, cin, cout)
    Np = _round_up(cout, LANE)
    return jnp.pad(w, ((0, 0), (0, cin_pad - cin), (0, Np - cout))).astype(jnp.bfloat16)


def _prep_dw_weight(w3d):
    _, _, c = w3d.shape
    Cp = _round_up(c, LANE)
    w = (w3d * BN_SCALE).reshape(9, 1, c)
    return jnp.pad(w, ((0, 0), (0, 0), (0, Cp - c))).astype(jnp.float32)


def _prep_bias(b):
    N = b.shape[0]
    return jnp.pad(b.astype(jnp.float32),
                   (0, _round_up(N, LANE) - N)).reshape(1, -1)


def init_params(key, cfgs, num_classes=10, width_mult=1.0):
    keys = iter(jax.random.split(key, 256))

    def conv_w(shape, out_ch, ksize):
        std = math.sqrt(2.0 / (ksize * ksize * out_ch))
        return jax.random.normal(next(keys), shape, jnp.float32) * std

    def linear_w(shape):
        return jax.random.normal(next(keys), shape, jnp.float32) * 0.001

    bn_s = lambda c: jnp.full((c,), BN_SCALE, jnp.float32)
    bn_b = lambda c: jnp.zeros((c,), jnp.float32)

    params = {}
    c_in = _make_divisible(24 * width_mult, 8)
    stem_cin_pad = LANE
    params["stem"] = dict(
        w=_prep_conv3x3_weight(conv_w((3, 3, 3, c_in), c_in, 3), bn_s(c_in),
                               stem_cin_pad),
        b=_prep_bias(bn_b(c_in)), cin_pad=stem_cin_pad)

    blocks = []
    for t, c, n, s, use_se in cfgs:
        c_out = _make_divisible(c * width_mult, 8)
        for i in range(n):
            st = s if i == 0 else 1
            hidden = round(c_in * t)
            blk = dict(use_se=bool(use_se), stride=st,
                       identity=(st == 1 and c_in == c_out))
            if use_se:
                se_dim = _make_divisible(c_in // 4, 8)
                blk["w_exp"] = _prep_matmul_weight(conv_w((c_in, hidden), hidden, 1),
                                                   bn_s(hidden))
                blk["b_exp"] = _prep_bias(bn_b(hidden))
                blk["w_dw"] = _prep_dw_weight(conv_w((3, 3, hidden), hidden, 3))
                blk["b_dw"] = _prep_bias(bn_b(hidden))
                blk["se_w1"] = _prep_matmul_weight(linear_w((hidden, se_dim)),
                                                   None, jnp.float32)
                blk["se_b1"] = _prep_bias(jnp.zeros((se_dim,), jnp.float32))
                blk["se_w2"] = _prep_matmul_weight(linear_w((se_dim, hidden)),
                                                   None, jnp.float32)
                blk["se_b2"] = _prep_bias(jnp.zeros((hidden,), jnp.float32))
            else:
                blk["w_exp"] = _prep_conv3x3_weight(
                    conv_w((3, 3, c_in, hidden), hidden, 3), bn_s(hidden),
                    _round_up(c_in, LANE))
                blk["b_exp"] = _prep_bias(bn_b(hidden))
            blk["w_proj"] = _prep_matmul_weight(conv_w((hidden, c_out), c_out, 1),
                                                bn_s(c_out))
            blk["b_proj"] = _prep_bias(bn_b(c_out))
            blocks.append(blk)
            c_in = c_out
    params["blocks"] = blocks

    c_head = _make_divisible(1792 * width_mult, 8) if width_mult > 1.0 else 1792
    params["head_conv"] = dict(
        w=_prep_matmul_weight(conv_w((c_in, c_head), c_head, 1), bn_s(c_head)),
        b=_prep_bias(bn_b(c_head)))
    params["classifier"] = dict(
        w=_prep_matmul_weight(linear_w((c_head, num_classes)), None, jnp.float32),
        b=_prep_bias(jnp.zeros((num_classes,), jnp.float32)), c_out=num_classes)
    return params


# ---------------------------------------------------------------------------
# Forward
# ---------------------------------------------------------------------------

def mbconv_forward(blk, rec):
    # TODO(synk): fuse the whole MBConv (expand->dw->SE->project) into a single
    # pallas_call with the hidden activation held in VMEM scratch.
    res = rec["t"] if blk["identity"] else None
    B = rec["b"]
    Cp_in = rec["t"].shape[-1]
    if blk["use_se"]:
        hid = fused_matmul(rec["t"], blk["w_exp"], blk["b_exp"], act="silu")
        hrec = dict(t=hid, h=rec["h"], w=rec["w"], b=B)
        hrec, pool = dwconv3x3(hrec, blk["w_dw"], blk["b_dw"], blk["stride"])
        se = se_scale(pool, hrec["h"] * hrec["w"], blk["se_w1"], blk["se_b1"],
                      blk["se_w2"], blk["se_b2"])
        Cp_h = hrec["t"].shape[-1]
        # TODO(synk): at large spatial sizes map SE per-batch via BlockSpec
        # index arithmetic instead of materializing the per-row broadcast.
        se_rows = jnp.broadcast_to(se, (B, hrec["h"] * hrec["w"], Cp_h)
                                   ).reshape(-1, Cp_h).astype(jnp.bfloat16)
        out = fused_matmul(hrec["t"], blk["w_proj"], blk["b_proj"], act="none",
                           se=se_rows, res=res)
        return dict(t=out, h=hrec["h"], w=hrec["w"], b=B)
    else:
        x_sp = rec["t"].reshape(B, rec["h"], rec["w"], Cp_in)
        hrec = conv3x3_direct(x_sp, blk["w_exp"], blk["b_exp"], blk["stride"])
        out = fused_matmul(hrec["t"], blk["w_proj"], blk["b_proj"], act="none",
                           res=res)
        return dict(t=out, h=hrec["h"], w=hrec["w"], b=B)


def effnetv2_forward(params, x_nchw):
    x = jnp.transpose(x_nchw, (0, 2, 3, 1))           # NCHW -> NHWC once
    p = params["stem"]
    x = jnp.pad(x, ((0, 0), (0, 0), (0, 0), (0, p["cin_pad"] - x.shape[-1])))
    rec = conv3x3_direct(x, p["w"], p["b"], stride=2)
    for blk in params["blocks"]:
        rec = mbconv_forward(blk, rec)
    p = params["head_conv"]
    rec = dict(t=fused_matmul(rec["t"], p["w"], p["b"], act="silu"),
               h=rec["h"], w=rec["w"], b=rec["b"])
    p = params["classifier"]
    logits = classifier_head(rec, p["w"], p["b"])
    return logits[:, :p["c_out"]]


# ---------------------------------------------------------------------------
# Main
# ---------------------------------------------------------------------------

if __name__ == "__main__":
    # Small EfficientNetV2-style config:  t, c, n, s, use_se
    cfgs = [
        [1, 24, 1, 1, 0],
        [4, 32, 1, 2, 0],
        [4, 48, 1, 2, 1],
        [4, 48, 1, 1, 1],
    ]
    num_classes = 10

    key = jax.random.PRNGKey(0)
    k_params, k_x = jax.random.split(key)
    params = init_params(k_params, cfgs, num_classes=num_classes, width_mult=1.0)

    x = jax.random.normal(k_x, (2, 3, 16, 16), jnp.float32)   # NCHW like PyTorch

    fwd = jax.jit(lambda inp: effnetv2_forward(params, inp))
    out = fwd(x)
    jax.block_until_ready(out)
    assert out.shape == (2, num_classes), out.shape
    print("KERNEL_OK")
</pallas_src>

<mosaic_0001>
module attributes {stable_mosaic.version = 11 : i64} {
  func.func @_conv3x3_kernel(%arg0: i32, %arg1: i32, %arg2: memref<1x4x90x128xbf16, #tpu.memory_space<vmem>>, %arg3: memref<9x128x128xbf16, #tpu.memory_space<vmem>>, %arg4: memref<1x128xf32, #tpu.memory_space<vmem>>, %arg5: memref<1x72x128xbf16, #tpu.memory_space<vmem>>) attributes {dimension_semantics = [#tpu.dimension_semantics<parallel>, #tpu.dimension_semantics<parallel>], iteration_bounds = array<i64: 2, 1>, scalar_prefetch = 0 : i64, scratch_operands = 0 : i64, tpu.core_type = #tpu.core_type<tc>, window_params = [{transform_indices = @transform_0, window_bounds = array<i64: 1, 4, 90, 128>}, {transform_indices = @transform_1, window_bounds = array<i64: 9, 128, 128>}, {transform_indices = @transform_2, window_bounds = array<i64: 1, 128>}, {transform_indices = @transform_3, window_bounds = array<i64: 1, 72, 128>}]} {
    %c0 = arith.constant 0 : index
    %c0_0 = arith.constant 0 : index
    %c0_1 = arith.constant 0 : index
    %c0_2 = arith.constant 0 : index
    %0 = vector.load %arg2[%c0, %c0_0, %c0_1, %c0_2] : memref<1x4x90x128xbf16, #tpu.memory_space<vmem>>, vector<1x1x72x128xbf16>
    %1 = vector.shape_cast %0 : vector<1x1x72x128xbf16> to vector<72x128xbf16>
    %c0_3 = arith.constant 0 : index
    %c0_4 = arith.constant 0 : index
    %c0_5 = arith.constant 0 : index
    %2 = vector.load %arg3[%c0_3, %c0_4, %c0_5] : memref<9x128x128xbf16, #tpu.memory_space<vmem>>, vector<1x128x128xbf16>
    %3 = vector.shape_cast %2 : vector<1x128x128xbf16> to vector<128x128xbf16>
    %cst = arith.constant dense<0.000000e+00> : vector<72x128xf32>
    %4 = tpu.matmul %1, %3, %cst {dimension_numbers = #tpu.dot_dimension_numbers<[1], [0], [0], [1], [0, 0, 1, 1], [], []>} : vector<72x128xbf16>, vector<128x128xbf16>, vector<72x128xf32> -> vector<72x128xf32>
    %c0_6 = arith.constant 0 : index
    %c1 = arith.constant 1 : index
    %c0_7 = arith.constant 0 : index
    %c0_8 = arith.constant 0 : index
    %5 = vector.load %arg2[%c0_6, %c1, %c0_7, %c0_8] : memref<1x4x90x128xbf16, #tpu.memory_space<vmem>>, vector<1x1x72x128xbf16>
    %6 = vector.shape_cast %5 : vector<1x1x72x128xbf16> to vector<72x128xbf16>
    %c1_9 = arith.constant 1 : index
    %c0_10 = arith.constant 0 : index
    %c0_11 = arith.constant 0 : index
    %7 = vector.load %arg3[%c1_9, %c0_10, %c0_11] : memref<9x128x128xbf16, #tpu.memory_space<vmem>>, vector<1x128x128xbf16>
    %8 = vector.shape_cast %7 : vector<1x128x128xbf16> to vector<128x128xbf16>
    %cst_12 = arith.constant dense<0.000000e+00> : vector<72x128xf32>
    %9 = tpu.matmul %6, %8, %cst_12 {dimension_numbers = #tpu.dot_dimension_numbers<[1], [0], [0], [1], [0, 0, 1, 1], [], []>} : vector<72x128xbf16>, vector<128x128xbf16>, vector<72x128xf32> -> vector<72x128xf32>
    %10 = arith.addf %4, %9 : vector<72x128xf32>
    %c0_13 = arith.constant 0 : index
    %c0_14 = arith.constant 0 : index
    %c1_15 = arith.constant 1 : index
    %c0_16 = arith.constant 0 : index
    %11 = vector.load %arg2[%c0_13, %c0_14, %c1_15, %c0_16] : memref<1x4x90x128xbf16, #tpu.memory_space<vmem>>, vector<1x1x72x128xbf16>
    %12 = vector.shape_cast %11 : vector<1x1x72x128xbf16> to vector<72x128xbf16>
    %c2 = arith.constant 2 : index
    %c0_17 = arith.constant 0 : index
    %c0_18 = arith.constant 0 : index
    %13 = vector.load %arg3[%c2, %c0_17, %c0_18] : memref<9x128x128xbf16, #tpu.memory_space<vmem>>, vector<1x128x128xbf16>
    %14 = vector.shape_cast %13 : vector<1x128x128xbf16> to vector<128x128xbf16>
    %cst_19 = arith.constant dense<0.000000e+00> : vector<72x128xf32>
    %15 = tpu.matmul %12, %14, %cst_19 {dimension_numbers = #tpu.dot_dimension_numbers<[1], [0], [0], [1], [0, 0, 1, 1], [], []>} : vector<72x128xbf16>, vector<128x128xbf16>, vector<72x128xf32> -> vector<72x128xf32>
    %16 = arith.addf %10, %15 : vector<72x128xf32>
    %c0_20 = arith.constant 0 : index
    %c2_21 = arith.constant 2 : index
    %c0_22 = arith.constant 0 : index
    %c0_23 = arith.constant 0 : index
    %17 = vector.load %arg2[%c0_20, %c2_21, %c0_22, %c0_23] : memref<1x4x90x128xbf16, #tpu.memory_space<vmem>>, vector<1x1x72x128xbf16>
    %18 = vector.shape_cast %17 : vector<1x1x72x128xbf16> to vector<72x128xbf16>
    %c3 = arith.constant 3 : index
    %c0_24 = arith.constant 0 : index
    %c0_25 = arith.constant 0 : index
    %19 = vector.load %arg3[%c3, %c0_24, %c0_25] : memref<9x128x128xbf16, #tpu.memory_space<vmem>>, vector<1x128x128xbf16>
    %20 = vector.shape_cast %19 : vector<1x128x128xbf16> to vector<128x128xbf16>
    %cst_26 = arith.constant dense<0.000000e+00> : vector<72x128xf32>
    %21 = tpu.matmul %18, %20, %cst_26 {dimension_numbers = #tpu.dot_dimension_numbers<[1], [0], [0], [1], [0, 0, 1, 1], [], []>} : vector<72x128xbf16>, vector<128x128xbf16>, vector<72x128xf32> -> vector<72x128xf32>
    %22 = arith.addf %16, %21 : vector<72x128xf32>
    %c0_27 = arith.constant 0 : index
    %c3_28 = arith.constant 3 : index
    %c0_29 = arith.constant 0 : index
    %c0_30 = arith.constant 0 : index
    %23 = vector.load %arg2[%c0_27, %c3_28, %c0_29, %c0_30] : memref<1x4x90x128xbf16, #tpu.memory_space<vmem>>, vector<1x1x72x128xbf16>
    %24 = vector.shape_cast %23 : vector<1x1x72x128xbf16> to vector<72x128xbf16>
    %c4 = arith.constant 4 : index
    %c0_31 = arith.constant 0 : index
    %c0_32 = arith.constant 0 : index
    %25 = vector.load %arg3[%c4, %c0_31, %c0_32] : memref<9x128x128xbf16, #tpu.memory_space<vmem>>, vector<1x128x128xbf16>
    %26 = vector.shape_cast %25 : vector<1x128x128xbf16> to vector<128x128xbf16>
    %cst_33 = arith.constant dense<0.000000e+00> : vector<72x128xf32>
    %27 = tpu.matmul %24, %26, %cst_33 {dimension_numbers = #tpu.dot_dimension_numbers<[1], [0], [0], [1], [0, 0, 1, 1], [], []>} : vector<72x128xbf16>, vector<128x128xbf16>, vector<72x128xf32> -> vector<72x128xf32>
    %28 = arith.addf %22, %27 : vector<72x128xf32>
    %c0_34 = arith.constant 0 : index
    %c2_35 = arith.constant 2 : index
    %c1_36 = arith.constant 1 : index
    %c0_37 = arith.constant 0 : index
    %29 = vector.load %arg2[%c0_34, %c2_35, %c1_36, %c0_37] : memref<1x4x90x128xbf16, #tpu.memory_space<vmem>>, vector<1x1x72x128xbf16>
    %30 = vector.shape_cast %29 : vector<1x1x72x128xbf16> to vector<72x128xbf16>
    %c5 = arith.constant 5 : index
    %c0_38 = arith.constant 0 : index
    %c0_39 = arith.constant 0 : index
    %31 = vector.load %arg3[%c5, %c0_38, %c0_39] : memref<9x128x128xbf16, #tpu.memory_space<vmem>>, vector<1x128x128xbf16>
    %32 = vector.shape_cast %31 : vector<1x128x128xbf16> to vector<128x128xbf16>
    %cst_40 = arith.constant dense<0.000000e+00> : vector<72x128xf32>
    %33 = tpu.matmul %30, %32, %cst_40 {dimension_numbers = #tpu.dot_dimension_numbers<[1], [0], [0], [1], [0, 0, 1, 1], [], []>} : vector<72x128xbf16>, vector<128x128xbf16>, vector<72x128xf32> -> vector<72x128xf32>
    %34 = arith.addf %28, %33 : vector<72x128xf32>
    %c0_41 = arith.constant 0 : index
    %c0_42 = arith.constant 0 : index
    %c9 = arith.constant 9 : index
    %c0_43 = arith.constant 0 : index
    %35 = vector.load %arg2[%c0_41, %c0_42, %c9, %c0_43] : memref<1x4x90x128xbf16, #tpu.memory_space<vmem>>, vector<1x1x72x128xbf16>
    %36 = vector.shape_cast %35 : vector<1x1x72x128xbf16> to vector<72x128xbf16>
    %c6 = arith.constant 6 : index
    %c0_44 = arith.constant 0 : index
    %c0_45 = arith.constant 0 : index
    %37 = vector.load %arg3[%c6, %c0_44, %c0_45] : memref<9x128x128xbf16, #tpu.memory_space<vmem>>, vector<1x128x128xbf16>
    %38 = vector.shape_cast %37 : vector<1x128x128xbf16> to vector<128x128xbf16>
    %cst_46 = arith.constant dense<0.000000e+00> : vector<72x128xf32>
    %39 = tpu.matmul %36, %38, %cst_46 {dimension_numbers = #tpu.dot_dimension_numbers<[1], [0], [0], [1], [0, 0, 1, 1], [], []>} : vector<72x128xbf16>, vector<128x128xbf16>, vector<72x128xf32> -> vector<72x128xf32>
    %40 = arith.addf %34, %39 : vector<72x128xf32>
    %c0_47 = arith.constant 0 : index
    %c1_48 = arith.constant 1 : index
    %c9_49 = arith.constant 9 : index
    %c0_50 = arith.constant 0 : index
    %41 = vector.load %arg2[%c0_47, %c1_48, %c9_49, %c0_50] : memref<1x4x90x128xbf16, #tpu.memory_space<vmem>>, vector<1x1x72x128xbf16>
    %42 = vector.shape_cast %41 : vector<1x1x72x128xbf16> to vector<72x128xbf16>
    %c7 = arith.constant 7 : index
    %c0_51 = arith.constant 0 : index
    %c0_52 = arith.constant 0 : index
    %43 = vector.load %arg3[%c7, %c0_51, %c0_52] : memref<9x128x128xbf16, #tpu.memory_space<vmem>>, vector<1x128x128xbf16>
    %44 = vector.shape_cast %43 : vector<1x128x128xbf16> to vector<128x128xbf16>
    %cst_53 = arith.constant dense<0.000000e+00> : vector<72x128xf32>
    %45 = tpu.matmul %42, %44, %cst_53 {dimension_numbers = #tpu.dot_dimension_numbers<[1], [0], [0], [1], [0, 0, 1, 1], [], []>} : vector<72x128xbf16>, vector<128x128xbf16>, vector<72x128xf32> -> vector<72x128xf32>
    %46 = arith.addf %40, %45 : vector<72x128xf32>
    %c0_54 = arith.constant 0 : index
    %c0_55 = arith.constant 0 : index
    %c10 = arith.constant 10 : index
    %c0_56 = arith.constant 0 : index
    %47 = vector.load %arg2[%c0_54, %c0_55, %c10, %c0_56] : memref<1x4x90x128xbf16, #tpu.memory_space<vmem>>, vector<1x1x72x128xbf16>
    %48 = vector.shape_cast %47 : vector<1x1x72x128xbf16> to vector<72x128xbf16>
    %c8 = arith.constant 8 : index
    %c0_57 = arith.constant 0 : index
    %c0_58 = arith.constant 0 : index
    %49 = vector.load %arg3[%c8, %c0_57, %c0_58] : memref<9x128x128xbf16, #tpu.memory_space<vmem>>, vector<1x128x128xbf16>
    %50 = vector.shape_cast %49 : vector<1x128x128xbf16> to vector<128x128xbf16>
    %cst_59 = arith.constant dense<0.000000e+00> : vector<72x128xf32>
    %51 = tpu.matmul %48, %50, %cst_59 {dimension_numbers = #tpu.dot_dimension_numbers<[1], [0], [0], [1], [0, 0, 1, 1], [], []>} : vector<72x128xbf16>, vector<128x128xbf16>, vector<72x128xf32> -> vector<72x128xf32>
    %52 = arith.addf %46, %51 : vector<72x128xf32>
    %c0_60 = arith.constant 0 : index
    %c0_61 = arith.constant 0 : index
    %53 = vector.load %arg4[%c0_60, %c0_61] : memref<1x128xf32, #tpu.memory_space<vmem>>, vector<1x128xf32>
    %54 = vector.broadcast %53 : vector<1x128xf32> to vector<72x128xf32>
    %55 = arith.addf %52, %54 : vector<72x128xf32>
    %56 = arith.negf %55 : vector<72x128xf32>
    %57 = math.exp %56 : vector<72x128xf32>
    %cst_62 = arith.constant 1.000000e+00 : f32
    %58 = vector.broadcast %cst_62 : f32 to vector<72x128xf32>
    %59 = arith.addf %58, %57 : vector<72x128xf32>
    %60 = arith.divf %58, %59 : vector<72x128xf32>
    %61 = arith.mulf %55, %60 : vector<72x128xf32>
    %62 = arith.truncf %61 : vector<72x128xf32> to vector<72x128xbf16>
    %c0_63 = arith.constant 0 : index
    %c0_64 = arith.constant 0 : index
    %c0_65 = arith.constant 0 : index
    %63 = vector.load %arg5[%c0_63, %c0_64, %c0_65] : memref<1x72x128xbf16, #tpu.memory_space<vmem>>, vector<1x72x128xbf16>
    %64 = vector.shape_cast %63 : vector<1x72x128xbf16> to vector<72x128xbf16>
    %65 = vector.shape_cast %62 : vector<72x128xbf16> to vector<1x72x128xbf16>
    tpu.vector_store %arg5[%c0_63, %c0_64, %c0_65], %65 {strides = array<i32>} : memref<1x72x128xbf16, #tpu.memory_space<vmem>>, vector<1x72x128xbf16>,
    return
  }
  func.func @transform_0(%arg0: i32, %arg1: i32) -> (i32, i32, i32, i32) {
    %c0_i32 = arith.constant 0 : i32
    %c0_i32_0 = arith.constant 0 : i32
    %c0_i32_1 = arith.constant 0 : i32
    %c0_i32_2 = arith.constant 0 : i32
    return %arg0, %c0_i32, %c0_i32_0, %c0_i32_1 : i32, i32, i32, i32
  }
  func.func @transform_1(%arg0: i32, %arg1: i32) -> (i32, i32, i32) {
    %c0_i32 = arith.constant 0 : i32
    %c0_i32_0 = arith.constant 0 : i32
    %c0_i32_1 = arith.constant 0 : i32
    return %c0_i32, %c0_i32_0, %arg1 : i32, i32, i32
  }
  func.func @transform_2(%arg0: i32, %arg1: i32) -> (i32, i32) {
    %c0_i32 = arith.constant 0 : i32
    %c0_i32_0 = arith.constant 0 : i32
    return %c0_i32, %arg1 : i32, i32
  }
  func.func @transform_3(%arg0: i32, %arg1: i32) -> (i32, i32, i32) {
    %c0_i32 = arith.constant 0 : i32
    %c0_i32_0 = arith.constant 0 : i32
    return %arg0, %c0_i32, %arg1 : i32, i32, i32
  }
}

module attributes {stable_mosaic.version = 11 : i64} {
  func.func @_conv3x3_kernel(%arg0: i32, %arg1: i32, %arg2: memref<1x1x110x128xbf16, #tpu.memory_space<vmem>>, %arg3: memref<9x128x128xbf16, #tpu.memory_space<vmem>>, %arg4: memref<1x128xf32, #tpu.memory_space<vmem>>, %arg5: memref<1x80x128xbf16, #tpu.memory_space<vmem>>) attributes {dimension_semantics = [#tpu.dimension_semantics<parallel>, #tpu.dimension_semantics<parallel>], iteration_bounds = array<i64: 2, 1>, scalar_prefetch = 0 : i64, scratch_operands = 0 : i64, tpu.core_type = #tpu.core_type<tc>, window_params = [{transform_indices = @transform_0, window_bounds = array<i64: 1, 1, 110, 128>}, {transform_indices = @transform_1, window_bounds = array<i64: 9, 128, 128>}, {transform_indices = @transform_2, window_bounds = array<i64: 1, 128>}, {transform_indices = @transform_3, window_bounds = array<i64: 1, 80, 128>}]} {
    %c0 = arith.constant 0 : index
    %c0_0 = arith.constant 0 : index
    %c0_1 = arith.constant 0 : index
    %c0_2 = arith.constant 0 : index
    %0 = vector.load %arg2[%c0, %c0_0, %c0_1, %c0_2] : memref<1x1x110x128xbf16, #tpu.memory_space<vmem>>, vector<1x1x80x128xbf16>
    %1 = vector.shape_cast %0 : vector<1x1x80x128xbf16> to vector<80x128xbf16>
    %c0_3 = arith.constant 0 : index
    %c0_4 = arith.constant 0 : index
    %c0_5 = arith.constant 0 : index
    %2 = vector.load %arg3[%c0_3, %c0_4, %c0_5] : memref<9x128x128xbf16, #tpu.memory_space<vmem>>, vector<1x128x128xbf16>
    %3 = vector.shape_cast %2 : vector<1x128x128xbf16> to vector<128x128xbf16>
    %cst = arith.constant dense<0.000000e+00> : vector<80x128xf32>
    %4 = tpu.matmul %1, %3, %cst {dimension_numbers = #tpu.dot_dimension_numbers<[1], [0], [0], [1], [0, 0, 1, 1], [], []>} : vector<80x128xbf16>, vector<128x128xbf16>, vector<80x128xf32> -> vector<80x128xf32>
    %c0_6 = arith.constant 0 : index
    %c0_7 = arith.constant 0 : index
    %c1 = arith.constant 1 : index
    %c0_8 = arith.constant 0 : index
    %5 = vector.load %arg2[%c0_6, %c0_7, %c1, %c0_8] : memref<1x1x110x128xbf16, #tpu.memory_space<vmem>>, vector<1x1x80x128xbf16>
    %6 = vector.shape_cast %5 : vector<1x1x80x128xbf16> to vector<80x128xbf16>
    %c1_9 = arith.constant 1 : index
    %c0_10 = arith.constant 0 : index
    %c0_11 = arith.constant 0 : index
    %7 = vector.load %arg3[%c1_9, %c0_10, %c0_11] : memref<9x128x128xbf16, #tpu.memory_space<vmem>>, vector<1x128x128xbf16>
    %8 = vector.shape_cast %7 : vector<1x128x128xbf16> to vector<128x128xbf16>
    %cst_12 = arith.constant dense<0.000000e+00> : vector<80x128xf32>
    %9 = tpu.matmul %6, %8, %cst_12 {dimension_numbers = #tpu.dot_dimension_numbers<[1], [0], [0], [1], [0, 0, 1, 1], [], []>} : vector<80x128xbf16>, vector<128x128xbf16>, vector<80x128xf32> -> vector<80x128xf32>
    %10 = arith.addf %4, %9 : vector<80x128xf32>
    %c0_13 = arith.constant 0 : index
    %c0_14 = arith.constant 0 : index
    %c2 = arith.constant 2 : index
    %c0_15 = arith.constant 0 : index
    %11 = vector.load %arg2[%c0_13, %c0_14, %c2, %c0_15] : memref<1x1x110x128xbf16, #tpu.memory_space<vmem>>, vector<1x1x80x128xbf16>
    %12 = vector.shape_cast %11 : vector<1x1x80x128xbf16> to vector<80x128xbf16>
    %c2_16 = arith.constant 2 : index
    %c0_17 = arith.constant 0 : index
    %c0_18 = arith.constant 0 : index
    %13 = vector.load %arg3[%c2_16, %c0_17, %c0_18] : memref<9x128x128xbf16, #tpu.memory_space<vmem>>, vector<1x128x128xbf16>
    %14 = vector.shape_cast %13 : vector<1x128x128xbf16> to vector<128x128xbf16>
    %cst_19 = arith.constant dense<0.000000e+00> : vector<80x128xf32>
    %15 = tpu.matmul %12, %14, %cst_19 {dimension_numbers = #tpu.dot_dimension_numbers<[1], [0], [0], [1], [0, 0, 1, 1], [], []>} : vector<80x128xbf16>, vector<128x128xbf16>, vector<80x128xf32> -> vector<80x128xf32>
    %16 = arith.addf %10, %15 : vector<80x128xf32>
    %c0_20 = arith.constant 0 : index
    %c0_21 = arith.constant 0 : index
    %c10 = arith.constant 10 : index
    %c0_22 = arith.constant 0 : index
    %17 = vector.load %arg2[%c0_20, %c0_21, %c10, %c0_22] : memref<1x1x110x128xbf16, #tpu.memory_space<vmem>>, vector<1x1x80x128xbf16>
    %18 = vector.shape_cast %17 : vector<1x1x80x128xbf16> to vector<80x128xbf16>
    %c3 = arith.constant 3 : index
    %c0_23 = arith.constant 0 : index
    %c0_24 = arith.constant 0 : index
    %19 = vector.load %arg3[%c3, %c0_23, %c0_24] : memref<9x128x128xbf16, #tpu.memory_space<vmem>>, vector<1x128x128xbf16>
    %20 = vector.shape_cast %19 : vector<1x128x128xbf16> to vector<128x128xbf16>
    %cst_25 = arith.constant dense<0.000000e+00> : vector<80x128xf32>
    %21 = tpu.matmul %18, %20, %cst_25 {dimension_numbers = #tpu.dot_dimension_numbers<[1], [0], [0], [1], [0, 0, 1, 1], [], []>} : vector<80x128xbf16>, vector<128x128xbf16>, vector<80x128xf32> -> vector<80x128xf32>
    %22 = arith.addf %16, %21 : vector<80x128xf32>
    %c0_26 = arith.constant 0 : index
    %c0_27 = arith.constant 0 : index
    %c11 = arith.constant 11 : index
    %c0_28 = arith.constant 0 : index
    %23 = vector.load %arg2[%c0_26, %c0_27, %c11, %c0_28] : memref<1x1x110x128xbf16, #tpu.memory_space<vmem>>, vector<1x1x80x128xbf16>
    %24 = vector.shape_cast %23 : vector<1x1x80x128xbf16> to vector<80x128xbf16>
    %c4 = arith.constant 4 : index
    %c0_29 = arith.constant 0 : index
    %c0_30 = arith.constant 0 : index
    %25 = vector.load %arg3[%c4, %c0_29, %c0_30] : memref<9x128x128xbf16, #tpu.memory_space<vmem>>, vector<1x128x128xbf16>
    %26 = vector.shape_cast %25 : vector<1x128x128xbf16> to vector<128x128xbf16>
    %cst_31 = arith.constant dense<0.000000e+00> : vector<80x128xf32>
    %27 = tpu.matmul %24, %26, %cst_31 {dimension_numbers = #tpu.dot_dimension_numbers<[1], [0], [0], [1], [0, 0, 1, 1], [], []>} : vector<80x128xbf16>, vector<128x128xbf16>, vector<80x128xf32> -> vector<80x128xf32>
    %28 = arith.addf %22, %27 : vector<80x128xf32>
    %c0_32 = arith.constant 0 : index
    %c0_33 = arith.constant 0 : index
    %c12 = arith.constant 12 : index
    %c0_34 = arith.constant 0 : index
    %29 = vector.load %arg2[%c0_32, %c0_33, %c12, %c0_34] : memref<1x1x110x128xbf16, #tpu.memory_space<vmem>>, vector<1x1x80x128xbf16>
    %30 = vector.shape_cast %29 : vector<1x1x80x128xbf16> to vector<80x128xbf16>
    %c5 = arith.constant 5 : index
    %c0_35 = arith.constant 0 : index
    %c0_36 = arith.constant 0 : index
    %31 = vector.load %arg3[%c5, %c0_35, %c0_36] : memref<9x128x128xbf16, #tpu.memory_space<vmem>>, vector<1x128x128xbf16>
    %32 = vector.shape_cast %31 : vector<1x128x128xbf16> to vector<128x128xbf16>
    %cst_37 = arith.constant dense<0.000000e+00> : vector<80x128xf32>
    %33 = tpu.matmul %30, %32, %cst_37 {dimension_numbers = #tpu.dot_dimension_numbers<[1], [0], [0], [1], [0, 0, 1, 1], [], []>} : vector<80x128xbf16>, vector<128x128xbf16>, vector<80x128xf32> -> vector<80x128xf32>
    %34 = arith.addf %28, %33 : vector<80x128xf32>
    %c0_38 = arith.constant 0 : index
    %c0_39 = arith.constant 0 : index
    %c20 = arith.constant 20 : index
    %c0_40 = arith.constant 0 : index
    %35 = vector.load %arg2[%c0_38, %c0_39, %c20, %c0_40] : memref<1x1x110x128xbf16, #tpu.memory_space<vmem>>, vector<1x1x80x128xbf16>
    %36 = vector.shape_cast %35 : vector<1x1x80x128xbf16> to vector<80x128xbf16>
    %c6 = arith.constant 6 : index
    %c0_41 = arith.constant 0 : index
    %c0_42 = arith.constant 0 : index
    %37 = vector.load %arg3[%c6, %c0_41, %c0_42] : memref<9x128x128xbf16, #tpu.memory_space<vmem>>, vector<1x128x128xbf16>
    %38 = vector.shape_cast %37 : vector<1x128x128xbf16> to vector<128x128xbf16>
    %cst_43 = arith.constant dense<0.000000e+00> : vector<80x128xf32>
    %39 = tpu.matmul %36, %38, %cst_43 {dimension_numbers = #tpu.dot_dimension_numbers<[1], [0], [0], [1], [0, 0, 1, 1], [], []>} : vector<80x128xbf16>, vector<128x128xbf16>, vector<80x128xf32> -> vector<80x128xf32>
    %40 = arith.addf %34, %39 : vector<80x128xf32>
    %c0_44 = arith.constant 0 : index
    %c0_45 = arith.constant 0 : index
    %c21 = arith.constant 21 : index
    %c0_46 = arith.constant 0 : index
    %41 = vector.load %arg2[%c0_44, %c0_45, %c21, %c0_46] : memref<1x1x110x128xbf16, #tpu.memory_space<vmem>>, vector<1x1x80x128xbf16>
    %42 = vector.shape_cast %41 : vector<1x1x80x128xbf16> to vector<80x128xbf16>
    %c7 = arith.constant 7 : index
    %c0_47 = arith.constant 0 : index
    %c0_48 = arith.constant 0 : index
    %43 = vector.load %arg3[%c7, %c0_47, %c0_48] : memref<9x128x128xbf16, #tpu.memory_space<vmem>>, vector<1x128x128xbf16>
    %44 = vector.shape_cast %43 : vector<1x128x128xbf16> to vector<128x128xbf16>
    %cst_49 = arith.constant dense<0.000000e+00> : vector<80x128xf32>
    %45 = tpu.matmul %42, %44, %cst_49 {dimension_numbers = #tpu.dot_dimension_numbers<[1], [0], [0], [1], [0, 0, 1, 1], [], []>} : vector<80x128xbf16>, vector<128x128xbf16>, vector<80x128xf32> -> vector<80x128xf32>
    %46 = arith.addf %40, %45 : vector<80x128xf32>
    %c0_50 = arith.constant 0 : index
    %c0_51 = arith.constant 0 : index
    %c22 = arith.constant 22 : index
    %c0_52 = arith.constant 0 : index
    %47 = vector.load %arg2[%c0_50, %c0_51, %c22, %c0_52] : memref<1x1x110x128xbf16, #tpu.memory_space<vmem>>, vector<1x1x80x128xbf16>
    %48 = vector.shape_cast %47 : vector<1x1x80x128xbf16> to vector<80x128xbf16>
    %c8 = arith.constant 8 : index
    %c0_53 = arith.constant 0 : index
    %c0_54 = arith.constant 0 : index
    %49 = vector.load %arg3[%c8, %c0_53, %c0_54] : memref<9x128x128xbf16, #tpu.memory_space<vmem>>, vector<1x128x128xbf16>
    %50 = vector.shape_cast %49 : vector<1x128x128xbf16> to vector<128x128xbf16>
    %cst_55 = arith.constant dense<0.000000e+00> : vector<80x128xf32>
    %51 = tpu.matmul %48, %50, %cst_55 {dimension_numbers = #tpu.dot_dimension_numbers<[1], [0], [0], [1], [0, 0, 1, 1], [], []>} : vector<80x128xbf16>, vector<128x128xbf16>, vector<80x128xf32> -> vector<80x128xf32>
    %52 = arith.addf %46, %51 : vector<80x128xf32>
    %c0_56 = arith.constant 0 : index
    %c0_57 = arith.constant 0 : index
    %53 = vector.load %arg4[%c0_56, %c0_57] : memref<1x128xf32, #tpu.memory_space<vmem>>, vector<1x128xf32>
    %54 = vector.broadcast %53 : vector<1x128xf32> to vector<80x128xf32>
    %55 = arith.addf %52, %54 : vector<80x128xf32>
    %56 = arith.negf %55 : vector<80x128xf32>
    %57 = math.exp %56 : vector<80x128xf32>
    %cst_58 = arith.constant 1.000000e+00 : f32
    %58 = vector.broadcast %cst_58 : f32 to vector<80x128xf32>
    %59 = arith.addf %58, %57 : vector<80x128xf32>
    %60 = arith.divf %58, %59 : vector<80x128xf32>
    %61 = arith.mulf %55, %60 : vector<80x128xf32>
    %62 = arith.truncf %61 : vector<80x128xf32> to vector<80x128xbf16>
    %c0_59 = arith.constant 0 : index
    %c0_60 = arith.constant 0 : index
    %c0_61 = arith.constant 0 : index
    %63 = vector.load %arg5[%c0_59, %c0_60, %c0_61] : memref<1x80x128xbf16, #tpu.memory_space<vmem>>, vector<1x80x128xbf16>
    %64 = vector.shape_cast %63 : vector<1x80x128xbf16> to vector<80x128xbf16>
    %65 = vector.shape_cast %62 : vector<80x128xbf16> to vector<1x80x128xbf16>
    tpu.vector_store %arg5[%c0_59, %c0_60, %c0_61], %65 {strides = array<i32>} : memref<1x80x128xbf16, #tpu.memory_space<vmem>>, vector<1x80x128xbf16>,
    return
  }
  func.func @transform_0(%arg0: i32, %arg1: i32) -> (i32, i32, i32, i32) {
    %c0_i32 = arith.constant 0 : i32
    %c0_i32_0 = arith.constant 0 : i32
    %c0_i32_1 = arith.constant 0 : i32
    %c0_i32_2 = arith.constant 0 : i32
    return %arg0, %c0_i32, %c0_i32_0, %c0_i32_1 : i32, i32, i32, i32
  }
  func.func @transform_1(%arg0: i32, %arg1: i32) -> (i32, i32, i32) {
    %c0_i32 = arith.constant 0 : i32
    %c0_i32_0 = arith.constant 0 : i32
    %c0_i32_1 = arith.constant 0 : i32
    return %c0_i32, %c0_i32_0, %arg1 : i32, i32, i32
  }
  func.func @transform_2(%arg0: i32, %arg1: i32) -> (i32, i32) {
    %c0_i32 = arith.constant 0 : i32
    %c0_i32_0 = arith.constant 0 : i32
    return %c0_i32, %arg1 : i32, i32
  }
  func.func @transform_3(%arg0: i32, %arg1: i32) -> (i32, i32, i32) {
    %c0_i32 = arith.constant 0 : i32
    %c0_i32_0 = arith.constant 0 : i32
    return %arg0, %c0_i32, %arg1 : i32, i32, i32
  }
}

module attributes {stable_mosaic.version = 11 : i64} {
  func.func @_mm_kernel(%arg0: i32, %arg1: i32, %arg2: i32, %arg3: memref<64x128xbf16, #tpu.memory_space<vmem>>, %arg4: memref<128x128xbf16, #tpu.memory_space<vmem>>, %arg5: memref<1x128xf32, #tpu.memory_space<vmem>>, %arg6: memref<64x128xbf16, #tpu.memory_space<vmem>>, %arg7: memref<64x128xbf16, #tpu.memory_space<vmem>>) attributes {dimension_semantics = [#tpu.dimension_semantics<parallel>, #tpu.dimension_semantics<parallel>, #tpu.dimension_semantics<arbitrary>], iteration_bounds = array<i64: 2, 1, 1>, scalar_prefetch = 0 : i64, scratch_operands = 0 : i64, tpu.core_type = #tpu.core_type<tc>, window_params = [{transform_indices = @transform_0, window_bounds = array<i64: 64, 128>}, {transform_indices = @transform_1, window_bounds = array<i64: 128, 128>}, {transform_indices = @transform_2, window_bounds = array<i64: 1, 128>}, {transform_indices = @transform_3, window_bounds = array<i64: 64, 128>}, {transform_indices = @transform_4, window_bounds = array<i64: 64, 128>}]} {
    %c0 = arith.constant 0 : index
    %c0_0 = arith.constant 0 : index
    %0 = vector.load %arg3[%c0, %c0_0] : memref<64x128xbf16, #tpu.memory_space<vmem>>, vector<64x128xbf16>
    %c0_1 = arith.constant 0 : index
    %c0_2 = arith.constant 0 : index
    %1 = vector.load %arg4[%c0_1, %c0_2] : memref<128x128xbf16, #tpu.memory_space<vmem>>, vector<128x128xbf16>
    %cst = arith.constant dense<0.000000e+00> : vector<64x128xf32>
    %2 = tpu.matmul %0, %1, %cst {dimension_numbers = #tpu.dot_dimension_numbers<[1], [0], [0], [1], [0, 0, 1, 1], [], []>} : vector<64x128xbf16>, vector<128x128xbf16>, vector<64x128xf32> -> vector<64x128xf32>
    %c0_3 = arith.constant 0 : index
    %c0_4 = arith.constant 0 : index
    %3 = vector.load %arg5[%c0_3, %c0_4] : memref<1x128xf32, #tpu.memory_space<vmem>>, vector<1x128xf32>
    %4 = vector.broadcast %3 : vector<1x128xf32> to vector<64x128xf32>
    %5 = arith.addf %2, %4 : vector<64x128xf32>
    %c0_5 = arith.constant 0 : index
    %c0_6 = arith.constant 0 : index
    %6 = vector.load %arg6[%c0_5, %c0_6] : memref<64x128xbf16, #tpu.memory_space<vmem>>, vector<64x128xbf16>
    %7 = arith.extf %6 : vector<64x128xbf16> to vector<64x128xf32>
    %8 = arith.addf %5, %7 : vector<64x128xf32>
    %9 = arith.truncf %8 : vector<64x128xf32> to vector<64x128xbf16>
    %c0_7 = arith.constant 0 : index
    %c0_8 = arith.constant 0 : index
    %10 = vector.load %arg7[%c0_7, %c0_8] : memref<64x128xbf16, #tpu.memory_space<vmem>>, vector<64x128xbf16>
    tpu.vector_store %arg7[%c0_7, %c0_8], %9 {strides = array<i32>} : memref<64x128xbf16, #tpu.memory_space<vmem>>, vector<64x128xbf16>,
    return
  }
  func.func @transform_0(%arg0: i32, %arg1: i32, %arg2: i32) -> (i32, i32) {
    %c0_i32 = arith.constant 0 : i32
    return %arg0, %arg2 : i32, i32
  }
  func.func @transform_1(%arg0: i32, %arg1: i32, %arg2: i32) -> (i32, i32) {
    %c0_i32 = arith.constant 0 : i32
    return %arg2, %arg1 : i32, i32
  }
  func.func @transform_2(%arg0: i32, %arg1: i32, %arg2: i32) -> (i32, i32) {
    %c0_i32 = arith.constant 0 : i32
    %c0_i32_0 = arith.constant 0 : i32
    return %c0_i32, %arg1 : i32, i32
  }
  func.func @transform_3(%arg0: i32, %arg1: i32, %arg2: i32) -> (i32, i32) {
    %c0_i32 = arith.constant 0 : i32
    return %arg0, %arg1 : i32, i32
  }
  func.func @transform_4(%arg0: i32, %arg1: i32, %arg2: i32) -> (i32, i32) {
    %c0_i32 = arith.constant 0 : i32
    return %arg0, %arg1 : i32, i32
  }
}

module attributes {stable_mosaic.version = 11 : i64} {
  func.func @_conv3x3_kernel(%arg0: i32, %arg1: i32, %arg2: memref<1x4x30x128xbf16, #tpu.memory_space<vmem>>, %arg3: memref<9x128x128xbf16, #tpu.memory_space<vmem>>, %arg4: memref<1x128xf32, #tpu.memory_space<vmem>>, %arg5: memref<1x20x128xbf16, #tpu.memory_space<vmem>>) attributes {dimension_semantics = [#tpu.dimension_semantics<parallel>, #tpu.dimension_semantics<parallel>], iteration_bounds = array<i64: 2, 1>, scalar_prefetch = 0 : i64, scratch_operands = 0 : i64, tpu.core_type = #tpu.core_type<tc>, window_params = [{transform_indices = @transform_0, window_bounds = array<i64: 1, 4, 30, 128>}, {transform_indices = @transform_1, window_bounds = array<i64: 9, 128, 128>}, {transform_indices = @transform_2, window_bounds = array<i64: 1, 128>}, {transform_indices = @transform_3, window_bounds = array<i64: 1, 20, 128>}]} {
    %c0 = arith.constant 0 : index
    %c0_0 = arith.constant 0 : index
    %c0_1 = arith.constant 0 : index
    %c0_2 = arith.constant 0 : index
    %0 = vector.load %arg2[%c0, %c0_0, %c0_1, %c0_2] : memref<1x4x30x128xbf16, #tpu.memory_space<vmem>>, vector<1x1x20x128xbf16>
    %1 = vector.shape_cast %0 : vector<1x1x20x128xbf16> to vector<20x128xbf16>
    %c0_3 = arith.constant 0 : index
    %c0_4 = arith.constant 0 : index
    %c0_5 = arith.constant 0 : index
    %2 = vector.load %arg3[%c0_3, %c0_4, %c0_5] : memref<9x128x128xbf16, #tpu.memory_space<vmem>>, vector<1x128x128xbf16>
    %3 = vector.shape_cast %2 : vector<1x128x128xbf16> to vector<128x128xbf16>
    %cst = arith.constant dense<0.000000e+00> : vector<20x128xf32>
    %4 = tpu.matmul %1, %3, %cst {dimension_numbers = #tpu.dot_dimension_numbers<[1], [0], [0], [1], [0, 0, 1, 1], [], []>} : vector<20x128xbf16>, vector<128x128xbf16>, vector<20x128xf32> -> vector<20x128xf32>
    %c0_6 = arith.constant 0 : index
    %c1 = arith.constant 1 : index
    %c0_7 = arith.constant 0 : index
    %c0_8 = arith.constant 0 : index
    %5 = vector.load %arg2[%c0_6, %c1, %c0_7, %c0_8] : memref<1x4x30x128xbf16, #tpu.memory_space<vmem>>, vector<1x1x20x128xbf16>
    %6 = vector.shape_cast %5 : vector<1x1x20x128xbf16> to vector<20x128xbf16>
    %c1_9 = arith.constant 1 : index
    %c0_10 = arith.constant 0 : index
    %c0_11 = arith.constant 0 : index
    %7 = vector.load %arg3[%c1_9, %c0_10, %c0_11] : memref<9x128x128xbf16, #tpu.memory_space<vmem>>, vector<1x128x128xbf16>
    %8 = vector.shape_cast %7 : vector<1x128x128xbf16> to vector<128x128xbf16>
    %cst_12 = arith.constant dense<0.000000e+00> : vector<20x128xf32>
    %9 = tpu.matmul %6, %8, %cst_12 {dimension_numbers = #tpu.dot_dimension_numbers<[1], [0], [0], [1], [0, 0, 1, 1], [], []>} : vector<20x128xbf16>, vector<128x128xbf16>, vector<20x128xf32> -> vector<20x128xf32>
    %10 = arith.addf %4, %9 : vector<20x128xf32>
    %c0_13 = arith.constant 0 : index
    %c0_14 = arith.constant 0 : index
    %c1_15 = arith.constant 1 : index
    %c0_16 = arith.constant 0 : index
    %11 = vector.load %arg2[%c0_13, %c0_14, %c1_15, %c0_16] : memref<1x4x30x128xbf16, #tpu.memory_space<vmem>>, vector<1x1x20x128xbf16>
    %12 = vector.shape_cast %11 : vector<1x1x20x128xbf16> to vector<20x128xbf16>
    %c2 = arith.constant 2 : index
    %c0_17 = arith.constant 0 : index
    %c0_18 = arith.constant 0 : index
    %13 = vector.load %arg3[%c2, %c0_17, %c0_18] : memref<9x128x128xbf16, #tpu.memory_space<vmem>>, vector<1x128x128xbf16>
    %14 = vector.shape_cast %13 : vector<1x128x128xbf16> to vector<128x128xbf16>
    %cst_19 = arith.constant dense<0.000000e+00> : vector<20x128xf32>
    %15 = tpu.matmul %12, %14, %cst_19 {dimension_numbers = #tpu.dot_dimension_numbers<[1], [0], [0], [1], [0, 0, 1, 1], [], []>} : vector<20x128xbf16>, vector<128x128xbf16>, vector<20x128xf32> -> vector<20x128xf32>
    %16 = arith.addf %10, %15 : vector<20x128xf32>
    %c0_20 = arith.constant 0 : index
    %c2_21 = arith.constant 2 : index
    %c0_22 = arith.constant 0 : index
    %c0_23 = arith.constant 0 : index
    %17 = vector.load %arg2[%c0_20, %c2_21, %c0_22, %c0_23] : memref<1x4x30x128xbf16, #tpu.memory_space<vmem>>, vector<1x1x20x128xbf16>
    %18 = vector.shape_cast %17 : vector<1x1x20x128xbf16> to vector<20x128xbf16>
    %c3 = arith.constant 3 : index
    %c0_24 = arith.constant 0 : index
    %c0_25 = arith.constant 0 : index
    %19 = vector.load %arg3[%c3, %c0_24, %c0_25] : memref<9x128x128xbf16, #tpu.memory_space<vmem>>, vector<1x128x128xbf16>
    %20 = vector.shape_cast %19 : vector<1x128x128xbf16> to vector<128x128xbf16>
    %cst_26 = arith.constant dense<0.000000e+00> : vector<20x128xf32>
    %21 = tpu.matmul %18, %20, %cst_26 {dimension_numbers = #tpu.dot_dimension_numbers<[1], [0], [0], [1], [0, 0, 1, 1], [], []>} : vector<20x128xbf16>, vector<128x128xbf16>, vector<20x128xf32> -> vector<20x128xf32>
    %22 = arith.addf %16, %21 : vector<20x128xf32>
    %c0_27 = arith.constant 0 : index
    %c3_28 = arith.constant 3 : index
    %c0_29 = arith.constant 0 : index
    %c0_30 = arith.constant 0 : index
    %23 = vector.load %arg2[%c0_27, %c3_28, %c0_29, %c0_30] : memref<1x4x30x128xbf16, #tpu.memory_space<vmem>>, vector<1x1x20x128xbf16>
    %24 = vector.shape_cast %23 : vector<1x1x20x128xbf16> to vector<20x128xbf16>
    %c4 = arith.constant 4 : index
    %c0_31 = arith.constant 0 : index
    %c0_32 = arith.constant 0 : index
    %25 = vector.load %arg3[%c4, %c0_31, %c0_32] : memref<9x128x128xbf16, #tpu.memory_space<vmem>>, vector<1x128x128xbf16>
    %26 = vector.shape_cast %25 : vector<1x128x128xbf16> to vector<128x128xbf16>
    %cst_33 = arith.constant dense<0.000000e+00> : vector<20x128xf32>
    %27 = tpu.matmul %24, %26, %cst_33 {dimension_numbers = #tpu.dot_dimension_numbers<[1], [0], [0], [1], [0, 0, 1, 1], [], []>} : vector<20x128xbf16>, vector<128x128xbf16>, vector<20x128xf32> -> vector<20x128xf32>
    %28 = arith.addf %22, %27 : vector<20x128xf32>
    %c0_34 = arith.constant 0 : index
    %c2_35 = arith.constant 2 : index
    %c1_36 = arith.constant 1 : index
    %c0_37 = arith.constant 0 : index
    %29 = vector.load %arg2[%c0_34, %c2_35, %c1_36, %c0_37] : memref<1x4x30x128xbf16, #tpu.memory_space<vmem>>, vector<1x1x20x128xbf16>
    %30 = vector.shape_cast %29 : vector<1x1x20x128xbf16> to vector<20x128xbf16>
    %c5 = arith.constant 5 : index
    %c0_38 = arith.constant 0 : index
    %c0_39 = arith.constant 0 : index
    %31 = vector.load %arg3[%c5, %c0_38, %c0_39] : memref<9x128x128xbf16, #tpu.memory_space<vmem>>, vector<1x128x128xbf16>
    %32 = vector.shape_cast %31 : vector<1x128x128xbf16> to vector<128x128xbf16>
    %cst_40 = arith.constant dense<0.000000e+00> : vector<20x128xf32>
    %33 = tpu.matmul %30, %32, %cst_40 {dimension_numbers = #tpu.dot_dimension_numbers<[1], [0], [0], [1], [0, 0, 1, 1], [], []>} : vector<20x128xbf16>, vector<128x128xbf16>, vector<20x128xf32> -> vector<20x128xf32>
    %34 = arith.addf %28, %33 : vector<20x128xf32>
    %c0_41 = arith.constant 0 : index
    %c0_42 = arith.constant 0 : index
    %c5_43 = arith.constant 5 : index
    %c0_44 = arith.constant 0 : index
    %35 = vector.load %arg2[%c0_41, %c0_42, %c5_43, %c0_44] : memref<1x4x30x128xbf16, #tpu.memory_space<vmem>>, vector<1x1x20x128xbf16>
    %36 = vector.shape_cast %35 : vector<1x1x20x128xbf16> to vector<20x128xbf16>
    %c6 = arith.constant 6 : index
    %c0_45 = arith.constant 0 : index
    %c0_46 = arith.constant 0 : index
    %37 = vector.load %arg3[%c6, %c0_45, %c0_46] : memref<9x128x128xbf16, #tpu.memory_space<vmem>>, vector<1x128x128xbf16>
    %38 = vector.shape_cast %37 : vector<1x128x128xbf16> to vector<128x128xbf16>
    %cst_47 = arith.constant dense<0.000000e+00> : vector<20x128xf32>
    %39 = tpu.matmul %36, %38, %cst_47 {dimension_numbers = #tpu.dot_dimension_numbers<[1], [0], [0], [1], [0, 0, 1, 1], [], []>} : vector<20x128xbf16>, vector<128x128xbf16>, vector<20x128xf32> -> vector<20x128xf32>
    %40 = arith.addf %34, %39 : vector<20x128xf32>
    %c0_48 = arith.constant 0 : index
    %c1_49 = arith.constant 1 : index
    %c5_50 = arith.constant 5 : index
    %c0_51 = arith.constant 0 : index
    %41 = vector.load %arg2[%c0_48, %c1_49, %c5_50, %c0_51] : memref<1x4x30x128xbf16, #tpu.memory_space<vmem>>, vector<1x1x20x128xbf16>
    %42 = vector.shape_cast %41 : vector<1x1x20x128xbf16> to vector<20x128xbf16>
    %c7 = arith.constant 7 : index
    %c0_52 = arith.constant 0 : index
    %c0_53 = arith.constant 0 : index
    %43 = vector.load %arg3[%c7, %c0_52, %c0_53] : memref<9x128x128xbf16, #tpu.memory_space<vmem>>, vector<1x128x128xbf16>
    %44 = vector.shape_cast %43 : vector<1x128x128xbf16> to vector<128x128xbf16>
    %cst_54 = arith.constant dense<0.000000e+00> : vector<20x128xf32>
    %45 = tpu.matmul %42, %44, %cst_54 {dimension_numbers = #tpu.dot_dimension_numbers<[1], [0], [0], [1], [0, 0, 1, 1], [], []>} : vector<20x128xbf16>, vector<128x128xbf16>, vector<20x128xf32> -> vector<20x128xf32>
    %46 = arith.addf %40, %45 : vector<20x128xf32>
    %c0_55 = arith.constant 0 : index
    %c0_56 = arith.constant 0 : index
    %c6_57 = arith.constant 6 : index
    %c0_58 = arith.constant 0 : index
    %47 = vector.load %arg2[%c0_55, %c0_56, %c6_57, %c0_58] : memref<1x4x30x128xbf16, #tpu.memory_space<vmem>>, vector<1x1x20x128xbf16>
    %48 = vector.shape_cast %47 : vector<1x1x20x128xbf16> to vector<20x128xbf16>
    %c8 = arith.constant 8 : index
    %c0_59 = arith.constant 0 : index
    %c0_60 = arith.constant 0 : index
    %49 = vector.load %arg3[%c8, %c0_59, %c0_60] : memref<9x128x128xbf16, #tpu.memory_space<vmem>>, vector<1x128x128xbf16>
    %50 = vector.shape_cast %49 : vector<1x128x128xbf16> to vector<128x128xbf16>
    %cst_61 = arith.constant dense<0.000000e+00> : vector<20x128xf32>
    %51 = tpu.matmul %48, %50, %cst_61 {dimension_numbers = #tpu.dot_dimension_numbers<[1], [0], [0], [1], [0, 0, 1, 1], [], []>} : vector<20x128xbf16>, vector<128x128xbf16>, vector<20x128xf32> -> vector<20x128xf32>
    %52 = arith.addf %46, %51 : vector<20x128xf32>
    %c0_62 = arith.constant 0 : index
    %c0_63 = arith.constant 0 : index
    %53 = vector.load %arg4[%c0_62, %c0_63] : memref<1x128xf32, #tpu.memory_space<vmem>>, vector<1x128xf32>
    %54 = vector.broadcast %53 : vector<1x128xf32> to vector<20x128xf32>
    %55 = arith.addf %52, %54 : vector<20x128xf32>
    %56 = arith.negf %55 : vector<20x128xf32>
    %57 = math.exp %56 : vector<20x128xf32>
    %cst_64 = arith.constant 1.000000e+00 : f32
    %58 = vector.broadcast %cst_64 : f32 to vector<20x128xf32>
    %59 = arith.addf %58, %57 : vector<20x128xf32>
    %60 = arith.divf %58, %59 : vector<20x128xf32>
    %61 = arith.mulf %55, %60 : vector<20x128xf32>
    %62 = arith.truncf %61 : vector<20x128xf32> to vector<20x128xbf16>
    %c0_65 = arith.constant 0 : index
    %c0_66 = arith.constant 0 : index
    %c0_67 = arith.constant 0 : index
    %63 = vector.load %arg5[%c0_65, %c0_66, %c0_67] : memref<1x20x128xbf16, #tpu.memory_space<vmem>>, vector<1x20x128xbf16>
    %64 = vector.shape_cast %63 : vector<1x20x128xbf16> to vector<20x128xbf16>
    %65 = vector.shape_cast %62 : vector<20x128xbf16> to vector<1x20x128xbf16>
    tpu.vector_store %arg5[%c0_65, %c0_66, %c0_67], %65 {strides = array<i32>} : memref<1x20x128xbf16, #tpu.memory_space<vmem>>, vector<1x20x128xbf16>,
    return
  }
  func.func @transform_0(%arg0: i32, %arg1: i32) -> (i32, i32, i32, i32) {
    %c0_i32 = arith.constant 0 : i32
    %c0_i32_0 = arith.constant 0 : i32
    %c0_i32_1 = arith.constant 0 : i32
    %c0_i32_2 = arith.constant 0 : i32
    return %arg0, %c0_i32, %c0_i32_0, %c0_i32_1 : i32, i32, i32, i32
  }
  func.func @transform_1(%arg0: i32, %arg1: i32) -> (i32, i32, i32) {
    %c0_i32 = arith.constant 0 : i32
    %c0_i32_0 = arith.constant 0 : i32
    %c0_i32_1 = arith.constant 0 : i32
    return %c0_i32, %c0_i32_0, %arg1 : i32, i32, i32
  }
  func.func @transform_2(%arg0: i32, %arg1: i32) -> (i32, i32) {
    %c0_i32 = arith.constant 0 : i32
    %c0_i32_0 = arith.constant 0 : i32
    return %c0_i32, %arg1 : i32, i32
  }
  func.func @transform_3(%arg0: i32, %arg1: i32) -> (i32, i32, i32) {
    %c0_i32 = arith.constant 0 : i32
    %c0_i32_0 = arith.constant 0 : i32
    return %arg0, %c0_i32, %arg1 : i32, i32, i32
  }
}

module attributes {stable_mosaic.version = 11 : i64} {
  func.func @_mm_kernel(%arg0: i32, %arg1: i32, %arg2: i32, %arg3: memref<16x128xbf16, #tpu.memory_space<vmem>>, %arg4: memref<128x128xbf16, #tpu.memory_space<vmem>>, %arg5: memref<1x128xf32, #tpu.memory_space<vmem>>, %arg6: memref<16x128xbf16, #tpu.memory_space<vmem>>) attributes {dimension_semantics = [#tpu.dimension_semantics<parallel>, #tpu.dimension_semantics<parallel>, #tpu.dimension_semantics<arbitrary>], iteration_bounds = array<i64: 2, 1, 1>, scalar_prefetch = 0 : i64, scratch_operands = 0 : i64, tpu.core_type = #tpu.core_type<tc>, window_params = [{transform_indices = @transform_0, window_bounds = array<i64: 16, 128>}, {transform_indices = @transform_1, window_bounds = array<i64: 128, 128>}, {transform_indices = @transform_2, window_bounds = array<i64: 1, 128>}, {transform_indices = @transform_3, window_bounds = array<i64: 16, 128>}]} {
    %c0 = arith.constant 0 : index
    %c0_0 = arith.constant 0 : index
    %0 = vector.load %arg3[%c0, %c0_0] : memref<16x128xbf16, #tpu.memory_space<vmem>>, vector<16x128xbf16>
    %c0_1 = arith.constant 0 : index
    %c0_2 = arith.constant 0 : index
    %1 = vector.load %arg4[%c0_1, %c0_2] : memref<128x128xbf16, #tpu.memory_space<vmem>>, vector<128x128xbf16>
    %cst = arith.constant dense<0.000000e+00> : vector<16x128xf32>
    %2 = tpu.matmul %0, %1, %cst {dimension_numbers = #tpu.dot_dimension_numbers<[1], [0], [0], [1], [0, 0, 1, 1], [], []>} : vector<16x128xbf16>, vector<128x128xbf16>, vector<16x128xf32> -> vector<16x128xf32>
    %c0_3 = arith.constant 0 : index
    %c0_4 = arith.constant 0 : index
    %3 = vector.load %arg5[%c0_3, %c0_4] : memref<1x128xf32, #tpu.memory_space<vmem>>, vector<1x128xf32>
    %4 = vector.broadcast %3 : vector<1x128xf32> to vector<16x128xf32>
    %5 = arith.addf %2, %4 : vector<16x128xf32>
    %6 = arith.truncf %5 : vector<16x128xf32> to vector<16x128xbf16>
    %c0_5 = arith.constant 0 : index
    %c0_6 = arith.constant 0 : index
    %7 = vector.load %arg6[%c0_5, %c0_6] : memref<16x128xbf16, #tpu.memory_space<vmem>>, vector<16x128xbf16>
    tpu.vector_store %arg6[%c0_5, %c0_6], %6 {strides = array<i32>} : memref<16x128xbf16, #tpu.memory_space<vmem>>, vector<16x128xbf16>,
    return
  }
  func.func @transform_0(%arg0: i32, %arg1: i32, %arg2: i32) -> (i32, i32) {
    %c0_i32 = arith.constant 0 : i32
    return %arg0, %arg2 : i32, i32
  }
  func.func @transform_1(%arg0: i32, %arg1: i32, %arg2: i32) -> (i32, i32) {
    %c0_i32 = arith.constant 0 : i32
    return %arg2, %arg1 : i32, i32
  }
  func.func @transform_2(%arg0: i32, %arg1: i32, %arg2: i32) -> (i32, i32) {
    %c0_i32 = arith.constant 0 : i32
    %c0_i32_0 = arith.constant 0 : i32
    return %c0_i32, %arg1 : i32, i32
  }
  func.func @transform_3(%arg0: i32, %arg1: i32, %arg2: i32) -> (i32, i32) {
    %c0_i32 = arith.constant 0 : i32
    return %arg0, %arg1 : i32, i32
  }
}

module attributes {stable_mosaic.version = 11 : i64} {
  func.func @_mm_kernel(%arg0: i32, %arg1: i32, %arg2: i32, %arg3: memref<16x128xbf16, #tpu.memory_space<vmem>>, %arg4: memref<128x128xbf16, #tpu.memory_space<vmem>>, %arg5: memref<1x128xf32, #tpu.memory_space<vmem>>, %arg6: memref<16x128xbf16, #tpu.memory_space<vmem>>) attributes {dimension_semantics = [#tpu.dimension_semantics<parallel>, #tpu.dimension_semantics<parallel>, #tpu.dimension_semantics<arbitrary>], iteration_bounds = array<i64: 2, 1, 1>, scalar_prefetch = 0 : i64, scratch_operands = 0 : i64, tpu.core_type = #tpu.core_type<tc>, window_params = [{transform_indices = @transform_0, window_bounds = array<i64: 16, 128>}, {transform_indices = @transform_1, window_bounds = array<i64: 128, 128>}, {transform_indices = @transform_2, window_bounds = array<i64: 1, 128>}, {transform_indices = @transform_3, window_bounds = array<i64: 16, 128>}]} {
    %c0 = arith.constant 0 : index
    %c0_0 = arith.constant 0 : index
    %0 = vector.load %arg3[%c0, %c0_0] : memref<16x128xbf16, #tpu.memory_space<vmem>>, vector<16x128xbf16>
    %c0_1 = arith.constant 0 : index
    %c0_2 = arith.constant 0 : index
    %1 = vector.load %arg4[%c0_1, %c0_2] : memref<128x128xbf16, #tpu.memory_space<vmem>>, vector<128x128xbf16>
    %cst = arith.constant dense<0.000000e+00> : vector<16x128xf32>
    %2 = tpu.matmul %0, %1, %cst {dimension_numbers = #tpu.dot_dimension_numbers<[1], [0], [0], [1], [0, 0, 1, 1], [], []>} : vector<16x128xbf16>, vector<128x128xbf16>, vector<16x128xf32> -> vector<16x128xf32>
    %c0_3 = arith.constant 0 : index
    %c0_4 = arith.constant 0 : index
    %3 = vector.load %arg5[%c0_3, %c0_4] : memref<1x128xf32, #tpu.memory_space<vmem>>, vector<1x128xf32>
    %4 = vector.broadcast %3 : vector<1x128xf32> to vector<16x128xf32>
    %5 = arith.addf %2, %4 : vector<16x128xf32>
    %6 = arith.negf %5 : vector<16x128xf32>
    %7 = math.exp %6 : vector<16x128xf32>
    %cst_5 = arith.constant 1.000000e+00 : f32
    %8 = vector.broadcast %cst_5 : f32 to vector<16x128xf32>
    %9 = arith.addf %8, %7 : vector<16x128xf32>
    %10 = arith.divf %8, %9 : vector<16x128xf32>
    %11 = arith.mulf %5, %10 : vector<16x128xf32>
    %12 = arith.truncf %11 : vector<16x128xf32> to vector<16x128xbf16>
    %c0_6 = arith.constant 0 : index
    %c0_7 = arith.constant 0 : index
    %13 = vector.load %arg6[%c0_6, %c0_7] : memref<16x128xbf16, #tpu.memory_space<vmem>>, vector<16x128xbf16>
    tpu.vector_store %arg6[%c0_6, %c0_7], %12 {strides = array<i32>} : memref<16x128xbf16, #tpu.memory_space<vmem>>, vector<16x128xbf16>,
    return
  }
  func.func @transform_0(%arg0: i32, %arg1: i32, %arg2: i32) -> (i32, i32) {
    %c0_i32 = arith.constant 0 : i32
    return %arg0, %arg2 : i32, i32
  }
  func.func @transform_1(%arg0: i32, %arg1: i32, %arg2: i32) -> (i32, i32) {
    %c0_i32 = arith.constant 0 : i32
    return %arg2, %arg1 : i32, i32
  }
  func.func @transform_2(%arg0: i32, %arg1: i32, %arg2: i32) -> (i32, i32) {
    %c0_i32 = arith.constant 0 : i32
    %c0_i32_0 = arith.constant 0 : i32
    return %c0_i32, %arg1 : i32, i32
  }
  func.func @transform_3(%arg0: i32, %arg1: i32, %arg2: i32) -> (i32, i32) {
    %c0_i32 = arith.constant 0 : i32
    return %arg0, %arg1 : i32, i32
  }
}

module attributes {stable_mosaic.version = 11 : i64} {
  func.func @_dw3x3_kernel(%arg0: i32, %arg1: i32, %arg2: memref<1x4x12x128xbf16, #tpu.memory_space<vmem>>, %arg3: memref<9x1x128xf32, #tpu.memory_space<vmem>>, %arg4: memref<1x128xf32, #tpu.memory_space<vmem>>, %arg5: memref<1x6x128xbf16, #tpu.memory_space<vmem>>, %arg6: memref<1x1x128xf32, #tpu.memory_space<vmem>>) attributes {dimension_semantics = [#tpu.dimension_semantics<parallel>, #tpu.dimension_semantics<parallel>], iteration_bounds = array<i64: 2, 1>, scalar_prefetch = 0 : i64, scratch_operands = 0 : i64, tpu.core_type = #tpu.core_type<tc>, window_params = [{transform_indices = @transform_0, window_bounds = array<i64: 1, 4, 12, 128>}, {transform_indices = @transform_1, window_bounds = array<i64: 9, 1, 128>}, {transform_indices = @transform_2, window_bounds = array<i64: 1, 128>}, {transform_indices = @transform_3, window_bounds = array<i64: 1, 6, 128>}, {transform_indices = @transform_4, window_bounds = array<i64: 1, 1, 128>}]} {
    %c0 = arith.constant 0 : index
    %c0_0 = arith.constant 0 : index
    %c0_1 = arith.constant 0 : index
    %c0_2 = arith.constant 0 : index
    %0 = vector.load %arg2[%c0, %c0_0, %c0_1, %c0_2] : memref<1x4x12x128xbf16, #tpu.memory_space<vmem>>, vector<1x1x6x128xbf16>
    %1 = vector.shape_cast %0 : vector<1x1x6x128xbf16> to vector<6x128xbf16>
    %2 = arith.extf %1 : vector<6x128xbf16> to vector<6x128xf32>
    %c0_3 = arith.constant 0 : index
    %c0_4 = arith.constant 0 : index
    %c0_5 = arith.constant 0 : index
    %3 = vector.load %arg3[%c0_3, %c0_4, %c0_5] : memref<9x1x128xf32, #tpu.memory_space<vmem>>, vector<1x1x128xf32>
    %4 = vector.shape_cast %3 : vector<1x1x128xf32> to vector<1x128xf32>
    %5 = vector.broadcast %4 : vector<1x128xf32> to vector<6x128xf32>
    %6 = arith.mulf %2, %5 : vector<6x128xf32>
    %c0_6 = arith.constant 0 : index
    %c1 = arith.constant 1 : index
    %c0_7 = arith.constant 0 : index
    %c0_8 = arith.constant 0 : index
    %7 = vector.load %arg2[%c0_6, %c1, %c0_7, %c0_8] : memref<1x4x12x128xbf16, #tpu.memory_space<vmem>>, vector<1x1x6x128xbf16>
    %8 = vector.shape_cast %7 : vector<1x1x6x128xbf16> to vector<6x128xbf16>
    %9 = arith.extf %8 : vector<6x128xbf16> to vector<6x128xf32>
    %c1_9 = arith.constant 1 : index
    %c0_10 = arith.constant 0 : index
    %c0_11 = arith.constant 0 : index
    %10 = vector.load %arg3[%c1_9, %c0_10, %c0_11] : memref<9x1x128xf32, #tpu.memory_space<vmem>>, vector<1x1x128xf32>
    %11 = vector.shape_cast %10 : vector<1x1x128xf32> to vector<1x128xf32>
    %12 = vector.broadcast %11 : vector<1x128xf32> to vector<6x128xf32>
    %13 = arith.mulf %9, %12 : vector<6x128xf32>
    %14 = arith.addf %6, %13 : vector<6x128xf32>
    %c0_12 = arith.constant 0 : index
    %c0_13 = arith.constant 0 : index
    %c1_14 = arith.constant 1 : index
    %c0_15 = arith.constant 0 : index
    %15 = vector.load %arg2[%c0_12, %c0_13, %c1_14, %c0_15] : memref<1x4x12x128xbf16, #tpu.memory_space<vmem>>, vector<1x1x6x128xbf16>
    %16 = vector.shape_cast %15 : vector<1x1x6x128xbf16> to vector<6x128xbf16>
    %17 = arith.extf %16 : vector<6x128xbf16> to vector<6x128xf32>
    %c2 = arith.constant 2 : index
    %c0_16 = arith.constant 0 : index
    %c0_17 = arith.constant 0 : index
    %18 = vector.load %arg3[%c2, %c0_16, %c0_17] : memref<9x1x128xf32, #tpu.memory_space<vmem>>, vector<1x1x128xf32>
    %19 = vector.shape_cast %18 : vector<1x1x128xf32> to vector<1x128xf32>
    %20 = vector.broadcast %19 : vector<1x128xf32> to vector<6x128xf32>
    %21 = arith.mulf %17, %20 : vector<6x128xf32>
    %22 = arith.addf %14, %21 : vector<6x128xf32>
    %c0_18 = arith.constant 0 : index
    %c2_19 = arith.constant 2 : index
    %c0_20 = arith.constant 0 : index
    %c0_21 = arith.constant 0 : index
    %23 = vector.load %arg2[%c0_18, %c2_19, %c0_20, %c0_21] : memref<1x4x12x128xbf16, #tpu.memory_space<vmem>>, vector<1x1x6x128xbf16>
    %24 = vector.shape_cast %23 : vector<1x1x6x128xbf16> to vector<6x128xbf16>
    %25 = arith.extf %24 : vector<6x128xbf16> to vector<6x128xf32>
    %c3 = arith.constant 3 : index
    %c0_22 = arith.constant 0 : index
    %c0_23 = arith.constant 0 : index
    %26 = vector.load %arg3[%c3, %c0_22, %c0_23] : memref<9x1x128xf32, #tpu.memory_space<vmem>>, vector<1x1x128xf32>
    %27 = vector.shape_cast %26 : vector<1x1x128xf32> to vector<1x128xf32>
    %28 = vector.broadcast %27 : vector<1x128xf32> to vector<6x128xf32>
    %29 = arith.mulf %25, %28 : vector<6x128xf32>
    %30 = arith.addf %22, %29 : vector<6x128xf32>
    %c0_24 = arith.constant 0 : index
    %c3_25 = arith.constant 3 : index
    %c0_26 = arith.constant 0 : index
    %c0_27 = arith.constant 0 : index
    %31 = vector.load %arg2[%c0_24, %c3_25, %c0_26, %c0_27] : memref<1x4x12x128xbf16, #tpu.memory_space<vmem>>, vector<1x1x6x128xbf16>
    %32 = vector.shape_cast %31 : vector<1x1x6x128xbf16> to vector<6x128xbf16>
    %33 = arith.extf %32 : vector<6x128xbf16> to vector<6x128xf32>
    %c4 = arith.constant 4 : index
    %c0_28 = arith.constant 0 : index
    %c0_29 = arith.constant 0 : index
    %34 = vector.load %arg3[%c4, %c0_28, %c0_29] : memref<9x1x128xf32, #tpu.memory_space<vmem>>, vector<1x1x128xf32>
    %35 = vector.shape_cast %34 : vector<1x1x128xf32> to vector<1x128xf32>
    %36 = vector.broadcast %35 : vector<1x128xf32> to vector<6x128xf32>
    %37 = arith.mulf %33, %36 : vector<6x128xf32>
    %38 = arith.addf %30, %37 : vector<6x128xf32>
    %c0_30 = arith.constant 0 : index
    %c2_31 = arith.constant 2 : index
    %c1_32 = arith.constant 1 : index
    %c0_33 = arith.constant 0 : index
    %39 = vector.load %arg2[%c0_30, %c2_31, %c1_32, %c0_33] : memref<1x4x12x128xbf16, #tpu.memory_space<vmem>>, vector<1x1x6x128xbf16>
    %40 = vector.shape_cast %39 : vector<1x1x6x128xbf16> to vector<6x128xbf16>
    %41 = arith.extf %40 : vector<6x128xbf16> to vector<6x128xf32>
    %c5 = arith.constant 5 : index
    %c0_34 = arith.constant 0 : index
    %c0_35 = arith.constant 0 : index
    %42 = vector.load %arg3[%c5, %c0_34, %c0_35] : memref<9x1x128xf32, #tpu.memory_space<vmem>>, vector<1x1x128xf32>
    %43 = vector.shape_cast %42 : vector<1x1x128xf32> to vector<1x128xf32>
    %44 = vector.broadcast %43 : vector<1x128xf32> to vector<6x128xf32>
    %45 = arith.mulf %41, %44 : vector<6x128xf32>
    %46 = arith.addf %38, %45 : vector<6x128xf32>
    %c0_36 = arith.constant 0 : index
    %c0_37 = arith.constant 0 : index
    %c3_38 = arith.constant 3 : index
    %c0_39 = arith.constant 0 : index
    %47 = vector.load %arg2[%c0_36, %c0_37, %c3_38, %c0_39] : memref<1x4x12x128xbf16, #tpu.memory_space<vmem>>, vector<1x1x6x128xbf16>
    %48 = vector.shape_cast %47 : vector<1x1x6x128xbf16> to vector<6x128xbf16>
    %49 = arith.extf %48 : vector<6x128xbf16> to vector<6x128xf32>
    %c6 = arith.constant 6 : index
    %c0_40 = arith.constant 0 : index
    %c0_41 = arith.constant 0 : index
    %50 = vector.load %arg3[%c6, %c0_40, %c0_41] : memref<9x1x128xf32, #tpu.memory_space<vmem>>, vector<1x1x128xf32>
    %51 = vector.shape_cast %50 : vector<1x1x128xf32> to vector<1x128xf32>
    %52 = vector.broadcast %51 : vector<1x128xf32> to vector<6x128xf32>
    %53 = arith.mulf %49, %52 : vector<6x128xf32>
    %54 = arith.addf %46, %53 : vector<6x128xf32>
    %c0_42 = arith.constant 0 : index
    %c1_43 = arith.constant 1 : index
    %c3_44 = arith.constant 3 : index
    %c0_45 = arith.constant 0 : index
    %55 = vector.load %arg2[%c0_42, %c1_43, %c3_44, %c0_45] : memref<1x4x12x128xbf16, #tpu.memory_space<vmem>>, vector<1x1x6x128xbf16>
    %56 = vector.shape_cast %55 : vector<1x1x6x128xbf16> to vector<6x128xbf16>
    %57 = arith.extf %56 : vector<6x128xbf16> to vector<6x128xf32>
    %c7 = arith.constant 7 : index
    %c0_46 = arith.constant 0 : index
    %c0_47 = arith.constant 0 : index
    %58 = vector.load %arg3[%c7, %c0_46, %c0_47] : memref<9x1x128xf32, #tpu.memory_space<vmem>>, vector<1x1x128xf32>
    %59 = vector.shape_cast %58 : vector<1x1x128xf32> to vector<1x128xf32>
    %60 = vector.broadcast %59 : vector<1x128xf32> to vector<6x128xf32>
    %61 = arith.mulf %57, %60 : vector<6x128xf32>
    %62 = arith.addf %54, %61 : vector<6x128xf32>
    %c0_48 = arith.constant 0 : index
    %c0_49 = arith.constant 0 : index
    %c4_50 = arith.constant 4 : index
    %c0_51 = arith.constant 0 : index
    %63 = vector.load %arg2[%c0_48, %c0_49, %c4_50, %c0_51] : memref<1x4x12x128xbf16, #tpu.memory_space<vmem>>, vector<1x1x6x128xbf16>
    %64 = vector.shape_cast %63 : vector<1x1x6x128xbf16> to vector<6x128xbf16>
    %65 = arith.extf %64 : vector<6x128xbf16> to vector<6x128xf32>
    %c8 = arith.constant 8 : index
    %c0_52 = arith.constant 0 : index
    %c0_53 = arith.constant 0 : index
    %66 = vector.load %arg3[%c8, %c0_52, %c0_53] : memref<9x1x128xf32, #tpu.memory_space<vmem>>, vector<1x1x128xf32>
    %67 = vector.shape_cast %66 : vector<1x1x128xf32> to vector<1x128xf32>
    %68 = vector.broadcast %67 : vector<1x128xf32> to vector<6x128xf32>
    %69 = arith.mulf %65, %68 : vector<6x128xf32>
    %70 = arith.addf %62, %69 : vector<6x128xf32>
    %c0_54 = arith.constant 0 : index
    %c0_55 = arith.constant 0 : index
    %71 = vector.load %arg4[%c0_54, %c0_55] : memref<1x128xf32, #tpu.memory_space<vmem>>, vector<1x128xf32>
    %72 = vector.broadcast %71 : vector<1x128xf32> to vector<6x128xf32>
    %73 = arith.addf %70, %72 : vector<6x128xf32>
    %74 = arith.negf %73 : vector<6x128xf32>
    %75 = math.exp %74 : vector<6x128xf32>
    %cst = arith.constant 1.000000e+00 : f32
    %76 = vector.broadcast %cst : f32 to vector<6x128xf32>
    %77 = arith.addf %76, %75 : vector<6x128xf32>
    %78 = arith.divf %76, %77 : vector<6x128xf32>
    %79 = arith.mulf %73, %78 : vector<6x128xf32>
    %80 = arith.truncf %79 : vector<6x128xf32> to vector<6x128xbf16>
    %c0_56 = arith.constant 0 : index
    %c0_57 = arith.constant 0 : index
    %c0_58 = arith.constant 0 : index
    %81 = vector.load %arg5[%c0_56, %c0_57, %c0_58] : memref<1x6x128xbf16, #tpu.memory_space<vmem>>, vector<1x6x128xbf16>
    %82 = vector.shape_cast %81 : vector<1x6x128xbf16> to vector<6x128xbf16>
    %83 = vector.shape_cast %80 : vector<6x128xbf16> to vector<1x6x128xbf16>
    tpu.vector_store %arg5[%c0_56, %c0_57, %c0_58], %83 {strides = array<i32>} : memref<1x6x128xbf16, #tpu.memory_space<vmem>>, vector<1x6x128xbf16>,
    %84 = tpu.iota {dimensions = array<i32: 0>} : vector<6x1xi32>
    %c3_i32 = arith.constant 3 : i32
    %c0_i32 = arith.constant 0 : i32
    %85 = arith.cmpi eq, %c3_i32, %c0_i32 : i32
    %c1_i32 = arith.constant 1 : i32
    %86 = arith.select %85, %c1_i32, %c3_i32 : i32
    %87 = vector.broadcast %86 : i32 to vector<6x1xi32>
    %88 = arith.remsi %84, %87 : vector<6x1xi32>
    %c0_i32_59 = arith.constant 0 : i32
    %89 = vector.broadcast %c0_i32_59 : i32 to vector<6x1xi32>
    %90 = arith.cmpi ne, %88, %89 : vector<6x1xi32>
    %c0_i32_60 = arith.constant 0 : i32
    %91 = vector.broadcast %c0_i32_60 : i32 to vector<6x1xi32>
    %92 = arith.cmpi slt, %88, %91 : vector<6x1xi32>
    %c0_i32_61 = arith.constant 0 : i32
    %93 = arith.cmpi slt, %86, %c0_i32_61 : i32
    %94 = vector.broadcast %93 : i1 to vector<6x1xi1>
    %95 = vector.broadcast %94 : vector<6x1xi1> to vector<6x1xi1>
    %96 = arith.xori %92, %95 : vector<6x1xi1>
    %97 = arith.andi %96, %90 : vector<6x1xi1>
    %98 = vector.broadcast %86 : i32 to vector<6x1xi32>
    %99 = arith.addi %88, %98 : vector<6x1xi32>
    %100 = arith.select %97, %99, %88 : vector<6x1xi1>, vector<6x1xi32>
    %c2_i32 = arith.constant 2 : i32
    %101 = vector.broadcast %c2_i32 : i32 to vector<6x1xi32>
    %102 = arith.cmpi slt, %100, %101 : vector<6x1xi32>
    %cst_62 = arith.constant 0.000000e+00 : f32
    %103 = vector.shape_cast %102 : vector<6x1xi1> to vector<6x1xi1>
    %104 = vector.broadcast %103 : vector<6x1xi1> to vector<6x128xi1>
    %105 = vector.broadcast %cst_62 : f32 to vector<6x128xf32>
    %106 = arith.select %104, %79, %105 : vector<6x128xi1>, vector<6x128xf32>
    %cst_63 = arith.constant dense<0.000000e+00> : vector<128xf32>
    %107 = vector.multi_reduction <add>, %106, %cst_63 [0] : vector<6x128xf32> to vector<128xf32>
    %108 = vector.shape_cast %107 : vector<128xf32> to vector<1x128xf32>
    %c0_64 = arith.constant 0 : index
    %c0_65 = arith.constant 0 : index
    %c0_66 = arith.constant 0 : index
    %109 = vector.load %arg6[%c0_64, %c0_65, %c0_66] : memref<1x1x128xf32, #tpu.memory_space<vmem>>, vector<1x1x128xf32>
    %110 = vector.shape_cast %109 : vector<1x1x128xf32> to vector<1x128xf32>
    %111 = vector.shape_cast %108 : vector<1x128xf32> to vector<1x1x128xf32>
    tpu.vector_store %arg6[%c0_64, %c0_65, %c0_66], %111 {strides = array<i32>} : memref<1x1x128xf32, #tpu.memory_space<vmem>>, vector<1x1x128xf32>,
    return
  }
  func.func @transform_0(%arg0: i32, %arg1: i32) -> (i32, i32, i32, i32) {
    %c0_i32 = arith.constant 0 : i32
    %c0_i32_0 = arith.constant 0 : i32
    %c0_i32_1 = arith.constant 0 : i32
    return %arg0, %c0_i32, %c0_i32_0, %arg1 : i32, i32, i32, i32
  }
  func.func @transform_1(%arg0: i32, %arg1: i32) -> (i32, i32, i32) {
    %c0_i32 = arith.constant 0 : i32
    %c0_i32_0 = arith.constant 0 : i32
    %c0_i32_1 = arith.constant 0 : i32
    return %c0_i32, %c0_i32_0, %arg1 : i32, i32, i32
  }
  func.func @transform_2(%arg0: i32, %arg1: i32) -> (i32, i32) {
    %c0_i32 = arith.constant 0 : i32
    %c0_i32_0 = arith.constant 0 : i32
    return %c0_i32, %arg1 : i32, i32
  }
  func.func @transform_3(%arg0: i32, %arg1: i32) -> (i32, i32, i32) {
    %c0_i32 = arith.constant 0 : i32
    %c0_i32_0 = arith.constant 0 : i32
    return %arg0, %c0_i32, %arg1 : i32, i32, i32
  }
  func.func @transform_4(%arg0: i32, %arg1: i32) -> (i32, i32, i32) {
    %c0_i32 = arith.constant 0 : i32
    %c0_i32_0 = arith.constant 0 : i32
    return %arg0, %c0_i32, %arg1 : i32, i32, i32
  }
}

module attributes {stable_mosaic.version = 11 : i64} {
  func.func @_mm_kernel(%arg0: i32, %arg1: i32, %arg2: i32, %arg3: memref<8x128xbf16, #tpu.memory_space<vmem>>, %arg4: memref<128x128xbf16, #tpu.memory_space<vmem>>, %arg5: memref<1x128xf32, #tpu.memory_space<vmem>>, %arg6: memref<8x128xbf16, #tpu.memory_space<vmem>>, %arg7: memref<8x128xbf16, #tpu.memory_space<vmem>>) attributes {dimension_semantics = [#tpu.dimension_semantics<parallel>, #tpu.dimension_semantics<parallel>, #tpu.dimension_semantics<arbitrary>], iteration_bounds = array<i64: 1, 1, 1>, scalar_prefetch = 0 : i64, scratch_operands = 0 : i64, tpu.core_type = #tpu.core_type<tc>, window_params = [{transform_indices = @transform_0, window_bounds = array<i64: 8, 128>}, {transform_indices = @transform_1, window_bounds = array<i64: 128, 128>}, {transform_indices = @transform_2, window_bounds = array<i64: 1, 128>}, {transform_indices = @transform_3, window_bounds = array<i64: 8, 128>}, {transform_indices = @transform_4, window_bounds = array<i64: 8, 128>}]} {
    %c0 = arith.constant 0 : index
    %c0_0 = arith.constant 0 : index
    %0 = vector.load %arg3[%c0, %c0_0] : memref<8x128xbf16, #tpu.memory_space<vmem>>, vector<8x128xbf16>
    %c0_1 = arith.constant 0 : index
    %c0_2 = arith.constant 0 : index
    %1 = vector.load %arg6[%c0_1, %c0_2] : memref<8x128xbf16, #tpu.memory_space<vmem>>, vector<8x128xbf16>
    %2 = arith.mulf %0, %1 : vector<8x128xbf16>
    %c0_3 = arith.constant 0 : index
    %c0_4 = arith.constant 0 : index
    %3 = vector.load %arg4[%c0_3, %c0_4] : memref<128x128xbf16, #tpu.memory_space<vmem>>, vector<128x128xbf16>
    %cst = arith.constant dense<0.000000e+00> : vector<8x128xf32>
    %4 = tpu.matmul %2, %3, %cst {dimension_numbers = #tpu.dot_dimension_numbers<[1], [0], [0], [1], [0, 0, 1, 1], [], []>} : vector<8x128xbf16>, vector<128x128xbf16>, vector<8x128xf32> -> vector<8x128xf32>
    %c0_5 = arith.constant 0 : index
    %c0_6 = arith.constant 0 : index
    %5 = vector.load %arg5[%c0_5, %c0_6] : memref<1x128xf32, #tpu.memory_space<vmem>>, vector<1x128xf32>
    %6 = vector.broadcast %5 : vector<1x128xf32> to vector<8x128xf32>
    %7 = arith.addf %4, %6 : vector<8x128xf32>
    %8 = arith.truncf %7 : vector<8x128xf32> to vector<8x128xbf16>
    %c0_7 = arith.constant 0 : index
    %c0_8 = arith.constant 0 : index
    %9 = vector.load %arg7[%c0_7, %c0_8] : memref<8x128xbf16, #tpu.memory_space<vmem>>, vector<8x128xbf16>
    tpu.vector_store %arg7[%c0_7, %c0_8], %8 {strides = array<i32>} : memref<8x128xbf16, #tpu.memory_space<vmem>>, vector<8x128xbf16>,
    return
  }
  func.func @transform_0(%arg0: i32, %arg1: i32, %arg2: i32) -> (i32, i32) {
    %c0_i32 = arith.constant 0 : i32
    return %arg0, %arg2 : i32, i32
  }
  func.func @transform_1(%arg0: i32, %arg1: i32, %arg2: i32) -> (i32, i32) {
    %c0_i32 = arith.constant 0 : i32
    return %arg2, %arg1 : i32, i32
  }
  func.func @transform_2(%arg0: i32, %arg1: i32, %arg2: i32) -> (i32, i32) {
    %c0_i32 = arith.constant 0 : i32
    %c0_i32_0 = arith.constant 0 : i32
    return %c0_i32, %arg1 : i32, i32
  }
  func.func @transform_3(%arg0: i32, %arg1: i32, %arg2: i32) -> (i32, i32) {
    %c0_i32 = arith.constant 0 : i32
    return %arg0, %arg2 : i32, i32
  }
  func.func @transform_4(%arg0: i32, %arg1: i32, %arg2: i32) -> (i32, i32) {
    %c0_i32 = arith.constant 0 : i32
    return %arg0, %arg1 : i32, i32
  }
}

module attributes {stable_mosaic.version = 11 : i64} {
  func.func @_se_fc_kernel(%arg0: memref<2x1x128xf32, #tpu.memory_space<vmem>>, %arg1: memref<128x128xf32, #tpu.memory_space<vmem>>, %arg2: memref<1x128xf32, #tpu.memory_space<vmem>>, %arg3: memref<128x128xf32, #tpu.memory_space<vmem>>, %arg4: memref<1x128xf32, #tpu.memory_space<vmem>>, %arg5: memref<2x1x128xf32, #tpu.memory_space<vmem>>) attributes {dimension_semantics = [], scalar_prefetch = 0 : i64, scratch_operands = 0 : i64, tpu.core_type = #tpu.core_type<tc>} {
    %c0 = arith.constant 0 : index
    %c0_0 = arith.constant 0 : index
    %c0_1 = arith.constant 0 : index
    %0 = vector.load %arg0[%c0, %c0_0, %c0_1] : memref<2x1x128xf32, #tpu.memory_space<vmem>>, vector<2x1x128xf32>
    %1 = vector.shape_cast %0 : vector<2x1x128xf32> to vector<2x128xf32>
    %cst = arith.constant 2.500000e-01 : f32
    %2 = vector.broadcast %cst : f32 to vector<2x128xf32>
    %3 = arith.mulf %1, %2 : vector<2x128xf32>
    %c0_2 = arith.constant 0 : index
    %c0_3 = arith.constant 0 : index
    %4 = vector.load %arg1[%c0_2, %c0_3] : memref<128x128xf32, #tpu.memory_space<vmem>>, vector<128x128xf32>
    %cst_4 = arith.constant dense<0.000000e+00> : vector<2x128xf32>
    %5 = tpu.matmul %3, %4, %cst_4 {dimension_numbers = #tpu.dot_dimension_numbers<[1], [0], [0], [1], [0, 0, 1, 1], [], []>} : vector<2x128xf32>, vector<128x128xf32>, vector<2x128xf32> -> vector<2x128xf32>
    %c0_5 = arith.constant 0 : index
    %c0_6 = arith.constant 0 : index
    %6 = vector.load %arg2[%c0_5, %c0_6] : memref<1x128xf32, #tpu.memory_space<vmem>>, vector<1x128xf32>
    %7 = vector.broadcast %6 : vector<1x128xf32> to vector<2x128xf32>
    %8 = arith.addf %5, %7 : vector<2x128xf32>
    %9 = arith.negf %8 : vector<2x128xf32>
    %10 = math.exp %9 : vector<2x128xf32>
    %cst_7 = arith.constant 1.000000e+00 : f32
    %11 = vector.broadcast %cst_7 : f32 to vector<2x128xf32>
    %12 = arith.addf %11, %10 : vector<2x128xf32>
    %13 = arith.divf %11, %12 : vector<2x128xf32>
    %14 = arith.mulf %8, %13 : vector<2x128xf32>
    %c0_8 = arith.constant 0 : index
    %c0_9 = arith.constant 0 : index
    %15 = vector.load %arg3[%c0_8, %c0_9] : memref<128x128xf32, #tpu.memory_space<vmem>>, vector<128x128xf32>
    %cst_10 = arith.constant dense<0.000000e+00> : vector<2x128xf32>
    %16 = tpu.matmul %14, %15, %cst_10 {dimension_numbers = #tpu.dot_dimension_numbers<[1], [0], [0], [1], [0, 0, 1, 1], [], []>} : vector<2x128xf32>, vector<128x128xf32>, vector<2x128xf32> -> vector<2x128xf32>
    %c0_11 = arith.constant 0 : index
    %c0_12 = arith.constant 0 : index
    %17 = vector.load %arg4[%c0_11, %c0_12] : memref<1x128xf32, #tpu.memory_space<vmem>>, vector<1x128xf32>
    %18 = vector.broadcast %17 : vector<1x128xf32> to vector<2x128xf32>
    %19 = arith.addf %16, %18 : vector<2x128xf32>
    %20 = arith.negf %19 : vector<2x128xf32>
    %21 = math.exp %20 : vector<2x128xf32>
    %cst_13 = arith.constant 1.000000e+00 : f32
    %22 = vector.broadcast %cst_13 : f32 to vector<2x128xf32>
    %23 = arith.addf %22, %21 : vector<2x128xf32>
    %24 = arith.divf %22, %23 : vector<2x128xf32>
    %25 = vector.shape_cast %24 : vector<2x128xf32> to vector<2x1x128xf32>
    %c0_14 = arith.constant 0 : index
    %c0_15 = arith.constant 0 : index
    %c0_16 = arith.constant 0 : index
    %26 = vector.load %arg5[%c0_14, %c0_15, %c0_16] : memref<2x1x128xf32, #tpu.memory_space<vmem>>, vector<2x1x128xf32>
    tpu.vector_store %arg5[%c0_14, %c0_15, %c0_16], %25 {strides = array<i32>} : memref<2x1x128xf32, #tpu.memory_space<vmem>>, vector<2x1x128xf32>,
    return
  }
}

module attributes {stable_mosaic.version = 11 : i64} {
  func.func @_mm_kernel(%arg0: i32, %arg1: i32, %arg2: i32, %arg3: memref<8x128xbf16, #tpu.memory_space<vmem>>, %arg4: memref<128x256xbf16, #tpu.memory_space<vmem>>, %arg5: memref<1x256xf32, #tpu.memory_space<vmem>>, %arg6: memref<8x256xbf16, #tpu.memory_space<vmem>>) attributes {dimension_semantics = [#tpu.dimension_semantics<parallel>, #tpu.dimension_semantics<parallel>, #tpu.dimension_semantics<arbitrary>], iteration_bounds = array<i64: 1, 1, 1>, scalar_prefetch = 0 : i64, scratch_operands = 0 : i64, tpu.core_type = #tpu.core_type<tc>, window_params = [{transform_indices = @transform_0, window_bounds = array<i64: 8, 128>}, {transform_indices = @transform_1, window_bounds = array<i64: 128, 256>}, {transform_indices = @transform_2, window_bounds = array<i64: 1, 256>}, {transform_indices = @transform_3, window_bounds = array<i64: 8, 256>}]} {
    %c0 = arith.constant 0 : index
    %c0_0 = arith.constant 0 : index
    %0 = vector.load %arg3[%c0, %c0_0] : memref<8x128xbf16, #tpu.memory_space<vmem>>, vector<8x128xbf16>
    %c0_1 = arith.constant 0 : index
    %c0_2 = arith.constant 0 : index
    %1 = vector.load %arg4[%c0_1, %c0_2] : memref<128x256xbf16, #tpu.memory_space<vmem>>, vector<128x256xbf16>
    %cst = arith.constant dense<0.000000e+00> : vector<8x256xf32>
    %2 = tpu.matmul %0, %1, %cst {dimension_numbers = #tpu.dot_dimension_numbers<[1], [0], [0], [1], [0, 0, 1, 1], [], []>} : vector<8x128xbf16>, vector<128x256xbf16>, vector<8x256xf32> -> vector<8x256xf32>
    %c0_3 = arith.constant 0 : index
    %c0_4 = arith.constant 0 : index
    %3 = vector.load %arg5[%c0_3, %c0_4] : memref<1x256xf32, #tpu.memory_space<vmem>>, vector<1x256xf32>
    %4 = vector.broadcast %3 : vector<1x256xf32> to vector<8x256xf32>
    %5 = arith.addf %2, %4 : vector<8x256xf32>
    %6 = arith.negf %5 : vector<8x256xf32>
    %7 = math.exp %6 : vector<8x256xf32>
    %cst_5 = arith.constant 1.000000e+00 : f32
    %8 = vector.broadcast %cst_5 : f32 to vector<8x256xf32>
    %9 = arith.addf %8, %7 : vector<8x256xf32>
    %10 = arith.divf %8, %9 : vector<8x256xf32>
    %11 = arith.mulf %5, %10 : vector<8x256xf32>
    %12 = arith.truncf %11 : vector<8x256xf32> to vector<8x256xbf16>
    %c0_6 = arith.constant 0 : index
    %c0_7 = arith.constant 0 : index
    %13 = vector.load %arg6[%c0_6, %c0_7] : memref<8x256xbf16, #tpu.memory_space<vmem>>, vector<8x256xbf16>
    tpu.vector_store %arg6[%c0_6, %c0_7], %12 {strides = array<i32>} : memref<8x256xbf16, #tpu.memory_space<vmem>>, vector<8x256xbf16>,
    return
  }
  func.func @transform_0(%arg0: i32, %arg1: i32, %arg2: i32) -> (i32, i32) {
    %c0_i32 = arith.constant 0 : i32
    return %arg0, %arg2 : i32, i32
  }
  func.func @transform_1(%arg0: i32, %arg1: i32, %arg2: i32) -> (i32, i32) {
    %c0_i32 = arith.constant 0 : i32
    return %arg2, %arg1 : i32, i32
  }
  func.func @transform_2(%arg0: i32, %arg1: i32, %arg2: i32) -> (i32, i32) {
    %c0_i32 = arith.constant 0 : i32
    %c0_i32_0 = arith.constant 0 : i32
    return %c0_i32, %arg1 : i32, i32
  }
  func.func @transform_3(%arg0: i32, %arg1: i32, %arg2: i32) -> (i32, i32) {
    %c0_i32 = arith.constant 0 : i32
    return %arg0, %arg1 : i32, i32
  }
}

module attributes {stable_mosaic.version = 11 : i64} {
  func.func @_dw3x3_kernel(%arg0: i32, %arg1: i32, %arg2: memref<1x1x20x256xbf16, #tpu.memory_space<vmem>>, %arg3: memref<9x1x256xf32, #tpu.memory_space<vmem>>, %arg4: memref<1x256xf32, #tpu.memory_space<vmem>>, %arg5: memref<1x8x256xbf16, #tpu.memory_space<vmem>>, %arg6: memref<1x1x256xf32, #tpu.memory_space<vmem>>) attributes {dimension_semantics = [#tpu.dimension_semantics<parallel>, #tpu.dimension_semantics<parallel>], iteration_bounds = array<i64: 2, 1>, scalar_prefetch = 0 : i64, scratch_operands = 0 : i64, tpu.core_type = #tpu.core_type<tc>, window_params = [{transform_indices = @transform_0, window_bounds = array<i64: 1, 1, 20, 256>}, {transform_indices = @transform_1, window_bounds = array<i64: 9, 1, 256>}, {transform_indices = @transform_2, window_bounds = array<i64: 1, 256>}, {transform_indices = @transform_3, window_bounds = array<i64: 1, 8, 256>}, {transform_indices = @transform_4, window_bounds = array<i64: 1, 1, 256>}]} {
    %c0 = arith.constant 0 : index
    %c0_0 = arith.constant 0 : index
    %c0_1 = arith.constant 0 : index
    %c0_2 = arith.constant 0 : index
    %0 = vector.load %arg2[%c0, %c0_0, %c0_1, %c0_2] : memref<1x1x20x256xbf16, #tpu.memory_space<vmem>>, vector<1x1x8x256xbf16>
    %1 = vector.shape_cast %0 : vector<1x1x8x256xbf16> to vector<8x256xbf16>
    %2 = arith.extf %1 : vector<8x256xbf16> to vector<8x256xf32>
    %c0_3 = arith.constant 0 : index
    %c0_4 = arith.constant 0 : index
    %c0_5 = arith.constant 0 : index
    %3 = vector.load %arg3[%c0_3, %c0_4, %c0_5] : memref<9x1x256xf32, #tpu.memory_space<vmem>>, vector<1x1x256xf32>
    %4 = vector.shape_cast %3 : vector<1x1x256xf32> to vector<1x256xf32>
    %5 = vector.broadcast %4 : vector<1x256xf32> to vector<8x256xf32>
    %6 = arith.mulf %2, %5 : vector<8x256xf32>
    %c0_6 = arith.constant 0 : index
    %c0_7 = arith.constant 0 : index
    %c1 = arith.constant 1 : index
    %c0_8 = arith.constant 0 : index
    %7 = vector.load %arg2[%c0_6, %c0_7, %c1, %c0_8] : memref<1x1x20x256xbf16, #tpu.memory_space<vmem>>, vector<1x1x8x256xbf16>
    %8 = vector.shape_cast %7 : vector<1x1x8x256xbf16> to vector<8x256xbf16>
    %9 = arith.extf %8 : vector<8x256xbf16> to vector<8x256xf32>
    %c1_9 = arith.constant 1 : index
    %c0_10 = arith.constant 0 : index
    %c0_11 = arith.constant 0 : index
    %10 = vector.load %arg3[%c1_9, %c0_10, %c0_11] : memref<9x1x256xf32, #tpu.memory_space<vmem>>, vector<1x1x256xf32>
    %11 = vector.shape_cast %10 : vector<1x1x256xf32> to vector<1x256xf32>
    %12 = vector.broadcast %11 : vector<1x256xf32> to vector<8x256xf32>
    %13 = arith.mulf %9, %12 : vector<8x256xf32>
    %14 = arith.addf %6, %13 : vector<8x256xf32>
    %c0_12 = arith.constant 0 : index
    %c0_13 = arith.constant 0 : index
    %c2 = arith.constant 2 : index
    %c0_14 = arith.constant 0 : index
    %15 = vector.load %arg2[%c0_12, %c0_13, %c2, %c0_14] : memref<1x1x20x256xbf16, #tpu.memory_space<vmem>>, vector<1x1x8x256xbf16>
    %16 = vector.shape_cast %15 : vector<1x1x8x256xbf16> to vector<8x256xbf16>
    %17 = arith.extf %16 : vector<8x256xbf16> to vector<8x256xf32>
    %c2_15 = arith.constant 2 : index
    %c0_16 = arith.constant 0 : index
    %c0_17 = arith.constant 0 : index
    %18 = vector.load %arg3[%c2_15, %c0_16, %c0_17] : memref<9x1x256xf32, #tpu.memory_space<vmem>>, vector<1x1x256xf32>
    %19 = vector.shape_cast %18 : vector<1x1x256xf32> to vector<1x256xf32>
    %20 = vector.broadcast %19 : vector<1x256xf32> to vector<8x256xf32>
    %21 = arith.mulf %17, %20 : vector<8x256xf32>
    %22 = arith.addf %14, %21 : vector<8x256xf32>
    %c0_18 = arith.constant 0 : index
    %c0_19 = arith.constant 0 : index
    %c4 = arith.constant 4 : index
    %c0_20 = arith.constant 0 : index
    %23 = vector.load %arg2[%c0_18, %c0_19, %c4, %c0_20] : memref<1x1x20x256xbf16, #tpu.memory_space<vmem>>, vector<1x1x8x256xbf16>
    %24 = vector.shape_cast %23 : vector<1x1x8x256xbf16> to vector<8x256xbf16>
    %25 = arith.extf %24 : vector<8x256xbf16> to vector<8x256xf32>
    %c3 = arith.constant 3 : index
    %c0_21 = arith.constant 0 : index
    %c0_22 = arith.constant 0 : index
    %26 = vector.load %arg3[%c3, %c0_21, %c0_22] : memref<9x1x256xf32, #tpu.memory_space<vmem>>, vector<1x1x256xf32>
    %27 = vector.shape_cast %26 : vector<1x1x256xf32> to vector<1x256xf32>
    %28 = vector.broadcast %27 : vector<1x256xf32> to vector<8x256xf32>
    %29 = arith.mulf %25, %28 : vector<8x256xf32>
    %30 = arith.addf %22, %29 : vector<8x256xf32>
    %c0_23 = arith.constant 0 : index
    %c0_24 = arith.constant 0 : index
    %c5 = arith.constant 5 : index
    %c0_25 = arith.constant 0 : index
    %31 = vector.load %arg2[%c0_23, %c0_24, %c5, %c0_25] : memref<1x1x20x256xbf16, #tpu.memory_space<vmem>>, vector<1x1x8x256xbf16>
    %32 = vector.shape_cast %31 : vector<1x1x8x256xbf16> to vector<8x256xbf16>
    %33 = arith.extf %32 : vector<8x256xbf16> to vector<8x256xf32>
    %c4_26 = arith.constant 4 : index
    %c0_27 = arith.constant 0 : index
    %c0_28 = arith.constant 0 : index
    %34 = vector.load %arg3[%c4_26, %c0_27, %c0_28] : memref<9x1x256xf32, #tpu.memory_space<vmem>>, vector<1x1x256xf32>
    %35 = vector.shape_cast %34 : vector<1x1x256xf32> to vector<1x256xf32>
    %36 = vector.broadcast %35 : vector<1x256xf32> to vector<8x256xf32>
    %37 = arith.mulf %33, %36 : vector<8x256xf32>
    %38 = arith.addf %30, %37 : vector<8x256xf32>
    %c0_29 = arith.constant 0 : index
    %c0_30 = arith.constant 0 : index
    %c6 = arith.constant 6 : index
    %c0_31 = arith.constant 0 : index
    %39 = vector.load %arg2[%c0_29, %c0_30, %c6, %c0_31] : memref<1x1x20x256xbf16, #tpu.memory_space<vmem>>, vector<1x1x8x256xbf16>
    %40 = vector.shape_cast %39 : vector<1x1x8x256xbf16> to vector<8x256xbf16>
    %41 = arith.extf %40 : vector<8x256xbf16> to vector<8x256xf32>
    %c5_32 = arith.constant 5 : index
    %c0_33 = arith.constant 0 : index
    %c0_34 = arith.constant 0 : index
    %42 = vector.load %arg3[%c5_32, %c0_33, %c0_34] : memref<9x1x256xf32, #tpu.memory_space<vmem>>, vector<1x1x256xf32>
    %43 = vector.shape_cast %42 : vector<1x1x256xf32> to vector<1x256xf32>
    %44 = vector.broadcast %43 : vector<1x256xf32> to vector<8x256xf32>
    %45 = arith.mulf %41, %44 : vector<8x256xf32>
    %46 = arith.addf %38, %45 : vector<8x256xf32>
    %c0_35 = arith.constant 0 : index
    %c0_36 = arith.constant 0 : index
    %c8 = arith.constant 8 : index
    %c0_37 = arith.constant 0 : index
    %47 = vector.load %arg2[%c0_35, %c0_36, %c8, %c0_37] : memref<1x1x20x256xbf16, #tpu.memory_space<vmem>>, vector<1x1x8x256xbf16>
    %48 = vector.shape_cast %47 : vector<1x1x8x256xbf16> to vector<8x256xbf16>
    %49 = arith.extf %48 : vector<8x256xbf16> to vector<8x256xf32>
    %c6_38 = arith.constant 6 : index
    %c0_39 = arith.constant 0 : index
    %c0_40 = arith.constant 0 : index
    %50 = vector.load %arg3[%c6_38, %c0_39, %c0_40] : memref<9x1x256xf32, #tpu.memory_space<vmem>>, vector<1x1x256xf32>
    %51 = vector.shape_cast %50 : vector<1x1x256xf32> to vector<1x256xf32>
    %52 = vector.broadcast %51 : vector<1x256xf32> to vector<8x256xf32>
    %53 = arith.mulf %49, %52 : vector<8x256xf32>
    %54 = arith.addf %46, %53 : vector<8x256xf32>
    %c0_41 = arith.constant 0 : index
    %c0_42 = arith.constant 0 : index
    %c9 = arith.constant 9 : index
    %c0_43 = arith.constant 0 : index
    %55 = vector.load %arg2[%c0_41, %c0_42, %c9, %c0_43] : memref<1x1x20x256xbf16, #tpu.memory_space<vmem>>, vector<1x1x8x256xbf16>
    %56 = vector.shape_cast %55 : vector<1x1x8x256xbf16> to vector<8x256xbf16>
    %57 = arith.extf %56 : vector<8x256xbf16> to vector<8x256xf32>
    %c7 = arith.constant 7 : index
    %c0_44 = arith.constant 0 : index
    %c0_45 = arith.constant 0 : index
    %58 = vector.load %arg3[%c7, %c0_44, %c0_45] : memref<9x1x256xf32, #tpu.memory_space<vmem>>, vector<1x1x256xf32>
    %59 = vector.shape_cast %58 : vector<1x1x256xf32> to vector<1x256xf32>
    %60 = vector.broadcast %59 : vector<1x256xf32> to vector<8x256xf32>
    %61 = arith.mulf %57, %60 : vector<8x256xf32>
    %62 = arith.addf %54, %61 : vector<8x256xf32>
    %c0_46 = arith.constant 0 : index
    %c0_47 = arith.constant 0 : index
    %c10 = arith.constant 10 : index
    %c0_48 = arith.constant 0 : index
    %63 = vector.load %arg2[%c0_46, %c0_47, %c10, %c0_48] : memref<1x1x20x256xbf16, #tpu.memory_space<vmem>>, vector<1x1x8x256xbf16>
    %64 = vector.shape_cast %63 : vector<1x1x8x256xbf16> to vector<8x256xbf16>
    %65 = arith.extf %64 : vector<8x256xbf16> to vector<8x256xf32>
    %c8_49 = arith.constant 8 : index
    %c0_50 = arith.constant 0 : index
    %c0_51 = arith.constant 0 : index
    %66 = vector.load %arg3[%c8_49, %c0_50, %c0_51] : memref<9x1x256xf32, #tpu.memory_space<vmem>>, vector<1x1x256xf32>
    %67 = vector.shape_cast %66 : vector<1x1x256xf32> to vector<1x256xf32>
    %68 = vector.broadcast %67 : vector<1x256xf32> to vector<8x256xf32>
    %69 = arith.mulf %65, %68 : vector<8x256xf32>
    %70 = arith.addf %62, %69 : vector<8x256xf32>
    %c0_52 = arith.constant 0 : index
    %c0_53 = arith.constant 0 : index
    %71 = vector.load %arg4[%c0_52, %c0_53] : memref<1x256xf32, #tpu.memory_space<vmem>>, vector<1x256xf32>
    %72 = vector.broadcast %71 : vector<1x256xf32> to vector<8x256xf32>
    %73 = arith.addf %70, %72 : vector<8x256xf32>
    %74 = arith.negf %73 : vector<8x256xf32>
    %75 = math.exp %74 : vector<8x256xf32>
    %cst = arith.constant 1.000000e+00 : f32
    %76 = vector.broadcast %cst : f32 to vector<8x256xf32>
    %77 = arith.addf %76, %75 : vector<8x256xf32>
    %78 = arith.divf %76, %77 : vector<8x256xf32>
    %79 = arith.mulf %73, %78 : vector<8x256xf32>
    %80 = arith.truncf %79 : vector<8x256xf32> to vector<8x256xbf16>
    %c0_54 = arith.constant 0 : index
    %c0_55 = arith.constant 0 : index
    %c0_56 = arith.constant 0 : index
    %81 = vector.load %arg5[%c0_54, %c0_55, %c0_56] : memref<1x8x256xbf16, #tpu.memory_space<vmem>>, vector<1x8x256xbf16>
    %82 = vector.shape_cast %81 : vector<1x8x256xbf16> to vector<8x256xbf16>
    %83 = vector.shape_cast %80 : vector<8x256xbf16> to vector<1x8x256xbf16>
    tpu.vector_store %arg5[%c0_54, %c0_55, %c0_56], %83 {strides = array<i32>} : memref<1x8x256xbf16, #tpu.memory_space<vmem>>, vector<1x8x256xbf16>,
    %84 = tpu.iota {dimensions = array<i32: 0>} : vector<8x1xi32>
    %c4_i32 = arith.constant 4 : i32
    %c0_i32 = arith.constant 0 : i32
    %85 = arith.cmpi eq, %c4_i32, %c0_i32 : i32
    %c1_i32 = arith.constant 1 : i32
    %86 = arith.select %85, %c1_i32, %c4_i32 : i32
    %87 = vector.broadcast %86 : i32 to vector<8x1xi32>
    %88 = arith.remsi %84, %87 : vector<8x1xi32>
    %c0_i32_57 = arith.constant 0 : i32
    %89 = vector.broadcast %c0_i32_57 : i32 to vector<8x1xi32>
    %90 = arith.cmpi ne, %88, %89 : vector<8x1xi32>
    %c0_i32_58 = arith.constant 0 : i32
    %91 = vector.broadcast %c0_i32_58 : i32 to vector<8x1xi32>
    %92 = arith.cmpi slt, %88, %91 : vector<8x1xi32>
    %c0_i32_59 = arith.constant 0 : i32
    %93 = arith.cmpi slt, %86, %c0_i32_59 : i32
    %94 = vector.broadcast %93 : i1 to vector<8x1xi1>
    %95 = vector.broadcast %94 : vector<8x1xi1> to vector<8x1xi1>
    %96 = arith.xori %92, %95 : vector<8x1xi1>
    %97 = arith.andi %96, %90 : vector<8x1xi1>
    %98 = vector.broadcast %86 : i32 to vector<8x1xi32>
    %99 = arith.addi %88, %98 : vector<8x1xi32>
    %100 = arith.select %97, %99, %88 : vector<8x1xi1>, vector<8x1xi32>
    %c2_i32 = arith.constant 2 : i32
    %101 = vector.broadcast %c2_i32 : i32 to vector<8x1xi32>
    %102 = arith.cmpi slt, %100, %101 : vector<8x1xi32>
    %cst_60 = arith.constant 0.000000e+00 : f32
    %103 = vector.shape_cast %102 : vector<8x1xi1> to vector<8x1xi1>
    %104 = vector.broadcast %103 : vector<8x1xi1> to vector<8x256xi1>
    %105 = vector.broadcast %cst_60 : f32 to vector<8x256xf32>
    %106 = arith.select %104, %79, %105 : vector<8x256xi1>, vector<8x256xf32>
    %cst_61 = arith.constant dense<0.000000e+00> : vector<256xf32>
    %107 = vector.multi_reduction <add>, %106, %cst_61 [0] : vector<8x256xf32> to vector<256xf32>
    %108 = vector.shape_cast %107 : vector<256xf32> to vector<1x256xf32>
    %c0_62 = arith.constant 0 : index
    %c0_63 = arith.constant 0 : index
    %c0_64 = arith.constant 0 : index
    %109 = vector.load %arg6[%c0_62, %c0_63, %c0_64] : memref<1x1x256xf32, #tpu.memory_space<vmem>>, vector<1x1x256xf32>
    %110 = vector.shape_cast %109 : vector<1x1x256xf32> to vector<1x256xf32>
    %111 = vector.shape_cast %108 : vector<1x256xf32> to vector<1x1x256xf32>
    tpu.vector_store %arg6[%c0_62, %c0_63, %c0_64], %111 {strides = array<i32>} : memref<1x1x256xf32, #tpu.memory_space<vmem>>, vector<1x1x256xf32>,
    return
  }
  func.func @transform_0(%arg0: i32, %arg1: i32) -> (i32, i32, i32, i32) {
    %c0_i32 = arith.constant 0 : i32
    %c0_i32_0 = arith.constant 0 : i32
    %c0_i32_1 = arith.constant 0 : i32
    return %arg0, %c0_i32, %c0_i32_0, %arg1 : i32, i32, i32, i32
  }
  func.func @transform_1(%arg0: i32, %arg1: i32) -> (i32, i32, i32) {
    %c0_i32 = arith.constant 0 : i32
    %c0_i32_0 = arith.constant 0 : i32
    %c0_i32_1 = arith.constant 0 : i32
    return %c0_i32, %c0_i32_0, %arg1 : i32, i32, i32
  }
  func.func @transform_2(%arg0: i32, %arg1: i32) -> (i32, i32) {
    %c0_i32 = arith.constant 0 : i32
    %c0_i32_0 = arith.constant 0 : i32
    return %c0_i32, %arg1 : i32, i32
  }
  func.func @transform_3(%arg0: i32, %arg1: i32) -> (i32, i32, i32) {
    %c0_i32 = arith.constant 0 : i32
    %c0_i32_0 = arith.constant 0 : i32
    return %arg0, %c0_i32, %arg1 : i32, i32, i32
  }
  func.func @transform_4(%arg0: i32, %arg1: i32) -> (i32, i32, i32) {
    %c0_i32 = arith.constant 0 : i32
    %c0_i32_0 = arith.constant 0 : i32
    return %arg0, %c0_i32, %arg1 : i32, i32, i32
  }
}

module attributes {stable_mosaic.version = 11 : i64} {
  func.func @_se_fc_kernel(%arg0: memref<2x1x256xf32, #tpu.memory_space<vmem>>, %arg1: memref<256x128xf32, #tpu.memory_space<vmem>>, %arg2: memref<1x128xf32, #tpu.memory_space<vmem>>, %arg3: memref<128x256xf32, #tpu.memory_space<vmem>>, %arg4: memref<1x256xf32, #tpu.memory_space<vmem>>, %arg5: memref<2x1x256xf32, #tpu.memory_space<vmem>>) attributes {dimension_semantics = [], scalar_prefetch = 0 : i64, scratch_operands = 0 : i64, tpu.core_type = #tpu.core_type<tc>} {
    %c0 = arith.constant 0 : index
    %c0_0 = arith.constant 0 : index
    %c0_1 = arith.constant 0 : index
    %0 = vector.load %arg0[%c0, %c0_0, %c0_1] : memref<2x1x256xf32, #tpu.memory_space<vmem>>, vector<2x1x256xf32>
    %1 = vector.shape_cast %0 : vector<2x1x256xf32> to vector<2x256xf32>
    %cst = arith.constant 2.500000e-01 : f32
    %2 = vector.broadcast %cst : f32 to vector<2x256xf32>
    %3 = arith.mulf %1, %2 : vector<2x256xf32>
    %c0_2 = arith.constant 0 : index
    %c0_3 = arith.constant 0 : index
    %4 = vector.load %arg1[%c0_2, %c0_3] : memref<256x128xf32, #tpu.memory_space<vmem>>, vector<256x128xf32>
    %cst_4 = arith.constant dense<0.000000e+00> : vector<2x128xf32>
    %5 = tpu.matmul %3, %4, %cst_4 {dimension_numbers = #tpu.dot_dimension_numbers<[1], [0], [0], [1], [0, 0, 1, 1], [], []>} : vector<2x256xf32>, vector<256x128xf32>, vector<2x128xf32> -> vector<2x128xf32>
    %c0_5 = arith.constant 0 : index
    %c0_6 = arith.constant 0 : index
    %6 = vector.load %arg2[%c0_5, %c0_6] : memref<1x128xf32, #tpu.memory_space<vmem>>, vector<1x128xf32>
    %7 = vector.broadcast %6 : vector<1x128xf32> to vector<2x128xf32>
    %8 = arith.addf %5, %7 : vector<2x128xf32>
    %9 = arith.negf %8 : vector<2x128xf32>
    %10 = math.exp %9 : vector<2x128xf32>
    %cst_7 = arith.constant 1.000000e+00 : f32
    %11 = vector.broadcast %cst_7 : f32 to vector<2x128xf32>
    %12 = arith.addf %11, %10 : vector<2x128xf32>
    %13 = arith.divf %11, %12 : vector<2x128xf32>
    %14 = arith.mulf %8, %13 : vector<2x128xf32>
    %c0_8 = arith.constant 0 : index
    %c0_9 = arith.constant 0 : index
    %15 = vector.load %arg3[%c0_8, %c0_9] : memref<128x256xf32, #tpu.memory_space<vmem>>, vector<128x256xf32>
    %cst_10 = arith.constant dense<0.000000e+00> : vector<2x256xf32>
    %16 = tpu.matmul %14, %15, %cst_10 {dimension_numbers = #tpu.dot_dimension_numbers<[1], [0], [0], [1], [0, 0, 1, 1], [], []>} : vector<2x128xf32>, vector<128x256xf32>, vector<2x256xf32> -> vector<2x256xf32>
    %c0_11 = arith.constant 0 : index
    %c0_12 = arith.constant 0 : index
    %17 = vector.load %arg4[%c0_11, %c0_12] : memref<1x256xf32, #tpu.memory_space<vmem>>, vector<1x256xf32>
    %18 = vector.broadcast %17 : vector<1x256xf32> to vector<2x256xf32>
    %19 = arith.addf %16, %18 : vector<2x256xf32>
    %20 = arith.negf %19 : vector<2x256xf32>
    %21 = math.exp %20 : vector<2x256xf32>
    %cst_13 = arith.constant 1.000000e+00 : f32
    %22 = vector.broadcast %cst_13 : f32 to vector<2x256xf32>
    %23 = arith.addf %22, %21 : vector<2x256xf32>
    %24 = arith.divf %22, %23 : vector<2x256xf32>
    %25 = vector.shape_cast %24 : vector<2x256xf32> to vector<2x1x256xf32>
    %c0_14 = arith.constant 0 : index
    %c0_15 = arith.constant 0 : index
    %c0_16 = arith.constant 0 : index
    %26 = vector.load %arg5[%c0_14, %c0_15, %c0_16] : memref<2x1x256xf32, #tpu.memory_space<vmem>>, vector<2x1x256xf32>
    tpu.vector_store %arg5[%c0_14, %c0_15, %c0_16], %25 {strides = array<i32>} : memref<2x1x256xf32, #tpu.memory_space<vmem>>, vector<2x1x256xf32>,
    return
  }
}

module attributes {stable_mosaic.version = 11 : i64} {
  func.func @_mm_kernel(%arg0: i32, %arg1: i32, %arg2: i32, %arg3: memref<8x256xbf16, #tpu.memory_space<vmem>>, %arg4: memref<256x128xbf16, #tpu.memory_space<vmem>>, %arg5: memref<1x128xf32, #tpu.memory_space<vmem>>, %arg6: memref<8x256xbf16, #tpu.memory_space<vmem>>, %arg7: memref<8x128xbf16, #tpu.memory_space<vmem>>, %arg8: memref<8x128xbf16, #tpu.memory_space<vmem>>) attributes {dimension_semantics = [#tpu.dimension_semantics<parallel>, #tpu.dimension_semantics<parallel>, #tpu.dimension_semantics<arbitrary>], iteration_bounds = array<i64: 1, 1, 1>, scalar_prefetch = 0 : i64, scratch_operands = 0 : i64, tpu.core_type = #tpu.core_type<tc>, window_params = [{transform_indices = @transform_0, window_bounds = array<i64: 8, 256>}, {transform_indices = @transform_1, window_bounds = array<i64: 256, 128>}, {transform_indices = @transform_2, window_bounds = array<i64: 1, 128>}, {transform_indices = @transform_3, window_bounds = array<i64: 8, 256>}, {transform_indices = @transform_4, window_bounds = array<i64: 8, 128>}, {transform_indices = @transform_5, window_bounds = array<i64: 8, 128>}]} {
    %c0 = arith.constant 0 : index
    %c0_0 = arith.constant 0 : index
    %0 = vector.load %arg3[%c0, %c0_0] : memref<8x256xbf16, #tpu.memory_space<vmem>>, vector<8x256xbf16>
    %c0_1 = arith.constant 0 : index
    %c0_2 = arith.constant 0 : index
    %1 = vector.load %arg6[%c0_1, %c0_2] : memref<8x256xbf16, #tpu.memory_space<vmem>>, vector<8x256xbf16>
    %2 = arith.mulf %0, %1 : vector<8x256xbf16>
    %c0_3 = arith.constant 0 : index
    %c0_4 = arith.constant 0 : index
    %3 = vector.load %arg4[%c0_3, %c0_4] : memref<256x128xbf16, #tpu.memory_space<vmem>>, vector<256x128xbf16>
    %cst = arith.constant dense<0.000000e+00> : vector<8x128xf32>
    %4 = tpu.matmul %2, %3, %cst {dimension_numbers = #tpu.dot_dimension_numbers<[1], [0], [0], [1], [0, 0, 1, 1], [], []>} : vector<8x256xbf16>, vector<256x128xbf16>, vector<8x128xf32> -> vector<8x128xf32>
    %c0_5 = arith.constant 0 : index
    %c0_6 = arith.constant 0 : index
    %5 = vector.load %arg5[%c0_5, %c0_6] : memref<1x128xf32, #tpu.memory_space<vmem>>, vector<1x128xf32>
    %6 = vector.broadcast %5 : vector<1x128xf32> to vector<8x128xf32>
    %7 = arith.addf %4, %6 : vector<8x128xf32>
    %c0_7 = arith.constant 0 : index
    %c0_8 = arith.constant 0 : index
    %8 = vector.load %arg7[%c0_7, %c0_8] : memref<8x128xbf16, #tpu.memory_space<vmem>>, vector<8x128xbf16>
    %9 = arith.extf %8 : vector<8x128xbf16> to vector<8x128xf32>
    %10 = arith.addf %7, %9 : vector<8x128xf32>
    %11 = arith.truncf %10 : vector<8x128xf32> to vector<8x128xbf16>
    %c0_9 = arith.constant 0 : index
    %c0_10 = arith.constant 0 : index
    %12 = vector.load %arg8[%c0_9, %c0_10] : memref<8x128xbf16, #tpu.memory_space<vmem>>, vector<8x128xbf16>
    tpu.vector_store %arg8[%c0_9, %c0_10], %11 {strides = array<i32>} : memref<8x128xbf16, #tpu.memory_space<vmem>>, vector<8x128xbf16>,
    return
  }
  func.func @transform_0(%arg0: i32, %arg1: i32, %arg2: i32) -> (i32, i32) {
    %c0_i32 = arith.constant 0 : i32
    return %arg0, %arg2 : i32, i32
  }
  func.func @transform_1(%arg0: i32, %arg1: i32, %arg2: i32) -> (i32, i32) {
    %c0_i32 = arith.constant 0 : i32
    return %arg2, %arg1 : i32, i32
  }
  func.func @transform_2(%arg0: i32, %arg1: i32, %arg2: i32) -> (i32, i32) {
    %c0_i32 = arith.constant 0 : i32
    %c0_i32_0 = arith.constant 0 : i32
    return %c0_i32, %arg1 : i32, i32
  }
  func.func @transform_3(%arg0: i32, %arg1: i32, %arg2: i32) -> (i32, i32) {
    %c0_i32 = arith.constant 0 : i32
    return %arg0, %arg2 : i32, i32
  }
  func.func @transform_4(%arg0: i32, %arg1: i32, %arg2: i32) -> (i32, i32) {
    %c0_i32 = arith.constant 0 : i32
    return %arg0, %arg1 : i32, i32
  }
  func.func @transform_5(%arg0: i32, %arg1: i32, %arg2: i32) -> (i32, i32) {
    %c0_i32 = arith.constant 0 : i32
    return %arg0, %arg1 : i32, i32
  }
}

module attributes {stable_mosaic.version = 11 : i64} {
  func.func @_mm_kernel(%arg0: i32, %arg1: i32, %arg2: i32, %arg3: memref<8x128xbf16, #tpu.memory_space<vmem>>, %arg4: memref<128x256xbf16, #tpu.memory_space<vmem>>, %arg5: memref<1x256xf32, #tpu.memory_space<vmem>>, %arg6: memref<8x256xbf16, #tpu.memory_space<vmem>>) attributes {dimension_semantics = [#tpu.dimension_semantics<parallel>, #tpu.dimension_semantics<parallel>, #tpu.dimension_semantics<arbitrary>], iteration_bounds = array<i64: 1, 7, 1>, scalar_prefetch = 0 : i64, scratch_operands = 0 : i64, tpu.core_type = #tpu.core_type<tc>, window_params = [{transform_indices = @transform_0, window_bounds = array<i64: 8, 128>}, {transform_indices = @transform_1, window_bounds = array<i64: 128, 256>}, {transform_indices = @transform_2, window_bounds = array<i64: 1, 256>}, {transform_indices = @transform_3, window_bounds = array<i64: 8, 256>}]} {
    %c0 = arith.constant 0 : index
    %c0_0 = arith.constant 0 : index
    %0 = vector.load %arg3[%c0, %c0_0] : memref<8x128xbf16, #tpu.memory_space<vmem>>, vector<8x128xbf16>
    %c0_1 = arith.constant 0 : index
    %c0_2 = arith.constant 0 : index
    %1 = vector.load %arg4[%c0_1, %c0_2] : memref<128x256xbf16, #tpu.memory_space<vmem>>, vector<128x256xbf16>
    %cst = arith.constant dense<0.000000e+00> : vector<8x256xf32>
    %2 = tpu.matmul %0, %1, %cst {dimension_numbers = #tpu.dot_dimension_numbers<[1], [0], [0], [1], [0, 0, 1, 1], [], []>} : vector<8x128xbf16>, vector<128x256xbf16>, vector<8x256xf32> -> vector<8x256xf32>
    %c0_3 = arith.constant 0 : index
    %c0_4 = arith.constant 0 : index
    %3 = vector.load %arg5[%c0_3, %c0_4] : memref<1x256xf32, #tpu.memory_space<vmem>>, vector<1x256xf32>
    %4 = vector.broadcast %3 : vector<1x256xf32> to vector<8x256xf32>
    %5 = arith.addf %2, %4 : vector<8x256xf32>
    %6 = arith.negf %5 : vector<8x256xf32>
    %7 = math.exp %6 : vector<8x256xf32>
    %cst_5 = arith.constant 1.000000e+00 : f32
    %8 = vector.broadcast %cst_5 : f32 to vector<8x256xf32>
    %9 = arith.addf %8, %7 : vector<8x256xf32>
    %10 = arith.divf %8, %9 : vector<8x256xf32>
    %11 = arith.mulf %5, %10 : vector<8x256xf32>
    %12 = arith.truncf %11 : vector<8x256xf32> to vector<8x256xbf16>
    %c0_6 = arith.constant 0 : index
    %c0_7 = arith.constant 0 : index
    %13 = vector.load %arg6[%c0_6, %c0_7] : memref<8x256xbf16, #tpu.memory_space<vmem>>, vector<8x256xbf16>
    tpu.vector_store %arg6[%c0_6, %c0_7], %12 {strides = array<i32>} : memref<8x256xbf16, #tpu.memory_space<vmem>>, vector<8x256xbf16>,
    return
  }
  func.func @transform_0(%arg0: i32, %arg1: i32, %arg2: i32) -> (i32, i32) {
    %c0_i32 = arith.constant 0 : i32
    return %arg0, %arg2 : i32, i32
  }
  func.func @transform_1(%arg0: i32, %arg1: i32, %arg2: i32) -> (i32, i32) {
    %c0_i32 = arith.constant 0 : i32
    return %arg2, %arg1 : i32, i32
  }
  func.func @transform_2(%arg0: i32, %arg1: i32, %arg2: i32) -> (i32, i32) {
    %c0_i32 = arith.constant 0 : i32
    %c0_i32_0 = arith.constant 0 : i32
    return %c0_i32, %arg1 : i32, i32
  }
  func.func @transform_3(%arg0: i32, %arg1: i32, %arg2: i32) -> (i32, i32) {
    %c0_i32 = arith.constant 0 : i32
    return %arg0, %arg1 : i32, i32
  }
}

module attributes {stable_mosaic.version = 11 : i64} {
  func.func @_head_kernel(%arg0: memref<2x4x1792xbf16, #tpu.memory_space<vmem>>, %arg1: memref<1792x128xf32, #tpu.memory_space<vmem>>, %arg2: memref<1x128xf32, #tpu.memory_space<vmem>>, %arg3: memref<2x128xf32, #tpu.memory_space<vmem>>) attributes {dimension_semantics = [], scalar_prefetch = 0 : i64, scratch_operands = 0 : i64, tpu.core_type = #tpu.core_type<tc>} {
    %c0 = arith.constant 0 : index
    %c0_0 = arith.constant 0 : index
    %c0_1 = arith.constant 0 : index
    %0 = vector.load %arg0[%c0, %c0_0, %c0_1] : memref<2x4x1792xbf16, #tpu.memory_space<vmem>>, vector<2x4x1792xbf16>
    %1 = arith.extf %0 : vector<2x4x1792xbf16> to vector<2x4x1792xf32>
    %cst = arith.constant dense<0.000000e+00> : vector<2x1792xf32>
    %2 = vector.multi_reduction <add>, %1, %cst [1] : vector<2x4x1792xf32> to vector<2x1792xf32>
    %cst_2 = arith.constant 2.500000e-01 : f32
    %3 = vector.broadcast %cst_2 : f32 to vector<2x1792xf32>
    %4 = arith.mulf %2, %3 : vector<2x1792xf32>
    %c0_3 = arith.constant 0 : index
    %c0_4 = arith.constant 0 : index
    %5 = vector.load %arg1[%c0_3, %c0_4] : memref<1792x128xf32, #tpu.memory_space<vmem>>, vector<1792x128xf32>
    %cst_5 = arith.constant dense<0.000000e+00> : vector<2x128xf32>
    %6 = tpu.matmul %4, %5, %cst_5 {dimension_numbers = #tpu.dot_dimension_numbers<[1], [0], [0], [1], [0, 0, 1, 1], [], []>} : vector<2x1792xf32>, vector<1792x128xf32>, vector<2x128xf32> -> vector<2x128xf32>
    %c0_6 = arith.constant 0 : index
    %c0_7 = arith.constant 0 : index
    %7 = vector.load %arg2[%c0_6, %c0_7] : memref<1x128xf32, #tpu.memory_space<vmem>>, vector<1x128xf32>
    %8 = vector.broadcast %7 : vector<1x128xf32> to vector<2x128xf32>
    %9 = arith.addf %6, %8 : vector<2x128xf32>
    %c0_8 = arith.constant 0 : index
    %c0_9 = arith.constant 0 : index
    %10 = vector.load %arg3[%c0_8, %c0_9] : memref<2x128xf32, #tpu.memory_space<vmem>>, vector<2x128xf32>
    tpu.vector_store %arg3[%c0_8, %c0_9], %9 {strides = array<i32>} : memref<2x128xf32, #tpu.memory_space<vmem>>, vector<2x128xf32>,
    return
  }
}

</mosaic_0001>

<bundles_post_ra>
// kernel: _lambda_.17
= control target key start
LH: loop header
LB: loop body
LE: loop exit
PB: predicated region body
PF: predicated region fallthrough
CT: control target
= control target key end

     0   :  { %s901_s15 = smov 0   ;;  %s903_s16 = smov 0   ;;  %s975_s0 = inlined_call_operand.vmem [shape: bf16[128,128], index: 0, kind: input, shape index: {}]   ;;  %s976_s1 = inlined_call_operand.vmem [shape: bf16[128,128], index: 1, kind: input, shape index: {}]   ;;  %s977_s2 = inlined_call_operand.vmem [shape: f32[1,128], index: 2, kind: input, shape index: {}]   ;;  %s978_s3 = inlined_call_operand.vmem [shape: bf16[128,128], index: 3, kind: input, shape index: {}]   ;;  %s979_s4 = inlined_call_operand.vmem [shape: bf16[128,128], index: 4, kind: output, shape index: {}]  }
   0x1   :  { %s905_s17 = smov 0  }
   0x2 LB: > { %s33_s18 = sadd.s32 1, %s870_s16  ;;  %p684_p0 = scmp.ge.s32.totalorder %s874_s17, 1  ;;  %s874_s17 = sphi %s905_s17, %s14_s17   ;;  %s870_s16 = sphi %s903_s16, %s981_s16   ;;  %s866_s15 = sphi %s901_s15, %s980_s15  }
   0x3   : > { %p35_p1 = scmp.ge.s32.totalorder %s33_s18, 2  ;;  %p229_p2 = scmp.lt.s32.totalorder %s874_s17, 3 }
   0x5   : > { %s983_s18 = smov (%p35_p1, %s33_s18), 0  ;;  %p230_p3 = pnand %p684_p0, %p229_p2 }
   0x6   : > { %s685_s21 = sshll.u32 (!%p230_p3), %s866_s15, 3 }
   0x7   : > { %233 = sbr.rel (%p230_p3) target bundleno = 251 (0xfb), region = 36  ;;  %p281_p4 = scmp.lt.s32.totalorder (!%p230_p3), %s685_s21, 15 }
   0xc   : > { %v840_v0 = vld [vmem:[%s976_s1 + $0x38] sm:$0xff]   ;;  %v841_v1 = vld [vmem:[%s976_s1 + $0x30] sm:$0xff]   ;;  %s985_s21 = smov (!%p281_p4, %s685_s21), 15  ;;  %v842_v2 = vld [vmem:[%s976_s1 + $0x28] sm:$0xff]  }
   0xd   : > { %776 = vmatprep.subr.bf16.mxu0 %v840_v0  ;;  %800 = vmatprep.subr.bf16.mxu1 %v840_v0  ;;  %s928_s26 = sshll.u32 %s985_s21, 2  ;;  %v843_v3 = vld [vmem:[%s976_s1 + $0x20] sm:$0xff]   ;;  %v844_v6 = vld [vmem:[%s976_s1 + $0x18] sm:$0xff]   ;;  %v845_v7 = vld [vmem:[%s976_s1 + $0x10] sm:$0xff]  }
   0xe   : > { %777 = vmatpush3.bf16.msra.mxu0 %v840_v0  ;;  %808 = vmatpush3.bf16.msra.mxu1 %v840_v0  ;;  %s934_s29 = scalar_lea.vmem %s975_s0, %s928_s26  ;;  %v846_v8 = vld [vmem:[%s976_s1 + $0x8] sm:$0xff]   ;;  %v847_v9 = vld [vmem:[%s976_s1] sm:$0xff]   ;;  %s308_s19 = scalar_lea.vmem %s978_s3, %s928_s26 }
   0xf   : > { %778 = vmatprep.subr.bf16.mxu0 %v841_v1  ;;  %801 = vmatprep.subr.bf16.mxu1 %v841_v1  ;;  %v848_v4 = vld [vmem:[%s934_s29] sm:$0xff]   ;;  %v849_v5 = vld [vmem:[%s934_s29 + $0x10] sm:$0xff]   ;;  %v850_v10 = vld [vmem:[%s934_s29 + $0x8] sm:$0xff]   ;;  %s317_s24 = scalar_lea.vmem %s979_s4, %s928_s26 }
  0x10   : > { %792 = vmatprep.mubr.bf16.mxu0 %v848_v4  ;;  %796 = vmatprep.mubr.bf16.mxu1 %v849_v5  ;;  %v851_v11 = vld [vmem:[%s934_s29 + $0x18] sm:$0xff]   ;;  %v691_v12 = vld [vmem:[%s977_s2] ss:$0 sm:$0xff]  ;;  %v758_v13 = vld [vmem:[%s308_s19 + $0x8] sm:$0xff]  }
  0x11   : > { %v760_v14 = vld [vmem:[%s308_s19 + $0x18] sm:$0xff]   ;;  %v723_v17 = vld [vmem:[%s308_s19] sm:$0xff]   ;;  %v759_v18 = vld [vmem:[%s308_s19 + $0x10] sm:$0xff]   ;;  %v728_v20 = vunpack.c.l.bf16 %v758_v13  ;;  %v729_v25 = vunpack.c.h.bf16 %v758_v13 }
  0x12   : > { %779 = vmatpush3.bf16.msra.mxu0 %v841_v1  ;;  %809 = vmatpush3.bf16.msra.mxu1 %v841_v1  ;;  %v736_v22 = vunpack.c.l.bf16 %v760_v14  ;;  %v737_v26 = vunpack.c.h.bf16 %v760_v14  ;;  %v724_v28 = vunpack.c.l.bf16 %v723_v17  ;;  %v732_v30 = vunpack.c.l.bf16 %v759_v18 }
  0x13   : > { %780 = vmatprep.subr.bf16.mxu0 %v842_v2  ;;  %802 = vmatprep.subr.bf16.mxu1 %v842_v2  ;;  %v725_v35 = vunpack.c.h.bf16 %v723_v17  ;;  %v733_v36 = vunpack.c.h.bf16 %v759_v18 }
  0x16   : > { %781 = vmatpush3.bf16.msra.mxu0 %v842_v2  ;;  %810 = vmatpush3.bf16.msra.mxu1 %v842_v2 }
  0x17   : > { %782 = vmatprep.subr.bf16.mxu0 %v843_v3  ;;  %803 = vmatprep.subr.bf16.mxu1 %v843_v3 }
  0x1a   : > { %783 = vmatpush3.bf16.msra.mxu0 %v843_v3  ;;  %811 = vmatpush3.bf16.msra.mxu1 %v843_v3 }
  0x1b   : > { %784 = vmatprep.subr.bf16.mxu0 %v844_v6  ;;  %804 = vmatprep.subr.bf16.mxu1 %v844_v6 }
  0x1e   : > { %785 = vmatpush3.bf16.msra.mxu0 %v844_v6  ;;  %812 = vmatpush3.bf16.msra.mxu1 %v844_v6 }
  0x1f   : > { %786 = vmatprep.subr.bf16.mxu0 %v845_v7  ;;  %805 = vmatprep.subr.bf16.mxu1 %v845_v7 }
  0x22   : > { %787 = vmatpush3.bf16.msra.mxu0 %v845_v7  ;;  %813 = vmatpush3.bf16.msra.mxu1 %v845_v7 }
  0x23   : > { %788 = vmatprep.subr.bf16.mxu0 %v846_v8  ;;  %806 = vmatprep.subr.bf16.mxu1 %v846_v8 }
  0x26   : > { %789 = vmatpush3.bf16.msra.mxu0 %v846_v8  ;;  %814 = vmatpush3.bf16.msra.mxu1 %v846_v8 }
  0x27   : > { %790 = vmatprep.subr.bf16.mxu0 %v847_v9  ;;  %807 = vmatprep.subr.bf16.mxu1 %v847_v9 }
  0x2a   : > { %791 = vmatpush3.bf16.msra.mxu0 %v847_v9  ;;  %815 = vmatpush3.bf16.msra.mxu1 %v847_v9 }
  0x2d   : > { %793 = vmatmul.mubr.bf16.vlgmr.msra.gmra.mxu0 %v850_v10  ;;  %797 = vmatmul.mubr.bf16.vlgmr.msra.gmra.mxu1 %v851_v11 }
  0xed   : > { %v794_v15 = vpop.f32.mrf.mxu0  ;;  %v798_v16 = vpop.f32.mrf.mxu1 }
  0xee   : > { %v466_v19 = vadd.f32 %v794_v15, %v691_v12  ;;  %v482_v21 = vadd.f32 %v798_v16, %v691_v12 }
  0xef   : > { %v457_v23 = vpop.f32.mrf.mxu0  ;;  %v473_v24 = vpop.f32.mrf.mxu1 }
  0xf0   : > { %v458_v27 = vadd.f32 %v691_v12, %v457_v23  ;;  %v474_v29 = vadd.f32 %v691_v12, %v473_v24  ;;  %v506_v37 = vadd.f32 %v728_v20, %v466_v19  ;;  %v510_v38 = vadd.f32 %v736_v22, %v482_v21 }
  0xf1   : > { %v795_v31 = vpop.f32.mrf.mxu0  ;;  %v799_v32 = vpop.f32.mrf.mxu1 }
  0xf2   : > { %v469_v33 = vadd.f32 %v795_v31, %v691_v12  ;;  %v485_v34 = vadd.f32 %v799_v32, %v691_v12  ;;  %v504_v45 = vadd.f32 %v724_v28, %v458_v27  ;;  %v508_v46 = vadd.f32 %v732_v30, %v474_v29 }
  0xf3   : > { %v460_v39 = vpop.f32.mrf.mxu0  ;;  %v476_v40 = vpop.f32.mrf.mxu1 }
  0xf4   : > { %v507_v41 = vadd.f32 %v729_v25, %v469_v33  ;;  %v511_v42 = vadd.f32 %v737_v26, %v485_v34  ;;  %v461_v43 = vadd.f32 %v691_v12, %v460_v39  ;;  %v477_v44 = vadd.f32 %v691_v12, %v476_v40 }
  0xf6   : > { %v746_v47 = vpack.c.bf16 %v507_v41, %v506_v37  ;;  %v756_v48 = vpack.c.bf16 %v511_v42, %v510_v38  ;;  %v505_v49 = vadd.f32 %v725_v35, %v461_v43  ;;  %v509_v50 = vadd.f32 %v733_v36, %v477_v44 }
  0xf8   : > { %761 = vst [vmem:[%s317_s24 + $0x8] sm:$0xff] %v746_v47   ;;  %763 = vst [vmem:[%s317_s24 + $0x18] sm:$0xff] %v756_v48   ;;  %v741_v51 = vpack.c.bf16 %v505_v49, %v504_v45  ;;  %v751_v52 = vpack.c.bf16 %v509_v50, %v508_v46 }
  0xfa   : > { %742 = vst [vmem:[%s317_s24] sm:$0xff] %v741_v51   ;;  %762 = vst [vmem:[%s317_s24 + $0x10] sm:$0xff] %v751_v52  }
  0xfb PF: > { %s14_s17 = sadd.s32 1, %s874_s17   ;;  %s980_s15 = smov %s870_s16 }
  0xfc   : > { %p11_p5 = scmp.ge.s32.totalorder %s14_s17, 4   ;;  %s981_s16 = smov %s983_s18 }
  0xfe   :  { %13 = sbr.rel (!%p11_p5) target bundleno = 2 (0x2), region = 75 }

// kernel: _lambda_.15
= control target key start
LH: loop header
LB: loop body
LE: loop exit
PB: predicated region body
PF: predicated region fallthrough
CT: control target
= control target key end

     0   :  { %s3265_s12 = smov 0   ;;  %s3267_s13 = smov 0   ;;  %s3863_s0 = inlined_call_operand.vmem [shape: bf16[2,4,90,128], index: 0, kind: input, shape index: {}]   ;;  %s3864_s1 = inlined_call_operand.vmem [shape: bf16[9,128,128], index: 1, kind: input, shape index: {}]   ;;  %s3865_s2 = inlined_call_operand.vmem [shape: f32[1,128], index: 2, kind: input, shape index: {}]   ;;  %s3866_s3 = inlined_call_operand.vmem [shape: bf16[2,72,128], index: 3, kind: output, shape index: {}]  }
   0x1   :  { %s3269_s14 = smov 0  }
   0x2 LB: > { %s25_s15 = sadd.s32 1, %s3237_s13  ;;  %p2241_p0 = scmp.ge.s32.totalorder %s3241_s14, 1  ;;  %s3241_s14 = sphi %s3269_s14, %s13_s14   ;;  %s3237_s13 = sphi %s3267_s13, %s3868_s13   ;;  %s3233_s12 = sphi %s3265_s12, %s3867_s12  }
   0x3   : > { %p27_p1 = scmp.ge.s32.totalorder %s25_s15, 2  ;;  %p168_p2 = scmp.lt.s32.totalorder %s3241_s14, 3 }
   0x5   : > { %s3870_s15 = smov (%p27_p1, %s25_s15), 0  ;;  %p169_p3 = pnand %p2241_p0, %p168_p2 }
   0x6   : > { %p202_p4 = scmp.lt.s32.totalorder (!%p169_p3), %s3233_s12, 1 }
   0x7   : > { %172 = sbr.rel (%p169_p3) target bundleno = 461 (0x1cd), region = 32 }
   0xc   : > { %v3070_v0 = vld [vmem:[%s3864_s1 + $0x78] sm:$0xff]   ;;  %v3243_v1 = vmov 0.0   ;;  %v3072_v3 = vld [vmem:[%s3864_s1 + $0x70] sm:$0xff]   ;;  %vm3244_vm0 = vmmov 0   ;;  %v3074_v5 = vld [vmem:[%s3864_s1 + $0x68] sm:$0xff]   ;;  %s3872_s12 = smov (!%p202_p4, %s3233_s12), 1 }
   0xd   : > { %2702 = vmatprep.subr.bf16.mxu0 %v3243_v1  ;;  %2738 = vmatprep.subr.bf16.mxu1 %v3243_v1  ;;  %v3071_v2 = vld [vmem:[%s3864_s1 + $0x38] sm:$0xff]   ;;  %v3073_v4 = vld [vmem:[%s3864_s1 + $0x30] sm:$0xff]   ;;  %v3075_v6 = vld [vmem:[%s3864_s1 + $0x28] sm:$0xff]   ;;  %s3042_s5 = smul.u32 192, %s3872_s12  ;;  %vm623_vm1 = vsmask.f32 7424 }
   0xe   : > { %2703 = vmatpush3.bf16.msra.mxu0 %v3070_v0  ;;  %2718 = vmatprep.mubr.msk.bf16.mxu0 %vm3244_vm0, %v3243_v1  ;;  %v3076_v7 = vld [vmem:[%s3864_s1 + $0x60] sm:$0xff]   ;;  %v3078_v9 = vld [vmem:[%s3864_s1 + $0x58] sm:$0xff]   ;;  %v3080_v11 = vld [vmem:[%s3864_s1 + $0x50] sm:$0xff]   ;;  %vm1861_vm2 = vcmask 1046528  }
   0xf   : > { %2739 = vmatpush3.bf16.msra.mxu1 %v3071_v2  ;;  %2704 = vmatprep.subr.bf16.mxu0 %v3243_v1  ;;  %v3077_v8 = vld [vmem:[%s3864_s1 + $0x20] sm:$0xff]   ;;  %v3079_v10 = vld [vmem:[%s3864_s1 + $0x18] sm:$0xff]   ;;  %s3336_s16 = scalar_lea.vmem %s3863_s0, %s3042_s5  ;;  %v3081_v12 = vld [vmem:[%s3864_s1 + $0x10] sm:$0xff]   ;;  %s3043_s5 = smul.u32 36, %s3872_s12 }
  0x10   : > { %2740 = vmatprep.subr.bf16.mxu1 %v3243_v1  ;;  %2754 = vmatprep.mubr.msk.bf16.mxu1 %vm3244_vm0, %v3243_v1  ;;  %v3082_v13 = vld [vmem:[%s3864_s1 + $0x48] sm:$0xff]   ;;  %v3084_v15 = vld [vmem:[%s3864_s1 + $0x40] sm:$0xff]   ;;  %v3086_v17 = vld [vmem:[%s3336_s16 + $0x30] sm:$0xff]  }
  0x11   : > { %v3083_v14 = vld [vmem:[%s3864_s1 + $0x8] sm:$0xff]   ;;  %v3085_v16 = vld [vmem:[%s3864_s1] sm:$0xff]   ;;  %v3088_v19 = vld [vmem:[%s3864_s1 + $0xb8] sm:$0xff]   ;;  %s221_s8 = scalar_lea.vmem %s3866_s3, %s3043_s5 }
  0x12   : > { %2705 = vmatpush3.bf16.msra.mxu0 %v3072_v3  ;;  %v3087_v18 = vld [vmem:[%s3336_s16] sm:$0xff]   ;;  %v3092_v20 = vld [vmem:[%s3864_s1 + $0xf8] sm:$0xff]   ;;  %v3089_v21 = vld [vmem:[%s3864_s1 + $0xb0] sm:$0xff]  }
  0x13   : > { %2741 = vmatpush3.bf16.msra.mxu1 %v3073_v4  ;;  %2706 = vmatprep.subr.bf16.mxu0 %v3243_v1  ;;  %v3090_v22 = vld [vmem:[%s3336_s16 + $0x38] sm:$0xff]   ;;  %v3094_v23 = vld [vmem:[%s3864_s1 + $0xf0] sm:$0xff]   ;;  %v3091_v24 = vld [vmem:[%s3336_s16 + $0x8] sm:$0xff]  }
  0x14   : > { %2742 = vmatprep.subr.bf16.mxu1 %v3243_v1  ;;  %v3093_v25 = vld [vmem:[%s3864_s1 + $0xa8] sm:$0xff]   ;;  %v3097_v27 = vld [vmem:[%s3864_s1 + $0xa0] sm:$0xff]   ;;  %v3096_v30 = vld [vmem:[%s3336_s16 + $0x10] sm:$0xff]  }
  0x15   : > { %v3098_v26 = vld [vmem:[%s3864_s1 + $0xe8] sm:$0xff]   ;;  %v3095_v28 = vld [vmem:[%s3336_s16 + $0x40] sm:$0xff]   ;;  %v3099_v31 = vld [vmem:[%s3864_s1 + $0x98] sm:$0xff]  }
  0x16   : > { %2707 = vmatpush3.bf16.msra.mxu0 %v3074_v5  ;;  %v3100_v29 = vld [vmem:[%s3864_s1 + $0xe0] sm:$0xff]   ;;  %v3103_v32 = vld [vmem:[%s3864_s1 + $0xd8] sm:$0xff]   ;;  %v3104_v33 = vld [vmem:[%s3864_s1 + $0x90] sm:$0xff]  }
  0x17   : > { %2743 = vmatpush3.bf16.msra.mxu1 %v3075_v6  ;;  %2708 = vmatprep.subr.bf16.mxu0 %v3243_v1  ;;  %v3101_v34 = vld [vmem:[%s3336_s16 + $0x48] sm:$0xff]   ;;  %v3105_v35 = vld [vmem:[%s3864_s1 + $0xd0] sm:$0xff]   ;;  %v3102_v36 = vld [vmem:[%s3336_s16 + $0x18] sm:$0xff]  }
  0x18   : > { %2744 = vmatprep.subr.bf16.mxu1 %v3243_v1  ;;  %v3112_v37 = vld [vmem:[%s3336_s16] sm:$0xff]   ;;  %v3106_v38 = vld [vmem:[%s3864_s1 + $0x88] sm:$0xff]   ;;  %v3107_v42 = vld [vmem:[%s3336_s16 + $0x50] ss:$0 sps:$4 sm:$0xff]  }
  0x19   : > { %v3109_v39 = vld [vmem:[%s3864_s1 + $0xc8] sm:$0xff]   ;;  %v627_v41 = vshll.u32 %v3112_v37, 16  ;;  %v3110_v43 = vld [vmem:[%s3864_s1 + $0x80] sm:$0xff]   ;;  %v625_v46 = vshrl.u32 %v3112_v37, 16  ;;  %v3117_v51 = vld [vmem:[%s3336_s16 + $0x10] sm:$0xff]  }
  0x1a   : > { %2709 = vmatpush3.bf16.msra.mxu0 %v3076_v7  ;;  %v3113_v40 = vld [vmem:[%s3336_s16 + $0x8] sm:$0xff]   ;;  %v3108_v44 = vld [vmem:[%s3336_s16 + $0x20] ss:$0 sps:$4 sm:$0xff]   ;;  %v3115_v53 = vld [vmem:[%s3864_s1 + $0x138] sm:$0xff]   ;;  %v640_v56 = vshll.u32 %v3117_v51, 16  ;;  %v644_v4 = vshrl.u32 %v3117_v51, 16 }
  0x1b   : > { %2745 = vmatpush3.bf16.msra.mxu1 %v3077_v8  ;;  %2710 = vmatprep.subr.bf16.mxu0 %v3243_v1  ;;  %v3111_v45 = vld [vmem:[%s3864_s1 + $0xc0] sm:$0xff]   ;;  %v629_v47 = vrot.slane %v627_v41, 1  ;;  %v632_v48 = vshll.u32 %v3113_v40, 16  ;;  %v636_v55 = vshrl.u32 %v3113_v40, 16  ;;  %v3119_v57 = vld [vmem:[%s3864_s1 + $0x178] sm:$0xff]   ;;  %v3116_v59 = vld [vmem:[%s3864_s1 + $0x130] sm:$0xff]  }
  0x1c   : > { %2746 = vmatprep.subr.bf16.mxu1 %v3243_v1  ;;  %v3114_v52 = vld [vmem:[%s3336_s16 + $0x60] sm:$0xff]   ;;  %v3122_v58 = vld [vmem:[%s3336_s16 + $0x18] sm:$0xff]   ;;  %v642_v61 = vrot.slane %v640_v56, 1  ;;  %v3121_v62 = vld [vmem:[%s3864_s1 + $0x170] sm:$0xff]  }
  0x1d   : > { %v630_v49 = vor.u32 %v629_v47, %v625_v46  ;;  %v634_v50 = vrot.slane %v632_v48, 1  ;;  %v3118_v63 = vld [vmem:[%s3336_s16 + $0x68] sm:$0xff]   ;;  %v648_v0 = vshll.u32 %v3122_v58, 16  ;;  %v3124_v7 = vld [vmem:[%s3864_s1 + $0x120] sm:$0xff]   ;;  %v3141_v40 = vld [vmem:[%s3864_s1 + $0x1b8] sm:$0xff]  }
  0x1e   : > { %2711 = vmatpush3.bf16.msra.mxu0 %v3078_v9  ;;  %v3120_v3 = vld [vmem:[%s3864_s1 + $0x128] sm:$0xff]   ;;  %v646_v8 = vor.u32 %v644_v4, %v642_v61  ;;  %v3128_v9 = vld [vmem:[%s3336_s16 + $0x20] sm:$0x1f]   ;;  %v3149_v48 = vld [vmem:[%s3336_s16 + $0x78] sm:$0xff]  }
  0x1f   : > { %2747 = vmatpush3.bf16.msra.mxu1 %v3079_v10  ;;  %2712 = vmatprep.subr.bf16.mxu0 %v3243_v1  ;;  %v635_v54 = vsel %vm623_vm1, %v630_v49, %v634_v50  ;;  %v638_v60 = vor.u32 %v636_v55, %v634_v50  ;;  %v3125_v5 = vld [vmem:[%s3864_s1 + $0x168] sm:$0xff]   ;;  %v650_v6 = vrot.slane %v648_v0, 1  ;;  %v3127_v10 = vld [vmem:[%s3864_s1 + $0x160] sm:$0xff]   ;;  %v3147_v49 = vld [vmem:[%s3864_s1 + $0x1f0] sm:$0xff]   ;;  %v1245_v0 = vshrl.u32 %v3149_v48, 16 }
  0x20   : > { %2748 = vmatprep.subr.bf16.mxu1 %v3243_v1  ;;  %v3143_v50 = vld [vmem:[%s3336_s16 + $0x98] sm:$0xff]   ;;  %v3146_v51 = vld [vmem:[%s3864_s1 + $0x1a8] sm:$0xff]   ;;  %v3150_v56 = vld [vmem:[%s3864_s1 + $0x1a0] sm:$0xff]  }
  0x21   : > { %v643_v2 = vsel %vm623_vm1, %v638_v60, %v642_v61  ;;  %v3151_v55 = vld [vmem:[%s3864_s1 + $0x1e8] sm:$0xff]   ;;  %v3153_v60 = vld [vmem:[%s3864_s1 + $0x1e0] sm:$0xff]   ;;  %v3157_v4 = vld [vmem:[%s3864_s1 + $0x190] sm:$0xff]  }
  0x22   : > { %2713 = vmatpush3.bf16.msra.mxu0 %v3080_v11  ;;  %v3123_v11 = vld [vmem:[%s3336_s16 + $0x70] sm:$0xff]   ;;  %v3148_v61 = vld [vmem:[%s3336_s16 + $0xa0] sm:$0xff]  }
  0x23   : > { %2749 = vmatpush3.bf16.msra.mxu1 %v3081_v12  ;;  %2714 = vmatprep.subr.bf16.mxu0 %v3243_v1  ;;  %v652_v12 = vshrl.u32 %v3122_v58, 16 }
  0x24   : > { %2750 = vmatprep.subr.bf16.mxu1 %v3243_v1 }
  0x26   : > { %2715 = vmatpush3.bf16.msra.mxu0 %v3082_v13  ;;  %v651_v13 = vsel %vm623_vm1, %v646_v8, %v650_v6  ;;  %v3623_v8 = vld [vmem:[%s3336_s16 + $0x8] sm:$0xf] }
  0x27   : > { %2751 = vmatpush3.bf16.msra.mxu1 %v3083_v14  ;;  %2716 = vmatprep.subr.bf16.mxu0 %v3243_v1  ;;  %v3126_v14 = vld [vmem:[%s3864_s1 + $0x118] sm:$0xff]  }
  0x28   : > { %2752 = vmatprep.subr.bf16.mxu1 %v3243_v1 }
  0x2a   : > { %2717 = vmatpush3.bf16.msra.mxu0 %v3084_v15  ;;  %v656_v15 = vshll.u32 %v3128_v9, 16 }
  0x2b   : > { %2753 = vmatpush3.bf16.msra.mxu1 %v3085_v16  ;;  %2774 = vmatprep.subr.bf16.mxu0 %v3243_v1  ;;  %v3130_v16 = vld [vmem:[%s3864_s1 + $0x158] sm:$0xff]  }
  0x2c   : > { %2810 = vmatprep.subr.bf16.mxu1 %v3243_v1 }
  0x2d   : > { %2719 = vmatmul.mubr.bf16.vlgmr.msra.gmra.mxu0 %v3086_v17  ;;  %v654_v17 = vor.u32 %v652_v12, %v650_v6 }
  0x2e   : > { %2755 = vmatmul.mubr.bf16.vlgmr.msra.gmra.mxu1 %v3087_v18  ;;  %2775 = vmatpush3.bf16.msra.mxu0 %v3088_v19  ;;  %v658_v18 = vrot.slane %v656_v15, 1  ;;  %v3131_v19 = vld [vmem:[%s3864_s1 + $0x110] sm:$0xff]   ;;  %v3161_v15 = vld [vmem:[%s3864_s1 + $0x1c8] sm:$0xff]  }
  0x2f   : > { %2776 = vmatprep.subr.bf16.mxu0 %v3243_v1  ;;  %2722 = vmatprep.mubr.msk.bf16.mxu0 %vm3244_vm0, %v3243_v1 }
  0x30   : > { %2758 = vmatprep.mubr.msk.bf16.mxu1 %vm3244_vm0, %v3243_v1  ;;  %2811 = vmatpush3.bf16.msra.mxu1 %v3092_v20  ;;  %v3132_v20 = vld [vmem:[%s3864_s1 + $0x150] sm:$0xff]  }
  0x31   : > { %2812 = vmatprep.subr.bf16.mxu1 %v3243_v1 }
  0x32   : > { %2777 = vmatpush3.bf16.msra.mxu0 %v3089_v21  ;;  %v3129_v21 = vld [vmem:[%s3336_s16 + $0x78] sm:$0xff]  }
  0x33   : > { %2778 = vmatprep.subr.bf16.mxu0 %v3243_v1 }
  0x34   : > { %2813 = vmatpush3.bf16.msra.mxu1 %v3094_v23  ;;  %v659_v23 = vsel %vm623_vm1, %v654_v17, %v658_v18  ;;  %v3645_v17 = vld [vmem:[%s3336_s16 + $0xc] sm:$0xff]  }
  0x35   : > { %2723 = vmatmul.mubr.bf16.gmra.mxu0 %v3090_v22  ;;  %2814 = vmatprep.subr.bf16.mxu1 %v3243_v1  ;;  %v3133_v22 = vld [vmem:[%s3864_s1 + $0x108] sm:$0xff]  }
  0x36   : > { %2759 = vmatmul.mubr.bf16.gmra.mxu1 %v3091_v24  ;;  %2779 = vmatpush3.bf16.msra.mxu0 %v3093_v25  ;;  %v3139_v24 = vld [vmem:[%s3336_s16 + $0x60] sm:$0xff]   ;;  %v3135_v25 = vld [vmem:[%s3864_s1 + $0x148] sm:$0xff]  }
  0x37   : > { %2726 = vmatprep.mubr.msk.bf16.mxu0 %vm3244_vm0, %v3243_v1  ;;  %2762 = vmatprep.mubr.msk.bf16.mxu1 %vm3244_vm0, %v3243_v1 }
  0x38   : > { %2780 = vmatprep.subr.bf16.mxu0 %v3243_v1  ;;  %2815 = vmatpush3.bf16.msra.mxu1 %v3098_v26  ;;  %v660_v26 = vshrl.u32 %v3128_v9, 16  ;;  %v3158_v9 = vld [vmem:[%s3864_s1 + $0x1d0] sm:$0xff]  }
  0x39   : > { %2816 = vmatprep.subr.bf16.mxu1 %v3243_v1 }
  0x3a   : > { %2781 = vmatpush3.bf16.msra.mxu0 %v3097_v27  ;;  %v3136_v27 = vld [vmem:[%s3864_s1 + $0x100] sm:$0xff]  }
  0x3b   : > { %2782 = vmatprep.subr.bf16.mxu0 %v3243_v1 }
  0x3c   : > { %2817 = vmatpush3.bf16.msra.mxu1 %v3100_v29  ;;  %v1220_v29 = vshll.u32 %v3139_v24, 16 }
  0x3d   : > { %2727 = vmatmul.mubr.bf16.gmra.mxu0 %v3095_v28  ;;  %2818 = vmatprep.subr.bf16.mxu1 %v3243_v1  ;;  %v3140_v28 = vld [vmem:[%s3336_s16 + $0x68] sm:$0xff]  }
  0x3e   : > { %2763 = vmatmul.mubr.bf16.gmra.mxu1 %v3096_v30  ;;  %2783 = vmatpush3.bf16.msra.mxu0 %v3099_v31  ;;  %v3137_v30 = vld [vmem:[%s3864_s1 + $0x140] sm:$0xff]   ;;  %v662_v31 = vor.u32 %v660_v26, %v658_v18 }
  0x3f   : > { %2730 = vmatprep.mubr.msk.bf16.mxu0 %vm3244_vm0, %v3243_v1  ;;  %2766 = vmatprep.mubr.msk.bf16.mxu1 %vm3244_vm0, %v3243_v1 }
  0x40   : > { %2784 = vmatprep.subr.bf16.mxu0 %v3243_v1  ;;  %2819 = vmatpush3.bf16.msra.mxu1 %v3103_v32  ;;  %v3134_v32 = vld [vmem:[%s3336_s16 + $0x80] ss:$0 sps:$4 sm:$0xff]  }
  0x41   : > { %2820 = vmatprep.subr.bf16.mxu1 %v3243_v1 }
  0x42   : > { %2785 = vmatpush3.bf16.msra.mxu0 %v3104_v33  ;;  %v1218_v33 = vshrl.u32 %v3139_v24, 16 }
  0x43   : > { %2786 = vmatprep.subr.bf16.mxu0 %v3243_v1 }
  0x44   : > { %2821 = vmatpush3.bf16.msra.mxu1 %v3105_v35  ;;  %v1225_v35 = vshll.u32 %v3140_v28, 16 }
  0x45   : > { %2731 = vmatmul.mubr.bf16.gmra.mxu0 %v3101_v34  ;;  %2822 = vmatprep.subr.bf16.mxu1 %v3243_v1  ;;  %v1222_v34 = vrot.slane %v1220_v29, 1 }
  0x46   : > { %2767 = vmatmul.mubr.bf16.gmra.mxu1 %v3102_v36  ;;  %2734 = vmatprep.mubr.msk.bf16.mxu0 %vm3244_vm0, %v3243_v1  ;;  %v1227_v37 = vrot.slane %v1225_v35, 1 }
  0x47   : > { %2770 = vmatprep.mubr.msk.bf16.mxu1 %vm3244_vm0, %v3243_v1  ;;  %2787 = vmatpush3.bf16.msra.mxu0 %v3106_v38  ;;  %v1223_v36 = vor.u32 %v1222_v34, %v1218_v33  ;;  %v3144_v38 = vld [vmem:[%s3336_s16 + $0x70] sm:$0xff]  }
  0x48   : > { %2823 = vmatpush3.bf16.msra.mxu1 %v3109_v39  ;;  %2788 = vmatprep.subr.bf16.mxu0 %v3243_v1  ;;  %v3138_v39 = vld [vmem:[%s3336_s16 + $0x90] sm:$0xff]  }
  0x49   : > { %2824 = vmatprep.subr.bf16.mxu1 %v3243_v1  ;;  %v1228_v41 = vsel %vm623_vm1, %v1223_v36, %v1227_v37  ;;  %v3665_v33 = vld [vmem:[%s3336_s16 + $0x14] sm:$0xff]   ;;  %v3171_v36 = vld [vmem:[%s3336_s16 + $0x44] sm:$0xff]  }
  0x4b   : > { %2789 = vmatpush3.bf16.msra.mxu0 %v3110_v43  ;;  %v1233_v43 = vshll.u32 %v3144_v38, 16 }
  0x4c   : > { %2825 = vmatpush3.bf16.msra.mxu1 %v3111_v45  ;;  %2846 = vmatprep.subr.bf16.mxu0 %v3243_v1  ;;  %v3142_v45 = vld [vmem:[%s3864_s1 + $0x1b0] sm:$0xff]  }
  0x4d   : > { %2735 = vmatmul.mubr.bf16.gmra.mxu0 %v3107_v42  ;;  %2882 = vmatprep.subr.bf16.mxu1 %v3243_v1  ;;  %v1229_v42 = vshrl.u32 %v3140_v28, 16  ;;  %v1235_v47 = vrot.slane %v1233_v43, 1  ;;  %v1683_v43 = vshll.u32 %v3171_v36, 16 }
  0x4e   : > { %2771 = vmatmul.mubr.bf16.gmra.mxu1 %v3108_v44  ;;  %2790 = vmatprep.mubr.msk.bf16.mxu0 %vm3244_vm0, %v3243_v1  ;;  %v3145_v44 = vld [vmem:[%s3864_s1 + $0x1f8] sm:$0xff]  }
  0x4f   : > { %2826 = vmatprep.mubr.msk.bf16.mxu1 %vm3244_vm0, %v3243_v1  ;;  %v1231_v46 = vor.u32 %v1229_v42, %v1227_v37 }
  0x55   : > { %2791 = vmatmul.mubr.bf16.vlgmr.msra.gmra.mxu0 %v635_v54  ;;  %v1241_v54 = vshll.u32 %v3149_v48, 16 }
  0x56   : > { %2827 = vmatmul.mubr.bf16.vlgmr.msra.gmra.mxu1 %v3114_v52  ;;  %2847 = vmatpush3.bf16.msra.mxu0 %v3115_v53  ;;  %v1236_v52 = vsel %vm623_vm1, %v1231_v46, %v1235_v47  ;;  %v1237_v53 = vshrl.u32 %v3144_v38, 16  ;;  %v3168_v38 = vld [vmem:[%s3864_s1 + $0x238] sm:$0xff]  }
  0x57   : > { %2848 = vmatprep.subr.bf16.mxu0 %v3243_v1  ;;  %2794 = vmatprep.mubr.msk.bf16.mxu0 %vm3244_vm0, %v3243_v1  ;;  %v1243_v58 = vrot.slane %v1241_v54, 1 }
  0x58   : > { %2830 = vmatprep.mubr.msk.bf16.mxu1 %vm3244_vm0, %v3243_v1  ;;  %2883 = vmatpush3.bf16.msra.mxu1 %v3119_v57  ;;  %v1239_v57 = vor.u32 %v1237_v53, %v1235_v47  ;;  %v3681_v47 = vld [vmem:[%s3336_s16 + $0x1c] sm:$0xff]   ;;  %v1462_v53 = vshrl.u32 %v3665_v33, 16 }
  0x59   : > { %2884 = vmatprep.subr.bf16.mxu1 %v3243_v1  ;;  %v1466_v54 = vshll.u32 %v3681_v47, 16 }
  0x5a   : > { %2849 = vmatpush3.bf16.msra.mxu0 %v3116_v59  ;;  %v3155_v59 = vld [vmem:[%s3336_s16 + $0x80] sm:$0x1f]  }
  0x5b   : > { %2850 = vmatprep.subr.bf16.mxu0 %v3243_v1 }
  0x5c   : > { %2885 = vmatpush3.bf16.msra.mxu1 %v3121_v62  ;;  %v3152_v62 = vld [vmem:[%s3864_s1 + $0x198] sm:$0xff]  }
  0x5d   : > { %2795 = vmatmul.mubr.bf16.gmra.mxu0 %v643_v2  ;;  %2886 = vmatprep.subr.bf16.mxu1 %v3243_v1  ;;  %v1249_v2 = vshll.u32 %v3155_v59, 16 }
  0x5e   : > { %2831 = vmatmul.mubr.bf16.gmra.mxu1 %v3118_v63  ;;  %2851 = vmatpush3.bf16.msra.mxu0 %v3120_v3  ;;  %v1244_v63 = vsel %vm623_vm1, %v1239_v57, %v1243_v58  ;;  %v3156_v3 = vld [vmem:[%s3864_s1 + $0x1d8] sm:$0xff]  }
  0x5f   : > { %2798 = vmatprep.mubr.msk.bf16.mxu0 %vm3244_vm0, %v3243_v1  ;;  %2834 = vmatprep.mubr.msk.bf16.mxu1 %vm3244_vm0, %v3243_v1  ;;  %v1251_v6 = vrot.slane %v1249_v2, 1 }
  0x60   : > { %2852 = vmatprep.subr.bf16.mxu0 %v3243_v1  ;;  %2887 = vmatpush3.bf16.msra.mxu1 %v3125_v5  ;;  %v1247_v5 = vor.u32 %v1245_v0, %v1243_v58  ;;  %v3178_v0 = vld [vmem:[%s3336_s16 + $0x54] sm:$0x1f]  }
  0x61   : > { %2888 = vmatprep.subr.bf16.mxu1 %v3243_v1 }
  0x62   : > { %2853 = vmatpush3.bf16.msra.mxu0 %v3124_v7  ;;  %v1390_v7 = vld [vmem:[%s3336_s16 + $0x4] sm:$0xf]  ;;  %v1252_v12 = vsel %vm623_vm1, %v1247_v5, %v1251_v6 }
  0x63   : > { %2854 = vmatprep.subr.bf16.mxu0 %v3243_v1 }
  0x64   : > { %2889 = vmatpush3.bf16.msra.mxu1 %v3127_v10  ;;  %v3154_v10 = vld [vmem:[%s3336_s16 + $0xa8] sm:$0xff]  }
  0x65   : > { %2799 = vmatmul.mubr.bf16.gmra.mxu0 %v651_v13  ;;  %2890 = vmatprep.subr.bf16.mxu1 %v3243_v1  ;;  %v3159_v13 = vld [vmem:[%s3864_s1 + $0x188] sm:$0xff]  }
  0x66   : > { %2835 = vmatmul.mubr.bf16.gmra.mxu1 %v3123_v11  ;;  %2855 = vmatpush3.bf16.msra.mxu0 %v3126_v14  ;;  %v2455_v11 = vcombine.low %v1390_v7, %v3623_v8  ;;  %v3166_v14 = vld [vmem:[%s3336_s16 + $0x34] sm:$0xff]  }
  0x67   : > { %2802 = vmatprep.mubr.msk.bf16.mxu0 %vm3244_vm0, %v3243_v1  ;;  %2838 = vmatprep.mubr.msk.bf16.mxu1 %vm3244_vm0, %v3243_v1  ;;  %v1668_v28 = vshrl.u32 %v3166_v14, 16 }
  0x68   : > { %2856 = vmatprep.subr.bf16.mxu0 %v3243_v1  ;;  %2891 = vmatpush3.bf16.msra.mxu1 %v3130_v16  ;;  %v1253_v16 = vshrl.u32 %v3155_v59, 16  ;;  %v1445_v18 = vshll.u32 %v2455_v11, 16  ;;  %v1468_v59 = vrot.slane %v1466_v54, 1 }
  0x69   : > { %2892 = vmatprep.subr.bf16.mxu1 %v3243_v1 }
  0x6a   : > { %2857 = vmatpush3.bf16.msra.mxu0 %v3131_v19  ;;  %v3162_v19 = vld [vmem:[%s3864_s1 + $0x180] sm:$0xff]   ;;  %v1255_v24 = vor.u32 %v1253_v16, %v1251_v6  ;;  %v1447_v26 = vrot.slane %v1445_v18, 1  ;;  %v3180_v18 = vld [vmem:[%s3864_s1 + $0x208] sm:$0xff]  }
  0x6b   : > { %2858 = vmatprep.subr.bf16.mxu0 %v3243_v1 }
  0x6c   : > { %2893 = vmatpush3.bf16.msra.mxu1 %v3132_v20  ;;  %v3167_v20 = vld [vmem:[%s3336_s16 + $0x3c] sm:$0xff]  }
  0x6d   : > { %2803 = vmatmul.mubr.bf16.gmra.mxu0 %v659_v23  ;;  %2894 = vmatprep.subr.bf16.mxu1 %v3243_v1  ;;  %v3160_v23 = vld [vmem:[%s3336_s16 + $0xb0] ss:$0 sps:$4 sm:$0xff]   ;;  %v1679_v42 = vshrl.u32 %v3167_v20, 16 }
  0x6e   : > { %2839 = vmatmul.mubr.bf16.gmra.mxu1 %v3129_v21  ;;  %2806 = vmatprep.mubr.msk.bf16.mxu0 %vm3244_vm0, %v3243_v1  ;;  %v1670_v21 = vshll.u32 %v3166_v14, 16 }
  0x6f   : > { %2842 = vmatprep.mubr.msk.bf16.mxu1 %vm3244_vm0, %v3243_v1  ;;  %2859 = vmatpush3.bf16.msra.mxu0 %v3133_v22  ;;  %v3163_v22 = vld [vmem:[%s3864_s1 + $0x1c0] sm:$0xff]  }
  0x70   : > { %2895 = vmatpush3.bf16.msra.mxu1 %v3135_v25  ;;  %2860 = vmatprep.subr.bf16.mxu0 %v3243_v1  ;;  %v1443_v25 = vshrl.u32 %v2455_v11, 16  ;;  %v1672_v29 = vrot.slane %v1670_v21, 1  ;;  %v3181_v21 = vld [vmem:[%s3864_s1 + $0x200] sm:$0xff]  }
  0x71   : > { %2896 = vmatprep.subr.bf16.mxu1 %v3243_v1 }
  0x72   : > { %v1673_v34 = vor.u32 %v1672_v29, %v1668_v28  ;;  %v1867_v28 = vrot.slane %v3681_v47, 1 }
  0x73   : > { %2861 = vmatpush3.bf16.msra.mxu0 %v3136_v27  ;;  %v1450_v27 = vshll.u32 %v3645_v17, 16 }
  0x74   : > { %2897 = vmatpush3.bf16.msra.mxu1 %v3137_v30  ;;  %2918 = vmatprep.subr.bf16.mxu0 %v3243_v1  ;;  %v1675_v30 = vshll.u32 %v3167_v20, 16  ;;  %v1703_v20 = vshrl.u32 %v3178_v0, 16 }
  0x75   : > { %2807 = vmatmul.mubr.bf16.gmra.mxu0 %v662_v31  ;;  %2954 = vmatprep.subr.bf16.mxu1 %v3243_v1  ;;  %v1448_v31 = vor.u32 %v1447_v26, %v1443_v25 }
  0x76   : > { %2843 = vmatmul.mubr.bf16.gmra.mxu1 %v3134_v32  ;;  %2862 = vmatprep.mubr.msk.bf16.mxu0 %vm3244_vm0, %v3243_v1  ;;  %v1452_v32 = vrot.slane %v1450_v27, 1  ;;  %v1677_v35 = vrot.slane %v1675_v30, 1  ;;  %v1863_v27 = vrot.slane %v3645_v17, 1 }
  0x77   : > { %2898 = vmatprep.mubr.msk.bf16.mxu1 %vm3244_vm0, %v3243_v1 }
  0x78   : > { %v1453_v37 = vsel %vm623_vm1, %v1448_v31, %v1452_v32  ;;  %v1681_v48 = vor.u32 %v1679_v42, %v1677_v35  ;;  %v1865_v31 = vrot.slane %v3665_v33, 1 }
  0x7d   : > { %2863 = vmatmul.mubr.bf16.vlgmr.msra.gmra.mxu0 %v3138_v39  ;;  %v1454_v39 = vshrl.u32 %v3645_v17, 16  ;;  %v1866_v17 = vsel %vm1861_vm2, %v1863_v27, %v1865_v31 }
  0x7e   : > { %2899 = vmatmul.mubr.bf16.vlgmr.msra.gmra.mxu1 %v1228_v41  ;;  %2919 = vmatpush3.bf16.msra.mxu0 %v3141_v40  ;;  %v1458_v40 = vshll.u32 %v3665_v33, 16  ;;  %v1678_v41 = vsel %vm623_vm1, %v1673_v34, %v1677_v35 }
  0x7f   : > { %2920 = vmatprep.subr.bf16.mxu0 %v3243_v1  ;;  %2866 = vmatprep.mubr.msk.bf16.mxu0 %vm3244_vm0, %v3243_v1 }
  0x80   : > { %2902 = vmatprep.mubr.msk.bf16.mxu1 %vm3244_vm0, %v3243_v1  ;;  %2955 = vmatpush3.bf16.msra.mxu1 %v3145_v44  ;;  %v3169_v44 = vld [vmem:[%s3864_s1 + $0x230] sm:$0xff]   ;;  %v1460_v46 = vrot.slane %v1458_v40, 1 }
  0x81   : > { %2956 = vmatprep.subr.bf16.mxu1 %v3243_v1 }
  0x82   : > { %2921 = vmatpush3.bf16.msra.mxu0 %v3142_v45  ;;  %v1456_v45 = vor.u32 %v1454_v39, %v1452_v32  ;;  %v1464_v58 = vor.u32 %v1462_v53, %v1460_v46  ;;  %v1868_v32 = vsel %vm1861_vm2, %v1865_v31, %v1867_v28 }
  0x83   : > { %2922 = vmatprep.subr.bf16.mxu0 %v3243_v1 }
  0x84   : > { %2957 = vmatpush3.bf16.msra.mxu1 %v3147_v49  ;;  %v1685_v49 = vrot.slane %v1683_v43, 1  ;;  %v1469_v2 = vsel %vm623_vm1, %v1464_v58, %v1468_v59 }
  0x85   : > { %2867 = vmatmul.mubr.bf16.gmra.mxu0 %v3143_v50  ;;  %2958 = vmatprep.subr.bf16.mxu1 %v3243_v1  ;;  %v3174_v50 = vld [vmem:[%s3336_s16 + $0x4c] sm:$0xff]  }
  0x86   : > { %2903 = vmatmul.mubr.bf16.gmra.mxu1 %v1236_v52  ;;  %2923 = vmatpush3.bf16.msra.mxu0 %v3146_v51  ;;  %v1461_v51 = vsel %vm623_vm1, %v1456_v45, %v1460_v46  ;;  %v3172_v52 = vld [vmem:[%s3864_s1 + $0x228] sm:$0xff]   ;;  %v1691_v57 = vshll.u32 %v3174_v50, 16  ;;  %v1695_v7 = vshrl.u32 %v3174_v50, 16 }
  0x87   : > { %2870 = vmatprep.mubr.msk.bf16.mxu0 %vm3244_vm0, %v3243_v1  ;;  %2906 = vmatprep.mubr.msk.bf16.mxu1 %vm3244_vm0, %v3243_v1 }
  0x88   : > { %2924 = vmatprep.subr.bf16.mxu0 %v3243_v1  ;;  %2959 = vmatpush3.bf16.msra.mxu1 %v3151_v55  ;;  %v1686_v55 = vsel %vm623_vm1, %v1681_v48, %v1685_v49 }
  0x89   : > { %2960 = vmatprep.subr.bf16.mxu1 %v3243_v1 }
  0x8a   : > { %2925 = vmatpush3.bf16.msra.mxu0 %v3150_v56  ;;  %v1687_v56 = vshrl.u32 %v3171_v36, 16 }
  0x8b   : > { %2926 = vmatprep.subr.bf16.mxu0 %v3243_v1 }
  0x8c   : > { %2961 = vmatpush3.bf16.msra.mxu1 %v3153_v60  ;;  %v3175_v60 = vld [vmem:[%s3864_s1 + $0x220] sm:$0xff]  }
  0x8d   : > { %2871 = vmatmul.mubr.bf16.gmra.mxu0 %v3148_v61  ;;  %2962 = vmatprep.subr.bf16.mxu1 %v3243_v1  ;;  %v3703_v61 = vld [vmem:[%s3336_s16 + $0x24] sm:$0x1f]  }
  0x8e   : > { %2907 = vmatmul.mubr.bf16.gmra.mxu1 %v1244_v63  ;;  %2927 = vmatpush3.bf16.msra.mxu0 %v3152_v62  ;;  %v1689_v62 = vor.u32 %v1687_v56, %v1685_v49  ;;  %v1693_v63 = vrot.slane %v1691_v57, 1  ;;  %v1474_v5 = vshll.u32 %v3703_v61, 16  ;;  %v1869_v29 = vrot.slane %v3703_v61, 1 }
  0x8f   : > { %2874 = vmatprep.mubr.msk.bf16.mxu0 %vm3244_vm0, %v3243_v1  ;;  %2910 = vmatprep.mubr.msk.bf16.mxu1 %vm3244_vm0, %v3243_v1 }
  0x90   : > { %2928 = vmatprep.subr.bf16.mxu0 %v3243_v1  ;;  %2963 = vmatpush3.bf16.msra.mxu1 %v3156_v3  ;;  %v3176_v3 = vld [vmem:[%s3864_s1 + $0x218] sm:$0xff]   ;;  %v1694_v6 = vsel %vm623_vm1, %v1689_v62, %v1693_v63  ;;  %v1476_v11 = vrot.slane %v1474_v5, 1 }
  0x91   : > { %2964 = vmatprep.subr.bf16.mxu1 %v3243_v1 }
  0x92   : > { %2929 = vmatpush3.bf16.msra.mxu0 %v3157_v4  ;;  %v1470_v4 = vshrl.u32 %v3681_v47, 16 }
  0x93   : > { %2930 = vmatprep.subr.bf16.mxu0 %v3243_v1 }
  0x94   : > { %2965 = vmatpush3.bf16.msra.mxu1 %v3158_v9  ;;  %v1699_v9 = vshll.u32 %v3178_v0, 16 }
  0x95   : > { %2875 = vmatmul.mubr.bf16.gmra.mxu0 %v3154_v10  ;;  %2966 = vmatprep.subr.bf16.mxu1 %v3243_v1  ;;  %v1472_v10 = vor.u32 %v1470_v4, %v1468_v59 }
  0x96   : > { %2911 = vmatmul.mubr.bf16.gmra.mxu1 %v1252_v12  ;;  %2878 = vmatprep.mubr.msk.bf16.mxu0 %vm3244_vm0, %v3243_v1  ;;  %v3179_v12 = vld [vmem:[%s3864_s1 + $0x210] sm:$0xff]   ;;  %v1701_v14 = vrot.slane %v1699_v9, 1 }
  0x97   : > { %2914 = vmatprep.mubr.msk.bf16.mxu1 %vm3244_vm0, %v3243_v1  ;;  %2931 = vmatpush3.bf16.msra.mxu0 %v3159_v13  ;;  %v1697_v13 = vor.u32 %v1695_v7, %v1693_v63 }
  0x98   : > { %2967 = vmatpush3.bf16.msra.mxu1 %v3161_v15  ;;  %2932 = vmatprep.subr.bf16.mxu0 %v3243_v1  ;;  %v1477_v15 = vsel %vm623_vm1, %v1472_v10, %v1476_v11 }
  0x99   : > { %2968 = vmatprep.subr.bf16.mxu1 %v3243_v1  ;;  %v1702_v16 = vsel %vm623_vm1, %v1697_v13, %v1701_v14 }
  0x9b   : > { %2933 = vmatpush3.bf16.msra.mxu0 %v3162_v19  ;;  %v1478_v19 = vshrl.u32 %v3703_v61, 16 }
  0x9c   : > { %2969 = vmatpush3.bf16.msra.mxu1 %v3163_v22  ;;  %2990 = vmatprep.subr.bf16.mxu0 %v3243_v1  ;;  %v1840_v22 = vld [vmem:[%s3336_s16 + $0x4] sm:$0xe] }
  0x9d   : > { %2879 = vmatmul.mubr.bf16.gmra.mxu0 %v3160_v23  ;;  %3026 = vmatprep.subr.bf16.mxu1 %v3243_v1  ;;  %v1480_v23 = vor.u32 %v1478_v19, %v1476_v11  ;;  %v2523_v25 = vcombine.low %v1840_v22, %v3623_v8  ;;  %v1870_v8 = vsel %vm1861_vm2, %v1867_v28, %v1869_v29 }
  0x9e   : > { %2915 = vmatmul.mubr.bf16.gmra.mxu1 %v1255_v24  ;;  %2934 = vmatprep.mubr.msk.bf16.mxu0 %vm3244_vm0, %v3243_v1  ;;  %v1705_v24 = vor.u32 %v1703_v20, %v1701_v14 }
  0x9f   : > { %2970 = vmatprep.mubr.msk.bf16.mxu1 %vm3244_vm0, %v3243_v1  ;;  %v1862_v26 = vrot.slane %v2523_v25, 1 }
  0xa1   : > { %v1864_v30 = vsel %vm1861_vm2, %v1862_v26, %v1863_v27 }
  0xa5   : > { %2935 = vmatmul.mubr.bf16.vlgmr.msra.gmra.mxu0 %v1453_v37 }
  0xa6   : > { %2971 = vmatmul.mubr.bf16.vlgmr.msra.gmra.mxu1 %v1678_v41  ;;  %2991 = vmatpush3.bf16.msra.mxu0 %v3168_v38 }
  0xa7   : > { %2992 = vmatprep.subr.bf16.mxu0 %v3243_v1  ;;  %2938 = vmatprep.mubr.msk.bf16.mxu0 %vm3244_vm0, %v3243_v1 }
  0xa8   : > { %2974 = vmatprep.mubr.msk.bf16.mxu1 %vm3244_vm0, %v3243_v1  ;;  %3034 = vmatpush3.bf16.msra.mxu1 %v3168_v38 }
  0xa9   : > { %3027 = vmatprep.subr.bf16.mxu1 %v3243_v1 }
  0xaa   : > { %2993 = vmatpush3.bf16.msra.mxu0 %v3169_v44 }
  0xab   : > { %2994 = vmatprep.subr.bf16.mxu0 %v3243_v1 }
  0xac   : > { %3035 = vmatpush3.bf16.msra.mxu1 %v3169_v44 }
  0xad   : > { %2939 = vmatmul.mubr.bf16.gmra.mxu0 %v1461_v51  ;;  %3028 = vmatprep.subr.bf16.mxu1 %v3243_v1 }
  0xae   : > { %2975 = vmatmul.mubr.bf16.gmra.mxu1 %v1686_v55  ;;  %2995 = vmatpush3.bf16.msra.mxu0 %v3172_v52 }
  0xaf   : > { %2942 = vmatprep.mubr.msk.bf16.mxu0 %vm3244_vm0, %v3243_v1  ;;  %2978 = vmatprep.mubr.msk.bf16.mxu1 %vm3244_vm0, %v3243_v1 }
  0xb0   : > { %2996 = vmatprep.subr.bf16.mxu0 %v3243_v1  ;;  %3036 = vmatpush3.bf16.msra.mxu1 %v3172_v52 }
  0xb1   : > { %3029 = vmatprep.subr.bf16.mxu1 %v3243_v1 }
  0xb2   : > { %2997 = vmatpush3.bf16.msra.mxu0 %v3175_v60 }
  0xb3   : > { %2998 = vmatprep.subr.bf16.mxu0 %v3243_v1 }
  0xb4   : > { %3037 = vmatpush3.bf16.msra.mxu1 %v3175_v60 }
  0xb5   : > { %2943 = vmatmul.mubr.bf16.gmra.mxu0 %v1469_v2  ;;  %3030 = vmatprep.subr.bf16.mxu1 %v3243_v1 }
  0xb6   : > { %2979 = vmatmul.mubr.bf16.gmra.mxu1 %v1694_v6  ;;  %2999 = vmatpush3.bf16.msra.mxu0 %v3176_v3 }
  0xb7   : > { %2946 = vmatprep.mubr.msk.bf16.mxu0 %vm3244_vm0, %v3243_v1  ;;  %2982 = vmatprep.mubr.msk.bf16.mxu1 %vm3244_vm0, %v3243_v1 }
  0xb8   : > { %3038 = vmatpush3.bf16.msra.mxu1 %v3176_v3  ;;  %3000 = vmatprep.subr.bf16.mxu0 %v3243_v1 }
  0xb9   : > { %3031 = vmatprep.subr.bf16.mxu1 %v3243_v1 }
  0xba   : > { %3001 = vmatpush3.bf16.msra.mxu0 %v3179_v12 }
  0xbb   : > { %3002 = vmatprep.subr.bf16.mxu0 %v3243_v1 }
  0xbc   : > { %3039 = vmatpush3.bf16.msra.mxu1 %v3179_v12 }
  0xbd   : > { %2947 = vmatmul.mubr.bf16.gmra.mxu0 %v1477_v15  ;;  %3032 = vmatprep.subr.bf16.mxu1 %v3243_v1 }
  0xbe   : > { %2983 = vmatmul.mubr.bf16.gmra.mxu1 %v1702_v16  ;;  %2950 = vmatprep.mubr.msk.bf16.mxu0 %vm3244_vm0, %v3243_v1 }
  0xbf   : > { %2986 = vmatprep.mubr.msk.bf16.mxu1 %vm3244_vm0, %v3243_v1  ;;  %3003 = vmatpush3.bf16.msra.mxu0 %v3180_v18 }
  0xc0   : > { %3040 = vmatpush3.bf16.msra.mxu1 %v3180_v18  ;;  %3004 = vmatprep.subr.bf16.mxu0 %v3243_v1 }
  0xc1   : > { %3033 = vmatprep.subr.bf16.mxu1 %v3243_v1 }
  0xc3   : > { %3005 = vmatpush3.bf16.msra.mxu0 %v3181_v21 }
  0xc4   : > { %3041 = vmatpush3.bf16.msra.mxu1 %v3181_v21 }
  0xc5   : > { %2951 = vmatmul.mubr.bf16.gmra.mxu0 %v1480_v23 }
  0xc6   : > { %2987 = vmatmul.mubr.bf16.gmra.mxu1 %v1705_v24  ;;  %3006 = vmatprep.mubr.msk.bf16.mxu0 %vm3244_vm0, %v3243_v1 }
  0xc7   : > { %3018 = vmatprep.mubr.msk.bf16.mxu1 %vm3244_vm0, %v3243_v1 }
  0xcd   : > { %3007 = vmatmul.mubr.bf16.vlgmr.msra.gmra.mxu0 %v1864_v30 }
  0xce   : > { %3019 = vmatmul.mubr.bf16.vlgmr.msra.gmra.mxu1 %v1870_v8  ;;  %3010 = vmatprep.mubr.msk.bf16.mxu0 %vm3244_vm0, %v3243_v1 }
  0xcf   : > { %3022 = vmatprep.mubr.msk.bf16.mxu1 %vm3244_vm0, %v3243_v1 }
  0xd5   : > { %3011 = vmatmul.mubr.bf16.gmra.mxu0 %v1866_v17 }
  0xd6   : > { %3023 = vmatmul.mubr.bf16.gmra.mxu1 %v1869_v29  ;;  %3014 = vmatprep.mubr.msk.bf16.mxu0 %vm3244_vm0, %v3243_v1 }
  0xdd   : > { %3015 = vmatmul.mubr.bf16.gmra.mxu0 %v1868_v32 }
  0xed   : > { %v385_v34 = vpop.f32.mrf.mxu0 }
  0xee   : > { %v533_v35 = vpop.f32.mrf.mxu1 }
  0xef   : > { %v534_v36 = vadd.f32 %v533_v35, %v385_v34  ;;  %v2720_v37 = vpop.f32.mrf.mxu0 }
  0xf0   : > { %v2756_v38 = vpop.f32.mrf.mxu1 }
  0xf1   : > { %v388_v39 = vpop.f32.mrf.mxu0 }
  0xf2   : > { %v536_v40 = vpop.f32.mrf.mxu1 }
  0xf3   : > { %v537_v41 = vadd.f32 %v536_v40, %v388_v39  ;;  %v2721_v33 = vpop.f32.mrf.mxu0 }
  0xf4   : > { %v2757_v42 = vpop.f32.mrf.mxu1 }
  0xf5   : > { %v393_v43 = vpop.f32.mrf.mxu0 }
  0xf6   : > { %v541_v44 = vpop.f32.mrf.mxu1 }
  0xf7   : > { %v542_v45 = vadd.f32 %v541_v44, %v393_v43  ;;  %v2724_v46 = vpop.f32.mrf.mxu0 }
  0xf8   : > { %v2760_v47 = vpop.f32.mrf.mxu1 }
  0xf9   : > { %v396_v48 = vpop.f32.mrf.mxu0 }
  0xfa   : > { %v544_v49 = vpop.f32.mrf.mxu1 }
  0xfb   : > { %v545_v1 = vadd.f32 %v544_v49, %v396_v48  ;;  %v2725_v50 = vpop.f32.mrf.mxu0 }
  0xfc   : > { %v2761_v51 = vpop.f32.mrf.mxu1 }
  0xfd   : > { %v401_v52 = vpop.f32.mrf.mxu0 }
  0xfe   : > { %v549_v53 = vpop.f32.mrf.mxu1 }
  0xff   : > { %v550_v54 = vadd.f32 %v549_v53, %v401_v52  ;;  %v2728_v55 = vpop.f32.mrf.mxu0 }
 0x100   : > { %v2764_v56 = vpop.f32.mrf.mxu1 }
 0x101   : > { %v404_v57 = vpop.f32.mrf.mxu0 }
 0x102   : > { %v552_v58 = vpop.f32.mrf.mxu1 }
 0x103   : > { %v553_v59 = vadd.f32 %v552_v58, %v404_v57  ;;  %v2729_v60 = vpop.f32.mrf.mxu0 }
 0x104   : > { %v2765_v61 = vpop.f32.mrf.mxu1 }
 0x105   : > { %v409_v62 = vpop.f32.mrf.mxu0 }
 0x106   : > { %v557_v63 = vpop.f32.mrf.mxu1 }
 0x107   : > { %v558_v0 = vadd.f32 %v557_v63, %v409_v62  ;;  %v2732_v2 = vpop.f32.mrf.mxu0 }
 0x108   : > { %v2768_v3 = vpop.f32.mrf.mxu1 }
 0x109   : > { %v412_v4 = vpop.f32.mrf.mxu0 }
 0x10a   : > { %v560_v5 = vpop.f32.mrf.mxu1 }
 0x10b   : > { %v561_v6 = vadd.f32 %v560_v5, %v412_v4  ;;  %v2733_v7 = vpop.f32.mrf.mxu0 }
 0x10c   : > { %v2769_v9 = vpop.f32.mrf.mxu1 }
 0x10d   : > { %v417_v10 = vpop.f32.mrf.mxu0 }
 0x10e   : > { %v565_v11 = vpop.f32.mrf.mxu1 }
 0x10f   : > { %v566_v12 = vadd.f32 %v565_v11, %v417_v10  ;;  %v2736_v13 = vpop.f32.mrf.mxu0 }
 0x110   : > { %v2772_v14 = vpop.f32.mrf.mxu1 }
 0x111   : > { %v420_v15 = vpop.f32.mrf.mxu0 }
 0x112   : > { %v568_v16 = vpop.f32.mrf.mxu1 }
 0x113   : > { %v2737_v18 = vpop.f32.mrf.mxu0 }
 0x114   : > { %v2773_v19 = vpop.f32.mrf.mxu1 }
 0x115   : > { %v750_v20 = vpop.f32.mrf.mxu0 }
 0x116   : > { %v788_v21 = vadd.f32 %v750_v20, %v534_v36  ;;  %v934_v22 = vpop.f32.mrf.mxu1 }
 0x117   : > { %v2792_v23 = vpop.f32.mrf.mxu0 }
 0x118   : > { %v972_v24 = vadd.f32 %v934_v22, %v788_v21  ;;  %v2828_v25 = vpop.f32.mrf.mxu1 }
 0x119   : > { %v753_v26 = vpop.f32.mrf.mxu0 }
 0x11a   : > { %v789_v27 = vadd.f32 %v753_v26, %v537_v41  ;;  %v937_v28 = vpop.f32.mrf.mxu1 }
 0x11b   : > { %v2793_v29 = vpop.f32.mrf.mxu0 }
 0x11c   : > { %v973_v30 = vadd.f32 %v937_v28, %v789_v27  ;;  %v2829_v8 = vpop.f32.mrf.mxu1 }
 0x11d   : > { %v758_v31 = vpop.f32.mrf.mxu0 }
 0x11e   : > { %v790_v17 = vadd.f32 %v758_v31, %v542_v45  ;;  %v942_v32 = vpop.f32.mrf.mxu1 }
 0x11f   : > { %v2796_v34 = vpop.f32.mrf.mxu0 }
 0x120   : > { %v974_v35 = vadd.f32 %v942_v32, %v790_v17  ;;  %v2832_v37 = vpop.f32.mrf.mxu1 }
 0x121   : > { %v761_v38 = vpop.f32.mrf.mxu0 }
 0x122   : > { %v791_v39 = vadd.f32 %v761_v38, %v545_v1  ;;  %v945_v40 = vpop.f32.mrf.mxu1 }
 0x123   : > { %v2797_v36 = vpop.f32.mrf.mxu0 }
 0x124   : > { %v975_v33 = vadd.f32 %v945_v40, %v791_v39  ;;  %v2833_v42 = vpop.f32.mrf.mxu1 }
 0x125   : > { %v766_v43 = vpop.f32.mrf.mxu0 }
 0x126   : > { %v792_v44 = vadd.f32 %v766_v43, %v550_v54  ;;  %v950_v46 = vpop.f32.mrf.mxu1 }
 0x127   : > { %v2800_v41 = vpop.f32.mrf.mxu0 }
 0x128   : > { %v976_v47 = vadd.f32 %v950_v46, %v792_v44  ;;  %v2836_v48 = vpop.f32.mrf.mxu1 }
 0x129   : > { %v769_v49 = vpop.f32.mrf.mxu0 }
 0x12a   : > { %v793_v50 = vadd.f32 %v769_v49, %v553_v59  ;;  %v953_v51 = vpop.f32.mrf.mxu1 }
 0x12b   : > { %v2801_v45 = vpop.f32.mrf.mxu0 }
 0x12c   : > { %v977_v52 = vadd.f32 %v953_v51, %v793_v50  ;;  %v2837_v53 = vpop.f32.mrf.mxu1 }
 0x12d   : > { %v774_v55 = vpop.f32.mrf.mxu0 }
 0x12e   : > { %v794_v56 = vadd.f32 %v774_v55, %v558_v0  ;;  %v958_v57 = vpop.f32.mrf.mxu1 }
 0x12f   : > { %v2804_v1 = vpop.f32.mrf.mxu0 }
 0x130   : > { %v3763_v58 = vadd.f32 %v958_v57, %v794_v56  ;;  %v2840_v60 = vpop.f32.mrf.mxu1 }
 0x131   : > { %v777_v61 = vpop.f32.mrf.mxu0 }
 0x132   : > { %v795_v62 = vadd.f32 %v777_v61, %v561_v6  ;;  %v961_v54 = vpop.f32.mrf.mxu1 }
 0x133   : > { %v2805_v63 = vpop.f32.mrf.mxu0 }
 0x134   : > { %v3765_v2 = vadd.f32 %v961_v54, %v795_v62  ;;  %v2841_v3 = vpop.f32.mrf.mxu1 }
 0x135   : > { %v782_v4 = vpop.f32.mrf.mxu0 }
 0x136   : > { %v796_v59 = vadd.f32 %v782_v4, %v566_v12  ;;  %v966_v5 = vpop.f32.mrf.mxu1 }
 0x137   : > { %v2808_v7 = vpop.f32.mrf.mxu0 }
 0x138   : > { %v3767_v9 = vadd.f32 %v966_v5, %v796_v59  ;;  %v2844_v10 = vpop.f32.mrf.mxu1 }
 0x139   : > { %v785_v0 = vpop.f32.mrf.mxu0 }
 0x13a   : > { %v969_v11 = vpop.f32.mrf.mxu1 }
 0x13b   : > { %v2809_v13 = vpop.f32.mrf.mxu0 }
 0x13c   : > { %v2845_v14 = vpop.f32.mrf.mxu1 }
 0x13d   : > { %v1118_v15 = vpop.f32.mrf.mxu0 }
 0x13e   : > { %v1156_v16 = vadd.f32 %v1118_v15, %v972_v24  ;;  %v1343_v18 = vpop.f32.mrf.mxu1 }
 0x13f   : > { %v2864_v6 = vpop.f32.mrf.mxu0 }
 0x140   : > { %v3769_v19 = vadd.f32 %v1343_v18, %v1156_v16  ;;  %v2900_v20 = vpop.f32.mrf.mxu1 }
 0x141   : > { %v1121_v21 = vpop.f32.mrf.mxu0 }
 0x142   : > { %v1157_v22 = vadd.f32 %v1121_v21, %v973_v30  ;;  %v1346_v23 = vpop.f32.mrf.mxu1 }
 0x143   : > { %v2865_v12 = vpop.f32.mrf.mxu0 }
 0x144   : > { %v3771_v25 = vadd.f32 %v1346_v23, %v1157_v22  ;;  %v2901_v26 = vpop.f32.mrf.mxu1 }
 0x145   : > { %v1126_v27 = vpop.f32.mrf.mxu0 }
 0x146   : > { %v1158_v28 = vadd.f32 %v1126_v27, %v974_v35  ;;  %v1351_v29 = vpop.f32.mrf.mxu1 }
 0x147   : > { %v2868_v8 = vpop.f32.mrf.mxu0 }
 0x148   : > { %v3773_v31 = vadd.f32 %v1351_v29, %v1158_v28  ;;  %v2904_v17 = vpop.f32.mrf.mxu1 }
 0x149   : > { %v1129_v24 = vpop.f32.mrf.mxu0 }
 0x14a   : > { %v1159_v32 = vadd.f32 %v1129_v24, %v975_v33  ;;  %v1354_v34 = vpop.f32.mrf.mxu1 }
 0x14b   : > { %v2869_v37 = vpop.f32.mrf.mxu0 }
 0x14c   : > { %v3775_v38 = vadd.f32 %v1354_v34, %v1159_v32  ;;  %v2905_v39 = vpop.f32.mrf.mxu1 }
 0x14d   : > { %v1134_v30 = vpop.f32.mrf.mxu0 }
 0x14e   : > { %v1160_v40 = vadd.f32 %v1134_v30, %v976_v47  ;;  %v1359_v36 = vpop.f32.mrf.mxu1 }
 0x14f   : > { %v2872_v42 = vpop.f32.mrf.mxu0 }
 0x150   : > { %v3777_v43 = vadd.f32 %v1359_v36, %v1160_v40  ;;  %v2908_v44 = vpop.f32.mrf.mxu1 }
 0x151   : > { %v1137_v35 = vpop.f32.mrf.mxu0 }
 0x152   : > { %v1161_v46 = vadd.f32 %v1137_v35, %v977_v52  ;;  %v1362_v41 = vpop.f32.mrf.mxu1 }
 0x153   : > { %v2873_v48 = vpop.f32.mrf.mxu0 }
 0x154   : > { %v3779_v49 = vadd.f32 %v1362_v41, %v1161_v46  ;;  %v2909_v50 = vpop.f32.mrf.mxu1 }
 0x155   : > { %v1142_v33 = vpop.f32.mrf.mxu0 }
 0x156   : > { %v1367_v51 = vpop.f32.mrf.mxu1  ;;  %v1162_v40 = vadd.f32 %v1142_v33, %v3763_v58 }
 0x157   : > { %v2876_v45 = vpop.f32.mrf.mxu0 }
 0x158   : > { %v2912_v53 = vpop.f32.mrf.mxu1  ;;  %v1387_v46 = vadd.f32 %v1367_v51, %v1162_v40 }
 0x159   : > { %v1145_v55 = vpop.f32.mrf.mxu0 }
 0x15a   : > { %v1370_v56 = vpop.f32.mrf.mxu1  ;;  %v1163_v41 = vadd.f32 %v1145_v55, %v3765_v2  ;;  %v3801_v2 = vld [vmem:[%s3865_s2] ss:$0 sm:$0xff] }
 0x15b   : > { %v2877_v57 = vpop.f32.mrf.mxu0 }
 0x15c   : > { %v2913_v47 = vpop.f32.mrf.mxu1 }
 0x15d   : > { %v1150_v1 = vpop.f32.mrf.mxu0 }
 0x15e   : > { %v1375_v60 = vpop.f32.mrf.mxu1 }
 0x15f   : > { %v2880_v61 = vpop.f32.mrf.mxu0 }
 0x160   : > { %v2916_v62 = vpop.f32.mrf.mxu1  ;;  %v1388_v61 = vadd.f32 %v1370_v56, %v1163_v41 }
 0x161   : > { %v1153_v54 = vpop.f32.mrf.mxu0  ;;  %v1164_v62 = vadd.f32 %v1150_v1, %v3767_v9 }
 0x162   : > { %v1378_v63 = vpop.f32.mrf.mxu1 }
 0x163   : > { %v2881_v52 = vpop.f32.mrf.mxu0 }
 0x164   : > { %v2917_v3 = vpop.f32.mrf.mxu1 }
 0x165   : > { %v1568_v4 = vpop.f32.mrf.mxu0 }
 0x166   : > { %v1793_v59 = vpop.f32.mrf.mxu1  ;;  %v1606_v50 = vadd.f32 %v1568_v4, %v3769_v19  ;;  %v1389_v4 = vadd.f32 %v1375_v60, %v1164_v62 }
 0x167   : > { %v2936_v5 = vpop.f32.mrf.mxu0 }
 0x168   : > { %v2972_v7 = vpop.f32.mrf.mxu1  ;;  %v1831_v63 = vadd.f32 %v1793_v59, %v1606_v50 }
 0x169   : > { %v1571_v10 = vpop.f32.mrf.mxu0 }
 0x16a   : > { %v1796_v0 = vpop.f32.mrf.mxu1  ;;  %v1607_v58 = vadd.f32 %v1571_v10, %v3771_v25 }
 0x16b   : > { %v2937_v11 = vpop.f32.mrf.mxu0 }
 0x16c   : > { %v2973_v13 = vpop.f32.mrf.mxu1  ;;  %v1832_v7 = vadd.f32 %v1796_v0, %v1607_v58 }
 0x16d   : > { %v1576_v14 = vpop.f32.mrf.mxu0 }
 0x16e   : > { %v3781_v15 = vpop.f32.mrf.mxu1  ;;  %v1608_v9 = vadd.f32 %v1576_v14, %v3773_v31 }
 0x16f   : > { %v2940_v16 = vpop.f32.mrf.mxu0 }
 0x170   : > { %v2976_v18 = vpop.f32.mrf.mxu1  ;;  %v1833_v31 = vadd.f32 %v3781_v15, %v1608_v9 }
 0x171   : > { %v1579_v6 = vpop.f32.mrf.mxu0 }
 0x172   : > { %v3783_v20 = vpop.f32.mrf.mxu1  ;;  %v1609_v14 = vadd.f32 %v1579_v6, %v3775_v38 }
 0x173   : > { %v2941_v21 = vpop.f32.mrf.mxu0 }
 0x174   : > { %v2977_v22 = vpop.f32.mrf.mxu1  ;;  %v1834_v38 = vadd.f32 %v3783_v20, %v1609_v14 }
 0x175   : > { %v3785_v23 = vpop.f32.mrf.mxu0 }
 0x176   : > { %v3787_v12 = vpop.f32.mrf.mxu1  ;;  %v1610_v6 = vadd.f32 %v3785_v23, %v3777_v43 }
 0x177   : > { %v2944_v26 = vpop.f32.mrf.mxu0 }
 0x178   : > { %v2980_v27 = vpop.f32.mrf.mxu1  ;;  %v1835_v50 = vadd.f32 %v3787_v12, %v1610_v6 }
 0x179   : > { %v3789_v28 = vpop.f32.mrf.mxu0 }
 0x17a   : > { %v3791_v29 = vpop.f32.mrf.mxu1  ;;  %v1611_v43 = vadd.f32 %v3789_v28, %v3779_v49 }
 0x17b   : > { %v2945_v8 = vpop.f32.mrf.mxu0 }
 0x17c   : > { %v2981_v17 = vpop.f32.mrf.mxu1  ;;  %v1836_v62 = vadd.f32 %v3791_v29, %v1611_v43 }
 0x17d   : > { %v1592_v24 = vpop.f32.mrf.mxu0 }
 0x17e   : > { %v1817_v32 = vpop.f32.mrf.mxu1  ;;  %v1612_v53 = vadd.f32 %v1592_v24, %v1387_v46 }
 0x17f   : > { %v2948_v34 = vpop.f32.mrf.mxu0 }
 0x180   : > { %v2984_v37 = vpop.f32.mrf.mxu1  ;;  %v1837_v52 = vadd.f32 %v1817_v32, %v1612_v53 }
 0x181   : > { %v1595_v39 = vpop.f32.mrf.mxu0 }
 0x182   : > { %v1820_v30 = vpop.f32.mrf.mxu1  ;;  %v1613_v3 = vadd.f32 %v1595_v39, %v1388_v61 }
 0x183   : > { %v2949_v36 = vpop.f32.mrf.mxu0 }
 0x184   : > { %v2985_v42 = vpop.f32.mrf.mxu1  ;;  %v1838_v59 = vadd.f32 %v1820_v30, %v1613_v3 }
 0x185   : > { %v1600_v44 = vpop.f32.mrf.mxu0 }
 0x186   : > { %v1825_v35 = vpop.f32.mrf.mxu1  ;;  %v1614_v10 = vadd.f32 %v1600_v44, %v1389_v4 }
 0x187   : > { %v2952_v48 = vpop.f32.mrf.mxu0 }
 0x188   : > { %v2988_v45 = vpop.f32.mrf.mxu1  ;;  %v1839_v8 = vadd.f32 %v1825_v35, %v1614_v10 }
 0x189   : > { %v1603_v57 = vpop.f32.mrf.mxu0 }
 0x18a   : > { %v1828_v47 = vpop.f32.mrf.mxu1 }
 0x18b   : > { %v2953_v54 = vpop.f32.mrf.mxu0 }
 0x18c   : > { %v2989_v33 = vpop.f32.mrf.mxu1 }
 0x18d   : > { %v1958_v51 = vpop.f32.mrf.mxu0 }
 0x18e   : > { %v1996_v19 = vadd.f32 %v1958_v51, %v1831_v63  ;;  %v1982_v55 = vpop.f32.mrf.mxu1 }
 0x18f   : > { %v2002_v5 = vadd.f32 %v1982_v55, %v1837_v52  ;;  %v3008_v56 = vpop.f32.mrf.mxu0 }
 0x190   : > { %v3805_v1 = vadd.f32 %v3801_v2, %v1996_v19  ;;  %v3020_v25 = vpop.f32.mrf.mxu1 }
 0x191   : > { %v3808_v11 = vadd.f32 %v3801_v2, %v2002_v5  ;;  %v1961_v13 = vpop.f32.mrf.mxu0 }
 0x192   : > { %v2533_v16 = vmul.f32 -1.442695, %v3805_v1  ;;  %v1997_v18 = vadd.f32 %v1961_v13, %v1832_v7  ;;  %v1985_v21 = vpop.f32.mrf.mxu1 }
 0x193   : > { %v2539_v60 = vmul.f32 -1.442695, %v3808_v11  ;;  %v2003_v22 = vadd.f32 %v1985_v21, %v1838_v59  ;;  %v3009_v0 = vpop.f32.mrf.mxu0 }
 0x194   : > { %3183 = vpow2.f32 %v2533_v16  ;;  %v3815_v26 = vadd.f32 %v3801_v2, %v1997_v18  ;;  %v3021_v27 = vpop.f32.mrf.mxu1 }
 0x195   : > { %3185 = vpow2.f32 %v2539_v60  ;;  %v3818_v17 = vadd.f32 %v3801_v2, %v2003_v22  ;;  %v1966_v24 = vpop.f32.mrf.mxu0 }
 0x196   : > { %v2534_v32 = vmul.f32 -1.442695, %v3815_v26  ;;  %v1998_v34 = vadd.f32 %v1966_v24, %v1833_v31  ;;  %v1990_v37 = vpop.f32.mrf.mxu1 }
 0x197   : > { %v2540_v39 = vmul.f32 -1.442695, %v3818_v17  ;;  %v2004_v15 = vadd.f32 %v1990_v37, %v1839_v8  ;;  %v3012_v30 = vpop.f32.mrf.mxu0 }
 0x198   : > { %3187 = vpow2.f32 %v2534_v32  ;;  %v3826_v40 = vadd.f32 %v3801_v2, %v1998_v34  ;;  %v3024_v36 = vpop.f32.mrf.mxu1 }
 0x199   : > { %3189 = vpow2.f32 %v2540_v39  ;;  %v3829_v42 = vadd.f32 %v3801_v2, %v2004_v15  ;;  %v1969_v44 = vpop.f32.mrf.mxu0 }
 0x19a   : > { %v2535_v35 = vmul.f32 -1.442695, %v3826_v40  ;;  %v1999_v46 = vadd.f32 %v1969_v44, %v1834_v38  ;;  %v1993_v41 = vpop.f32.mrf.mxu1 }
 0x19b   : > { %v2541_v48 = vmul.f32 -1.442695, %v3829_v42  ;;  %v3013_v20 = vpop.f32.mrf.mxu0 }
 0x19c   : > { %3191 = vpow2.f32 %v2535_v35  ;;  %v3837_v23 = vadd.f32 %v3801_v2, %v1999_v46  ;;  %v3025_v45 = vpop.f32.mrf.mxu1 }
 0x19d   : > { %3193 = vpow2.f32 %v2541_v48  ;;  %v1974_v53 = vpop.f32.mrf.mxu0 }
 0x19e   : > { %v2536_v57 = vmul.f32 -1.442695, %v3837_v23  ;;  %v2000_v47 = vadd.f32 %v1974_v53, %v1835_v50 }
 0x19f   : > { %v3016_v61 = vpop.f32.mrf.mxu0 }
 0x1a0   : > { %3195 = vpow2.f32 %v2536_v57  ;;  %v2016_v54 = vadd.f32 %v3801_v2, %v2000_v47 }
 0x1a1   : > { %v3184_v12 = vpop.eup %3183  ;;  %v1977_v63 = vpop.f32.mrf.mxu0 }
 0x1a2   : > { %v3186_v58 = vpop.eup %3185  ;;  %v2048_v49 = vadd.f32 1.0, %v3184_v12  ;;  %v2537_v28 = vmul.f32 -1.442695, %v2016_v54  ;;  %v2001_v33 = vadd.f32 %v1977_v63, %v1836_v62 }
 0x1a3   : > { %v2054_v52 = vadd.f32 1.0, %v3186_v58  ;;  %v3017_v3 = vpop.f32.mrf.mxu0 }
 0x1a4   : > { %v2017_v51 = vadd.f32 %v3801_v2, %v2001_v33  ;;  %3197 = vrcp.f32 %v2048_v49 }
 0x1a5   : > { %v3188_v19 = vpop.eup %3187  ;;  %3199 = vpow2.f32 %v2537_v28 }
 0x1a6   : > { %v3190_v55 = vpop.eup %3189  ;;  %v2049_v4 = vadd.f32 1.0, %v3188_v19  ;;  %v2538_v5 = vmul.f32 -1.442695, %v2017_v51  ;;  %3201 = vrcp.f32 %v2054_v52 }
 0x1a7   : > { %v2055_v29 = vadd.f32 1.0, %v3190_v55 }
 0x1a8   : > { %3203 = vrcp.f32 %v2049_v4 }
 0x1a9   : > { %v3192_v56 = vpop.eup %3191  ;;  %3205 = vrcp.f32 %v2055_v29 }
 0x1aa   : > { %v3194_v7 = vpop.eup %3193  ;;  %v2050_v9 = vadd.f32 1.0, %v3192_v56  ;;  %3207 = vpow2.f32 %v2538_v5 }
 0x1ab   : > { %v2056_v25 = vadd.f32 1.0, %v3194_v7 }
 0x1ad   : > { %v3196_v59 = vpop.eup %3195  ;;  %3209 = vrcp.f32 %v2056_v25 }
 0x1ae   : > { %3211 = vrcp.f32 %v2050_v9  ;;  %v2051_v2 = vadd.f32 1.0, %v3196_v59 }
 0x1b0   : > { %3213 = vrcp.f32 %v2051_v2 }
 0x1b1   : > { %v3198_v10 = vpop.eup %3197 }
 0x1b2   : > { %v3200_v13 = vpop.eup %3199  ;;  %v2075_v22 = vmul.f32 %v3198_v10, %v3805_v1 }
 0x1b3   : > { %v3202_v16 = vpop.eup %3201  ;;  %v2052_v18 = vadd.f32 1.0, %v3200_v13 }
 0x1b4   : > { %v2081_v14 = vmul.f32 %v3202_v16, %v3808_v11 }
 0x1b5   : > { %v3204_v21 = vpop.eup %3203  ;;  %3215 = vrcp.f32 %v2052_v18 }
 0x1b6   : > { %v3206_v60 = vpop.eup %3205  ;;  %v2076_v0 = vmul.f32 %v3204_v21, %v3815_v26 }
 0x1b7   : > { %v3208_v31 = vpop.eup %3207  ;;  %v2082_v27 = vmul.f32 %v3206_v60, %v3818_v17 }
 0x1b8   : > { %v2565_v8 = vpack.c.bf16 %v2076_v0, %v2075_v22  ;;  %v2053_v24 = vadd.f32 1.0, %v3208_v31 }
 0x1b9   : > { %v2580_v32 = vpack.c.bf16 %v2082_v27, %v2081_v14 }
 0x1ba   : > { %v3210_v34 = vpop.eup %3209  ;;  %2566 = vst [vmem:[%s221_s8] sm:$0xff] %v2565_v8   ;;  %3217 = vrcp.f32 %v2053_v24 }
 0x1bb   : > { %v3212_v37 = vpop.eup %3211  ;;  %2584 = vst [vmem:[%s221_s8 + $0x18] sm:$0xff] %v2580_v32   ;;  %v2083_v1 = vmul.f32 %v3210_v34, %v3829_v42 }
 0x1bc   : > { %v2077_v11 = vmul.f32 %v3212_v37, %v3826_v40 }
 0x1bd   : > { %v3214_v26 = vpop.eup %3213  ;;  %v2561_v39 = vpack.c.bf16 %v2083_v1, %v2083_v1 }
 0x1be   : > { %v2078_v15 = vmul.f32 %v3214_v26, %v3837_v23 }
 0x1bf   : > { %2129 = vst [vmem:[%s221_s8 + $0x20] sm:$0xf] %v2561_v39 }
 0x1c0   : > { %v2570_v30 = vpack.c.bf16 %v2078_v15, %v2077_v11 }
 0x1c2   : > { %2582 = vst [vmem:[%s221_s8 + $0x8] sm:$0xff] %v2570_v30   ;;  %v3216_v17 = vpop.eup %3215 }
 0x1c3   : > { %v2079_v6 = vmul.f32 %v3216_v17, %v2016_v54 }
 0x1c7   : > { %v3218_v38 = vpop.eup %3217 }
 0x1c8   : > { %v2080_v36 = vmul.f32 %v3218_v38, %v2017_v51 }
 0x1ca   : > { %v2575_v44 = vpack.c.bf16 %v2080_v36, %v2079_v6 }
 0x1cc   : > { %2583 = vst [vmem:[%s221_s8 + $0x10] sm:$0xff] %v2575_v44  }
 0x1cd PF: > { %s13_s14 = sadd.s32 1, %s3241_s14   ;;  %s3867_s12 = smov %s3237_s13 }
 0x1ce   : > { %p10_p5 = scmp.ge.s32.totalorder %s13_s14, 4   ;;  %s3868_s13 = smov %s3870_s15 }
 0x1d0   :  { %12 = sbr.rel (!%p10_p5) target bundleno = 2 (0x2), region = 79 }

// kernel: _lambda_.16
= control target key start
LH: loop header
LB: loop body
LE: loop exit
PB: predicated region body
PF: predicated region fallthrough
CT: control target
= control target key end

     0   :  { %s3129_s12 = smov 0   ;;  %s3131_s13 = smov 0   ;;  %s3823_s0 = inlined_call_operand.vmem [shape: bf16[2,1,110,128], index: 0, kind: input, shape index: {}]   ;;  %s3824_s1 = inlined_call_operand.vmem [shape: bf16[9,128,128], index: 1, kind: input, shape index: {}]   ;;  %s3825_s2 = inlined_call_operand.vmem [shape: f32[1,128], index: 2, kind: input, shape index: {}]   ;;  %s3826_s3 = inlined_call_operand.vmem [shape: bf16[2,80,128], index: 3, kind: output, shape index: {}]  }
   0x1   :  { %s3133_s14 = smov 0  }
   0x2 LB: > { %s25_s15 = sadd.s32 1, %s3101_s13  ;;  %p2175_p0 = scmp.ge.s32.totalorder %s3105_s14, 1  ;;  %s3105_s14 = sphi %s3133_s14, %s13_s14   ;;  %s3101_s13 = sphi %s3131_s13, %s3828_s13   ;;  %s3097_s12 = sphi %s3129_s12, %s3827_s12  }
   0x3   : > { %p27_p1 = scmp.ge.s32.totalorder %s25_s15, 2  ;;  %p168_p2 = scmp.lt.s32.totalorder %s3105_s14, 3 }
   0x5   : > { %s3830_s15 = smov (%p27_p1, %s25_s15), 0  ;;  %p169_p3 = pnand %p2175_p0, %p168_p2 }
   0x6   : > { %p202_p4 = scmp.lt.s32.totalorder (!%p169_p3), %s3097_s12, 1 }
   0x7   : > { %172 = sbr.rel (%p169_p3) target bundleno = 461 (0x1cd), region = 32 }
   0xc   : > { %v2948_v0 = vld [vmem:[%s3824_s1 + $0x78] sm:$0xff]   ;;  %v3107_v1 = vmov 0.0   ;;  %v2950_v3 = vld [vmem:[%s3824_s1 + $0x70] sm:$0xff]   ;;  %vm3108_vm0 = vmmov 0   ;;  %s3832_s12 = smov (!%p202_p4, %s3097_s12), 1  ;;  %v2952_v5 = vld [vmem:[%s3824_s1 + $0x68] sm:$0xff]  }
   0xd   : > { %2580 = vmatprep.subr.bf16.mxu0 %v3107_v1  ;;  %2616 = vmatprep.subr.bf16.mxu1 %v3107_v1  ;;  %v2949_v2 = vld [vmem:[%s3824_s1 + $0x38] sm:$0xff]   ;;  %v2951_v4 = vld [vmem:[%s3824_s1 + $0x30] sm:$0xff]   ;;  %v2953_v6 = vld [vmem:[%s3824_s1 + $0x28] sm:$0xff]   ;;  %s2920_s28 = smul.u32 56, %s3832_s12  ;;  %vm295_vm1 = vsmask.f32 7424 }
   0xe   : > { %2581 = vmatpush3.bf16.msra.mxu0 %v2948_v0  ;;  %2596 = vmatprep.mubr.msk.bf16.mxu0 %vm3108_vm0, %v3107_v1  ;;  %v2954_v7 = vld [vmem:[%s3824_s1 + $0x60] sm:$0xff]   ;;  %v2956_v9 = vld [vmem:[%s3824_s1 + $0x58] sm:$0xff]   ;;  %v2958_v13 = vld [vmem:[%s3824_s1 + $0x50] sm:$0xff]   ;;  %vm613_vm2 = vcmask 1046528   ;;  %vm985_vm3 = vsmask.f32 6400 }
   0xf   : > { %2617 = vmatpush3.bf16.msra.mxu1 %v2949_v2  ;;  %2582 = vmatprep.subr.bf16.mxu0 %v3107_v1  ;;  %v2955_v8 = vld [vmem:[%s3824_s1 + $0x20] sm:$0xff]   ;;  %s3189_s8 = scalar_lea.vmem %s3823_s0, %s2920_s28  ;;  %v2957_v10 = vld [vmem:[%s3824_s1 + $0x18] sm:$0xff]   ;;  %v2959_v16 = vld [vmem:[%s3824_s1 + $0x10] sm:$0xff]   ;;  %vm1196_vm4 = vcmask 1045504   ;;  %vm1568_vm5 = vsmask.f32 5376 }
  0x10   : > { %2618 = vmatprep.subr.bf16.mxu1 %v3107_v1  ;;  %2632 = vmatprep.mubr.msk.bf16.mxu1 %vm3108_vm0, %v3107_v1  ;;  %v223_v11 = vld [vmem:[%s3189_s8] sm:$0xf]  ;;  %v3201_v12 = vld [vmem:[%s3189_s8 + $0x4] sm:$0xf]  ;;  %v3208_v15 = vld [vmem:[%s3189_s8 + $0x8] sm:$0xff]   ;;  %vm1779_vm6 = vcmask 1044480  }
  0x11   : > { %v2194_v14 = vcombine.low %v223_v11, %v3201_v12  ;;  %v2960_v18 = vld [vmem:[%s3824_s1 + $0x48] sm:$0xff]   ;;  %v304_v21 = vshll.u32 %v3208_v15, 16  ;;  %v2962_v23 = vld [vmem:[%s3824_s1 + $0x40] sm:$0xff]   ;;  %v3231_v27 = vld [vmem:[%s3189_s8 + $0x10] sm:$0xff]   ;;  %v308_v30 = vshrl.u32 %v3208_v15, 16  ;;  %s2921_s5 = smul.u32 40, %s3832_s12 }
  0x12   : > { %2583 = vmatpush3.bf16.msra.mxu0 %v2950_v3  ;;  %v2961_v22 = vld [vmem:[%s3824_s1 + $0x8] sm:$0xff]   ;;  %v2963_v24 = vld [vmem:[%s3824_s1] sm:$0xff]   ;;  %v2966_v28 = vld [vmem:[%s3824_s1 + $0xb8] sm:$0xff]   ;;  %v312_v31 = vshll.u32 %v3231_v27, 16  ;;  %v316_v41 = vshrl.u32 %v3231_v27, 16 }
  0x13   : > { %2619 = vmatpush3.bf16.msra.mxu1 %v2951_v4  ;;  %2584 = vmatprep.subr.bf16.mxu0 %v3107_v1  ;;  %v299_v17 = vshll.u32 %v2194_v14, 16  ;;  %v297_v19 = vshrl.u32 %v2194_v14, 16  ;;  %v306_v26 = vrot.slane %v304_v21, 1  ;;  %v2969_v32 = vld [vmem:[%s3824_s1 + $0xf8] sm:$0xff]   ;;  %v2967_v34 = vld [vmem:[%s3824_s1 + $0xb0] sm:$0xff]   ;;  %v2970_v40 = vld [vmem:[%s3824_s1 + $0xa8] sm:$0xff]   ;;  %s221_s9 = scalar_lea.vmem %s3826_s3, %s2921_s5 }
  0x14   : > { %2620 = vmatprep.subr.bf16.mxu1 %v3107_v1  ;;  %v3247_v33 = vld [vmem:[%s3189_s8 + $0x18] sm:$0xff]   ;;  %v314_v36 = vrot.slane %v312_v31, 1  ;;  %v2971_v37 = vld [vmem:[%s3824_s1 + $0xf0] sm:$0xff]   ;;  %v2974_v42 = vld [vmem:[%s3824_s1 + $0xe8] sm:$0xff]   ;;  %v617_v21 = vrot.slane %v3231_v27, 1 }
  0x15   : > { %v301_v20 = vrot.slane %v299_v17, 1  ;;  %v310_v35 = vor.u32 %v308_v30, %v306_v26  ;;  %v320_v38 = vshll.u32 %v3247_v33, 16  ;;  %v2973_v44 = vld [vmem:[%s3824_s1 + $0xa0] sm:$0xff]   ;;  %v2975_v48 = vld [vmem:[%s3824_s1 + $0x98] sm:$0xff]   ;;  %v324_v50 = vshrl.u32 %v3247_v33, 16  ;;  %v2979_v56 = vld [vmem:[%s3824_s1 + $0x90] sm:$0xff]  }
  0x16   : > { %2585 = vmatpush3.bf16.msra.mxu0 %v2952_v5  ;;  %v3276_v45 = vld [vmem:[%s3189_s8 + $0x20] sm:$0xff]   ;;  %v318_v46 = vor.u32 %v316_v41, %v314_v36  ;;  %v2978_v52 = vld [vmem:[%s3824_s1 + $0xd8] sm:$0xff]   ;;  %v3299_v53 = vld [vmem:[%s3189_s8 + $0x28] ss:$0 sps:$4 sm:$0x11]  }
  0x17   : > { %2621 = vmatpush3.bf16.msra.mxu1 %v2953_v6  ;;  %2586 = vmatprep.subr.bf16.mxu0 %v3107_v1  ;;  %v302_v25 = vor.u32 %v301_v20, %v297_v19  ;;  %v315_v39 = vsel %vm295_vm1, %v310_v35, %v314_v36  ;;  %v322_v43 = vrot.slane %v320_v38, 1  ;;  %v2976_v47 = vld [vmem:[%s3824_s1 + $0xe0] sm:$0xff]   ;;  %v328_v51 = vshll.u32 %v3276_v45, 16  ;;  %v2980_v57 = vld [vmem:[%s3824_s1 + $0xd0] sm:$0xff]   ;;  %v2981_v61 = vld [vmem:[%s3824_s1 + $0x88] sm:$0xff]  }
  0x18   : > { %2622 = vmatprep.subr.bf16.mxu1 %v3107_v1  ;;  %v332_v59 = vshrl.u32 %v3276_v45, 16  ;;  %v336_v60 = vshll.u32 %v3299_v53, 16  ;;  %v2983_v62 = vld [vmem:[%s3824_s1 + $0xc8] sm:$0xff]   ;;  %v2984_v63 = vld [vmem:[%s3824_s1 + $0x80] sm:$0xff]   ;;  %v2989_v17 = vld [vmem:[%s3824_s1 + $0x138] sm:$0xff]   ;;  %v621_v38 = vrot.slane %v3276_v45, 1 }
  0x19   : > { %v307_v29 = vsel %vm295_vm1, %v302_v25, %v306_v26  ;;  %v323_v49 = vsel %vm295_vm1, %v318_v46, %v322_v43  ;;  %v326_v54 = vor.u32 %v324_v50, %v322_v43  ;;  %v330_v55 = vrot.slane %v328_v51, 1  ;;  %v2985_v3 = vld [vmem:[%s3824_s1 + $0xc0] sm:$0xff]   ;;  %v3341_v6 = vld [vmem:[%s3189_s8 + $0x8] sm:$0xf]  ;;  %v3368_v19 = vld [vmem:[%s3189_s8 + $0x14] sm:$0xff]  }
  0x1a   : > { %2587 = vmatpush3.bf16.msra.mxu0 %v2954_v7  ;;  %v338_v2 = vrot.slane %v336_v60, 1  ;;  %v592_v4 = vld [vmem:[%s3189_s8] sm:$0xe]  ;;  %v761_v5 = vld [vmem:[%s3189_s8 + $0x4] sm:$0xe]  ;;  %v2990_v20 = vld [vmem:[%s3824_s1 + $0x130] sm:$0xff]  }
  0x1b   : > { %2623 = vmatpush3.bf16.msra.mxu1 %v2955_v8  ;;  %2588 = vmatprep.subr.bf16.mxu0 %v3107_v1  ;;  %v331_v58 = vsel %vm295_vm1, %v326_v54, %v330_v55  ;;  %v334_v0 = vor.u32 %v332_v59, %v330_v55  ;;  %v2232_v8 = vcombine.low %v592_v4, %v3201_v12  ;;  %v615_v12 = vrot.slane %v3208_v15, 1  ;;  %v2993_v25 = vld [vmem:[%s3824_s1 + $0x128] sm:$0xff]   ;;  %v2996_v30 = vld [vmem:[%s3824_s1 + $0x120] sm:$0xff]   ;;  %v3003_v41 = vld [vmem:[%s3824_s1 + $0x150] sm:$0xff]  }
  0x1c   : > { %2624 = vmatprep.subr.bf16.mxu1 %v3107_v1  ;;  %v3421_v36 = vld [vmem:[%s3189_s8 + $0x24] sm:$0xff]   ;;  %v3005_v43 = vld [vmem:[%s3189_s8 + $0x2c] ss:$0 sps:$4 sm:$0x11]  }
  0x1d   : > { %v339_v7 = vsel %vm295_vm1, %v334_v0, %v338_v2  ;;  %v614_v11 = vrot.slane %v2232_v8, 1  ;;  %v3006_v46 = vld [vmem:[%s3824_s1 + $0x148] sm:$0xff]   ;;  %v3008_v54 = vld [vmem:[%s3824_s1 + $0x140] sm:$0xff]   ;;  %v1004_v2 = vshrl.u32 %v3368_v19, 16 }
  0x1e   : > { %2589 = vmatpush3.bf16.msra.mxu0 %v2956_v9  ;;  %v3347_v9 = vcombine.low %v761_v5, %v3341_v6  ;;  %v1175_v55 = vld [vmem:[%s3189_s8 + $0x4] sm:$0xc] }
  0x1f   : > { %2625 = vmatpush3.bf16.msra.mxu1 %v2957_v10  ;;  %2590 = vmatprep.subr.bf16.mxu0 %v3107_v1  ;;  %v3350_v10 = vld [vmem:[%s3189_s8 + $0xc] sm:$0xff]   ;;  %v1006_v8 = vrot.slane %v1004_v2, 1 }
  0x20   : > { %2626 = vmatprep.subr.bf16.mxu1 %v3107_v1  ;;  %v995_v50 = vshrl.u32 %v3350_v10, 16  ;;  %v998_v51 = vshll.u32 %v3350_v10, 16  ;;  %v1198_v5 = vrot.slane %v3350_v10, 2 }
  0x22   : > { %2591 = vmatpush3.bf16.msra.mxu0 %v2958_v13  ;;  %v817_v13 = vrot.slane %v3347_v9, 1  ;;  %v997_v59 = vrot.slane %v995_v50, 1  ;;  %v1000_v60 = vrot.slane %v998_v51, 2  ;;  %v3566_v51 = vld [vmem:[%s3189_s8 + $0x10] sm:$0xff]  }
  0x23   : > { %2627 = vmatpush3.bf16.msra.mxu1 %v2959_v16  ;;  %2592 = vmatprep.subr.bf16.mxu0 %v3107_v1  ;;  %v616_v16 = vsel %vm613_vm2, %v614_v11, %v615_v12 }
  0x24   : > { %2628 = vmatprep.subr.bf16.mxu1 %v3107_v1  ;;  %v1001_v0 = vor.u32 %v1000_v60, %v997_v59  ;;  %v1581_v59 = vshll.u32 %v3566_v51, 16  ;;  %v3026_v60 = vld [vmem:[%s3824_s1 + $0x1c0] sm:$0xff]  }
  0x26   : > { %2593 = vmatpush3.bf16.msra.mxu0 %v2960_v18 }
  0x27   : > { %2629 = vmatpush3.bf16.msra.mxu1 %v2961_v22  ;;  %2594 = vmatprep.subr.bf16.mxu0 %v3107_v1  ;;  %v820_v22 = vrot.slane %v3368_v19, 1 }
  0x28   : > { %2630 = vmatprep.subr.bf16.mxu1 %v3107_v1 }
  0x2a   : > { %2595 = vmatpush3.bf16.msra.mxu0 %v2962_v23  ;;  %v2994_v23 = vld [vmem:[%s3824_s1 + $0x170] sm:$0xff]  }
  0x2b   : > { %2631 = vmatpush3.bf16.msra.mxu1 %v2963_v24  ;;  %2652 = vmatprep.subr.bf16.mxu0 %v3107_v1  ;;  %v618_v24 = vsel %vm613_vm2, %v615_v12, %v617_v21  ;;  %v3012_v12 = vld [vmem:[%s3824_s1 + $0x1f8] sm:$0xff]  }
  0x2c   : > { %2688 = vmatprep.subr.bf16.mxu1 %v3107_v1 }
  0x2d   : > { %2597 = vmatmul.mubr.bf16.vlgmr.msra.gmra.mxu0 %v307_v29  ;;  %v619_v29 = vrot.slane %v3247_v33, 1 }
  0x2e   : > { %2633 = vmatmul.mubr.bf16.vlgmr.msra.gmra.mxu1 %v2194_v14  ;;  %2653 = vmatpush3.bf16.msra.mxu0 %v2966_v28  ;;  %v818_v14 = vrot.slane %v3350_v10, 1  ;;  %v2997_v28 = vld [vmem:[%s3824_s1 + $0x168] sm:$0xff]   ;;  %v3011_v10 = vld [vmem:[%s3824_s1 + $0x1b0] sm:$0xff]  }
  0x2f   : > { %2654 = vmatprep.subr.bf16.mxu0 %v3107_v1  ;;  %2600 = vmatprep.mubr.msk.bf16.mxu0 %vm3108_vm0, %v3107_v1 }
  0x30   : > { %2636 = vmatprep.mubr.msk.bf16.mxu1 %vm3108_vm0, %v3107_v1  ;;  %2689 = vmatpush3.bf16.msra.mxu1 %v2969_v32  ;;  %v819_v18 = vsel %vm613_vm2, %v817_v13, %v818_v14  ;;  %v821_v26 = vsel %vm613_vm2, %v818_v14, %v820_v22  ;;  %v2999_v32 = vld [vmem:[%s3824_s1 + $0x160] sm:$0xff]  }
  0x31   : > { %2690 = vmatprep.subr.bf16.mxu1 %v3107_v1 }
  0x32   : > { %2655 = vmatpush3.bf16.msra.mxu0 %v2967_v34  ;;  %v2998_v34 = vld [vmem:[%s3824_s1 + $0x118] sm:$0xff]  }
  0x33   : > { %2656 = vmatprep.subr.bf16.mxu0 %v3107_v1 }
  0x34   : > { %2691 = vmatpush3.bf16.msra.mxu1 %v2971_v37  ;;  %v3001_v37 = vld [vmem:[%s3824_s1 + $0x158] sm:$0xff]  }
  0x35   : > { %2601 = vmatmul.mubr.bf16.gmra.mxu0 %v315_v39  ;;  %2692 = vmatprep.subr.bf16.mxu1 %v3107_v1  ;;  %v3002_v39 = vld [vmem:[%s3824_s1 + $0x110] sm:$0xff]  }
  0x36   : > { %2637 = vmatmul.mubr.bf16.gmra.mxu1 %v3208_v15  ;;  %2657 = vmatpush3.bf16.msra.mxu0 %v2970_v40  ;;  %v2992_v15 = vld [vmem:[%s3824_s1 + $0x178] sm:$0xff]   ;;  %v824_v40 = vrot.slane %v3421_v36, 1 }
  0x37   : > { %2604 = vmatprep.mubr.msk.bf16.mxu0 %vm3108_vm0, %v3107_v1  ;;  %2640 = vmatprep.mubr.msk.bf16.mxu1 %vm3108_vm0, %v3107_v1 }
  0x38   : > { %2658 = vmatprep.subr.bf16.mxu0 %v3107_v1  ;;  %2693 = vmatpush3.bf16.msra.mxu1 %v2974_v42  ;;  %v622_v42 = vsel %vm613_vm2, %v619_v29, %v621_v38 }
  0x39   : > { %2694 = vmatprep.subr.bf16.mxu1 %v3107_v1 }
  0x3a   : > { %2659 = vmatpush3.bf16.msra.mxu0 %v2973_v44 }
  0x3b   : > { %2660 = vmatprep.subr.bf16.mxu0 %v3107_v1 }
  0x3c   : > { %2695 = vmatpush3.bf16.msra.mxu1 %v2976_v47  ;;  %v623_v47 = vrot.slane %v3299_v53, 1  ;;  %v3007_v53 = vld [vmem:[%s3824_s1 + $0x100] sm:$0xff]  }
  0x3d   : > { %2605 = vmatmul.mubr.bf16.gmra.mxu0 %v323_v49  ;;  %2696 = vmatprep.subr.bf16.mxu1 %v3107_v1  ;;  %v990_v49 = vshll.u32 %v3347_v9, 16 }
  0x3e   : > { %2641 = vmatmul.mubr.bf16.gmra.mxu1 %v3231_v27  ;;  %2661 = vmatpush3.bf16.msra.mxu0 %v2975_v48  ;;  %v3394_v27 = vld [vmem:[%s3189_s8 + $0x1c] sm:$0xff]   ;;  %v987_v48 = vshrl.u32 %v3347_v9, 16 }
  0x3f   : > { %2608 = vmatprep.mubr.msk.bf16.mxu0 %vm3108_vm0, %v3107_v1  ;;  %2644 = vmatprep.mubr.msk.bf16.mxu1 %vm3108_vm0, %v3107_v1  ;;  %v822_v31 = vrot.slane %v3394_v27, 1  ;;  %v1013_v14 = vshrl.u32 %v3394_v27, 16 }
  0x40   : > { %2662 = vmatprep.subr.bf16.mxu0 %v3107_v1  ;;  %2697 = vmatpush3.bf16.msra.mxu1 %v2978_v52  ;;  %v826_v52 = vrot.slane %v3005_v43, 1  ;;  %v3021_v43 = vld [vmem:[%s3824_s1 + $0x1d0] sm:$0xff]  }
  0x41   : > { %2698 = vmatprep.subr.bf16.mxu1 %v3107_v1  ;;  %v823_v35 = vsel %vm613_vm2, %v820_v22, %v822_v31  ;;  %v825_v44 = vsel %vm613_vm2, %v822_v31, %v824_v40 }
  0x42   : > { %2663 = vmatpush3.bf16.msra.mxu0 %v2979_v56  ;;  %v624_v56 = vsel %vm613_vm2, %v621_v38, %v623_v47 }
  0x43   : > { %2664 = vmatprep.subr.bf16.mxu0 %v3107_v1 }
  0x44   : > { %2699 = vmatpush3.bf16.msra.mxu1 %v2980_v57  ;;  %v989_v57 = vrot.slane %v987_v48, 1 }
  0x45   : > { %2609 = vmatmul.mubr.bf16.gmra.mxu0 %v331_v58  ;;  %2700 = vmatprep.subr.bf16.mxu1 %v3107_v1  ;;  %v992_v58 = vrot.slane %v990_v49, 2 }
  0x46   : > { %2645 = vmatmul.mubr.bf16.gmra.mxu1 %v3247_v33  ;;  %2612 = vmatprep.mubr.msk.bf16.mxu0 %vm3108_vm0, %v3107_v1  ;;  %v620_v33 = vsel %vm613_vm2, %v617_v21, %v619_v29  ;;  %v1015_v21 = vrot.slane %v1013_v14, 1  ;;  %v1202_v29 = vrot.slane %v3394_v27, 2 }
  0x47   : > { %2648 = vmatprep.mubr.msk.bf16.mxu1 %vm3108_vm0, %v3107_v1  ;;  %2665 = vmatpush3.bf16.msra.mxu0 %v2981_v61  ;;  %v827_v61 = vsel %vm613_vm2, %v824_v40, %v826_v52  ;;  %v3024_v52 = vld [vmem:[%s3824_s1 + $0x1c8] sm:$0xff]  }
  0x48   : > { %2701 = vmatpush3.bf16.msra.mxu1 %v2983_v62  ;;  %2666 = vmatprep.subr.bf16.mxu0 %v3107_v1  ;;  %v2312_v62 = vcombine.low %v1175_v55, %v3341_v6  ;;  %v3025_v55 = vld [vmem:[%s3824_s1 + $0x180] sm:$0xff]  }
  0x49   : > { %2702 = vmatprep.subr.bf16.mxu1 %v3107_v1 }
  0x4a   : > { %v1197_v4 = vrot.slane %v2312_v62, 2 }
  0x4b   : > { %2667 = vmatpush3.bf16.msra.mxu0 %v2984_v63  ;;  %v993_v63 = vor.u32 %v992_v58, %v989_v57  ;;  %v1578_v58 = vshrl.u32 %v3566_v51, 16 }
  0x4c   : > { %2703 = vmatpush3.bf16.msra.mxu1 %v2985_v3  ;;  %2724 = vmatprep.subr.bf16.mxu0 %v3107_v1  ;;  %v1007_v3 = vshll.u32 %v3368_v19, 16  ;;  %v1199_v11 = vsel %vm1196_vm4, %v1197_v4, %v1198_v5  ;;  %v3589_v4 = vld [vmem:[%s3189_s8 + $0x18] sm:$0xff]  }
  0x4d   : > { %2613 = vmatmul.mubr.bf16.gmra.mxu0 %v339_v7  ;;  %2760 = vmatprep.subr.bf16.mxu1 %v3107_v1  ;;  %v1002_v6 = vsel %vm985_vm3, %v993_v63, %v1001_v0  ;;  %v3010_v7 = vld [vmem:[%s3824_s1 + $0x1b8] sm:$0xff]   ;;  %v1580_v2 = vrot.slane %v1578_v58, 2 }
  0x4e   : > { %2649 = vmatmul.mubr.bf16.gmra.mxu1 %v3276_v45  ;;  %2668 = vmatprep.mubr.msk.bf16.mxu0 %vm3108_vm0, %v3107_v1  ;;  %v3004_v45 = vld [vmem:[%s3824_s1 + $0x108] sm:$0xff]   ;;  %v1009_v9 = vrot.slane %v1007_v3, 2  ;;  %v1583_v3 = vrot.slane %v1581_v59, 3 }
  0x4f   : > { %2704 = vmatprep.mubr.msk.bf16.mxu1 %vm3108_vm0, %v3107_v1 }
  0x50   : > { %v1010_v13 = vor.u32 %v1009_v9, %v1006_v8  ;;  %v1584_v8 = vor.u32 %v1583_v3, %v1580_v2  ;;  %v1587_v9 = vshrl.u32 %v3589_v4, 16 }
  0x52   : > { %v1589_v14 = vrot.slane %v1587_v9, 2 }
  0x55   : > { %2669 = vmatmul.mubr.bf16.vlgmr.msra.gmra.mxu0 %v616_v16  ;;  %v1016_v16 = vshll.u32 %v3394_v27, 16 }
  0x56   : > { %2705 = vmatmul.mubr.bf16.vlgmr.msra.gmra.mxu1 %v819_v18  ;;  %2725 = vmatpush3.bf16.msra.mxu0 %v2989_v17  ;;  %v1200_v17 = vrot.slane %v3368_v19, 2  ;;  %v3014_v18 = vld [vmem:[%s3824_s1 + $0x1f0] sm:$0xff]  }
  0x57   : > { %2726 = vmatprep.subr.bf16.mxu0 %v3107_v1  ;;  %2672 = vmatprep.mubr.msk.bf16.mxu0 %vm3108_vm0, %v3107_v1  ;;  %v1018_v22 = vrot.slane %v1016_v16, 2 }
  0x58   : > { %2708 = vmatprep.mubr.msk.bf16.mxu1 %vm3108_vm0, %v3107_v1  ;;  %2761 = vmatpush3.bf16.msra.mxu1 %v2992_v15  ;;  %v1011_v15 = vsel %vm985_vm3, %v1001_v0, %v1010_v13  ;;  %v1201_v19 = vsel %vm1196_vm4, %v1198_v5, %v1200_v17  ;;  %v1203_v27 = vsel %vm1196_vm4, %v1200_v17, %v1202_v29  ;;  %v3606_v17 = vld [vmem:[%s3189_s8 + $0x20] sm:$0xff]  }
  0x59   : > { %2762 = vmatprep.subr.bf16.mxu1 %v3107_v1 }
  0x5a   : > { %2727 = vmatpush3.bf16.msra.mxu0 %v2990_v20  ;;  %v3013_v20 = vld [vmem:[%s3824_s1 + $0x1a8] sm:$0xff]  }
  0x5b   : > { %2728 = vmatprep.subr.bf16.mxu0 %v3107_v1 }
  0x5c   : > { %2763 = vmatpush3.bf16.msra.mxu1 %v2994_v23  ;;  %v3016_v23 = vld [vmem:[%s3824_s1 + $0x1e8] sm:$0xff]  }
  0x5d   : > { %2673 = vmatmul.mubr.bf16.gmra.mxu0 %v618_v24  ;;  %2764 = vmatprep.subr.bf16.mxu1 %v3107_v1  ;;  %v1019_v24 = vor.u32 %v1018_v22, %v1015_v21  ;;  %v1596_v21 = vshrl.u32 %v3606_v17, 16  ;;  %v1599_v22 = vshll.u32 %v3606_v17, 16 }
  0x5e   : > { %2709 = vmatmul.mubr.bf16.gmra.mxu1 %v821_v26  ;;  %2729 = vmatpush3.bf16.msra.mxu0 %v2993_v25  ;;  %v3015_v25 = vld [vmem:[%s3824_s1 + $0x1a0] sm:$0xff]   ;;  %v1022_v26 = vshrl.u32 %v3421_v36, 16 }
  0x5f   : > { %2676 = vmatprep.mubr.msk.bf16.mxu0 %vm3108_vm0, %v3107_v1  ;;  %2712 = vmatprep.mubr.msk.bf16.mxu1 %vm3108_vm0, %v3107_v1  ;;  %v1020_v31 = vsel %vm985_vm3, %v1010_v13, %v1019_v24 }
  0x60   : > { %2730 = vmatprep.subr.bf16.mxu0 %v3107_v1  ;;  %2765 = vmatpush3.bf16.msra.mxu1 %v2997_v28  ;;  %v1025_v28 = vshll.u32 %v3421_v36, 16 }
  0x61   : > { %2766 = vmatprep.subr.bf16.mxu1 %v3107_v1 }
  0x62   : > { %2731 = vmatpush3.bf16.msra.mxu0 %v2996_v30  ;;  %v3018_v30 = vld [vmem:[%s3824_s1 + $0x1e0] sm:$0xff]  }
  0x63   : > { %2732 = vmatprep.subr.bf16.mxu0 %v3107_v1 }
  0x64   : > { %2767 = vmatpush3.bf16.msra.mxu1 %v2999_v32  ;;  %v3017_v32 = vld [vmem:[%s3824_s1 + $0x198] sm:$0xff]  }
  0x65   : > { %2677 = vmatmul.mubr.bf16.gmra.mxu0 %v620_v33  ;;  %2768 = vmatprep.subr.bf16.mxu1 %v3107_v1  ;;  %v1024_v33 = vrot.slane %v1022_v26, 1  ;;  %v1601_v26 = vrot.slane %v1599_v22, 3 }
  0x66   : > { %2713 = vmatmul.mubr.bf16.gmra.mxu1 %v823_v35  ;;  %2733 = vmatpush3.bf16.msra.mxu0 %v2998_v34  ;;  %v1027_v34 = vrot.slane %v1025_v28, 2  ;;  %v3023_v35 = vld [vmem:[%s3189_s8 + $0x2c] ss:$0 sps:$4 sm:$0x33]  }
  0x67   : > { %2680 = vmatprep.mubr.msk.bf16.mxu0 %vm3108_vm0, %v3107_v1  ;;  %2716 = vmatprep.mubr.msk.bf16.mxu1 %vm3108_vm0, %v3107_v1  ;;  %v1031_v40 = vshrl.u32 %v3023_v35, 16  ;;  %v3627_v28 = vld [vmem:[%s3189_s8 + $0x28] sm:$0xff]  }
  0x68   : > { %2734 = vmatprep.subr.bf16.mxu0 %v3107_v1  ;;  %2769 = vmatpush3.bf16.msra.mxu1 %v3001_v37  ;;  %v3019_v37 = vld [vmem:[%s3824_s1 + $0x1d8] sm:$0xff]   ;;  %v1028_v38 = vor.u32 %v1027_v34, %v1024_v33  ;;  %v1608_v33 = vshll.u32 %v3627_v28, 16 }
  0x69   : > { %2770 = vmatprep.subr.bf16.mxu1 %v3107_v1  ;;  %v1033_v47 = vrot.slane %v1031_v40, 1  ;;  %v1407_v40 = vrot.slane %v3627_v28, 2 }
  0x6a   : > { %2735 = vmatpush3.bf16.msra.mxu0 %v3002_v39  ;;  %v3020_v39 = vld [vmem:[%s3824_s1 + $0x190] sm:$0xff]  }
  0x6b   : > { %2736 = vmatprep.subr.bf16.mxu0 %v3107_v1 }
  0x6c   : > { %2771 = vmatpush3.bf16.msra.mxu1 %v3003_v41  ;;  %v1034_v41 = vshll.u32 %v3023_v35, 16 }
  0x6d   : > { %2681 = vmatmul.mubr.bf16.gmra.mxu0 %v622_v42  ;;  %2772 = vmatprep.subr.bf16.mxu1 %v3107_v1  ;;  %v1204_v42 = vrot.slane %v3421_v36, 2  ;;  %v3022_v36 = vld [vmem:[%s3824_s1 + $0x188] sm:$0xff]  }
  0x6e   : > { %2717 = vmatmul.mubr.bf16.gmra.mxu1 %v825_v44  ;;  %2684 = vmatprep.mubr.msk.bf16.mxu0 %vm3108_vm0, %v3107_v1  ;;  %v1344_v44 = vld [vmem:[%s3189_s8 + $0x8] sm:$0xc]  ;;  %v1036_v48 = vrot.slane %v1034_v41, 2  ;;  %v3037_v41 = vld [vmem:[%s3824_s1 + $0x210] sm:$0xff]  }
  0x6f   : > { %2720 = vmatprep.mubr.msk.bf16.mxu1 %vm3108_vm0, %v3107_v1  ;;  %2737 = vmatpush3.bf16.msra.mxu0 %v3004_v45  ;;  %v3555_v45 = vld [vmem:[%s3189_s8 + $0xc] sm:$0xf]  ;;  %v1205_v49 = vsel %vm1196_vm4, %v1202_v29, %v1204_v42  ;;  %v1405_v29 = vrot.slane %v3606_v17, 2 }
  0x70   : > { %2773 = vmatpush3.bf16.msra.mxu1 %v3006_v46  ;;  %2738 = vmatprep.subr.bf16.mxu0 %v3107_v1  ;;  %v1029_v46 = vsel %vm985_vm3, %v1019_v24, %v1028_v38  ;;  %v2337_v50 = vcombine.low %v1344_v44, %v3555_v45 }
  0x71   : > { %2774 = vmatprep.subr.bf16.mxu1 %v3107_v1 }
  0x72   : > { %v1573_v57 = vshll.u32 %v2337_v50, 16  ;;  %v1400_v5 = vrot.slane %v2337_v50, 2 }
  0x73   : > { %2739 = vmatpush3.bf16.msra.mxu0 %v3007_v53  ;;  %v1037_v53 = vor.u32 %v1036_v48, %v1033_v47  ;;  %v3039_v47 = vld [vmem:[%s3189_s8 + $0x30] ss:$0 sps:$4 sm:$0x33]  }
  0x74   : > { %2775 = vmatpush3.bf16.msra.mxu1 %v3008_v54  ;;  %2796 = vmatprep.subr.bf16.mxu0 %v3107_v1  ;;  %v1206_v54 = vrot.slane %v3023_v35, 2  ;;  %v1575_v0 = vrot.slane %v1573_v57, 3  ;;  %v3035_v35 = vld [vmem:[%s3824_s1 + $0x218] sm:$0xff]  }
  0x75   : > { %2685 = vmatmul.mubr.bf16.gmra.mxu0 %v624_v56  ;;  %2832 = vmatprep.subr.bf16.mxu1 %v3107_v1  ;;  %v1570_v56 = vshrl.u32 %v2337_v50, 16 }
  0x76   : > { %2721 = vmatmul.mubr.bf16.gmra.mxu1 %v827_v61  ;;  %2740 = vmatprep.mubr.msk.bf16.mxu0 %vm3108_vm0, %v3107_v1  ;;  %v1038_v61 = vsel %vm985_vm3, %v1028_v38, %v1037_v53  ;;  %v1207_v62 = vsel %vm1196_vm4, %v1204_v42, %v1206_v54  ;;  %v1610_v38 = vrot.slane %v1608_v33, 3  ;;  %v3041_v54 = vld [vmem:[%s3824_s1 + $0x200] sm:$0xff]  }
  0x77   : > { %2776 = vmatprep.mubr.msk.bf16.mxu1 %vm3108_vm0, %v3107_v1  ;;  %v1572_v63 = vrot.slane %v1570_v56, 2 }
  0x7d   : > { %2741 = vmatmul.mubr.bf16.vlgmr.msra.gmra.mxu0 %v1002_v6  ;;  %v1401_v6 = vrot.slane %v3566_v51, 2 }
  0x7e   : > { %2777 = vmatmul.mubr.bf16.vlgmr.msra.gmra.mxu1 %v1199_v11  ;;  %2797 = vmatpush3.bf16.msra.mxu0 %v3010_v7  ;;  %v1576_v7 = vor.u32 %v1575_v0, %v1572_v63  ;;  %v1590_v11 = vshll.u32 %v3589_v4, 16  ;;  %v1783_v0 = vrot.slane %v3589_v4, 3 }
  0x7f   : > { %2798 = vmatprep.subr.bf16.mxu0 %v3107_v1  ;;  %2744 = vmatprep.mubr.msk.bf16.mxu0 %vm3108_vm0, %v3107_v1 }
  0x80   : > { %2780 = vmatprep.mubr.msk.bf16.mxu1 %vm3108_vm0, %v3107_v1  ;;  %2833 = vmatpush3.bf16.msra.mxu1 %v3012_v12  ;;  %v1402_v12 = vsel %vm1196_vm4, %v1400_v5, %v1401_v6  ;;  %v1585_v13 = vsel %vm1568_vm5, %v1576_v7, %v1584_v8  ;;  %v1592_v16 = vrot.slane %v1590_v11, 3 }
  0x81   : > { %2834 = vmatprep.subr.bf16.mxu1 %v3107_v1 }
  0x82   : > { %2799 = vmatpush3.bf16.msra.mxu0 %v3011_v10  ;;  %v3029_v10 = vld [vmem:[%s3824_s1 + $0x238] sm:$0xff]  }
  0x83   : > { %2800 = vmatprep.subr.bf16.mxu0 %v3107_v1 }
  0x84   : > { %2835 = vmatpush3.bf16.msra.mxu1 %v3014_v18  ;;  %v3030_v18 = vld [vmem:[%s3824_s1 + $0x230] sm:$0xff]  }
  0x85   : > { %2745 = vmatmul.mubr.bf16.gmra.mxu0 %v1011_v15  ;;  %2836 = vmatprep.subr.bf16.mxu1 %v3107_v1  ;;  %v1403_v15 = vrot.slane %v3589_v4, 2 }
  0x86   : > { %2781 = vmatmul.mubr.bf16.gmra.mxu1 %v1201_v19  ;;  %2801 = vmatpush3.bf16.msra.mxu0 %v3013_v20  ;;  %v1593_v20 = vor.u32 %v1592_v16, %v1589_v14 }
  0x87   : > { %2748 = vmatprep.mubr.msk.bf16.mxu0 %vm3108_vm0, %v3107_v1  ;;  %2784 = vmatprep.mubr.msk.bf16.mxu1 %vm3108_vm0, %v3107_v1  ;;  %v1404_v19 = vsel %vm1196_vm4, %v1401_v6, %v1403_v15  ;;  %v1406_v34 = vsel %vm1196_vm4, %v1403_v15, %v1405_v29 }
  0x88   : > { %2802 = vmatprep.subr.bf16.mxu0 %v3107_v1  ;;  %2837 = vmatpush3.bf16.msra.mxu1 %v3016_v23  ;;  %v3032_v23 = vld [vmem:[%s3824_s1 + $0x228] sm:$0xff]   ;;  %v1594_v24 = vsel %vm1568_vm5, %v1584_v8, %v1593_v20 }
  0x89   : > { %2838 = vmatprep.subr.bf16.mxu1 %v3107_v1 }
  0x8a   : > { %2803 = vmatpush3.bf16.msra.mxu0 %v3015_v25  ;;  %v1598_v25 = vrot.slane %v1596_v21, 2 }
  0x8b   : > { %2804 = vmatprep.subr.bf16.mxu0 %v3107_v1 }
  0x8c   : > { %2839 = vmatpush3.bf16.msra.mxu1 %v3018_v30  ;;  %v3034_v30 = vld [vmem:[%s3824_s1 + $0x220] sm:$0xff]  }
  0x8d   : > { %2749 = vmatmul.mubr.bf16.gmra.mxu0 %v1020_v31  ;;  %2840 = vmatprep.subr.bf16.mxu1 %v3107_v1  ;;  %v1602_v31 = vor.u32 %v1601_v26, %v1598_v25 }
  0x8e   : > { %2785 = vmatmul.mubr.bf16.gmra.mxu1 %v1203_v27  ;;  %2805 = vmatpush3.bf16.msra.mxu0 %v3017_v32  ;;  %v1605_v32 = vshrl.u32 %v3627_v28, 16 }
  0x8f   : > { %2752 = vmatprep.mubr.msk.bf16.mxu0 %vm3108_vm0, %v3107_v1  ;;  %2788 = vmatprep.mubr.msk.bf16.mxu1 %vm3108_vm0, %v3107_v1  ;;  %v1603_v27 = vsel %vm1568_vm5, %v1593_v20, %v1602_v31 }
  0x90   : > { %2806 = vmatprep.subr.bf16.mxu0 %v3107_v1  ;;  %2841 = vmatpush3.bf16.msra.mxu1 %v3019_v37  ;;  %v1607_v37 = vrot.slane %v1605_v32, 2 }
  0x91   : > { %2842 = vmatprep.subr.bf16.mxu1 %v3107_v1 }
  0x92   : > { %2807 = vmatpush3.bf16.msra.mxu0 %v3020_v39  ;;  %v3649_v39 = vld [vmem:[%s3189_s8 + $0x30] ss:$0 sps:$4 sm:$0x77]   ;;  %v1611_v42 = vor.u32 %v1610_v38, %v1607_v37 }
  0x93   : > { %2808 = vmatprep.subr.bf16.mxu0 %v3107_v1  ;;  %v1617_v44 = vshll.u32 %v3649_v39, 16 }
  0x94   : > { %2843 = vmatpush3.bf16.msra.mxu1 %v3021_v43  ;;  %v1614_v43 = vshrl.u32 %v3649_v39, 16  ;;  %v1612_v48 = vsel %vm1568_vm5, %v1602_v31, %v1611_v42 }
  0x95   : > { %2753 = vmatmul.mubr.bf16.gmra.mxu0 %v1029_v46  ;;  %2844 = vmatprep.subr.bf16.mxu1 %v3107_v1  ;;  %v1408_v46 = vsel %vm1196_vm4, %v1405_v29, %v1407_v40  ;;  %v1619_v50 = vrot.slane %v1617_v44, 3 }
  0x96   : > { %2789 = vmatmul.mubr.bf16.gmra.mxu1 %v1205_v49  ;;  %2756 = vmatprep.mubr.msk.bf16.mxu0 %vm3108_vm0, %v3107_v1  ;;  %v3038_v49 = vld [vmem:[%s3824_s1 + $0x208] sm:$0xff]  }
  0x97   : > { %2792 = vmatprep.mubr.msk.bf16.mxu1 %vm3108_vm0, %v3107_v1  ;;  %2809 = vmatpush3.bf16.msra.mxu0 %v3022_v36  ;;  %v1616_v36 = vrot.slane %v1614_v43, 2 }
  0x98   : > { %2845 = vmatpush3.bf16.msra.mxu1 %v3024_v52  ;;  %2810 = vmatprep.subr.bf16.mxu0 %v3107_v1  ;;  %v1409_v52 = vrot.slane %v3039_v47, 2 }
  0x99   : > { %2846 = vmatprep.subr.bf16.mxu1 %v3107_v1  ;;  %v1620_v53 = vor.u32 %v1619_v50, %v1616_v36 }
  0x9a   : > { %v1410_v56 = vsel %vm1196_vm4, %v1407_v40, %v1409_v52 }
  0x9b   : > { %2811 = vmatpush3.bf16.msra.mxu0 %v3025_v55  ;;  %v1758_v55 = vld [vmem:[%s3189_s8 + $0x8] sm:$0x8]  ;;  %v1621_v58 = vsel %vm1568_vm5, %v1611_v42, %v1620_v53 }
  0x9c   : > { %2847 = vmatpush3.bf16.msra.mxu1 %v3026_v60  ;;  %2868 = vmatprep.subr.bf16.mxu0 %v3107_v1  ;;  %v2392_v57 = vcombine.low %v1758_v55, %v3555_v45  ;;  %v1781_v60 = vrot.slane %v3566_v51, 3  ;;  %v1787_v45 = vrot.slane %v3627_v28, 3  ;;  %v1789_v51 = vrot.slane %v3649_v39, 3 }
  0x9d   : > { %2757 = vmatmul.mubr.bf16.gmra.mxu0 %v1038_v61  ;;  %2904 = vmatprep.subr.bf16.mxu1 %v3107_v1  ;;  %v1785_v61 = vrot.slane %v3606_v17, 3 }
  0x9e   : > { %2793 = vmatmul.mubr.bf16.gmra.mxu1 %v1207_v62  ;;  %2812 = vmatprep.mubr.msk.bf16.mxu0 %vm3108_vm0, %v3107_v1  ;;  %v1780_v59 = vrot.slane %v2392_v57, 3  ;;  %v1784_v2 = vsel %vm1779_vm6, %v1781_v60, %v1783_v0  ;;  %v1790_v3 = vsel %vm1779_vm6, %v1787_v45, %v1789_v51 }
  0x9f   : > { %2848 = vmatprep.mubr.msk.bf16.mxu1 %vm3108_vm0, %v3107_v1  ;;  %v1788_v63 = vsel %vm1779_vm6, %v1785_v61, %v1787_v45  ;;  %v1786_v5 = vsel %vm1779_vm6, %v1783_v0, %v1785_v61 }
  0xa0   : > { %v1782_v62 = vsel %vm1779_vm6, %v1780_v59, %v1781_v60 }
  0xa5   : > { %2813 = vmatmul.mubr.bf16.vlgmr.msra.gmra.mxu0 %v1402_v12 }
  0xa6   : > { %2849 = vmatmul.mubr.bf16.vlgmr.msra.gmra.mxu1 %v1585_v13  ;;  %2869 = vmatpush3.bf16.msra.mxu0 %v3029_v10 }
  0xa7   : > { %2870 = vmatprep.subr.bf16.mxu0 %v3107_v1  ;;  %2816 = vmatprep.mubr.msk.bf16.mxu0 %vm3108_vm0, %v3107_v1 }
  0xa8   : > { %2852 = vmatprep.mubr.msk.bf16.mxu1 %vm3108_vm0, %v3107_v1  ;;  %2912 = vmatpush3.bf16.msra.mxu1 %v3029_v10 }
  0xa9   : > { %2905 = vmatprep.subr.bf16.mxu1 %v3107_v1 }
  0xaa   : > { %2871 = vmatpush3.bf16.msra.mxu0 %v3030_v18 }
  0xab   : > { %2872 = vmatprep.subr.bf16.mxu0 %v3107_v1 }
  0xac   : > { %2913 = vmatpush3.bf16.msra.mxu1 %v3030_v18 }
  0xad   : > { %2817 = vmatmul.mubr.bf16.gmra.mxu0 %v1404_v19  ;;  %2906 = vmatprep.subr.bf16.mxu1 %v3107_v1 }
  0xae   : > { %2853 = vmatmul.mubr.bf16.gmra.mxu1 %v1594_v24  ;;  %2873 = vmatpush3.bf16.msra.mxu0 %v3032_v23 }
  0xaf   : > { %2820 = vmatprep.mubr.msk.bf16.mxu0 %vm3108_vm0, %v3107_v1  ;;  %2856 = vmatprep.mubr.msk.bf16.mxu1 %vm3108_vm0, %v3107_v1 }
  0xb0   : > { %2874 = vmatprep.subr.bf16.mxu0 %v3107_v1  ;;  %2914 = vmatpush3.bf16.msra.mxu1 %v3032_v23 }
  0xb1   : > { %2907 = vmatprep.subr.bf16.mxu1 %v3107_v1 }
  0xb2   : > { %2875 = vmatpush3.bf16.msra.mxu0 %v3034_v30 }
  0xb3   : > { %2876 = vmatprep.subr.bf16.mxu0 %v3107_v1 }
  0xb4   : > { %2915 = vmatpush3.bf16.msra.mxu1 %v3034_v30 }
  0xb5   : > { %2821 = vmatmul.mubr.bf16.gmra.mxu0 %v1406_v34  ;;  %2908 = vmatprep.subr.bf16.mxu1 %v3107_v1 }
  0xb6   : > { %2857 = vmatmul.mubr.bf16.gmra.mxu1 %v1603_v27  ;;  %2877 = vmatpush3.bf16.msra.mxu0 %v3035_v35 }
  0xb7   : > { %2824 = vmatprep.mubr.msk.bf16.mxu0 %vm3108_vm0, %v3107_v1  ;;  %2860 = vmatprep.mubr.msk.bf16.mxu1 %vm3108_vm0, %v3107_v1 }
  0xb8   : > { %2916 = vmatpush3.bf16.msra.mxu1 %v3035_v35  ;;  %2878 = vmatprep.subr.bf16.mxu0 %v3107_v1 }
  0xb9   : > { %2909 = vmatprep.subr.bf16.mxu1 %v3107_v1 }
  0xba   : > { %2879 = vmatpush3.bf16.msra.mxu0 %v3037_v41 }
  0xbb   : > { %2880 = vmatprep.subr.bf16.mxu0 %v3107_v1 }
  0xbc   : > { %2917 = vmatpush3.bf16.msra.mxu1 %v3037_v41 }
  0xbd   : > { %2825 = vmatmul.mubr.bf16.gmra.mxu0 %v1408_v46  ;;  %2910 = vmatprep.subr.bf16.mxu1 %v3107_v1 }
  0xbe   : > { %2861 = vmatmul.mubr.bf16.gmra.mxu1 %v1612_v48  ;;  %2828 = vmatprep.mubr.msk.bf16.mxu0 %vm3108_vm0, %v3107_v1 }
  0xbf   : > { %2864 = vmatprep.mubr.msk.bf16.mxu1 %vm3108_vm0, %v3107_v1  ;;  %2881 = vmatpush3.bf16.msra.mxu0 %v3038_v49 }
  0xc0   : > { %2918 = vmatpush3.bf16.msra.mxu1 %v3038_v49  ;;  %2882 = vmatprep.subr.bf16.mxu0 %v3107_v1 }
  0xc1   : > { %2911 = vmatprep.subr.bf16.mxu1 %v3107_v1 }
  0xc3   : > { %2883 = vmatpush3.bf16.msra.mxu0 %v3041_v54 }
  0xc4   : > { %2919 = vmatpush3.bf16.msra.mxu1 %v3041_v54 }
  0xc5   : > { %2829 = vmatmul.mubr.bf16.gmra.mxu0 %v1410_v56 }
  0xc6   : > { %2865 = vmatmul.mubr.bf16.gmra.mxu1 %v1621_v58  ;;  %2884 = vmatprep.mubr.msk.bf16.mxu0 %vm3108_vm0, %v3107_v1 }
  0xc7   : > { %2896 = vmatprep.mubr.msk.bf16.mxu1 %vm3108_vm0, %v3107_v1 }
  0xcd   : > { %2885 = vmatmul.mubr.bf16.vlgmr.msra.gmra.mxu0 %v1782_v62 }
  0xce   : > { %2897 = vmatmul.mubr.bf16.vlgmr.msra.gmra.mxu1 %v1788_v63  ;;  %2888 = vmatprep.mubr.msk.bf16.mxu0 %vm3108_vm0, %v3107_v1 }
  0xcf   : > { %2900 = vmatprep.mubr.msk.bf16.mxu1 %vm3108_vm0, %v3107_v1 }
  0xd5   : > { %2889 = vmatmul.mubr.bf16.gmra.mxu0 %v1784_v2 }
  0xd6   : > { %2901 = vmatmul.mubr.bf16.gmra.mxu1 %v1790_v3  ;;  %2892 = vmatprep.mubr.msk.bf16.mxu0 %vm3108_vm0, %v3107_v1 }
  0xdd   : > { %2893 = vmatmul.mubr.bf16.gmra.mxu0 %v1786_v5 }
  0xed   : > { %v427_v6 = vpop.f32.mrf.mxu0 }
  0xee   : > { %v553_v7 = vpop.f32.mrf.mxu1 }
  0xef   : > { %v554_v4 = vadd.f32 %v553_v7, %v427_v6  ;;  %v2598_v8 = vpop.f32.mrf.mxu0 }
  0xf0   : > { %v2634_v9 = vpop.f32.mrf.mxu1 }
  0xf1   : > { %v430_v11 = vpop.f32.mrf.mxu0 }
  0xf2   : > { %v556_v12 = vpop.f32.mrf.mxu1 }
  0xf3   : > { %v557_v10 = vadd.f32 %v556_v12, %v430_v11  ;;  %v2599_v13 = vpop.f32.mrf.mxu0 }
  0xf4   : > { %v2635_v14 = vpop.f32.mrf.mxu1 }
  0xf5   : > { %v435_v16 = vpop.f32.mrf.mxu0 }
  0xf6   : > { %v561_v17 = vpop.f32.mrf.mxu1 }
  0xf7   : > { %v562_v18 = vadd.f32 %v561_v17, %v435_v16  ;;  %v2602_v15 = vpop.f32.mrf.mxu0 }
  0xf8   : > { %v2638_v20 = vpop.f32.mrf.mxu1 }
  0xf9   : > { %v438_v21 = vpop.f32.mrf.mxu0 }
  0xfa   : > { %v564_v1 = vpop.f32.mrf.mxu1 }
  0xfb   : > { %v565_v22 = vadd.f32 %v564_v1, %v438_v21  ;;  %v2603_v19 = vpop.f32.mrf.mxu0 }
  0xfc   : > { %v2639_v23 = vpop.f32.mrf.mxu1 }
  0xfd   : > { %v443_v24 = vpop.f32.mrf.mxu0 }
  0xfe   : > { %v569_v25 = vpop.f32.mrf.mxu1 }
  0xff   : > { %v570_v26 = vadd.f32 %v569_v25, %v443_v24  ;;  %v2606_v28 = vpop.f32.mrf.mxu0 }
 0x100   : > { %v2642_v29 = vpop.f32.mrf.mxu1 }
 0x101   : > { %v446_v30 = vpop.f32.mrf.mxu0 }
 0x102   : > { %v572_v31 = vpop.f32.mrf.mxu1 }
 0x103   : > { %v573_v32 = vadd.f32 %v572_v31, %v446_v30  ;;  %v2607_v33 = vpop.f32.mrf.mxu0 }
 0x104   : > { %v2643_v34 = vpop.f32.mrf.mxu1 }
 0x105   : > { %v451_v35 = vpop.f32.mrf.mxu0 }
 0x106   : > { %v577_v27 = vpop.f32.mrf.mxu1 }
 0x107   : > { %v578_v37 = vadd.f32 %v577_v27, %v451_v35  ;;  %v2610_v38 = vpop.f32.mrf.mxu0 }
 0x108   : > { %v2646_v39 = vpop.f32.mrf.mxu1 }
 0x109   : > { %v454_v40 = vpop.f32.mrf.mxu0 }
 0x10a   : > { %v580_v41 = vpop.f32.mrf.mxu1 }
 0x10b   : > { %v581_v42 = vadd.f32 %v580_v41, %v454_v40  ;;  %v2611_v43 = vpop.f32.mrf.mxu0 }
 0x10c   : > { %v2647_v44 = vpop.f32.mrf.mxu1 }
 0x10d   : > { %v459_v46 = vpop.f32.mrf.mxu0 }
 0x10e   : > { %v585_v47 = vpop.f32.mrf.mxu1 }
 0x10f   : > { %v586_v48 = vadd.f32 %v585_v47, %v459_v46  ;;  %v2614_v49 = vpop.f32.mrf.mxu0 }
 0x110   : > { %v2650_v36 = vpop.f32.mrf.mxu1 }
 0x111   : > { %v462_v50 = vpop.f32.mrf.mxu0 }
 0x112   : > { %v588_v52 = vpop.f32.mrf.mxu1 }
 0x113   : > { %v589_v53 = vadd.f32 %v588_v52, %v462_v50  ;;  %v2615_v54 = vpop.f32.mrf.mxu0 }
 0x114   : > { %v2651_v55 = vpop.f32.mrf.mxu1 }
 0x115   : > { %v712_v56 = vpop.f32.mrf.mxu0 }
 0x116   : > { %v751_v57 = vadd.f32 %v712_v56, %v554_v4  ;;  %v915_v58 = vpop.f32.mrf.mxu1 }
 0x117   : > { %v2670_v59 = vpop.f32.mrf.mxu0 }
 0x118   : > { %v954_v60 = vadd.f32 %v915_v58, %v751_v57  ;;  %v2706_v61 = vpop.f32.mrf.mxu1 }
 0x119   : > { %v715_v45 = vpop.f32.mrf.mxu0 }
 0x11a   : > { %v752_v62 = vadd.f32 %v715_v45, %v557_v10  ;;  %v918_v63 = vpop.f32.mrf.mxu1 }
 0x11b   : > { %v2671_v0 = vpop.f32.mrf.mxu0 }
 0x11c   : > { %v955_v51 = vadd.f32 %v918_v63, %v752_v62  ;;  %v2707_v2 = vpop.f32.mrf.mxu1 }
 0x11d   : > { %v720_v3 = vpop.f32.mrf.mxu0 }
 0x11e   : > { %v753_v5 = vadd.f32 %v720_v3, %v562_v18  ;;  %v923_v6 = vpop.f32.mrf.mxu1 }
 0x11f   : > { %v2674_v7 = vpop.f32.mrf.mxu0 }
 0x120   : > { %v956_v8 = vadd.f32 %v923_v6, %v753_v5  ;;  %v2710_v9 = vpop.f32.mrf.mxu1 }
 0x121   : > { %v723_v11 = vpop.f32.mrf.mxu0 }
 0x122   : > { %v754_v12 = vadd.f32 %v723_v11, %v565_v22  ;;  %v926_v13 = vpop.f32.mrf.mxu1 }
 0x123   : > { %v2675_v4 = vpop.f32.mrf.mxu0 }
 0x124   : > { %v957_v14 = vadd.f32 %v926_v13, %v754_v12  ;;  %v2711_v16 = vpop.f32.mrf.mxu1 }
 0x125   : > { %v728_v17 = vpop.f32.mrf.mxu0 }
 0x126   : > { %v755_v15 = vadd.f32 %v728_v17, %v570_v26  ;;  %v931_v20 = vpop.f32.mrf.mxu1 }
 0x127   : > { %v2678_v10 = vpop.f32.mrf.mxu0 }
 0x128   : > { %v958_v21 = vadd.f32 %v931_v20, %v755_v15  ;;  %v2714_v1 = vpop.f32.mrf.mxu1 }
 0x129   : > { %v731_v19 = vpop.f32.mrf.mxu0 }
 0x12a   : > { %v756_v23 = vadd.f32 %v731_v19, %v573_v32  ;;  %v934_v24 = vpop.f32.mrf.mxu1 }
 0x12b   : > { %v2679_v18 = vpop.f32.mrf.mxu0 }
 0x12c   : > { %v959_v25 = vadd.f32 %v934_v24, %v756_v23  ;;  %v2715_v28 = vpop.f32.mrf.mxu1 }
 0x12d   : > { %v736_v29 = vpop.f32.mrf.mxu0 }
 0x12e   : > { %v757_v30 = vadd.f32 %v736_v29, %v578_v37  ;;  %v939_v31 = vpop.f32.mrf.mxu1 }
 0x12f   : > { %v2682_v22 = vpop.f32.mrf.mxu0 }
 0x130   : > { %v3705_v33 = vadd.f32 %v939_v31, %v757_v30  ;;  %v2718_v34 = vpop.f32.mrf.mxu1 }
 0x131   : > { %v739_v35 = vpop.f32.mrf.mxu0 }
 0x132   : > { %v758_v27 = vadd.f32 %v739_v35, %v581_v42  ;;  %v942_v26 = vpop.f32.mrf.mxu1 }
 0x133   : > { %v2683_v38 = vpop.f32.mrf.mxu0 }
 0x134   : > { %v3707_v39 = vadd.f32 %v942_v26, %v758_v27  ;;  %v2719_v40 = vpop.f32.mrf.mxu1 }
 0x135   : > { %v744_v41 = vpop.f32.mrf.mxu0 }
 0x136   : > { %v759_v32 = vadd.f32 %v744_v41, %v586_v48  ;;  %v947_v43 = vpop.f32.mrf.mxu1 }
 0x137   : > { %v2686_v44 = vpop.f32.mrf.mxu0 }
 0x138   : > { %v3709_v46 = vadd.f32 %v947_v43, %v759_v32  ;;  %v2722_v47 = vpop.f32.mrf.mxu1 }
 0x139   : > { %v747_v37 = vpop.f32.mrf.mxu0 }
 0x13a   : > { %v760_v49 = vadd.f32 %v747_v37, %v589_v53  ;;  %v950_v36 = vpop.f32.mrf.mxu1 }
 0x13b   : > { %v2687_v50 = vpop.f32.mrf.mxu0 }
 0x13c   : > { %v3711_v52 = vadd.f32 %v950_v36, %v760_v49  ;;  %v2723_v54 = vpop.f32.mrf.mxu1 }
 0x13d   : > { %v1126_v42 = vpop.f32.mrf.mxu0 }
 0x13e   : > { %v1165_v55 = vadd.f32 %v1126_v42, %v954_v60  ;;  %v1295_v56 = vpop.f32.mrf.mxu1 }
 0x13f   : > { %v2742_v57 = vpop.f32.mrf.mxu0 }
 0x140   : > { %v3713_v58 = vadd.f32 %v1295_v56, %v1165_v55  ;;  %v2778_v59 = vpop.f32.mrf.mxu1 }
 0x141   : > { %v1129_v48 = vpop.f32.mrf.mxu0 }
 0x142   : > { %v1166_v61 = vadd.f32 %v1129_v48, %v955_v51  ;;  %v1298_v45 = vpop.f32.mrf.mxu1 }
 0x143   : > { %v2743_v62 = vpop.f32.mrf.mxu0 }
 0x144   : > { %v3715_v63 = vadd.f32 %v1298_v45, %v1166_v61  ;;  %v2779_v0 = vpop.f32.mrf.mxu1 }
 0x145   : > { %v1134_v53 = vpop.f32.mrf.mxu0 }
 0x146   : > { %v1167_v2 = vadd.f32 %v1134_v53, %v956_v8  ;;  %v1303_v3 = vpop.f32.mrf.mxu1 }
 0x147   : > { %v2746_v5 = vpop.f32.mrf.mxu0 }
 0x148   : > { %v3717_v6 = vadd.f32 %v1303_v3, %v1167_v2  ;;  %v2782_v7 = vpop.f32.mrf.mxu1 }
 0x149   : > { %v1137_v60 = vpop.f32.mrf.mxu0 }
 0x14a   : > { %v1168_v9 = vadd.f32 %v1137_v60, %v957_v14  ;;  %v1306_v11 = vpop.f32.mrf.mxu1 }
 0x14b   : > { %v2747_v12 = vpop.f32.mrf.mxu0 }
 0x14c   : > { %v3719_v13 = vadd.f32 %v1306_v11, %v1168_v9  ;;  %v2783_v4 = vpop.f32.mrf.mxu1 }
 0x14d   : > { %v1142_v51 = vpop.f32.mrf.mxu0 }
 0x14e   : > { %v1169_v16 = vadd.f32 %v1142_v51, %v958_v21  ;;  %v1311_v17 = vpop.f32.mrf.mxu1 }
 0x14f   : > { %v2750_v15 = vpop.f32.mrf.mxu0 }
 0x150   : > { %v3721_v20 = vadd.f32 %v1311_v17, %v1169_v16  ;;  %v2786_v10 = vpop.f32.mrf.mxu1 }
 0x151   : > { %v1145_v8 = vpop.f32.mrf.mxu0 }
 0x152   : > { %v1170_v1 = vadd.f32 %v1145_v8, %v959_v25  ;;  %v1314_v19 = vpop.f32.mrf.mxu1 }
 0x153   : > { %v2751_v23 = vpop.f32.mrf.mxu0 }
 0x154   : > { %v3723_v24 = vadd.f32 %v1314_v19, %v1170_v1  ;;  %v2787_v18 = vpop.f32.mrf.mxu1 }
 0x155   : > { %v1150_v14 = vpop.f32.mrf.mxu0 }
 0x156   : > { %v1319_v28 = vpop.f32.mrf.mxu1  ;;  %v1171_v17 = vadd.f32 %v1150_v14, %v3705_v33 }
 0x157   : > { %v2754_v29 = vpop.f32.mrf.mxu0 }
 0x158   : > { %v2790_v30 = vpop.f32.mrf.mxu1  ;;  %v1340_v19 = vadd.f32 %v1319_v28, %v1171_v17 }
 0x159   : > { %v1153_v31 = vpop.f32.mrf.mxu0 }
 0x15a   : > { %v1322_v22 = vpop.f32.mrf.mxu1  ;;  %v1172_v23 = vadd.f32 %v1153_v31, %v3707_v39  ;;  %v3749_v39 = vld [vmem:[%s3825_s2] ss:$0 sm:$0xff] }
 0x15b   : > { %v2755_v34 = vpop.f32.mrf.mxu0 }
 0x15c   : > { %v2791_v21 = vpop.f32.mrf.mxu1 }
 0x15d   : > { %v1158_v35 = vpop.f32.mrf.mxu0 }
 0x15e   : > { %v1327_v27 = vpop.f32.mrf.mxu1 }
 0x15f   : > { %v2758_v26 = vpop.f32.mrf.mxu0 }
 0x160   : > { %v2794_v38 = vpop.f32.mrf.mxu1 }
 0x161   : > { %v1161_v40 = vpop.f32.mrf.mxu0  ;;  %v1341_v38 = vadd.f32 %v1322_v22, %v1172_v23 }
 0x162   : > { %v3725_v41 = vpop.f32.mrf.mxu1  ;;  %v1174_v22 = vadd.f32 %v1161_v40, %v3711_v52 }
 0x163   : > { %v2759_v25 = vpop.f32.mrf.mxu0 }
 0x164   : > { %v2795_v32 = vpop.f32.mrf.mxu1  ;;  %v1173_v25 = vadd.f32 %v1158_v35, %v3709_v46  ;;  %v1343_v52 = vadd.f32 %v3725_v41, %v1174_v22 }
 0x165   : > { %v1498_v43 = vpop.f32.mrf.mxu0 }
 0x166   : > { %v1709_v44 = vpop.f32.mrf.mxu1  ;;  %v1537_v29 = vadd.f32 %v1498_v43, %v3713_v58  ;;  %v1342_v43 = vadd.f32 %v1327_v27, %v1173_v25 }
 0x167   : > { %v2814_v47 = vpop.f32.mrf.mxu0 }
 0x168   : > { %v2850_v37 = vpop.f32.mrf.mxu1  ;;  %v1748_v47 = vadd.f32 %v1709_v44, %v1537_v29 }
 0x169   : > { %v1501_v49 = vpop.f32.mrf.mxu0 }
 0x16a   : > { %v1712_v36 = vpop.f32.mrf.mxu1  ;;  %v1538_v33 = vadd.f32 %v1501_v49, %v3715_v63 }
 0x16b   : > { %v2815_v50 = vpop.f32.mrf.mxu0 }
 0x16c   : > { %v2851_v54 = vpop.f32.mrf.mxu1  ;;  %v1749_v35 = vadd.f32 %v1712_v36, %v1538_v33 }
 0x16d   : > { %v1506_v42 = vpop.f32.mrf.mxu0 }
 0x16e   : > { %v3727_v55 = vpop.f32.mrf.mxu1  ;;  %v1539_v44 = vadd.f32 %v1506_v42, %v3717_v6 }
 0x16f   : > { %v2818_v56 = vpop.f32.mrf.mxu0 }
 0x170   : > { %v2854_v57 = vpop.f32.mrf.mxu1  ;;  %v1750_v42 = vadd.f32 %v3727_v55, %v1539_v44 }
 0x171   : > { %v3729_v59 = vpop.f32.mrf.mxu0 }
 0x172   : > { %v3731_v48 = vpop.f32.mrf.mxu1 }
 0x173   : > { %v2819_v61 = vpop.f32.mrf.mxu0 }
 0x174   : > { %v2855_v45 = vpop.f32.mrf.mxu1 }
 0x175   : > { %v3733_v62 = vpop.f32.mrf.mxu0 }
 0x176   : > { %v3735_v0 = vpop.f32.mrf.mxu1 }
 0x177   : > { %v2822_v53 = vpop.f32.mrf.mxu0 }
 0x178   : > { %v2858_v2 = vpop.f32.mrf.mxu1 }
 0x179   : > { %v3737_v3 = vpop.f32.mrf.mxu0 }
 0x17a   : > { %v3739_v5 = vpop.f32.mrf.mxu1 }
 0x17b   : > { %v2823_v7 = vpop.f32.mrf.mxu0 }
 0x17c   : > { %v2859_v60 = vpop.f32.mrf.mxu1  ;;  %v1540_v7 = vadd.f32 %v3729_v59, %v3719_v13 }
 0x17d   : > { %v1522_v9 = vpop.f32.mrf.mxu0 }
 0x17e   : > { %v1733_v11 = vpop.f32.mrf.mxu1  ;;  %v1543_v34 = vadd.f32 %v1522_v9, %v1340_v19  ;;  %v1751_v59 = vadd.f32 %v3731_v48, %v1540_v7 }
 0x17f   : > { %v2826_v12 = vpop.f32.mrf.mxu0 }
 0x180   : > { %v2862_v4 = vpop.f32.mrf.mxu1  ;;  %v1754_v37 = vadd.f32 %v1733_v11, %v1543_v34 }
 0x181   : > { %v1525_v51 = vpop.f32.mrf.mxu0 }
 0x182   : > { %v1736_v16 = vpop.f32.mrf.mxu1  ;;  %v1544_v50 = vadd.f32 %v1525_v51, %v1341_v38 }
 0x183   : > { %v2827_v15 = vpop.f32.mrf.mxu0 }
 0x184   : > { %v2863_v10 = vpop.f32.mrf.mxu1  ;;  %v1755_v56 = vadd.f32 %v1736_v16, %v1544_v50 }
 0x185   : > { %v1530_v8 = vpop.f32.mrf.mxu0  ;;  %v1541_v10 = vadd.f32 %v3733_v62, %v3721_v20  ;;  %v1542_v62 = vadd.f32 %v3737_v3, %v3723_v24 }
 0x186   : > { %v1741_v1 = vpop.f32.mrf.mxu1  ;;  %v1545_v57 = vadd.f32 %v1530_v8, %v1342_v43 }
 0x187   : > { %v2830_v18 = vpop.f32.mrf.mxu0  ;;  %v1752_v20 = vadd.f32 %v3735_v0, %v1541_v10  ;;  %v1753_v0 = vadd.f32 %v3739_v5, %v1542_v62 }
 0x188   : > { %v2866_v30 = vpop.f32.mrf.mxu1  ;;  %v1756_v11 = vadd.f32 %v1741_v1, %v1545_v57 }
 0x189   : > { %v1533_v21 = vpop.f32.mrf.mxu0 }
 0x18a   : > { %v1744_v26 = vpop.f32.mrf.mxu1  ;;  %v1546_v12 = vadd.f32 %v1533_v21, %v1343_v52 }
 0x18b   : > { %v2831_v32 = vpop.f32.mrf.mxu0 }
 0x18c   : > { %v2867_v14 = vpop.f32.mrf.mxu1  ;;  %v1757_v19 = vadd.f32 %v1744_v26, %v1546_v12 }
 0x18d   : > { %v1878_v28 = vpop.f32.mrf.mxu0 }
 0x18e   : > { %v1917_v58 = vadd.f32 %v1878_v28, %v1748_v47  ;;  %v1902_v31 = vpop.f32.mrf.mxu1 }
 0x18f   : > { %v1923_v54 = vadd.f32 %v1902_v31, %v1754_v37  ;;  %v2886_v46 = vpop.f32.mrf.mxu0 }
 0x190   : > { %v3754_v63 = vadd.f32 %v3749_v39, %v1917_v58  ;;  %v2898_v49 = vpop.f32.mrf.mxu1 }
 0x191   : > { %v3757_v61 = vadd.f32 %v3749_v39, %v1923_v54  ;;  %v1881_v45 = vpop.f32.mrf.mxu0 }
 0x192   : > { %v2402_v53 = vmul.f32 -1.442695, %v3754_v63  ;;  %v1918_v27 = vadd.f32 %v1881_v45, %v1749_v35  ;;  %v1905_v2 = vpop.f32.mrf.mxu1 }
 0x193   : > { %v2408_v40 = vmul.f32 -1.442695, %v3757_v61  ;;  %v1924_v36 = vadd.f32 %v1905_v2, %v1755_v56  ;;  %v2887_v6 = vpop.f32.mrf.mxu0 }
 0x194   : > { %3043 = vpow2.f32 %v2402_v53  ;;  %v3766_v60 = vadd.f32 %v3749_v39, %v1918_v27  ;;  %v2899_v9 = vpop.f32.mrf.mxu1 }
 0x195   : > { %3045 = vpow2.f32 %v2408_v40  ;;  %v3769_v4 = vadd.f32 %v3749_v39, %v1924_v36  ;;  %v1886_v41 = vpop.f32.mrf.mxu0 }
 0x196   : > { %v2403_v51 = vmul.f32 -1.442695, %v3766_v60  ;;  %v1919_v16 = vadd.f32 %v1886_v41, %v1750_v42  ;;  %v1910_v17 = vpop.f32.mrf.mxu1 }
 0x197   : > { %v2409_v55 = vmul.f32 -1.442695, %v3769_v4  ;;  %v1925_v15 = vadd.f32 %v1910_v17, %v1756_v11  ;;  %v2890_v13 = vpop.f32.mrf.mxu0 }
 0x198   : > { %3047 = vpow2.f32 %v2403_v51  ;;  %v3777_v8 = vadd.f32 %v3749_v39, %v1919_v16  ;;  %v2902_v1 = vpop.f32.mrf.mxu1 }
 0x199   : > { %3049 = vpow2.f32 %v2409_v55  ;;  %v3780_v23 = vadd.f32 %v3749_v39, %v1925_v15  ;;  %v1889_v18 = vpop.f32.mrf.mxu0 }
 0x19a   : > { %v2404_v29 = vmul.f32 -1.442695, %v3777_v8  ;;  %v1920_v30 = vadd.f32 %v1889_v18, %v1751_v59  ;;  %v1913_v34 = vpop.f32.mrf.mxu1 }
 0x19b   : > { %v2410_v48 = vmul.f32 -1.442695, %v3780_v23  ;;  %v1926_v21 = vadd.f32 %v1913_v34, %v1757_v19  ;;  %v2891_v38 = vpop.f32.mrf.mxu0 }
 0x19c   : > { %3051 = vpow2.f32 %v2404_v29  ;;  %v3788_v26 = vadd.f32 %v3749_v39, %v1920_v30  ;;  %v2903_v25 = vpop.f32.mrf.mxu1 }
 0x19d   : > { %3053 = vpow2.f32 %v2410_v48  ;;  %v3791_v32 = vadd.f32 %v3749_v39, %v1926_v21  ;;  %v1894_v47 = vpop.f32.mrf.mxu0 }
 0x19e   : > { %v2405_v33 = vmul.f32 -1.442695, %v3788_v26  ;;  %v1921_v14 = vadd.f32 %v1894_v47, %v1752_v20 }
 0x19f   : > { %v2411_v37 = vmul.f32 -1.442695, %v3791_v32  ;;  %v2894_v50 = vpop.f32.mrf.mxu0 }
 0x1a0   : > { %3055 = vpow2.f32 %v2405_v33  ;;  %v3797_v24 = vadd.f32 %v3749_v39, %v1921_v14 }
 0x1a1   : > { %v3044_v3 = vpop.eup %3043  ;;  %3057 = vpow2.f32 %v2411_v37  ;;  %v1897_v28 = vpop.f32.mrf.mxu0 }
 0x1a2   : > { %v3046_v58 = vpop.eup %3045  ;;  %v1974_v31 = vadd.f32 1.0, %v3044_v3  ;;  %v2406_v43 = vmul.f32 -1.442695, %v3797_v24  ;;  %v1922_v22 = vadd.f32 %v1897_v28, %v1753_v0 }
 0x1a3   : > { %v1980_v54 = vadd.f32 1.0, %v3046_v58  ;;  %v2895_v46 = vpop.f32.mrf.mxu0 }
 0x1a4   : > { %v1939_v35 = vadd.f32 %v3749_v39, %v1922_v22  ;;  %3059 = vrcp.f32 %v1974_v31 }
 0x1a5   : > { %v3048_v44 = vpop.eup %3047  ;;  %3061 = vpow2.f32 %v2406_v43 }
 0x1a6   : > { %v3050_v49 = vpop.eup %3049  ;;  %v1975_v5 = vadd.f32 1.0, %v3048_v44  ;;  %v2407_v56 = vmul.f32 -1.442695, %v1939_v35  ;;  %3063 = vrcp.f32 %v1980_v54 }
 0x1a7   : > { %v1981_v57 = vadd.f32 1.0, %v3050_v49 }
 0x1a8   : > { %3065 = vrcp.f32 %v1975_v5 }
 0x1a9   : > { %v3052_v45 = vpop.eup %3051  ;;  %3067 = vrcp.f32 %v1981_v57 }
 0x1aa   : > { %v3054_v53 = vpop.eup %3053  ;;  %v1976_v27 = vadd.f32 1.0, %v3052_v45  ;;  %3069 = vpow2.f32 %v2407_v56 }
 0x1ab   : > { %v1982_v2 = vadd.f32 1.0, %v3054_v53 }
 0x1ac   : > { %3071 = vrcp.f32 %v1976_v27 }
 0x1ad   : > { %v3056_v52 = vpop.eup %3055  ;;  %3073 = vrcp.f32 %v1982_v2 }
 0x1ae   : > { %v3058_v40 = vpop.eup %3057  ;;  %v1977_v39 = vadd.f32 1.0, %v3056_v52 }
 0x1af   : > { %v1983_v36 = vadd.f32 1.0, %v3058_v40 }
 0x1b0   : > { %3075 = vrcp.f32 %v1977_v39 }
 0x1b1   : > { %3077 = vrcp.f32 %v1983_v36  ;;  %v3060_v6 = vpop.eup %3059 }
 0x1b2   : > { %v3062_v42 = vpop.eup %3061  ;;  %v2004_v41 = vmul.f32 %v3060_v6, %v3754_v63 }
 0x1b3   : > { %v3064_v7 = vpop.eup %3063  ;;  %v1978_v9 = vadd.f32 1.0, %v3062_v42 }
 0x1b4   : > { %v2010_v17 = vmul.f32 %v3064_v7, %v3757_v61 }
 0x1b5   : > { %v3066_v11 = vpop.eup %3065  ;;  %3079 = vrcp.f32 %v1978_v9 }
 0x1b6   : > { %v3068_v12 = vpop.eup %3067  ;;  %v2005_v51 = vmul.f32 %v3066_v11, %v3766_v60 }
 0x1b7   : > { %v3070_v16 = vpop.eup %3069  ;;  %v2011_v55 = vmul.f32 %v3068_v12, %v3769_v4 }
 0x1b8   : > { %v2437_v15 = vpack.c.bf16 %v2005_v51, %v2004_v41  ;;  %v1979_v13 = vadd.f32 1.0, %v3070_v16 }
 0x1b9   : > { %v2452_v59 = vpack.c.bf16 %v2011_v55, %v2010_v17  ;;  %v3072_v10 = vpop.eup %3071 }
 0x1ba   : > { %2438 = vst [vmem:[%s221_s9] sm:$0xff] %v2437_v15   ;;  %3081 = vrcp.f32 %v1979_v13  ;;  %v3074_v63 = vpop.eup %3073  ;;  %v2006_v19 = vmul.f32 %v3072_v10, %v3777_v8 }
 0x1bb   : > { %2461 = vst [vmem:[%s221_s9 + $0x18] sm:$0xff] %v2452_v59   ;;  %v2012_v18 = vmul.f32 %v3074_v63, %v3780_v23 }
 0x1bd   : > { %v3076_v1 = vpop.eup %3075 }
 0x1be   : > { %v3078_v60 = vpop.eup %3077  ;;  %v2007_v61 = vmul.f32 %v3076_v1, %v3788_v26 }
 0x1bf   : > { %v2013_v29 = vmul.f32 %v3078_v60, %v3791_v32 }
 0x1c0   : > { %v2442_v4 = vpack.c.bf16 %v2007_v61, %v2006_v19 }
 0x1c1   : > { %v2457_v30 = vpack.c.bf16 %v2013_v29, %v2012_v18 }
 0x1c2   : > { %2459 = vst [vmem:[%s221_s9 + $0x8] sm:$0xff] %v2442_v4   ;;  %v3080_v34 = vpop.eup %3079 }
 0x1c3   : > { %2462 = vst [vmem:[%s221_s9 + $0x20] sm:$0xff] %v2457_v30   ;;  %v2008_v21 = vmul.f32 %v3080_v34, %v3797_v24 }
 0x1c7   : > { %v3082_v48 = vpop.eup %3081 }
 0x1c8   : > { %v2009_v38 = vmul.f32 %v3082_v48, %v1939_v35 }
 0x1ca   : > { %v2447_v20 = vpack.c.bf16 %v2009_v38, %v2008_v21 }
 0x1cc   : > { %2460 = vst [vmem:[%s221_s9 + $0x10] sm:$0xff] %v2447_v20  }
 0x1cd PF: > { %s13_s14 = sadd.s32 1, %s3105_s14   ;;  %s3827_s12 = smov %s3101_s13 }
 0x1ce   : > { %p10_p5 = scmp.ge.s32.totalorder %s13_s14, 4   ;;  %s3828_s13 = smov %s3830_s15 }
 0x1d0   :  { %12 = sbr.rel (!%p10_p5) target bundleno = 2 (0x2), region = 76 }

// kernel: _lambda_.20
= control target key start
LH: loop header
LB: loop body
LE: loop exit
PB: predicated region body
PF: predicated region fallthrough
CT: control target
= control target key end

     0   :  { %s667_s12 = smov 0   ;;  %s669_s13 = smov 0   ;;  %s734_s0 = inlined_call_operand.vmem [shape: bf16[32,128], index: 0, kind: input, shape index: {}]   ;;  %s735_s1 = inlined_call_operand.vmem [shape: bf16[128,128], index: 1, kind: input, shape index: {}]   ;;  %s736_s2 = inlined_call_operand.vmem [shape: f32[1,128], index: 2, kind: input, shape index: {}]   ;;  %s737_s3 = inlined_call_operand.vmem [shape: bf16[32,128], index: 3, kind: output, shape index: {}]  }
   0x1   :  { %s671_s14 = smov 0  }
   0x2 LB: > { %s32_s15 = sadd.s32 1, %s639_s13  ;;  %p521_p0 = scmp.ge.s32.totalorder %s643_s14, 1  ;;  %s643_s14 = sphi %s671_s14, %s13_s14   ;;  %s639_s13 = sphi %s669_s13, %s739_s13   ;;  %s635_s12 = sphi %s667_s12, %s738_s12  }
   0x3   : > { %p34_p1 = scmp.ge.s32.totalorder %s32_s15, 2  ;;  %p188_p2 = scmp.lt.s32.totalorder %s643_s14, 3 }
   0x5   : > { %s741_s15 = smov (%p34_p1, %s32_s15), 0  ;;  %p189_p3 = pnand %p521_p0, %p188_p2 }
   0x6   : > { %s522_s20 = sshll.u32 (!%p189_p3), %s635_s12, 1 }
   0x7   : > { %192 = sbr.rel (%p189_p3) target bundleno = 281 (0x119), region = 32  ;;  %p230_p4 = scmp.lt.s32.totalorder (!%p189_p3), %s522_s20, 3 }
   0xc   : > { %v604_v0 = vld [vmem:[%s735_s1 + $0x38] sm:$0xff]   ;;  %v645_v1 = vmov 0.0   ;;  %v605_v2 = vld [vmem:[%s735_s1 + $0x30] sm:$0xff]   ;;  %vm646_vm0 = vmmov 0   ;;  %s743_s20 = smov (!%p230_p4, %s522_s20), 3  ;;  %v606_v3 = vld [vmem:[%s735_s1 + $0x28] sm:$0xff]  }
   0xd   : > { %558 = vmatprep.subr.bf16.mxu0 %v645_v1  ;;  %574 = vmatprep.mubr.msk.bf16.mxu0 %vm646_vm0, %v645_v1  ;;  %s523_s23 = sshll.u32 %s743_s20, 2  ;;  %v607_v4 = vld [vmem:[%s735_s1 + $0x20] sm:$0xff]   ;;  %v608_v5 = vld [vmem:[%s735_s1 + $0x18] sm:$0xff]   ;;  %v609_v6 = vld [vmem:[%s735_s1 + $0x10] sm:$0xff]  }
   0xe   : > { %559 = vmatpush3.bf16.msra.mxu0 %v604_v0  ;;  %s236_s26 = scalar_lea.vmem %s734_s0, %s523_s23  ;;  %v610_v7 = vld [vmem:[%s735_s1 + $0x8] sm:$0xff]   ;;  %v611_v8 = vld [vmem:[%s735_s1] sm:$0xff]   ;;  %s257_s17 = scalar_lea.vmem %s737_s3, %s523_s23 }
   0xf   : > { %560 = vmatprep.subr.bf16.mxu0 %v645_v1  ;;  %v612_v9 = vld [vmem:[%s236_s26] sm:$0xff]  }
  0x10   : > { %v526_v10 = vld [vmem:[%s736_s2] ss:$0 sm:$0xff] }
  0x12   : > { %561 = vmatpush3.bf16.msra.mxu0 %v605_v2 }
  0x13   : > { %562 = vmatprep.subr.bf16.mxu0 %v645_v1 }
  0x16   : > { %563 = vmatpush3.bf16.msra.mxu0 %v606_v3 }
  0x17   : > { %564 = vmatprep.subr.bf16.mxu0 %v645_v1 }
  0x1a   : > { %565 = vmatpush3.bf16.msra.mxu0 %v607_v4 }
  0x1b   : > { %566 = vmatprep.subr.bf16.mxu0 %v645_v1 }
  0x1e   : > { %567 = vmatpush3.bf16.msra.mxu0 %v608_v5 }
  0x1f   : > { %568 = vmatprep.subr.bf16.mxu0 %v645_v1 }
  0x22   : > { %569 = vmatpush3.bf16.msra.mxu0 %v609_v6 }
  0x23   : > { %570 = vmatprep.subr.bf16.mxu0 %v645_v1 }
  0x26   : > { %571 = vmatpush3.bf16.msra.mxu0 %v610_v7 }
  0x27   : > { %572 = vmatprep.subr.bf16.mxu0 %v645_v1 }
  0x2a   : > { %573 = vmatpush3.bf16.msra.mxu0 %v611_v8 }
  0x2d   : > { %575 = vmatmul.mubr.bf16.vlgmr.msra.gmra.mxu0 %v612_v9 }
  0xed   : > { %v373_v11 = vpop.f32.mrf.mxu0 }
  0xee   : > { %v374_v12 = vadd.f32 %v526_v10, %v373_v11 }
  0xef   : > { %v576_v13 = vpop.f32.mrf.mxu0 }
  0xf0   : > { %v536_v14 = vmul.f32 -1.442695, %v374_v12 }
  0xf1   : > { %v376_v15 = vpop.f32.mrf.mxu0 }
  0xf2   : > { %613 = vpow2.f32 %v536_v14  ;;  %v377_v16 = vadd.f32 %v526_v10, %v376_v15 }
  0xf3   : > { %v577_v17 = vpop.f32.mrf.mxu0 }
  0xf4   : > { %v537_v18 = vmul.f32 -1.442695, %v377_v16 }
  0xf6   : > { %615 = vpow2.f32 %v537_v18 }
  0xff   : > { %v614_v19 = vpop.eup %613 }
 0x100   : > { %v386_v20 = vadd.f32 1.0, %v614_v19 }
 0x102   : > { %617 = vrcp.f32 %v386_v20 }
 0x103   : > { %v616_v21 = vpop.eup %615 }
 0x104   : > { %v387_v22 = vadd.f32 1.0, %v616_v21 }
 0x106   : > { %619 = vrcp.f32 %v387_v22 }
 0x10f   : > { %v618_v23 = vpop.eup %617 }
 0x110   : > { %v392_v25 = vmul.f32 %v618_v23, %v374_v12 }
 0x113   : > { %v620_v24 = vpop.eup %619 }
 0x114   : > { %v393_v26 = vmul.f32 %v620_v24, %v377_v16 }
 0x116   : > { %v547_v27 = vpack.c.bf16 %v393_v26, %v392_v25 }
 0x118   : > { %548 = vst [vmem:[%s257_s17] sm:$0xff] %v547_v27  }
 0x119 PF: > { %s13_s14 = sadd.s32 1, %s643_s14   ;;  %s738_s12 = smov %s639_s13 }
 0x11a   : > { %p10_p5 = scmp.ge.s32.totalorder %s13_s14, 4   ;;  %s739_s13 = smov %s741_s15 }
 0x11c   :  { %12 = sbr.rel (!%p10_p5) target bundleno = 2 (0x2), region = 68 }

// kernel: _lambda_.19
= control target key start
LH: loop header
LB: loop body
LE: loop exit
PB: predicated region body
PF: predicated region fallthrough
CT: control target
= control target key end

     0   :  { %s643_s12 = smov 0   ;;  %s645_s13 = smov 0   ;;  %s706_s0 = inlined_call_operand.vmem [shape: bf16[32,128], index: 0, kind: input, shape index: {}]   ;;  %s707_s1 = inlined_call_operand.vmem [shape: bf16[128,128], index: 1, kind: input, shape index: {}]   ;;  %s708_s2 = inlined_call_operand.vmem [shape: f32[1,128], index: 2, kind: input, shape index: {}]   ;;  %s709_s3 = inlined_call_operand.vmem [shape: bf16[32,128], index: 3, kind: output, shape index: {}]  }
   0x1   :  { %s647_s14 = smov 0  }
   0x2 LB: > { %s32_s15 = sadd.s32 1, %s615_s13  ;;  %p507_p0 = scmp.ge.s32.totalorder %s619_s14, 1  ;;  %s619_s14 = sphi %s647_s14, %s13_s14   ;;  %s615_s13 = sphi %s645_s13, %s711_s13   ;;  %s611_s12 = sphi %s643_s12, %s710_s12  }
   0x3   : > { %p34_p1 = scmp.ge.s32.totalorder %s32_s15, 2  ;;  %p188_p2 = scmp.lt.s32.totalorder %s619_s14, 3 }
   0x5   : > { %s713_s15 = smov (%p34_p1, %s32_s15), 0  ;;  %p189_p3 = pnand %p507_p0, %p188_p2 }
   0x6   : > { %s508_s20 = sshll.u32 (!%p189_p3), %s611_s12, 1 }
   0x7   : > { %192 = sbr.rel (%p189_p3) target bundleno = 247 (0xf7), region = 32  ;;  %p230_p4 = scmp.lt.s32.totalorder (!%p189_p3), %s508_s20, 3 }
   0xc   : > { %v588_v0 = vld [vmem:[%s707_s1 + $0x38] sm:$0xff]   ;;  %v621_v1 = vmov 0.0   ;;  %v589_v2 = vld [vmem:[%s707_s1 + $0x30] sm:$0xff]   ;;  %vm622_vm0 = vmmov 0   ;;  %s715_s20 = smov (!%p230_p4, %s508_s20), 3  ;;  %v590_v3 = vld [vmem:[%s707_s1 + $0x28] sm:$0xff]  }
   0xd   : > { %542 = vmatprep.subr.bf16.mxu0 %v621_v1  ;;  %558 = vmatprep.mubr.msk.bf16.mxu0 %vm622_vm0, %v621_v1  ;;  %s509_s23 = sshll.u32 %s715_s20, 2  ;;  %v591_v4 = vld [vmem:[%s707_s1 + $0x20] sm:$0xff]   ;;  %v592_v5 = vld [vmem:[%s707_s1 + $0x18] sm:$0xff]   ;;  %v593_v6 = vld [vmem:[%s707_s1 + $0x10] sm:$0xff]  }
   0xe   : > { %543 = vmatpush3.bf16.msra.mxu0 %v588_v0  ;;  %s236_s26 = scalar_lea.vmem %s706_s0, %s509_s23  ;;  %v594_v7 = vld [vmem:[%s707_s1 + $0x8] sm:$0xff]   ;;  %v595_v8 = vld [vmem:[%s707_s1] sm:$0xff]   ;;  %s257_s17 = scalar_lea.vmem %s709_s3, %s509_s23 }
   0xf   : > { %544 = vmatprep.subr.bf16.mxu0 %v621_v1  ;;  %v596_v9 = vld [vmem:[%s236_s26] sm:$0xff]  }
  0x10   : > { %v512_v11 = vld [vmem:[%s708_s2] ss:$0 sm:$0xff] }
  0x12   : > { %545 = vmatpush3.bf16.msra.mxu0 %v589_v2 }
  0x13   : > { %546 = vmatprep.subr.bf16.mxu0 %v621_v1 }
  0x16   : > { %547 = vmatpush3.bf16.msra.mxu0 %v590_v3 }
  0x17   : > { %548 = vmatprep.subr.bf16.mxu0 %v621_v1 }
  0x1a   : > { %549 = vmatpush3.bf16.msra.mxu0 %v591_v4 }
  0x1b   : > { %550 = vmatprep.subr.bf16.mxu0 %v621_v1 }
  0x1e   : > { %551 = vmatpush3.bf16.msra.mxu0 %v592_v5 }
  0x1f   : > { %552 = vmatprep.subr.bf16.mxu0 %v621_v1 }
  0x22   : > { %553 = vmatpush3.bf16.msra.mxu0 %v593_v6 }
  0x23   : > { %554 = vmatprep.subr.bf16.mxu0 %v621_v1 }
  0x26   : > { %555 = vmatpush3.bf16.msra.mxu0 %v594_v7 }
  0x27   : > { %556 = vmatprep.subr.bf16.mxu0 %v621_v1 }
  0x2a   : > { %557 = vmatpush3.bf16.msra.mxu0 %v595_v8 }
  0x2d   : > { %559 = vmatmul.mubr.bf16.vlgmr.msra.gmra.mxu0 %v596_v9 }
  0xed   : > { %v373_v10 = vpop.f32.mrf.mxu0 }
  0xee   : > { %v374_v14 = vadd.f32 %v512_v11, %v373_v10 }
  0xef   : > { %v560_v12 = vpop.f32.mrf.mxu0 }
  0xf1   : > { %v376_v13 = vpop.f32.mrf.mxu0 }
  0xf2   : > { %v377_v15 = vadd.f32 %v512_v11, %v376_v13 }
  0xf3   : > { %v561_v16 = vpop.f32.mrf.mxu0 }
  0xf4   : > { %v531_v17 = vpack.c.bf16 %v377_v15, %v374_v14 }
  0xf6   : > { %532 = vst [vmem:[%s257_s17] sm:$0xff] %v531_v17  }
  0xf7 PF: > { %s13_s14 = sadd.s32 1, %s619_s14   ;;  %s710_s12 = smov %s615_s13 }
  0xf8   : > { %p10_p5 = scmp.ge.s32.totalorder %s13_s14, 4   ;;  %s711_s13 = smov %s713_s15 }
  0xfa   :  { %12 = sbr.rel (!%p10_p5) target bundleno = 2 (0x2), region = 68 }

// kernel: _lambda_.18
= control target key start
LH: loop header
LB: loop body
LE: loop exit
PB: predicated region body
PF: predicated region fallthrough
CT: control target
= control target key end

     0   :  { %s2282_s12 = smov 0   ;;  %s2284_s13 = smov 0   ;;  %s2583_s0 = inlined_call_operand.vmem [shape: bf16[2,4,30,128], index: 0, kind: input, shape index: {}]   ;;  %s2584_s1 = inlined_call_operand.vmem [shape: bf16[9,128,128], index: 1, kind: input, shape index: {}]   ;;  %s2585_s2 = inlined_call_operand.vmem [shape: f32[1,128], index: 2, kind: input, shape index: {}]   ;;  %s2586_s3 = inlined_call_operand.vmem [shape: bf16[2,20,128], index: 3, kind: output, shape index: {}]  }
   0x1   :  { %s2286_s14 = smov 0  }
   0x2 LB: > { %s25_s15 = sadd.s32 1, %s2256_s13  ;;  %p1593_p0 = scmp.ge.s32.totalorder %s2260_s14, 1  ;;  %s2260_s14 = sphi %s2286_s14, %s13_s14   ;;  %s2256_s13 = sphi %s2284_s13, %s2588_s13   ;;  %s2252_s12 = sphi %s2282_s12, %s2587_s12  }
   0x3   : > { %p27_p1 = scmp.ge.s32.totalorder %s25_s15, 2  ;;  %p168_p2 = scmp.lt.s32.totalorder %s2260_s14, 3 }
   0x5   : > { %s2590_s15 = smov (%p27_p1, %s25_s15), 0  ;;  %p169_p3 = pnand %p1593_p0, %p168_p2 }
   0x6   : > { %p202_p4 = scmp.lt.s32.totalorder (!%p169_p3), %s2252_s12, 1 }
   0x7   : > { %172 = sbr.rel (%p169_p3) target bundleno = 413 (0x19d), region = 32 }
   0xc   : > { %v2139_v0 = vld [vmem:[%s2584_s1 + $0x78] sm:$0xff]   ;;  %v2141_v2 = vld [vmem:[%s2584_s1 + $0x70] sm:$0xff]   ;;  %v2143_v4 = vld [vmem:[%s2584_s1 + $0x68] sm:$0xff]   ;;  %s2592_s12 = smov (!%p202_p4, %s2252_s12), 1  ;;  %vm496_vm0 = vsmask.f32 7424 }
   0xd   : > { %v2140_v1 = vld [vmem:[%s2584_s1 + $0x38] sm:$0xff]   ;;  %1934 = vmatprep.subr.bf16.mxu0 %v2139_v0  ;;  %v2142_v3 = vld [vmem:[%s2584_s1 + $0x30] sm:$0xff]   ;;  %v2144_v5 = vld [vmem:[%s2584_s1 + $0x28] sm:$0xff]   ;;  %s1835_s5 = sshll.u32 %s2592_s12, 6  ;;  %vm1041_vm1 = vsmask.f32 5376 }
   0xe   : > { %1954 = vmatprep.subr.bf16.mxu1 %v2140_v1  ;;  %1935 = vmatpush3.bf16.msra.mxu0 %v2139_v0  ;;  %v2145_v6 = vld [vmem:[%s2584_s1 + $0x60] sm:$0xff]   ;;  %v2147_v8 = vld [vmem:[%s2584_s1 + $0x58] sm:$0xff]   ;;  %s2336_s16 = scalar_lea.vmem %s2583_s0, %s1835_s5  ;;  %v2149_v10 = vld [vmem:[%s2584_s1 + $0x50] sm:$0xff]   ;;  %vm1330_vm2 = vcmask 1044480   ;;  %s2114_s5 = smul.u32 12, %s2592_s12 }
   0xf   : > { %1955 = vmatpush3.bf16.msra.mxu1 %v2140_v1  ;;  %1936 = vmatprep.subr.bf16.mxu0 %v2141_v2  ;;  %v2146_v7 = vld [vmem:[%s2584_s1 + $0x20] sm:$0xff]   ;;  %v2148_v9 = vld [vmem:[%s2584_s1 + $0x18] sm:$0xff]   ;;  %v2150_v11 = vld [vmem:[%s2584_s1 + $0x10] sm:$0xff]  }
  0x10   : > { %1956 = vmatprep.subr.bf16.mxu1 %v2142_v3  ;;  %v2155_v12 = vld [vmem:[%s2336_s16 + $0x10] sm:$0xff]   ;;  %v2156_v13 = vld [vmem:[%s2336_s16] sm:$0xff]   ;;  %v2151_v14 = vld [vmem:[%s2584_s1 + $0x48] sm:$0xff]   ;;  %s221_s8 = scalar_lea.vmem %s2586_s3, %s2114_s5 }
  0x11   : > { %1950 = vmatprep.mubr.bf16.mxu0 %v2155_v12  ;;  %1970 = vmatprep.mubr.bf16.mxu1 %v2156_v13  ;;  %v2152_v15 = vld [vmem:[%s2584_s1 + $0x8] sm:$0xff]   ;;  %v2153_v16 = vld [vmem:[%s2584_s1 + $0x40] sm:$0xff]   ;;  %v2157_v18 = vld [vmem:[%s2336_s16 + $0x18] ss:$0 sps:$4 sm:$0x33]   ;;  %v500_v22 = vshll.u32 %v2156_v13, 16 }
  0x12   : > { %1937 = vmatpush3.bf16.msra.mxu0 %v2141_v2  ;;  %v2154_v17 = vld [vmem:[%s2584_s1] sm:$0xff]   ;;  %v2159_v19 = vld [vmem:[%s2584_s1 + $0xb8] sm:$0xff]   ;;  %v2158_v20 = vld [vmem:[%s2336_s16 + $0x8] ss:$0 sps:$4 sm:$0x33]   ;;  %v498_v25 = vshrl.u32 %v2156_v13, 16 }
  0x13   : > { %1957 = vmatpush3.bf16.msra.mxu1 %v2142_v3  ;;  %1938 = vmatprep.subr.bf16.mxu0 %v2143_v4  ;;  %v2160_v21 = vld [vmem:[%s2584_s1 + $0xf8] sm:$0xff]   ;;  %v2161_v23 = vld [vmem:[%s2584_s1 + $0xb0] sm:$0xff]   ;;  %v502_v26 = vrot.slane %v500_v22, 1  ;;  %v2163_v27 = vld [vmem:[%s2584_s1 + $0xa8] sm:$0xff]  }
  0x14   : > { %1958 = vmatprep.subr.bf16.mxu1 %v2144_v5  ;;  %v2162_v24 = vld [vmem:[%s2584_s1 + $0xf0] sm:$0xff]   ;;  %v2164_v28 = vld [vmem:[%s2584_s1 + $0xe8] sm:$0xff]   ;;  %v2177_v32 = vld [vmem:[%s2336_s16 + $0x20] sm:$0xff]  }
  0x15   : > { %v2175_v29 = vld [vmem:[%s2336_s16 + $0x8] ss:$0 sps:$4 sm:$0x77]   ;;  %v503_v30 = vor.u32 %v502_v26, %v498_v25  ;;  %v2165_v33 = vld [vmem:[%s2584_s1 + $0xa0] sm:$0xff]   ;;  %v2167_v37 = vld [vmem:[%s2584_s1 + $0x98] sm:$0xff]   ;;  %v897_v43 = vshll.u32 %v2177_v32, 16 }
  0x16   : > { %1939 = vmatpush3.bf16.msra.mxu0 %v2143_v4  ;;  %v505_v31 = vshll.u32 %v2175_v29, 16  ;;  %v2166_v34 = vld [vmem:[%s2584_s1 + $0xe0] sm:$0xff]   ;;  %v2168_v38 = vld [vmem:[%s2584_s1 + $0xd8] sm:$0xff]   ;;  %v2169_v39 = vld [vmem:[%s2584_s1 + $0x90] sm:$0xff]   ;;  %v509_v46 = vshrl.u32 %v2175_v29, 16  ;;  %v895_v48 = vshrl.u32 %v2177_v32, 16 }
  0x17   : > { %1959 = vmatpush3.bf16.msra.mxu1 %v2144_v5  ;;  %1940 = vmatprep.subr.bf16.mxu0 %v2145_v6  ;;  %v2170_v40 = vld [vmem:[%s2584_s1 + $0xd0] sm:$0xff]   ;;  %v2171_v41 = vld [vmem:[%s2584_s1 + $0x88] sm:$0xff]   ;;  %v2173_v44 = vld [vmem:[%s2584_s1 + $0x80] sm:$0xff]   ;;  %v899_v49 = vrot.slane %v897_v43, 1 }
  0x18   : > { %1960 = vmatprep.subr.bf16.mxu1 %v2146_v7  ;;  %v507_v35 = vrot.slane %v505_v31, 1  ;;  %v2172_v42 = vld [vmem:[%s2584_s1 + $0xc8] sm:$0xff]   ;;  %v2174_v45 = vld [vmem:[%s2584_s1 + $0xc0] sm:$0xff]   ;;  %v2176_v50 = vld [vmem:[%s2584_s1 + $0x138] sm:$0xff]  }
  0x19   : > { %v2412_v47 = vld [vmem:[%s2336_s16 + $0x28] ss:$0 sps:$4 sm:$0x77]   ;;  %v2179_v53 = vld [vmem:[%s2584_s1 + $0x178] sm:$0xff]   ;;  %v2180_v55 = vld [vmem:[%s2584_s1 + $0x130] sm:$0xff]   ;;  %v900_v56 = vor.u32 %v899_v49, %v895_v48 }
  0x1a   : > { %1941 = vmatpush3.bf16.msra.mxu0 %v2145_v6  ;;  %v508_v36 = vsel %vm496_vm0, %v503_v30, %v507_v35  ;;  %v902_v51 = vshll.u32 %v2412_v47, 16  ;;  %v2178_v52 = vld [vmem:[%s2336_s16 + $0x28] ss:$0 sps:$4 sm:$0x33]   ;;  %v511_v54 = vor.u32 %v509_v46, %v507_v35  ;;  %v2181_v58 = vld [vmem:[%s2584_s1 + $0x170] sm:$0xff]   ;;  %v2184_v63 = vld [vmem:[%s2584_s1 + $0x120] sm:$0xff]  }
  0x1b   : > { %1961 = vmatpush3.bf16.msra.mxu1 %v2146_v7  ;;  %1942 = vmatprep.subr.bf16.mxu0 %v2147_v8  ;;  %v2194_v59 = vld [vmem:[%s2336_s16 + $0x30] sm:$0xff]   ;;  %v2182_v61 = vld [vmem:[%s2584_s1 + $0x128] sm:$0xff]   ;;  %v2185_v0 = vld [vmem:[%s2584_s1 + $0x160] sm:$0xff]  }
  0x1c   : > { %1962 = vmatprep.subr.bf16.mxu1 %v2148_v9  ;;  %v2425_v57 = vrot.slane %v902_v51, 1  ;;  %v2183_v62 = vld [vmem:[%s2584_s1 + $0x168] sm:$0xff]   ;;  %v2186_v1 = vld [vmem:[%s2584_s1 + $0x118] sm:$0xff]   ;;  %v1010_v3 = vld [vmem:[%s2336_s16] sm:$0xc] }
  0x1d   : > { %v2187_v2 = vld [vmem:[%s2584_s1 + $0x158] sm:$0xff]   ;;  %v2453_v4 = vld [vmem:[%s2336_s16 + $0x4] sm:$0xf]  ;;  %v2188_v5 = vld [vmem:[%s2584_s1 + $0x110] sm:$0xff]  }
  0x1e   : > { %1943 = vmatpush3.bf16.msra.mxu0 %v2147_v8  ;;  %v905_v60 = vsel %vm496_vm0, %v900_v56, %v2425_v57  ;;  %v2189_v6 = vld [vmem:[%s2584_s1 + $0x150] sm:$0xff]   ;;  %v1761_v7 = vcombine.low %v1010_v3, %v2453_v4  ;;  %v2463_v8 = vld [vmem:[%s2336_s16 + $0x8] sm:$0x1f]   ;;  %v2193_v22 = vld [vmem:[%s2584_s1 + $0x140] sm:$0xff]  }
  0x1f   : > { %1963 = vmatpush3.bf16.msra.mxu1 %v2148_v9  ;;  %1944 = vmatprep.subr.bf16.mxu0 %v2149_v10  ;;  %v2190_v9 = vld [vmem:[%s2584_s1 + $0x108] sm:$0xff]   ;;  %v2203_v46 = vld [vmem:[%s2584_s1 + $0x1a0] sm:$0xff]   ;;  %v2205_v48 = vld [vmem:[%s2584_s1 + $0x198] sm:$0xff]  }
  0x20   : > { %1964 = vmatprep.subr.bf16.mxu1 %v2150_v11  ;;  %v2191_v12 = vld [vmem:[%s2584_s1 + $0x148] sm:$0xff]   ;;  %v1043_v13 = vshrl.u32 %v1761_v7, 16  ;;  %v2206_v49 = vld [vmem:[%s2584_s1 + $0x1d8] sm:$0xff]   ;;  %v2208_v51 = vld [vmem:[%s2584_s1 + $0x1d0] sm:$0xff]  }
  0x21   : > { %v2212_v56 = vld [vmem:[%s2584_s1 + $0x1c0] sm:$0xff]   ;;  %v2223_v3 = vld [vmem:[%s2584_s1 + $0x208] sm:$0xff]  }
  0x22   : > { %1945 = vmatpush3.bf16.msra.mxu0 %v2149_v10  ;;  %v2216_v10 = vld [vmem:[%s2336_s16 + $0x10] sm:$0xfc]  }
  0x23   : > { %1965 = vmatpush3.bf16.msra.mxu1 %v2150_v11  ;;  %1946 = vmatprep.subr.bf16.mxu0 %v2151_v14  ;;  %v2217_v11 = vld [vmem:[%s2336_s16 + $0x18] sm:$0x1f]  }
  0x24   : > { %1966 = vmatprep.subr.bf16.mxu1 %v2152_v15 }
  0x26   : > { %1947 = vmatpush3.bf16.msra.mxu0 %v2151_v14  ;;  %v1046_v14 = vshll.u32 %v1761_v7, 16 }
  0x27   : > { %1967 = vmatpush3.bf16.msra.mxu1 %v2152_v15  ;;  %1948 = vmatprep.subr.bf16.mxu0 %v2153_v16  ;;  %v1051_v15 = vshrl.u32 %v2463_v8, 16 }
  0x28   : > { %1968 = vmatprep.subr.bf16.mxu1 %v2154_v17  ;;  %v1048_v25 = vrot.slane %v1046_v14, 3 }
  0x29   : > { %v1053_v26 = vrot.slane %v1051_v15, 2 }
  0x2a   : > { %1949 = vmatpush3.bf16.msra.mxu0 %v2153_v16  ;;  %v1054_v16 = vshll.u32 %v2463_v8, 16 }
  0x2b   : > { %1969 = vmatpush3.bf16.msra.mxu1 %v2154_v17  ;;  %1974 = vmatprep.subr.bf16.mxu0 %v2159_v19  ;;  %v1192_v17 = vshrl.u32 %v2216_v10, 16 }
  0x2c   : > { %1994 = vmatprep.subr.bf16.mxu1 %v2160_v21 }
  0x2d   : > { %1951 = vmatmul.mubr.bf16.vlgmr.msra.gmra.mxu0 %v2157_v18  ;;  %v1195_v18 = vshll.u32 %v2216_v10, 16 }
  0x2e   : > { %1971 = vmatmul.mubr.bf16.vlgmr.msra.gmra.mxu1 %v2158_v20  ;;  %1975 = vmatpush3.bf16.msra.mxu0 %v2159_v19  ;;  %v1200_v19 = vshrl.u32 %v2217_v11, 16  ;;  %v1203_v20 = vshll.u32 %v2217_v11, 16 }
  0x2f   : > { %1995 = vmatpush3.bf16.msra.mxu1 %v2160_v21  ;;  %1976 = vmatprep.subr.bf16.mxu0 %v2161_v23  ;;  %v2192_v21 = vld [vmem:[%s2584_s1 + $0x100] sm:$0xff]   ;;  %v1197_v29 = vrot.slane %v1195_v18, 3 }
  0x30   : > { %1996 = vmatprep.subr.bf16.mxu1 %v2162_v24  ;;  %2010 = vmatprep.mubr.bf16.mxu1 %v2177_v32  ;;  %v1202_v30 = vrot.slane %v1200_v19, 2  ;;  %v1205_v31 = vrot.slane %v1203_v20, 3  ;;  %v2196_v32 = vld [vmem:[%s2584_s1 + $0x1b8] sm:$0xff]  }
  0x31   : > { %1990 = vmatprep.mubr.bf16.mxu0 %v508_v36 }
  0x32   : > { %1977 = vmatpush3.bf16.msra.mxu0 %v2161_v23  ;;  %v906_v23 = vshrl.u32 %v2412_v47, 16  ;;  %v2204_v47 = vld [vmem:[%s2584_s1 + $0x1e0] sm:$0xff]  }
  0x33   : > { %1997 = vmatpush3.bf16.msra.mxu1 %v2162_v24  ;;  %1978 = vmatprep.subr.bf16.mxu0 %v2163_v27  ;;  %v1045_v24 = vrot.slane %v1043_v13, 2 }
  0x34   : > { %1998 = vmatprep.subr.bf16.mxu1 %v2164_v28 }
  0x35   : > { %v1049_v35 = vor.u32 %v1048_v25, %v1045_v24 }
  0x36   : > { %1979 = vmatpush3.bf16.msra.mxu0 %v2163_v27  ;;  %v1056_v27 = vrot.slane %v1054_v16, 3 }
  0x37   : > { %1999 = vmatpush3.bf16.msra.mxu1 %v2164_v28  ;;  %1980 = vmatprep.subr.bf16.mxu0 %v2165_v33  ;;  %v1194_v28 = vrot.slane %v1192_v17, 2 }
  0x38   : > { %2000 = vmatprep.subr.bf16.mxu1 %v2166_v34  ;;  %v2489_v36 = vor.u32 %v1056_v27, %v1053_v26 }
  0x3a   : > { %1981 = vmatpush3.bf16.msra.mxu0 %v2165_v33  ;;  %v2198_v33 = vld [vmem:[%s2584_s1 + $0x1f8] sm:$0xff]  }
  0x3b   : > { %2001 = vmatpush3.bf16.msra.mxu1 %v2166_v34  ;;  %1982 = vmatprep.subr.bf16.mxu0 %v2167_v37  ;;  %v2195_v34 = vld [vmem:[%s2336_s16 + $0x38] ss:$0 sps:$4 sm:$0x33]  }
  0x3c   : > { %2002 = vmatprep.subr.bf16.mxu1 %v2168_v38 }
  0x3e   : > { %1983 = vmatpush3.bf16.msra.mxu0 %v2167_v37  ;;  %v908_v37 = vor.u32 %v906_v23, %v2425_v57 }
  0x3f   : > { %2003 = vmatpush3.bf16.msra.mxu1 %v2168_v38  ;;  %1984 = vmatprep.subr.bf16.mxu0 %v2169_v39  ;;  %v1198_v38 = vor.u32 %v1197_v29, %v1194_v28 }
  0x40   : > { %2004 = vmatprep.subr.bf16.mxu1 %v2170_v40 }
  0x42   : > { %1985 = vmatpush3.bf16.msra.mxu0 %v2169_v39  ;;  %v2492_v39 = vor.u32 %v1205_v31, %v1202_v30 }
  0x43   : > { %2005 = vmatpush3.bf16.msra.mxu1 %v2170_v40  ;;  %1986 = vmatprep.subr.bf16.mxu0 %v2171_v41  ;;  %v2199_v40 = vld [vmem:[%s2584_s1 + $0x1b0] sm:$0xff]  }
  0x44   : > { %2006 = vmatprep.subr.bf16.mxu1 %v2172_v42  ;;  %v1207_v43 = vsel %vm1041_vm1, %v1198_v38, %v2492_v39 }
  0x46   : > { %1987 = vmatpush3.bf16.msra.mxu0 %v2171_v41  ;;  %v2200_v41 = vld [vmem:[%s2584_s1 + $0x1f0] sm:$0xff]  }
  0x47   : > { %2007 = vmatpush3.bf16.msra.mxu1 %v2172_v42  ;;  %1988 = vmatprep.subr.bf16.mxu0 %v2173_v44  ;;  %v1058_v42 = vsel %vm1041_vm1, %v1049_v35, %v2489_v36 }
  0x48   : > { %2008 = vmatprep.subr.bf16.mxu1 %v2174_v45 }
  0x4a   : > { %1989 = vmatpush3.bf16.msra.mxu0 %v2173_v44  ;;  %v2201_v44 = vld [vmem:[%s2584_s1 + $0x1a8] sm:$0xff]  }
  0x4b   : > { %2009 = vmatpush3.bf16.msra.mxu1 %v2174_v45  ;;  %2014 = vmatprep.subr.bf16.mxu0 %v2176_v50  ;;  %v2202_v45 = vld [vmem:[%s2584_s1 + $0x1e8] sm:$0xff]  }
  0x4c   : > { %2034 = vmatprep.subr.bf16.mxu1 %v2179_v53 }
  0x4d   : > { %1991 = vmatmul.mubr.bf16.vlgmr.msra.gmra.mxu0 %v511_v54  ;;  %v1309_v54 = vld [vmem:[%s2336_s16] sm:$0x8] }
  0x4e   : > { %2015 = vmatpush3.bf16.msra.mxu0 %v2176_v50  ;;  %2011 = vmatmul.mubr.bf16.vlgmr.msra.gmra.mxu1 %v2178_v52  ;;  %v2207_v50 = vld [vmem:[%s2584_s1 + $0x190] sm:$0xff]   ;;  %v2209_v52 = vld [vmem:[%s2584_s1 + $0x188] sm:$0xff]   ;;  %v1817_v57 = vcombine.low %v1309_v54, %v2453_v4  ;;  %v2224_v4 = vld [vmem:[%s2584_s1 + $0x200] sm:$0xff]  }
  0x4f   : > { %2035 = vmatpush3.bf16.msra.mxu1 %v2179_v53  ;;  %2016 = vmatprep.subr.bf16.mxu0 %v2180_v55  ;;  %v2210_v53 = vld [vmem:[%s2584_s1 + $0x1c8] sm:$0xff]  }
  0x50   : > { %2036 = vmatprep.subr.bf16.mxu1 %v2181_v58  ;;  %2030 = vmatprep.mubr.bf16.mxu0 %v2194_v59  ;;  %v1331_v59 = vrot.slane %v1817_v57, 3 }
  0x51   : > { %2050 = vmatprep.mubr.bf16.mxu1 %v905_v60  ;;  %v1332_v60 = vrot.slane %v2463_v8, 3 }
  0x52   : > { %2017 = vmatpush3.bf16.msra.mxu0 %v2180_v55  ;;  %v2211_v55 = vld [vmem:[%s2584_s1 + $0x180] sm:$0xff]  }
  0x53   : > { %2037 = vmatpush3.bf16.msra.mxu1 %v2181_v58  ;;  %2018 = vmatprep.subr.bf16.mxu0 %v2182_v61  ;;  %v2215_v58 = vld [vmem:[%s2584_s1 + $0x238] sm:$0xff]  }
  0x54   : > { %2038 = vmatprep.subr.bf16.mxu1 %v2183_v62 }
  0x56   : > { %2019 = vmatpush3.bf16.msra.mxu0 %v2182_v61  ;;  %v2218_v61 = vld [vmem:[%s2584_s1 + $0x230] sm:$0xff]  }
  0x57   : > { %2039 = vmatpush3.bf16.msra.mxu1 %v2183_v62  ;;  %2020 = vmatprep.subr.bf16.mxu0 %v2184_v63  ;;  %v1333_v62 = vsel %vm1330_vm2, %v1331_v59, %v1332_v60 }
  0x58   : > { %2040 = vmatprep.subr.bf16.mxu1 %v2185_v0 }
  0x5a   : > { %2021 = vmatpush3.bf16.msra.mxu0 %v2184_v63  ;;  %v2219_v63 = vld [vmem:[%s2584_s1 + $0x228] sm:$0xff]  }
  0x5b   : > { %2041 = vmatpush3.bf16.msra.mxu1 %v2185_v0  ;;  %2022 = vmatprep.subr.bf16.mxu0 %v2186_v1  ;;  %v2220_v0 = vld [vmem:[%s2584_s1 + $0x220] sm:$0xff]  }
  0x5c   : > { %2042 = vmatprep.subr.bf16.mxu1 %v2187_v2 }
  0x5e   : > { %2023 = vmatpush3.bf16.msra.mxu0 %v2186_v1  ;;  %v2221_v1 = vld [vmem:[%s2584_s1 + $0x218] sm:$0xff]  }
  0x5f   : > { %2043 = vmatpush3.bf16.msra.mxu1 %v2187_v2  ;;  %2024 = vmatprep.subr.bf16.mxu0 %v2188_v5  ;;  %v2222_v2 = vld [vmem:[%s2584_s1 + $0x210] sm:$0xff]  }
  0x60   : > { %2044 = vmatprep.subr.bf16.mxu1 %v2189_v6 }
  0x62   : > { %2025 = vmatpush3.bf16.msra.mxu0 %v2188_v5 }
  0x63   : > { %2045 = vmatpush3.bf16.msra.mxu1 %v2189_v6  ;;  %2026 = vmatprep.subr.bf16.mxu0 %v2190_v9 }
  0x64   : > { %2046 = vmatprep.subr.bf16.mxu1 %v2191_v12 }
  0x66   : > { %2027 = vmatpush3.bf16.msra.mxu0 %v2190_v9 }
  0x67   : > { %2047 = vmatpush3.bf16.msra.mxu1 %v2191_v12  ;;  %2028 = vmatprep.subr.bf16.mxu0 %v2192_v21 }
  0x68   : > { %2048 = vmatprep.subr.bf16.mxu1 %v2193_v22 }
  0x6a   : > { %2029 = vmatpush3.bf16.msra.mxu0 %v2192_v21 }
  0x6b   : > { %2049 = vmatpush3.bf16.msra.mxu1 %v2193_v22  ;;  %2054 = vmatprep.subr.bf16.mxu0 %v2196_v32 }
  0x6c   : > { %2074 = vmatprep.subr.bf16.mxu1 %v2198_v33 }
  0x6d   : > { %2031 = vmatmul.mubr.bf16.vlgmr.msra.gmra.mxu0 %v2195_v34 }
  0x6e   : > { %2055 = vmatpush3.bf16.msra.mxu0 %v2196_v32  ;;  %2051 = vmatmul.mubr.bf16.vlgmr.msra.gmra.mxu1 %v908_v37 }
  0x6f   : > { %2075 = vmatpush3.bf16.msra.mxu1 %v2198_v33  ;;  %2056 = vmatprep.subr.bf16.mxu0 %v2199_v40 }
  0x70   : > { %2076 = vmatprep.subr.bf16.mxu1 %v2200_v41  ;;  %2070 = vmatprep.mubr.bf16.mxu0 %v1058_v42 }
  0x71   : > { %2090 = vmatprep.mubr.bf16.mxu1 %v1207_v43 }
  0x72   : > { %2057 = vmatpush3.bf16.msra.mxu0 %v2199_v40 }
  0x73   : > { %2077 = vmatpush3.bf16.msra.mxu1 %v2200_v41  ;;  %2058 = vmatprep.subr.bf16.mxu0 %v2201_v44 }
  0x74   : > { %2078 = vmatprep.subr.bf16.mxu1 %v2202_v45 }
  0x76   : > { %2059 = vmatpush3.bf16.msra.mxu0 %v2201_v44 }
  0x77   : > { %2079 = vmatpush3.bf16.msra.mxu1 %v2202_v45  ;;  %2060 = vmatprep.subr.bf16.mxu0 %v2203_v46 }
  0x78   : > { %2080 = vmatprep.subr.bf16.mxu1 %v2204_v47 }
  0x7a   : > { %2061 = vmatpush3.bf16.msra.mxu0 %v2203_v46 }
  0x7b   : > { %2081 = vmatpush3.bf16.msra.mxu1 %v2204_v47  ;;  %2062 = vmatprep.subr.bf16.mxu0 %v2205_v48 }
  0x7c   : > { %2082 = vmatprep.subr.bf16.mxu1 %v2206_v49 }
  0x7e   : > { %2063 = vmatpush3.bf16.msra.mxu0 %v2205_v48 }
  0x7f   : > { %2083 = vmatpush3.bf16.msra.mxu1 %v2206_v49  ;;  %2064 = vmatprep.subr.bf16.mxu0 %v2207_v50 }
  0x80   : > { %2084 = vmatprep.subr.bf16.mxu1 %v2208_v51 }
  0x82   : > { %2065 = vmatpush3.bf16.msra.mxu0 %v2207_v50 }
  0x83   : > { %2085 = vmatpush3.bf16.msra.mxu1 %v2208_v51  ;;  %2066 = vmatprep.subr.bf16.mxu0 %v2209_v52 }
  0x84   : > { %2086 = vmatprep.subr.bf16.mxu1 %v2210_v53 }
  0x86   : > { %2067 = vmatpush3.bf16.msra.mxu0 %v2209_v52 }
  0x87   : > { %2087 = vmatpush3.bf16.msra.mxu1 %v2210_v53  ;;  %2068 = vmatprep.subr.bf16.mxu0 %v2211_v55 }
  0x88   : > { %2088 = vmatprep.subr.bf16.mxu1 %v2212_v56 }
  0x8a   : > { %2069 = vmatpush3.bf16.msra.mxu0 %v2211_v55  ;;  %v1826_v55 = vld [vmem:[%s2585_s2] ss:$0 sm:$0xff] }
  0x8b   : > { %2089 = vmatpush3.bf16.msra.mxu1 %v2212_v56  ;;  %2094 = vmatprep.subr.bf16.mxu0 %v2215_v58 }
  0x8d   : > { %2071 = vmatmul.mubr.bf16.vlgmr.msra.gmra.mxu0 %v2489_v36 }
  0x8e   : > { %2095 = vmatpush3.bf16.msra.mxu0 %v2215_v58  ;;  %2091 = vmatmul.mubr.bf16.vlgmr.msra.gmra.mxu1 %v2492_v39 }
  0x8f   : > { %2096 = vmatprep.subr.bf16.mxu0 %v2218_v61  ;;  %2110 = vmatprep.mubr.bf16.mxu0 %v1333_v62 }
  0x92   : > { %2097 = vmatpush3.bf16.msra.mxu0 %v2218_v61 }
  0x93   : > { %2098 = vmatprep.subr.bf16.mxu0 %v2219_v63 }
  0x96   : > { %2099 = vmatpush3.bf16.msra.mxu0 %v2219_v63 }
  0x97   : > { %2100 = vmatprep.subr.bf16.mxu0 %v2220_v0 }
  0x9a   : > { %2101 = vmatpush3.bf16.msra.mxu0 %v2220_v0 }
  0x9b   : > { %2102 = vmatprep.subr.bf16.mxu0 %v2221_v1 }
  0x9e   : > { %2103 = vmatpush3.bf16.msra.mxu0 %v2221_v1 }
  0x9f   : > { %2104 = vmatprep.subr.bf16.mxu0 %v2222_v2 }
  0xa2   : > { %2105 = vmatpush3.bf16.msra.mxu0 %v2222_v2 }
  0xa3   : > { %2106 = vmatprep.subr.bf16.mxu0 %v2223_v3 }
  0xa6   : > { %2107 = vmatpush3.bf16.msra.mxu0 %v2223_v3 }
  0xa7   : > { %2108 = vmatprep.subr.bf16.mxu0 %v2224_v4 }
  0xaa   : > { %2109 = vmatpush3.bf16.msra.mxu0 %v2224_v4 }
  0xad   : > { %2111 = vmatmul.mubr.bf16.vlgmr.msra.gmra.mxu0 %v1332_v60 }
  0xed   : > { %v1952_v5 = vpop.f32.mrf.mxu0 }
  0xee   : > { %v1972_v6 = vpop.f32.mrf.mxu1 }
  0xef   : > { %v470_v7 = vadd.f32 %v1972_v6, %v1952_v5  ;;  %v355_v8 = vpop.f32.mrf.mxu0 }
  0xf0   : > { %v461_v9 = vpop.f32.mrf.mxu1 }
  0xf1   : > { %v462_v10 = vadd.f32 %v461_v9, %v355_v8  ;;  %v1953_v11 = vpop.f32.mrf.mxu0 }
  0xf2   : > { %v1973_v12 = vpop.f32.mrf.mxu1 }
  0xf3   : > { %v358_v13 = vpop.f32.mrf.mxu0 }
  0xf4   : > { %v464_v14 = vpop.f32.mrf.mxu1 }
  0xf5   : > { %v465_v15 = vadd.f32 %v464_v14, %v358_v13 }
 0x10d   : > { %v1992_v16 = vpop.f32.mrf.mxu0 }
 0x10e   : > { %v612_v17 = vadd.f32 %v1992_v16, %v470_v7  ;;  %v2012_v18 = vpop.f32.mrf.mxu1 }
 0x10f   : > { %v596_v19 = vpop.f32.mrf.mxu0 }
 0x110   : > { %v610_v20 = vadd.f32 %v596_v19, %v462_v10  ;;  %v742_v21 = vadd.f32 %v2012_v18, %v612_v17  ;;  %v726_v22 = vpop.f32.mrf.mxu1 }
 0x111   : > { %v1993_v23 = vpop.f32.mrf.mxu0 }
 0x112   : > { %v740_v24 = vadd.f32 %v726_v22, %v610_v20  ;;  %v2013_v25 = vpop.f32.mrf.mxu1 }
 0x113   : > { %v599_v26 = vpop.f32.mrf.mxu0 }
 0x114   : > { %v729_v27 = vpop.f32.mrf.mxu1  ;;  %v611_v42 = vadd.f32 %v599_v26, %v465_v15 }
 0x116   : > { %v741_v45 = vadd.f32 %v729_v27, %v611_v42 }
 0x12d   : > { %v2032_v28 = vpop.f32.mrf.mxu0 }
 0x12e   : > { %v2052_v29 = vpop.f32.mrf.mxu1  ;;  %v872_v43 = vadd.f32 %v2032_v28, %v742_v21 }
 0x12f   : > { %v856_v30 = vpop.f32.mrf.mxu0 }
 0x130   : > { %v993_v31 = vpop.f32.mrf.mxu1  ;;  %v870_v44 = vadd.f32 %v856_v30, %v740_v24  ;;  %v1009_v46 = vadd.f32 %v2052_v29, %v872_v43 }
 0x131   : > { %v2033_v32 = vpop.f32.mrf.mxu0 }
 0x132   : > { %v2053_v33 = vpop.f32.mrf.mxu1  ;;  %v1007_v47 = vadd.f32 %v993_v31, %v870_v44 }
 0x133   : > { %v859_v34 = vpop.f32.mrf.mxu0 }
 0x134   : > { %v996_v35 = vpop.f32.mrf.mxu1  ;;  %v871_v48 = vadd.f32 %v859_v34, %v741_v45 }
 0x136   : > { %v1008_v52 = vadd.f32 %v996_v35, %v871_v48 }
 0x14d   : > { %v2072_v36 = vpop.f32.mrf.mxu0 }
 0x14e   : > { %v2092_v37 = vpop.f32.mrf.mxu1  ;;  %v1159_v49 = vadd.f32 %v2072_v36, %v1009_v46 }
 0x14f   : > { %v1143_v38 = vpop.f32.mrf.mxu0 }
 0x150   : > { %v1292_v39 = vpop.f32.mrf.mxu1  ;;  %v1157_v50 = vadd.f32 %v1143_v38, %v1007_v47  ;;  %v1308_v53 = vadd.f32 %v2092_v37, %v1159_v49 }
 0x151   : > { %v2073_v40 = vpop.f32.mrf.mxu0 }
 0x152   : > { %v2093_v41 = vpop.f32.mrf.mxu1  ;;  %v1306_v56 = vadd.f32 %v1292_v39, %v1157_v50 }
 0x153   : > { %v1146_v51 = vpop.f32.mrf.mxu0 }
 0x154   : > { %v1158_v57 = vadd.f32 %v1146_v51, %v1008_v52  ;;  %v1295_v59 = vpop.f32.mrf.mxu1 }
 0x156   : > { %v1307_v0 = vadd.f32 %v1295_v59, %v1158_v57 }
 0x16d   : > { %v2112_v54 = vpop.f32.mrf.mxu0 }
 0x16e   : > { %v1434_v58 = vadd.f32 %v2112_v54, %v1308_v53 }
 0x16f   : > { %v1418_v60 = vpop.f32.mrf.mxu0 }
 0x170   : > { %v1444_v61 = vadd.f32 %v1826_v55, %v1434_v58  ;;  %v1432_v62 = vadd.f32 %v1418_v60, %v1306_v56 }
 0x171   : > { %v2113_v63 = vpop.f32.mrf.mxu0 }
 0x172   : > { %v1829_v1 = vmul.f32 -1.442695, %v1444_v61  ;;  %v1442_v2 = vadd.f32 %v1826_v55, %v1432_v62 }
 0x173   : > { %v1421_v3 = vpop.f32.mrf.mxu0 }
 0x174   : > { %2226 = vpow2.f32 %v1829_v1  ;;  %v1827_v4 = vmul.f32 -1.442695, %v1442_v2  ;;  %v1433_v5 = vadd.f32 %v1421_v3, %v1307_v0 }
 0x176   : > { %2228 = vpow2.f32 %v1827_v4  ;;  %v1443_v6 = vadd.f32 %v1826_v55, %v1433_v5 }
 0x178   : > { %v1828_v7 = vmul.f32 -1.442695, %v1443_v6 }
 0x17a   : > { %2230 = vpow2.f32 %v1828_v7 }
 0x181   : > { %v2227_v8 = vpop.eup %2226 }
 0x182   : > { %v1456_v9 = vadd.f32 1.0, %v2227_v8 }
 0x183   : > { %v2229_v10 = vpop.eup %2228 }
 0x184   : > { %2232 = vrcp.f32 %v1456_v9  ;;  %v1454_v11 = vadd.f32 1.0, %v2229_v10 }
 0x186   : > { %2234 = vrcp.f32 %v1454_v11 }
 0x187   : > { %v2231_v12 = vpop.eup %2230 }
 0x188   : > { %v1455_v13 = vadd.f32 1.0, %v2231_v12 }
 0x18a   : > { %2236 = vrcp.f32 %v1455_v13 }
 0x191   : > { %v2233_v14 = vpop.eup %2232 }
 0x192   : > { %v1465_v15 = vmul.f32 %v2233_v14, %v1444_v61 }
 0x193   : > { %v2235_v17 = vpop.eup %2234 }
 0x194   : > { %v1838_v16 = vpack.c.bf16 %v1465_v15, %v1465_v15  ;;  %v1463_v19 = vmul.f32 %v2235_v17, %v1442_v2 }
 0x196   : > { %1481 = vst [vmem:[%s221_s8 + $0x8] sm:$0x3] %v1838_v16 }
 0x197   : > { %v2237_v18 = vpop.eup %2236 }
 0x198   : > { %v1464_v20 = vmul.f32 %v2237_v18, %v1443_v6 }
 0x19a   : > { %v1842_v21 = vpack.c.bf16 %v1464_v20, %v1463_v19 }
 0x19c   : > { %1843 = vst [vmem:[%s221_s8] sm:$0xff] %v1842_v21  }
 0x19d PF: > { %s13_s14 = sadd.s32 1, %s2260_s14   ;;  %s2587_s12 = smov %s2256_s13 }
 0x19e   : > { %p10_p5 = scmp.ge.s32.totalorder %s13_s14, 4   ;;  %s2588_s13 = smov %s2590_s15 }
 0x1a0   :  { %12 = sbr.rel (!%p10_p5) target bundleno = 2 (0x2), region = 79 }

// kernel: _lambda_.23
= control target key start
LH: loop header
LB: loop body
LE: loop exit
PB: predicated region body
PF: predicated region fallthrough
CT: control target
= control target key end

     0   :  { %v186_v0 = vmov 0.0   ;;  %vm187_vm0 = vmmov 0   ;;  %s249_s1 = inlined_call_operand.vmem [shape: bf16[128,128], index: 1, kind: input, shape index: {}]   ;;  %s250_s0 = inlined_call_operand.vmem [shape: bf16[8,128], index: 0, kind: input, shape index: {}]   ;;  %s251_s3 = inlined_call_operand.vmem [shape: bf16[8,128], index: 3, kind: input, shape index: {}]   ;;  %s252_s2 = inlined_call_operand.vmem [shape: f32[1,128], index: 2, kind: input, shape index: {}]   ;;  %s253_s4 = inlined_call_operand.vmem [shape: bf16[8,128], index: 4, kind: output, shape index: {}]  }
   0x1   :  { %156 = vmatprep.subr.bf16.mxu0 %v186_v0  ;;  %v178_v1 = vld [vmem:[%s249_s1 + $0x38] sm:$0xff]   ;;  %172 = vmatprep.mubr.msk.bf16.mxu0 %vm187_vm0, %v186_v0  ;;  %v179_v2 = vld [vmem:[%s249_s1 + $0x30] sm:$0xff]   ;;  %v180_v3 = vld [vmem:[%s249_s1 + $0x28] sm:$0xff]  }
   0x2   :  { %157 = vmatpush3.bf16.msra.mxu0 %v178_v1  ;;  %v181_v4 = vld [vmem:[%s249_s1 + $0x20] sm:$0xff]   ;;  %v182_v5 = vld [vmem:[%s249_s1 + $0x18] sm:$0xff]   ;;  %v183_v6 = vld [vmem:[%s249_s1 + $0x10] sm:$0xff]  }
   0x3   :  { %158 = vmatprep.subr.bf16.mxu0 %v186_v0  ;;  %v184_v7 = vld [vmem:[%s249_s1 + $0x8] sm:$0xff]   ;;  %v185_v8 = vld [vmem:[%s249_s1] sm:$0xff]  }
   0x4   :  { %v18_v9 = vld [vmem:[%s250_s0] sm:$0xf] }
   0x5   :  { %v19_v10 = vld [vmem:[%s251_s3] sm:$0xf] }
   0x6   :  { %159 = vmatpush3.bf16.msra.mxu0 %v179_v2  ;;  %v20_v11 = vmul.bf16 %v19_v10, %v18_v9  ;;  %v138_v12 = vld [vmem:[%s252_s2] ss:$0 sm:$0xff] }
   0x7   :  { %160 = vmatprep.subr.bf16.mxu0 %v186_v0 }
   0xa   :  { %161 = vmatpush3.bf16.msra.mxu0 %v180_v3 }
   0xb   :  { %162 = vmatprep.subr.bf16.mxu0 %v186_v0 }
   0xe   :  { %163 = vmatpush3.bf16.msra.mxu0 %v181_v4 }
   0xf   :  { %164 = vmatprep.subr.bf16.mxu0 %v186_v0 }
  0x12   :  { %165 = vmatpush3.bf16.msra.mxu0 %v182_v5 }
  0x13   :  { %166 = vmatprep.subr.bf16.mxu0 %v186_v0 }
  0x16   :  { %167 = vmatpush3.bf16.msra.mxu0 %v183_v6 }
  0x17   :  { %168 = vmatprep.subr.bf16.mxu0 %v186_v0 }
  0x1a   :  { %169 = vmatpush3.bf16.msra.mxu0 %v184_v7 }
  0x1b   :  { %170 = vmatprep.subr.bf16.mxu0 %v186_v0 }
  0x1e   :  { %171 = vmatpush3.bf16.msra.mxu0 %v185_v8 }
  0x21   :  { %173 = vmatmul.mubr.bf16.vlgmr.msra.gmra.mxu0 %v20_v11 }
  0xe1   :  { %v126_v13 = vpop.f32.mrf.mxu0 }
  0xe2   :  { %v127_v14 = vadd.f32 %v138_v12, %v126_v13 }
  0xe3   :  { %v174_v15 = vpop.f32.mrf.mxu0 }
  0xe4   :  { %v132_v16 = vpack.c.bf16 %v127_v14, %v127_v14 }
  0xe5   :  { %v129_v17 = vpop.f32.mrf.mxu0 }
  0xe6   :  { %133 = vst [vmem:[%s253_s4] sm:$0xf] %v132_v16 }
  0xe7   :  { %v175_v18 = vpop.f32.mrf.mxu0 }

// kernel: _lambda_.21
= control target key start
LH: loop header
LB: loop body
LE: loop exit
PB: predicated region body
PF: predicated region fallthrough
CT: control target
= control target key end

     0   :  { %s716_s15 = smov 0   ;;  %s718_s16 = smov 0   ;;  %s791_s0 = inlined_call_operand.vmem [shape: bf16[2,4,12,128], index: 0, kind: input, shape index: {}]   ;;  %s792_s1 = inlined_call_operand.vmem [shape: f32[9,1,128], index: 1, kind: input, shape index: {}]   ;;  %s793_s2 = inlined_call_operand.vmem [shape: f32[1,128], index: 2, kind: input, shape index: {}]   ;;  %s794_s3 = inlined_call_operand.vmem [shape: bf16[2,6,128], index: 3, kind: output, shape index: {0}]   ;;  %s795_s4 = inlined_call_operand.vmem [shape: f32[2,1,128], index: 4, kind: output, shape index: {1}]  }
   0x1   :  { %s720_s17 = smov 0  }
   0x2 LB: > { %s27_s18 = sadd.s32 1, %s685_s16  ;;  %p605_p0 = scmp.ge.s32.totalorder %s689_s17, 1  ;;  %s689_s17 = sphi %s720_s17, %s15_s17   ;;  %s685_s16 = sphi %s718_s16, %s797_s16   ;;  %s681_s15 = sphi %s716_s15, %s796_s15  }
   0x3   : > { %p29_p1 = scmp.ge.s32.totalorder %s27_s18, 2  ;;  %p202_p2 = scmp.lt.s32.totalorder %s689_s17, 3 }
   0x5   : > { %s799_s18 = smov (%p29_p1, %s27_s18), 0  ;;  %p203_p3 = pnand %p605_p0, %p202_p2 }
   0x6   : > { %p245_p4 = scmp.lt.s32.totalorder (!%p203_p3), %s681_s15, 1 }
   0x7   : > { %206 = sbr.rel (%p203_p3) target bundleno = 88 (0x58), region = 32 }
   0xc   : > { %s801_s15 = smov (!%p245_p4, %s681_s15), 1  ;;  %v609_v0 = vld [vmem:[%s792_s1] ss:$0 sm:$0xff]  ;;  %v612_v1 = vld [vmem:[%s792_s1 + $0x1] ss:$0 sm:$0xff]  ;;  %vm367_vm0 = vcmask 1044480   ;;  %v431_v60 = vlaneseq }
   0xd   : > { %s636_s19 = sshll.u32 %s801_s15, 5  ;;  %v614_v2 = vld [vmem:[%s792_s1 + $0x2] ss:$0 sm:$0xff]  ;;  %v623_v3 = vld [vmem:[%s792_s1 + $0x5] ss:$0 sm:$0xff]  ;;  %vm408_vm1 = vcmask 1043456   ;;  %s271_s27 = scalar_lea.vmem %s795_s4, %s801_s15 }
   0xe   : > { %s252_s26 = scalar_lea.vmem %s791_s0, %s636_s19  ;;  %v625_v4 = vld [vmem:[%s792_s1 + $0x6] ss:$0 sm:$0xff]  ;;  %v617_v16 = vld [vmem:[%s792_s1 + $0x3] ss:$0 sm:$0xff]  ;;  %v620_v26 = vld [vmem:[%s792_s1 + $0x4] ss:$0 sm:$0xff] }
   0xf   : > { %v272_v5 = vld [vmem:[%s252_s26] sm:$0x7]  ;;  %v610_v6 = vld [vmem:[%s252_s26 + $0x8] sm:$0x7]  ;;  %v615_v11 = vld [vmem:[%s252_s26 + $0x10] sm:$0x7] }
  0x10   : > { %v295_v7 = vld [vmem:[%s252_s26] ss:$16 sps:$4 sm:$0xff]   ;;  %v273_v8 = vunpack.c.l.bf16 %v272_v5  ;;  %v284_v9 = vunpack.c.l.bf16 %v610_v6  ;;  %v618_v12 = vld [vmem:[%s252_s26 + $0x18] sm:$0x7]  ;;  %v312_v15 = vunpack.c.l.bf16 %v615_v11  ;;  %v352_v17 = vld [vmem:[%s252_s26 + $0x4] sm:$0x1] }
  0x11   : > { %v296_v10 = vunpack.c.l.bf16 %v295_v7  ;;  %v337_v13 = vunpack.c.h.bf16 %v295_v7  ;;  %v351_v14 = vld [vmem:[%s252_s26] sm:$0xe]  ;;  %v626_v19 = vld [vmem:[%s252_s26 + $0x8] sm:$0xe]  ;;  %v325_v23 = vunpack.c.l.bf16 %v618_v12  ;;  %v627_v24 = vld [vmem:[%s252_s26 + $0xc] sm:$0x1]  ;;  %v354_v28 = vunpack.c.l.bf16 %v352_v17 }
  0x12   : > { %v353_v18 = vunpack.c.l.bf16 %v351_v14  ;;  %v281_v20 = vmul.f32 %v609_v0, %v273_v8  ;;  %v293_v21 = vmul.f32 %v612_v1, %v284_v9  ;;  %v394_v25 = vld [vmem:[%s252_s26] sm:$0xc]  ;;  %v629_v30 = vld [vmem:[%s792_s1 + $0x7] ss:$0 sm:$0xff]  ;;  %v321_v33 = vmul.f32 %v617_v16, %v312_v15  ;;  %v631_v35 = vld [vmem:[%s792_s1 + $0x8] ss:$0 sm:$0xff] }
  0x13   : > { %v305_v22 = vmul.f32 %v614_v2, %v296_v10  ;;  %v346_v27 = vmul.f32 %v623_v3, %v337_v13  ;;  %v375_v34 = vunpack.c.l.bf16 %v626_v19  ;;  %v364_v36 = vmul.f32 %v625_v4, %v354_v28  ;;  %v632_v61 = vld [vmem:[%s793_s2] ss:$0 sm:$0xff]  ;;  %s608_s21 = sshll.u32 %s801_s15, 2 }
  0x14   : > { %v363_v29 = vmul.f32 %v625_v4, %v353_v18  ;;  %v294_v31 = vadd.f32 %v293_v21, %v281_v20  ;;  %v376_v37 = vunpack.c.l.bf16 %v627_v24  ;;  %v395_v38 = vunpack.c.l.bf16 %v394_v25  ;;  %s265_s24 = scalar_lea.vmem %s794_s3, %s608_s21 }
  0x15   : > { %v307_v32 = vrot.slane %v305_v22, 1  ;;  %v334_v40 = vmul.f32 %v620_v26, %v325_v23  ;;  %v385_v42 = vmul.f32 %v629_v30, %v375_v34  ;;  %v369_v43 = vrot.slane %v364_v36, 3 }
  0x16   : > { %v368_v41 = vrot.slane %v363_v29, 3  ;;  %v386_v44 = vmul.f32 %v629_v30, %v376_v37  ;;  %v404_v45 = vmul.f32 %v631_v35, %v395_v38  ;;  %v405_v46 = vmul.f32 %v631_v35, %v354_v28 }
  0x17   : > { %v309_v39 = vadd.f32 %v307_v32, %v294_v31  ;;  %v348_v48 = vrot.slane %v346_v27, 1  ;;  %v389_v49 = vrot.slane %v385_v42, 3  ;;  %v432_v0 = vshrl.u32 %v431_v60, 7 }
  0x18   : > { %v390_v50 = vrot.slane %v386_v44, 3  ;;  %v370_v52 = vsel %vm367_vm0, %v368_v41, %v369_v43  ;;  %v409_v53 = vrot.slane %v404_v45, 4  ;;  %v410_v54 = vrot.slane %v405_v46, 4 }
  0x19   : > { %v322_v47 = vadd.f32 %v321_v33, %v309_v39  ;;  %v770_v2 = vmul.u32.u64.low 2863311531, %v432_v0  ;;  %v771_v3 = vmul.u32.u64.high 2863311531, %v432_v0, %v770_v2  ;;  %vm453_vm6 = vcmask 1045504  }
  0x1a   : > { %v391_v56 = vsel %vm367_vm0, %v389_v49, %v390_v50  ;;  %v411_v58 = vsel %vm408_vm1, %v409_v53, %v410_v54 }
  0x1b   : > { %v335_v51 = vadd.f32 %v334_v40, %v322_v47  ;;  %v439_v4 = vshrl.u32 %v771_v3, 1 }
  0x1d   : > { %v350_v55 = vadd.f32 %v348_v48, %v335_v51  ;;  %v440_v5 = vmul.u32 3, %v439_v4 }
  0x1f   : > { %v372_v57 = vadd.f32 %v370_v52, %v350_v55  ;;  %v441_v8 = vsub.s32 %v432_v0, %v440_v5 }
  0x21   : > { %v393_v59 = vadd.f32 %v391_v56, %v372_v57  ;;  %vm444_vm2 = vcmp.ne.s32.totalorder %v441_v8, 0  ;;  %vm445_vm3 = vcmp.lt.s32.totalorder %v441_v8, 0  ;;  %v447_v9 = vadd.s32 3, %v441_v8 }
  0x22   : > { %vm446_vm4 = vmand %vm445_vm3, %vm444_vm2 }
  0x23   : > { %v413_v62 = vadd.f32 %v411_v58, %v393_v59  ;;  %v448_v10 = vsel %vm446_vm4, %v447_v9, %v441_v8 }
  0x24   : > { %vm449_vm5 = vcmp.lt.s32.totalorder %v448_v10, 2 }
  0x25   : > { %v421_v63 = vadd.f32 %v632_v61, %v413_v62 }
  0x27   : > { %v633_v1 = vmul.f32 -1.442695, %v421_v63 }
  0x29   : > { %663 = vpow2.f32 %v633_v1 }
  0x36   : > { %v664_v6 = vpop.eup %663 }
  0x37   : > { %v425_v7 = vadd.f32 1.0, %v664_v6 }
  0x39   : > { %665 = vrcp.f32 %v425_v7 }
  0x46   : > { %v666_v11 = vpop.eup %665 }
  0x47   : > { %v428_v12 = vmul.f32 %v666_v11, %v421_v63 }
  0x49   : > { %v429_v13 = vpack.c.bf16 %v428_v12, %v428_v12  ;;  %v452_v14 = vsel %vm449_vm5, %v428_v12, 0.0 }
  0x4a   : > { %v454_v15 = vsel %vm453_vm6, %v452_v14, 0.0 }
  0x4b   : > { %430 = vst [vmem:[%s265_s24] sm:$0x7] %v429_v13  ;;  %v455_v16 = vrot.slane %v454_v15, 4 }
  0x4d   : > { %v456_v17 = vadd.f32 %v455_v16, %v454_v15 }
  0x4f   : > { %v457_v18 = vrot.slane %v456_v17, 2 }
  0x51   : > { %v458_v19 = vadd.f32 %v457_v18, %v456_v17 }
  0x53   : > { %v459_v20 = vrot.slane %v458_v19, 1 }
  0x55   : > { %v460_v21 = vadd.f32 %v459_v20, %v458_v19 }
  0x57   : > { %461 = vst [vmem:[%s271_s27] sm:$0x1] %v460_v21 }
  0x58 PF: > { %s15_s17 = sadd.s32 1, %s689_s17   ;;  %s796_s15 = smov %s685_s16 }
  0x59   : > { %p12_p5 = scmp.ge.s32.totalorder %s15_s17, 4   ;;  %s797_s16 = smov %s799_s18 }
  0x5b   :  { %14 = sbr.rel (!%p12_p5) target bundleno = 2 (0x2), region = 91 }

// kernel: _lambda_.22
= control target key start
LH: loop header
LB: loop body
LE: loop exit
PB: predicated region body
PF: predicated region fallthrough
CT: control target
= control target key end

     0   :  { %v393_v0 = vmov 0.0   ;;  %vm394_vm0 = vmmov 0   ;;  %v395_v9 = vmov 1966171168   ;;  %v53_v11 = vlaneseq  ;;  %s579_s1 = inlined_call_operand.vmem [shape: f32[128,128], index: 1, kind: input, shape index: {}]   ;;  %s580_s0 = inlined_call_operand.vmem [shape: f32[2,1,128], index: 0, kind: input, shape index: {}]   ;;  %s581_s3 = inlined_call_operand.vmem [shape: f32[128,128], index: 3, kind: input, shape index: {}]   ;;  %s582_s2 = inlined_call_operand.vmem [shape: f32[1,128], index: 2, kind: input, shape index: {}, may-alias: {2,4}]   ;;  %s583_s4 = inlined_call_operand.vmem [shape: f32[1,128], index: 4, kind: input, shape index: {}, may-alias: {2,4}]   ;;  %s584_s5 = inlined_call_operand.vmem [shape: f32[2,1,128], index: 5, kind: output, shape index: {}]  }
   0x1   :  { %312 = vmatprep.subr.mxu0 %v393_v0  ;;  %v39_v1 = vld [vmem:[%s579_s1 + $0x78] sm:$0xff]  ;;  %v38_v2 = vld [vmem:[%s579_s1 + $0x70] sm:$0xff]  ;;  %344 = vmatprep.mubr.msk.f32.mxu0 %vm394_vm0, %v393_v0  ;;  %v37_v3 = vld [vmem:[%s579_s1 + $0x68] sm:$0xff]  ;;  %v51_v10 = vunpack.c.l.s4 %v395_v9 }
   0x2   :  { %313 = vmatpush3.msra.mxu0 %v39_v1  ;;  %347 = vmatprep.subr.mxu1 %v393_v0  ;;  %v36_v4 = vld [vmem:[%s579_s1 + $0x60] sm:$0xff]  ;;  %v35_v5 = vld [vmem:[%s579_s1 + $0x58] sm:$0xff]  ;;  %v34_v6 = vld [vmem:[%s579_s1 + $0x50] sm:$0xff]  ;;  %v54_v19 = vshrl.u32 %v53_v11, 7 }
   0x3   :  { %314 = vmatprep.subr.mxu0 %v393_v0  ;;  %379 = vmatprep.mubr.msk.f32.mxu1 %vm394_vm0, %v393_v0  ;;  %v33_v7 = vld [vmem:[%s579_s1 + $0x48] sm:$0xff]  ;;  %v32_v8 = vld [vmem:[%s579_s1 + $0x40] sm:$0xff]  ;;  %v31_v14 = vld [vmem:[%s579_s1 + $0x38] sm:$0xff]  ;;  %v52_v18 = vunpack.c.0.s8 %v51_v10 }
   0x4   :  { %315 = vmatpush3.msra.mxu0 %v38_v2  ;;  %v20_v12 = vld [vmem:[%s580_s0] sm:$0x1]  ;;  %v21_v13 = vld [vmem:[%s580_s0 + $0x1] sm:$0x1]  ;;  %v30_v15 = vld [vmem:[%s579_s1 + $0x30] sm:$0xff] }
   0x5   :  { %316 = vmatprep.subr.mxu0 %v393_v0  ;;  %v22_v16 = vmul.f32 0.25, %v20_v12  ;;  %v23_v17 = vmul.f32 0.25, %v21_v13  ;;  %v29_v20 = vld [vmem:[%s579_s1 + $0x28] sm:$0xff]  ;;  %v28_v21 = vld [vmem:[%s579_s1 + $0x20] sm:$0xff]  ;;  %v482_v23 = vsub.s32 %v52_v18, %v54_v19  ;;  %v27_v24 = vld [vmem:[%s579_s1 + $0x18] sm:$0xff] }
   0x6   :  { %317 = vmatpush3.msra.mxu0 %v37_v3  ;;  %v26_v25 = vld [vmem:[%s579_s1 + $0x10] sm:$0xff]  ;;  %v25_v27 = vld [vmem:[%s579_s1 + $0x8] sm:$0xff]  ;;  %v24_v28 = vld [vmem:[%s579_s1] sm:$0xff] }
   0x7   :  { %318 = vmatprep.subr.mxu0 %v393_v0  ;;  %v49_v22 = vcombine.low %v22_v16, %v23_v17  ;;  %v157_v30 = vld [vmem:[%s581_s3 + $0x78] sm:$0xff]  ;;  %v156_v31 = vld [vmem:[%s581_s3 + $0x70] sm:$0xff]  ;;  %v155_v32 = vld [vmem:[%s581_s3 + $0x68] sm:$0xff] }
   0x8   :  { %319 = vmatpush3.msra.mxu0 %v36_v4  ;;  %348 = vmatpush3.msra.mxu1 %v157_v30  ;;  %v154_v33 = vld [vmem:[%s581_s3 + $0x60] sm:$0xff]  ;;  %v153_v34 = vld [vmem:[%s581_s3 + $0x58] sm:$0xff]  ;;  %v152_v35 = vld [vmem:[%s581_s3 + $0x50] sm:$0xff] }
   0x9   :  { %320 = vmatprep.subr.mxu0 %v393_v0  ;;  %v56_v26 = vrot.slane %v49_v22, %v482_v23  ;;  %349 = vmatprep.subr.mxu1 %v393_v0  ;;  %v151_v36 = vld [vmem:[%s581_s3 + $0x48] sm:$0xff]  ;;  %v150_v37 = vld [vmem:[%s581_s3 + $0x40] sm:$0xff]  ;;  %v149_v38 = vld [vmem:[%s581_s3 + $0x38] sm:$0xff] }
   0xa   :  { %321 = vmatpush3.msra.mxu0 %v35_v5  ;;  %350 = vmatpush3.msra.mxu1 %v156_v31  ;;  %v148_v39 = vld [vmem:[%s581_s3 + $0x30] sm:$0xff]  ;;  %v147_v40 = vld [vmem:[%s581_s3 + $0x28] sm:$0xff]  ;;  %v146_v41 = vld [vmem:[%s581_s3 + $0x20] sm:$0xff] }
   0xb   :  { %322 = vmatprep.subr.mxu0 %v393_v0  ;;  %v63_v29 = vrot.slane %v56_v26, %v482_v23  ;;  %351 = vmatprep.subr.mxu1 %v393_v0  ;;  %v145_v42 = vld [vmem:[%s581_s3 + $0x18] sm:$0xff]  ;;  %v144_v43 = vld [vmem:[%s581_s3 + $0x10] sm:$0xff]  ;;  %v143_v44 = vld [vmem:[%s581_s3 + $0x8] sm:$0xff] }
   0xc   :  { %323 = vmatpush3.msra.mxu0 %v34_v6  ;;  %352 = vmatpush3.msra.mxu1 %v155_v32  ;;  %v142_v45 = vld [vmem:[%s581_s3] sm:$0xff] }
   0xd   :  { %324 = vmatprep.subr.mxu0 %v393_v0  ;;  %353 = vmatprep.subr.mxu1 %v393_v0  ;;  %v272_v46 = vld [vmem:[%s582_s2] ss:$0 sm:$0xff] }
   0xe   :  { %325 = vmatpush3.msra.mxu0 %v33_v7  ;;  %354 = vmatpush3.msra.mxu1 %v154_v33  ;;  %v274_v55 = vld [vmem:[%s583_s4] ss:$0 sm:$0xff] }
   0xf   :  { %326 = vmatprep.subr.mxu0 %v393_v0  ;;  %355 = vmatprep.subr.mxu1 %v393_v0 }
  0x10   :  { %327 = vmatpush3.msra.mxu0 %v32_v8  ;;  %356 = vmatpush3.msra.mxu1 %v153_v34 }
  0x11   :  { %328 = vmatprep.subr.mxu0 %v393_v0  ;;  %357 = vmatprep.subr.mxu1 %v393_v0 }
  0x12   :  { %329 = vmatpush3.msra.mxu0 %v31_v14  ;;  %358 = vmatpush3.msra.mxu1 %v152_v35 }
  0x13   :  { %330 = vmatprep.subr.mxu0 %v393_v0  ;;  %359 = vmatprep.subr.mxu1 %v393_v0 }
  0x14   :  { %331 = vmatpush3.msra.mxu0 %v30_v15  ;;  %360 = vmatpush3.msra.mxu1 %v151_v36 }
  0x15   :  { %332 = vmatprep.subr.mxu0 %v393_v0  ;;  %361 = vmatprep.subr.mxu1 %v393_v0 }
  0x16   :  { %333 = vmatpush3.msra.mxu0 %v29_v20  ;;  %362 = vmatpush3.msra.mxu1 %v150_v37 }
  0x17   :  { %334 = vmatprep.subr.mxu0 %v393_v0  ;;  %363 = vmatprep.subr.mxu1 %v393_v0 }
  0x18   :  { %335 = vmatpush3.msra.mxu0 %v28_v21  ;;  %364 = vmatpush3.msra.mxu1 %v149_v38 }
  0x19   :  { %336 = vmatprep.subr.mxu0 %v393_v0  ;;  %365 = vmatprep.subr.mxu1 %v393_v0 }
  0x1a   :  { %337 = vmatpush3.msra.mxu0 %v27_v24  ;;  %366 = vmatpush3.msra.mxu1 %v148_v39 }
  0x1b   :  { %338 = vmatprep.subr.mxu0 %v393_v0  ;;  %367 = vmatprep.subr.mxu1 %v393_v0 }
  0x1c   :  { %339 = vmatpush3.msra.mxu0 %v26_v25  ;;  %368 = vmatpush3.msra.mxu1 %v147_v40 }
  0x1d   :  { %340 = vmatprep.subr.mxu0 %v393_v0  ;;  %369 = vmatprep.subr.mxu1 %v393_v0 }
  0x1e   :  { %341 = vmatpush3.msra.mxu0 %v25_v27  ;;  %370 = vmatpush3.msra.mxu1 %v146_v41 }
  0x1f   :  { %342 = vmatprep.subr.mxu0 %v393_v0  ;;  %371 = vmatprep.subr.mxu1 %v393_v0 }
  0x20   :  { %343 = vmatpush3.msra.mxu0 %v24_v28  ;;  %372 = vmatpush3.msra.mxu1 %v145_v42 }
  0x21   :  { %345 = vmatmul.mubr.f32.vlgmr.msra.gmra.mxu0 %v63_v29  ;;  %373 = vmatprep.subr.mxu1 %v393_v0 }
  0x22   :  { %374 = vmatpush3.msra.mxu1 %v144_v43 }
  0x23   :  { %375 = vmatprep.subr.mxu1 %v393_v0 }
  0x24   :  { %376 = vmatpush3.msra.mxu1 %v143_v44 }
  0x25   :  { %377 = vmatprep.subr.mxu1 %v393_v0 }
  0x26   :  { %378 = vmatpush3.msra.mxu1 %v142_v45 }
  0xe1   :  { %v131_v47 = vpop.f32.mrf.mxu0 }
  0xe2   :  { %v132_v48 = vadd.f32 %v272_v46, %v131_v47 }
  0xe3   :  { %v346_v49 = vpop.f32.mrf.mxu0 }
  0xe4   :  { %v273_v50 = vmul.f32 -1.442695, %v132_v48 }
  0xe6   :  { %385 = vpow2.f32 %v273_v50 }
  0xf3   :  { %v386_v51 = vpop.eup %385 }
  0xf4   :  { %v138_v52 = vadd.f32 1.0, %v386_v51 }
  0xf6   :  { %387 = vrcp.f32 %v138_v52 }
 0x103   :  { %v388_v53 = vpop.eup %387 }
 0x104   :  { %v141_v54 = vmul.f32 %v388_v53, %v132_v48 }
 0x106   :  { %380 = vmatmul.mubr.f32.vlgmr.msra.gmra.mxu1 %v141_v54 }
 0x1c6   :  { %v231_v56 = vpop.f32.mrf.mxu1 }
 0x1c7   :  { %v232_v57 = vadd.f32 %v274_v55, %v231_v56 }
 0x1c8   :  { %v381_v58 = vpop.f32.mrf.mxu1 }
 0x1c9   :  { %v275_v59 = vmul.f32 -1.442695, %v232_v57 }
 0x1cb   :  { %389 = vpow2.f32 %v275_v59 }
 0x1d8   :  { %v390_v60 = vpop.eup %389 }
 0x1d9   :  { %v238_v61 = vadd.f32 1.0, %v390_v60 }
 0x1db   :  { %391 = vrcp.f32 %v238_v61 }
 0x1e8   :  { %v392_v62 = vpop.eup %391 }
 0x1e9   :  { %v248_v63 = vrot.slane %v392_v62, %v482_v23 }
 0x1eb   :  { %v249_v0 = vcombine.high %v248_v63, %v248_v63  ;;  %276 = vst.sshfl [vmem:[%s584_s5] sm:$0x1 pattern:$0x73625140] %v248_v63 }
 0x1ed   :  { %277 = vst.sshfl [vmem:[%s584_s5 + $0x1] sm:$0x1 pattern:$0x73625140] %v249_v0 }

// kernel: _lambda_.24
= control target key start
LH: loop header
LB: loop body
LE: loop exit
PB: predicated region body
PF: predicated region fallthrough
CT: control target
= control target key end

     0   :  { %v245_v1 = vmov 0   ;;  %v34_v18 = vlaneseq  ;;  %s323_s1 = inlined_call_operand.vmem [shape: bf16[128,256], index: 1, kind: input, shape index: {}]   ;;  %s324_s0 = inlined_call_operand.vmem [shape: bf16[8,128], index: 0, kind: input, shape index: {}]   ;;  %s325_s2 = inlined_call_operand.vmem [shape: f32[1,256], index: 2, kind: input, shape index: {}]   ;;  %s326_s3 = inlined_call_operand.vmem [shape: bf16[8,256], index: 3, kind: output, shape index: {}]  }
   0x1   :  { %v213_v0 = vld [vmem:[%s323_s1 + $0x74] ss:$8 sps:$4 sm:$0xff]   ;;  %156 = vmatprep.mubr.bf16.mxu0 %v245_v1  ;;  %v215_v2 = vld [vmem:[%s323_s1 + $0x70] ss:$8 sps:$4 sm:$0xff]   ;;  %v216_v3 = vld [vmem:[%s323_s1 + $0x64] ss:$8 sps:$4 sm:$0xff]  }
   0x2   :  { %124 = vmatprep.subr.bf16.mxu0 %v213_v0  ;;  %v218_v4 = vld [vmem:[%s323_s1 + $0x60] ss:$8 sps:$4 sm:$0xff]   ;;  %v219_v5 = vld [vmem:[%s323_s1 + $0x54] ss:$8 sps:$4 sm:$0xff]   ;;  %v221_v6 = vld [vmem:[%s323_s1 + $0x50] ss:$8 sps:$4 sm:$0xff]  }
   0x3   :  { %125 = vmatpush1.bf16.msra.mxu0 %v215_v2  ;;  %v222_v7 = vld [vmem:[%s323_s1 + $0x44] ss:$8 sps:$4 sm:$0xff]   ;;  %v224_v8 = vld [vmem:[%s323_s1 + $0x40] ss:$8 sps:$4 sm:$0xff]   ;;  %v225_v9 = vld [vmem:[%s323_s1 + $0x34] ss:$8 sps:$4 sm:$0xff]  }
   0x4   :  { %126 = vmatprep.subr.bf16.mxu0 %v216_v3  ;;  %v227_v10 = vld [vmem:[%s323_s1 + $0x30] ss:$8 sps:$4 sm:$0xff]   ;;  %v228_v11 = vld [vmem:[%s323_s1 + $0x24] ss:$8 sps:$4 sm:$0xff]   ;;  %v230_v12 = vld [vmem:[%s323_s1 + $0x20] ss:$8 sps:$4 sm:$0xff]  }
   0x5   :  { %v231_v13 = vld [vmem:[%s323_s1 + $0x14] ss:$8 sps:$4 sm:$0xff]   ;;  %v233_v14 = vld [vmem:[%s323_s1 + $0x10] ss:$8 sps:$4 sm:$0xff]   ;;  %v234_v15 = vld [vmem:[%s323_s1 + $0x4] ss:$8 sps:$4 sm:$0xff]  }
   0x6   :  { %v236_v16 = vld [vmem:[%s323_s1] ss:$8 sps:$4 sm:$0xff]   ;;  %v35_v19 = vshrl.u32 %v34_v18, 7 }
   0x7   :  { %127 = vmatpush1.bf16.msra.mxu0 %v218_v4  ;;  %v15_v17 = vld [vmem:[%s324_s0] sm:$0xf] }
   0x8   :  { %128 = vmatprep.subr.bf16.mxu0 %v219_v5  ;;  %v36_v20 = vsub.s32 0, %v35_v19  ;;  %v32_v21 = vld [vmem:[%s325_s2] sm:$0x3]  ;;  %v40_v22 = vsub.s32 1, %v35_v19 }
   0xa   :  { %v37_v23 = vrot.slane %v32_v21, %v36_v20  ;;  %v41_v24 = vrot.slane %v32_v21, %v40_v22 }
   0xb   :  { %129 = vmatpush1.bf16.msra.mxu0 %v221_v6 }
   0xc   :  { %130 = vmatprep.subr.bf16.mxu0 %v222_v7 }
   0xf   :  { %131 = vmatpush1.bf16.msra.mxu0 %v224_v8 }
  0x10   :  { %132 = vmatprep.subr.bf16.mxu0 %v225_v9 }
  0x13   :  { %133 = vmatpush1.bf16.msra.mxu0 %v227_v10 }
  0x14   :  { %134 = vmatprep.subr.bf16.mxu0 %v228_v11 }
  0x17   :  { %135 = vmatpush1.bf16.msra.mxu0 %v230_v12 }
  0x18   :  { %136 = vmatprep.subr.bf16.mxu0 %v231_v13 }
  0x1b   :  { %137 = vmatpush1.bf16.msra.mxu0 %v233_v14 }
  0x1c   :  { %138 = vmatprep.subr.bf16.mxu0 %v234_v15 }
  0x1f   :  { %139 = vmatpush1.bf16.msra.mxu0 %v236_v16 }
  0x22   :  { %157 = vmatmul.mubr.bf16.vlgmr.msra.gmra.mxu0 %v15_v17 }
  0xe2   :  { %v158_v25 = vpop.f32.mrf.mxu0 }
  0xe3   :  { %v159_v26 = vadd.f32 %v158_v25, %v37_v23 }
  0xe4   :  { %v160_v27 = vpop.f32.mrf.mxu0 }
  0xe5   :  { %v208_v28 = vmul.f32 -1.442695, %v159_v26  ;;  %v161_v29 = vadd.f32 %v160_v27, %v41_v24 }
  0xe6   :  { %v162_v30 = vpop.f32.mrf.mxu0 }
  0xe7   :  { %237 = vpow2.f32 %v208_v28  ;;  %v209_v31 = vmul.f32 -1.442695, %v161_v29 }
  0xe8   :  { %v163_v32 = vpop.f32.mrf.mxu0 }
  0xe9   :  { %239 = vpow2.f32 %v209_v31 }
  0xf4   :  { %v238_v33 = vpop.eup %237 }
  0xf5   :  { %v171_v34 = vadd.f32 1.0, %v238_v33 }
  0xf6   :  { %v240_v35 = vpop.eup %239 }
  0xf7   :  { %241 = vrcp.f32 %v171_v34  ;;  %v172_v36 = vadd.f32 1.0, %v240_v35 }
  0xf9   :  { %243 = vrcp.f32 %v172_v36 }
 0x104   :  { %v242_v37 = vpop.eup %241 }
 0x105   :  { %v177_v39 = vmul.f32 %v242_v37, %v159_v26 }
 0x106   :  { %v244_v38 = vpop.eup %243 }
 0x107   :  { %v178_v40 = vmul.f32 %v244_v38, %v161_v29 }
 0x109   :  { %v211_v41 = vpack.c.bf16 %v178_v40, %v177_v39 }
 0x10b   :  { %187 = vst [vmem:[%s326_s3] sm:$0xff] %v211_v41 }

// kernel: _lambda_.26
= control target key start
LH: loop header
LB: loop body
LE: loop exit
PB: predicated region body
PF: predicated region fallthrough
CT: control target
= control target key end

     0   :  { %v384_v7 = vmov 1966171168   ;;  %v69_v9 = vlaneseq  ;;  %s641_s1 = inlined_call_operand.vmem [shape: f32[256,128], index: 1, kind: input, shape index: {}]   ;;  %s642_s0 = inlined_call_operand.vmem [shape: f32[2,1,256], index: 0, kind: input, shape index: {}]   ;;  %s643_s3 = inlined_call_operand.vmem [shape: f32[128,256], index: 3, kind: input, shape index: {}]   ;;  %s644_s2 = inlined_call_operand.vmem [shape: f32[1,128], index: 2, kind: input, shape index: {}]   ;;  %s645_s4 = inlined_call_operand.vmem [shape: f32[1,256], index: 4, kind: input, shape index: {}]   ;;  %s646_s5 = inlined_call_operand.vmem [shape: f32[2,1,256], index: 5, kind: output, shape index: {}]  }
   0x1   :  { %v55_v0 = vld [vmem:[%s641_s1 + $0xf8] sm:$0xff]  ;;  %v54_v2 = vld [vmem:[%s641_s1 + $0xf0] sm:$0xff]  ;;  %v53_v4 = vld [vmem:[%s641_s1 + $0xe8] sm:$0xff]  ;;  %v67_v8 = vunpack.c.l.s4 %v384_v7 }
   0x2   :  { %v39_v1 = vld [vmem:[%s641_s1 + $0x78] sm:$0xff]  ;;  %335 = vmatprep.subr.mxu0 %v55_v0  ;;  %v38_v3 = vld [vmem:[%s641_s1 + $0x70] sm:$0xff]  ;;  %v37_v5 = vld [vmem:[%s641_s1 + $0x68] sm:$0xff]  ;;  %v450_v15 = vshrl.u32 %v69_v9, 7  ;;  %vm323_vm0 = vcmp.lt.s32.totalorder %v69_v9, 256 }
   0x3   :  { %336 = vmatpush3.msra.mxu0 %v39_v1  ;;  %v52_v6 = vld [vmem:[%s641_s1 + $0xe0] sm:$0xff]  ;;  %v51_v11 = vld [vmem:[%s641_s1 + $0xd8] sm:$0xff]  ;;  %v50_v13 = vld [vmem:[%s641_s1 + $0xd0] sm:$0xff]  ;;  %v68_v14 = vunpack.c.0.s8 %v67_v8 }
   0x4   :  { %337 = vmatprep.subr.mxu0 %v54_v2  ;;  %v36_v10 = vld [vmem:[%s641_s1 + $0x60] sm:$0xff]  ;;  %v35_v12 = vld [vmem:[%s641_s1 + $0x58] sm:$0xff]  ;;  %v34_v16 = vld [vmem:[%s641_s1 + $0x50] sm:$0xff] }
   0x5   :  { %338 = vmatpush3.msra.mxu0 %v38_v3  ;;  %v49_v17 = vld [vmem:[%s641_s1 + $0xc8] sm:$0xff]  ;;  %v20_v18 = vld [vmem:[%s642_s0] sm:$0x3]  ;;  %v21_v20 = vld [vmem:[%s642_s0 + $0x2] sm:$0x3]  ;;  %v471_v24 = vsub.s32 %v68_v14, %v450_v15 }
   0x6   :  { %339 = vmatprep.subr.mxu0 %v53_v4  ;;  %v33_v19 = vld [vmem:[%s641_s1 + $0x48] sm:$0xff]  ;;  %v22_v21 = vmul.f32 0.25, %v20_v18  ;;  %v48_v22 = vld [vmem:[%s641_s1 + $0xc0] sm:$0xff]  ;;  %v23_v23 = vmul.f32 0.25, %v21_v20  ;;  %v47_v26 = vld [vmem:[%s641_s1 + $0xb8] sm:$0xff]  ;;  %v385_v4 = vmov 0.0  }
   0x7   :  { %340 = vmatpush3.msra.mxu0 %v37_v5  ;;  %v32_v25 = vld [vmem:[%s641_s1 + $0x40] sm:$0xff]  ;;  %v31_v28 = vld [vmem:[%s641_s1 + $0x38] sm:$0xff]  ;;  %v46_v29 = vld [vmem:[%s641_s1 + $0xb0] sm:$0xff]  ;;  %275 = vmatprep.mubr.f32.mxu1 %v385_v4 }
   0x8   :  { %341 = vmatprep.subr.mxu0 %v52_v6  ;;  %v65_v27 = vcombine.low %v22_v21, %v23_v23  ;;  %v30_v31 = vld [vmem:[%s641_s1 + $0x30] sm:$0xff]  ;;  %v45_v32 = vld [vmem:[%s641_s1 + $0xa8] sm:$0xff]  ;;  %v44_v35 = vld [vmem:[%s641_s1 + $0xa0] sm:$0xff] }
   0x9   :  { %342 = vmatpush3.msra.mxu0 %v36_v10  ;;  %v29_v34 = vld [vmem:[%s641_s1 + $0x28] sm:$0xff]  ;;  %v28_v37 = vld [vmem:[%s641_s1 + $0x20] sm:$0xff]  ;;  %v43_v38 = vld [vmem:[%s641_s1 + $0x98] sm:$0xff] }
   0xa   :  { %343 = vmatprep.subr.mxu0 %v51_v11  ;;  %v72_v30 = vrot.slane %v65_v27, %v471_v24  ;;  %v27_v39 = vld [vmem:[%s641_s1 + $0x18] sm:$0xff]  ;;  %v42_v40 = vld [vmem:[%s641_s1 + $0x90] sm:$0xff]  ;;  %v41_v42 = vld [vmem:[%s641_s1 + $0x88] sm:$0xff] }
   0xb   :  { %344 = vmatpush3.msra.mxu0 %v35_v12  ;;  %v26_v41 = vld [vmem:[%s641_s1 + $0x10] sm:$0xff]  ;;  %v25_v43 = vld [vmem:[%s641_s1 + $0x8] sm:$0xff]  ;;  %v40_v44 = vld [vmem:[%s641_s1 + $0x80] sm:$0xff] }
   0xc   :  { %345 = vmatprep.subr.mxu0 %v50_v13  ;;  %v73_v33 = vcombine.high %v72_v30, %v72_v30  ;;  %v24_v45 = vld [vmem:[%s641_s1] sm:$0xff]  ;;  %v80_v46 = vrot.slane %v72_v30, %v471_v24  ;;  %v198_v47 = vld [vmem:[%s643_s3 + $0xf8] sm:$0xff]  ;;  %v197_v48 = vld [vmem:[%s643_s3 + $0xf0] sm:$0xff] }
   0xd   :  { %346 = vmatpush3.msra.mxu0 %v34_v16  ;;  %211 = vmatprep.subr.mxu1 %v198_v47  ;;  %v196_v49 = vld [vmem:[%s643_s3 + $0xe8] sm:$0xff]  ;;  %v195_v50 = vld [vmem:[%s643_s3 + $0xe0] sm:$0xff]  ;;  %v194_v51 = vld [vmem:[%s643_s3 + $0xd8] sm:$0xff] }
   0xe   :  { %347 = vmatprep.subr.mxu0 %v49_v17  ;;  %v87_v36 = vrot.slane %v73_v33, %v471_v24  ;;  %212 = vmatpush1.msra.mxu1 %v197_v48  ;;  %v193_v52 = vld [vmem:[%s643_s3 + $0xd0] sm:$0xff]  ;;  %v192_v53 = vld [vmem:[%s643_s3 + $0xc8] sm:$0xff]  ;;  %v191_v54 = vld [vmem:[%s643_s3 + $0xc0] sm:$0xff] }
   0xf   :  { %348 = vmatpush3.msra.mxu0 %v33_v19  ;;  %213 = vmatprep.subr.mxu1 %v196_v49  ;;  %v190_v55 = vld [vmem:[%s643_s3 + $0xb8] sm:$0xff]  ;;  %v189_v56 = vld [vmem:[%s643_s3 + $0xb0] sm:$0xff]  ;;  %v188_v57 = vld [vmem:[%s643_s3 + $0xa8] sm:$0xff] }
  0x10   :  { %349 = vmatprep.subr.mxu0 %v48_v22  ;;  %154 = vmatprep.mubr.f32.mxu0 %v87_v36  ;;  %v187_v58 = vld [vmem:[%s643_s3 + $0xa0] sm:$0xff]  ;;  %v186_v59 = vld [vmem:[%s643_s3 + $0x98] sm:$0xff]  ;;  %v185_v60 = vld [vmem:[%s643_s3 + $0x90] sm:$0xff] }
  0x11   :  { %350 = vmatpush3.msra.mxu0 %v32_v25  ;;  %214 = vmatpush1.msra.mxu1 %v195_v50  ;;  %v184_v61 = vld [vmem:[%s643_s3 + $0x88] sm:$0xff]  ;;  %v183_v62 = vld [vmem:[%s643_s3 + $0x80] sm:$0xff]  ;;  %v182_v63 = vld [vmem:[%s643_s3 + $0x78] sm:$0xff] }
  0x12   :  { %351 = vmatprep.subr.mxu0 %v47_v26  ;;  %215 = vmatprep.subr.mxu1 %v194_v51  ;;  %v181_v0 = vld [vmem:[%s643_s3 + $0x70] sm:$0xff]  ;;  %v180_v1 = vld [vmem:[%s643_s3 + $0x68] sm:$0xff]  ;;  %v179_v2 = vld [vmem:[%s643_s3 + $0x60] sm:$0xff] }
  0x13   :  { %352 = vmatpush3.msra.mxu0 %v31_v28  ;;  %216 = vmatpush1.msra.mxu1 %v193_v52  ;;  %v178_v3 = vld [vmem:[%s643_s3 + $0x58] sm:$0xff]  ;;  %v177_v5 = vld [vmem:[%s643_s3 + $0x50] sm:$0xff]  ;;  %v176_v6 = vld [vmem:[%s643_s3 + $0x48] sm:$0xff] }
  0x14   :  { %353 = vmatprep.subr.mxu0 %v46_v29  ;;  %217 = vmatprep.subr.mxu1 %v192_v53  ;;  %v175_v7 = vld [vmem:[%s643_s3 + $0x40] sm:$0xff]  ;;  %v174_v8 = vld [vmem:[%s643_s3 + $0x38] sm:$0xff]  ;;  %v173_v10 = vld [vmem:[%s643_s3 + $0x30] sm:$0xff]  ;;  %v203_v29 = vsub.s32 0, %v450_v15 }
  0x15   :  { %354 = vmatpush3.msra.mxu0 %v30_v31  ;;  %218 = vmatpush1.msra.mxu1 %v191_v54  ;;  %v172_v11 = vld [vmem:[%s643_s3 + $0x28] sm:$0xff]  ;;  %v171_v12 = vld [vmem:[%s643_s3 + $0x20] sm:$0xff]  ;;  %v170_v13 = vld [vmem:[%s643_s3 + $0x18] sm:$0xff]  ;;  %v207_v31 = vsub.s32 1, %v450_v15 }
  0x16   :  { %355 = vmatprep.subr.mxu0 %v45_v32  ;;  %219 = vmatprep.subr.mxu1 %v190_v55  ;;  %v169_v14 = vld [vmem:[%s643_s3 + $0x10] sm:$0xff]  ;;  %v168_v16 = vld [vmem:[%s643_s3 + $0x8] sm:$0xff]  ;;  %v167_v17 = vld [vmem:[%s643_s3] sm:$0xff] }
  0x17   :  { %356 = vmatpush3.msra.mxu0 %v29_v34  ;;  %220 = vmatpush1.msra.mxu1 %v189_v56  ;;  %v331_v19 = vld [vmem:[%s644_s2] ss:$0 sm:$0xff] }
  0x18   :  { %357 = vmatprep.subr.mxu0 %v44_v35  ;;  %221 = vmatprep.subr.mxu1 %v188_v57  ;;  %v199_v30 = vld [vmem:[%s645_s4] sm:$0x3] }
  0x19   :  { %358 = vmatpush3.msra.mxu0 %v28_v37  ;;  %222 = vmatpush1.msra.mxu1 %v187_v58  ;;  %v204_v32 = vrot.slane %v199_v30, %v203_v29  ;;  %v208_v33 = vrot.slane %v199_v30, %v207_v31 }
  0x1a   :  { %359 = vmatprep.subr.mxu0 %v43_v38  ;;  %223 = vmatprep.subr.mxu1 %v186_v59 }
  0x1b   :  { %360 = vmatpush3.msra.mxu0 %v27_v39  ;;  %224 = vmatpush1.msra.mxu1 %v185_v60 }
  0x1c   :  { %361 = vmatprep.subr.mxu0 %v42_v40  ;;  %225 = vmatprep.subr.mxu1 %v184_v61 }
  0x1d   :  { %362 = vmatpush3.msra.mxu0 %v26_v41  ;;  %226 = vmatpush1.msra.mxu1 %v183_v62 }
  0x1e   :  { %363 = vmatprep.subr.mxu0 %v41_v42  ;;  %227 = vmatprep.subr.mxu1 %v182_v63 }
  0x1f   :  { %364 = vmatpush3.msra.mxu0 %v25_v43  ;;  %228 = vmatpush1.msra.mxu1 %v181_v0 }
  0x20   :  { %365 = vmatprep.subr.mxu0 %v40_v44  ;;  %229 = vmatprep.subr.mxu1 %v180_v1 }
  0x21   :  { %366 = vmatpush3.msra.mxu0 %v24_v45  ;;  %230 = vmatpush1.msra.mxu1 %v179_v2 }
  0x22   :  { %155 = vmatmul.mubr.f32.vlgmr.msra.gmra.mxu0 %v80_v46  ;;  %231 = vmatprep.subr.mxu1 %v178_v3 }
  0x23   :  { %232 = vmatpush1.msra.mxu1 %v177_v5 }
  0x24   :  { %233 = vmatprep.subr.mxu1 %v176_v6 }
  0x25   :  { %234 = vmatpush1.msra.mxu1 %v175_v7 }
  0x26   :  { %235 = vmatprep.subr.mxu1 %v174_v8 }
  0x27   :  { %236 = vmatpush1.msra.mxu1 %v173_v10 }
  0x28   :  { %237 = vmatprep.subr.mxu1 %v172_v11 }
  0x29   :  { %238 = vmatpush1.msra.mxu1 %v171_v12 }
  0x2a   :  { %239 = vmatprep.subr.mxu1 %v170_v13 }
  0x2b   :  { %240 = vmatpush1.msra.mxu1 %v169_v14 }
  0x2c   :  { %241 = vmatprep.subr.mxu1 %v168_v16 }
  0x2d   :  { %242 = vmatpush1.msra.mxu1 %v167_v17 }
  0xe2   :  { %v367_v18 = vpop.f32.mrf.mxu0 }
  0xe4   :  { %v368_v20 = vpop.f32.mrf.mxu0 }
  0xe5   :  { %v369_v21 = vadd.f32 %v368_v20, %v367_v18 }
  0xe7   :  { %v157_v22 = vadd.f32 %v369_v21, %v331_v19 }
  0xe9   :  { %v332_v23 = vmul.f32 -1.442695, %v157_v22 }
  0xeb   :  { %372 = vpow2.f32 %v332_v23 }
  0xf8   :  { %v373_v25 = vpop.eup %372 }
  0xf9   :  { %v163_v26 = vadd.f32 1.0, %v373_v25 }
  0xfb   :  { %374 = vrcp.f32 %v163_v26 }
 0x108   :  { %v375_v27 = vpop.eup %374 }
 0x109   :  { %v166_v28 = vmul.f32 %v375_v27, %v157_v22 }
 0x10b   :  { %276 = vmatmul.mubr.f32.vlgmr.msra.gmra.mxu1 %v166_v28 }
 0x1cb   :  { %v277_v34 = vpop.f32.mrf.mxu1 }
 0x1cc   :  { %v278_v35 = vadd.f32 %v277_v34, %v204_v32 }
 0x1cd   :  { %v279_v36 = vpop.f32.mrf.mxu1 }
 0x1ce   :  { %v333_v37 = vmul.f32 -1.442695, %v278_v35  ;;  %v280_v38 = vadd.f32 %v279_v36, %v208_v33 }
 0x1d0   :  { %376 = vpow2.f32 %v333_v37  ;;  %v334_v39 = vmul.f32 -1.442695, %v280_v38 }
 0x1d2   :  { %378 = vpow2.f32 %v334_v39 }
 0x1dd   :  { %v377_v40 = vpop.eup %376 }
 0x1de   :  { %v288_v41 = vadd.f32 1.0, %v377_v40 }
 0x1df   :  { %v379_v42 = vpop.eup %378 }
 0x1e0   :  { %v289_v43 = vadd.f32 1.0, %v379_v42  ;;  %380 = vrcp.f32 %v288_v41 }
 0x1e2   :  { %382 = vrcp.f32 %v289_v43 }
 0x1ed   :  { %v381_v44 = vpop.eup %380 }
 0x1ef   :  { %v383_v45 = vpop.eup %382 }
 0x1f0   :  { %v296_v46 = vcombine.low %v381_v44, %v383_v45 }
 0x1f2   :  { %v303_v15 = vrot.slane %v296_v46, %v471_v24 }
 0x1f4   :  { %v304_v47 = vcombine.high %v303_v15, %v303_v15  ;;  %v311_v48 = vrot.slane %v303_v15, %v471_v24 }
 0x1f6   :  { %v318_v49 = vrot.slane %v304_v47, %v471_v24  ;;  %325 = vst.msk [vmem:[%s646_s5] sm:$0x3] %vm323_vm0, %v311_v48 }
 0x1f8   :  { %326 = vst.msk [vmem:[%s646_s5 + $0x2] sm:$0x3] %vm323_vm0, %v318_v49 }

// kernel: _lambda_.25
= control target key start
LH: loop header
LB: loop body
LE: loop exit
PB: predicated region body
PF: predicated region fallthrough
CT: control target
= control target key end

     0   :  { %s936_s15 = smov 0   ;;  %s938_s16 = smov 0   ;;  %s1065_s0 = inlined_call_operand.vmem [shape: bf16[2,1,20,256], index: 0, kind: input, shape index: {}]   ;;  %s1066_s1 = inlined_call_operand.vmem [shape: f32[9,1,256], index: 1, kind: input, shape index: {}]   ;;  %s1067_s2 = inlined_call_operand.vmem [shape: f32[1,256], index: 2, kind: input, shape index: {}]   ;;  %s1068_s3 = inlined_call_operand.vmem [shape: bf16[2,8,256], index: 3, kind: output, shape index: {0}]   ;;  %s1069_s4 = inlined_call_operand.vmem [shape: f32[2,1,256], index: 4, kind: output, shape index: {1}]  }
   0x1   :  { %s940_s17 = smov 0  }
   0x2 LB: > { %s27_s18 = sadd.s32 1, %s904_s16  ;;  %p832_p0 = scmp.ge.s32.totalorder %s908_s17, 1  ;;  %s908_s17 = sphi %s940_s17, %s15_s17   ;;  %s904_s16 = sphi %s938_s16, %s1071_s16   ;;  %s900_s15 = sphi %s936_s15, %s1070_s15  }
   0x3   : > { %p29_p1 = scmp.ge.s32.totalorder %s27_s18, 2  ;;  %p208_p2 = scmp.lt.s32.totalorder %s908_s17, 3 }
   0x5   : > { %s1073_s18 = smov (%p29_p1, %s27_s18), 0  ;;  %p209_p3 = pnand %p832_p0, %p208_p2 }
   0x6   : > { %p259_p4 = scmp.lt.s32.totalorder (!%p209_p3), %s900_s15, 1 }
   0x7   : > { %212 = sbr.rel (%p209_p3) target bundleno = 109 (0x6d), region = 32 }
   0xc   : > { %v302_v0 = vlaneseq  ;;  %s1075_s15 = smov (!%p259_p4, %s900_s15), 1  ;;  %v300_v2 = vld [vmem:[%s1066_s1] sm:$0x3]  ;;  %v837_v3 = vld [vmem:[%s1066_s1 + $0x2] sm:$0x3]  ;;  %vm338_vm0 = vcmask 1046528  }
   0xd   : > { %v838_v4 = vld [vmem:[%s1066_s1 + $0x4] sm:$0x3]  ;;  %s852_s25 = smul.u32 24, %s1075_s15  ;;  %v839_v7 = vld [vmem:[%s1066_s1 + $0x6] sm:$0x3]  ;;  %vm373_vm1 = vcmask 1045504  }
   0xe   : > { %v957_v1 = vshrl.u32 %v302_v0, 7  ;;  %vm411_vm2 = vcmask 1043456   ;;  %vm446_vm3 = vcmask 1042432   ;;  %v840_v58 = vld [vmem:[%s1066_s1 + $0x8] sm:$0x3]  ;;  %vm481_vm4 = vcmask 1041408  }
   0xf   : > { %s981_s30 = scalar_lea.vmem %s1065_s0, %s852_s25  ;;  %s850_s21 = sshll.u32 %s1075_s15, 3  ;;  %vm668_vm6 = vcmp.lt.s32.totalorder %v302_v0, 256 }
  0x10   : > { %v970_v5 = vsub.s32 0, %v957_v1  ;;  %v973_v6 = vsub.s32 1, %v957_v1  ;;  %v297_v12 = vld [vmem:[%s981_s30] sm:$0xff]  ;;  %v314_v13 = vld [vmem:[%s981_s30 + $0x8] sm:$0x11]  ;;  %s286_s24 = scalar_lea.vmem %s1068_s3, %s850_s21  ;;  %s836_s25 = sshll.u32 %s1075_s15, 1 }
  0x11   : > { %v349_v14 = vld [vmem:[%s981_s30] sm:$0xee]  ;;  %v298_v19 = vunpack.c.l.bf16 %v297_v12  ;;  %v299_v20 = vunpack.c.h.bf16 %v297_v12  ;;  %v315_v21 = vunpack.c.l.bf16 %v314_v13  ;;  %v316_v22 = vunpack.c.h.bf16 %v314_v13  ;;  %v385_v36 = vld [vmem:[%s981_s30 + $0x8] sm:$0x33]  ;;  %s295_s28 = scalar_lea.vmem %s1069_s4, %s836_s25 }
  0x12   : > { %v305_v8 = vrot.slane %v300_v2, %v970_v5  ;;  %v309_v9 = vrot.slane %v300_v2, %v973_v6  ;;  %v323_v10 = vrot.slane %v837_v3, %v970_v5  ;;  %v327_v11 = vrot.slane %v837_v3, %v973_v6  ;;  %v384_v23 = vld [vmem:[%s981_s30] sm:$0xcc]  ;;  %v422_v53 = vld [vmem:[%s981_s30 + $0x8] sm:$0x77] }
  0x13   : > { %v358_v15 = vrot.slane %v838_v4, %v970_v5  ;;  %v362_v16 = vrot.slane %v838_v4, %v973_v6  ;;  %v396_v17 = vrot.slane %v839_v7, %v970_v5  ;;  %v400_v18 = vrot.slane %v839_v7, %v973_v6  ;;  %v457_v63 = vld [vmem:[%s981_s30] sm:$0x88]  ;;  %v841_v2 = vld [vmem:[%s1066_s1 + $0xa] sm:$0x3] }
  0x14   : > { %v350_v24 = vunpack.c.l.bf16 %v349_v14  ;;  %v351_v25 = vunpack.c.h.bf16 %v349_v14  ;;  %v386_v26 = vunpack.c.l.bf16 %v384_v23  ;;  %v387_v27 = vunpack.c.h.bf16 %v384_v23 }
  0x15   : > { %v312_v28 = vmul.f32 %v305_v8, %v298_v19  ;;  %v313_v29 = vmul.f32 %v309_v9, %v299_v20  ;;  %v330_v30 = vmul.f32 %v323_v10, %v298_v19  ;;  %v331_v31 = vmul.f32 %v327_v11, %v299_v20 }
  0x16   : > { %v332_v32 = vmul.f32 %v323_v10, %v315_v21  ;;  %v333_v33 = vmul.f32 %v327_v11, %v316_v22  ;;  %v365_v34 = vmul.f32 %v358_v15, %v350_v24  ;;  %v366_v35 = vmul.f32 %v362_v16, %v351_v25  ;;  %v492_v25 = vld [vmem:[%s981_s30 + $0x8] sm:$0xff] }
  0x17   : > { %v339_v37 = vrot.slane %v330_v30, 1  ;;  %v342_v38 = vrot.slane %v331_v31, 1  ;;  %v367_v39 = vmul.f32 %v358_v15, %v315_v21  ;;  %v368_v40 = vmul.f32 %v362_v16, %v316_v22 }
  0x18   : > { %v340_v41 = vrot.slane %v332_v32, 1  ;;  %v343_v42 = vrot.slane %v333_v33, 1  ;;  %v374_v43 = vrot.slane %v365_v34, 2  ;;  %v377_v44 = vrot.slane %v366_v35, 2 }
  0x19   : > { %v375_v45 = vrot.slane %v367_v39, 2  ;;  %v378_v46 = vrot.slane %v368_v40, 2  ;;  %v388_v47 = vunpack.c.l.bf16 %v385_v36  ;;  %v389_v48 = vunpack.c.h.bf16 %v385_v36  ;;  %v512_v39 = vld [vmem:[%s981_s30 + $0x10] sm:$0x11] }
  0x1a   : > { %v341_v49 = vsel %vm338_vm0, %v339_v37, %v340_v41  ;;  %v344_v50 = vsel %vm338_vm0, %v342_v38, %v343_v42  ;;  %v403_v51 = vmul.f32 %v396_v17, %v386_v26  ;;  %v404_v52 = vmul.f32 %v400_v18, %v387_v27 }
  0x1b   : > { %v347_v54 = vadd.f32 %v341_v49, %v312_v28  ;;  %v348_v55 = vadd.f32 %v344_v50, %v313_v29  ;;  %v376_v56 = vsel %vm373_vm1, %v374_v43, %v375_v45  ;;  %v379_v57 = vsel %vm373_vm1, %v377_v44, %v378_v46  ;;  %v546_v49 = vld [vmem:[%s981_s30 + $0x8] sm:$0xee] }
  0x1c   : > { %v405_v59 = vmul.f32 %v396_v17, %v388_v47  ;;  %v406_v60 = vmul.f32 %v400_v18, %v389_v48  ;;  %v412_v61 = vrot.slane %v403_v51, 4  ;;  %v415_v62 = vrot.slane %v404_v52, 4  ;;  %v843_v48 = vld [vmem:[%s1066_s1 + $0xe] sm:$0x3] }
  0x1d   : > { %v382_v3 = vadd.f32 %v376_v56, %v347_v54  ;;  %v383_v4 = vadd.f32 %v379_v57, %v348_v55  ;;  %v423_v7 = vunpack.c.l.bf16 %v422_v53  ;;  %v424_v8 = vunpack.c.h.bf16 %v422_v53  ;;  %v844_v54 = vld [vmem:[%s1066_s1 + $0x10] sm:$0x3] }
  0x1e   : > { %v413_v9 = vrot.slane %v405_v59, 4  ;;  %v416_v10 = vrot.slane %v406_v60, 4  ;;  %v431_v11 = vrot.slane %v840_v58, %v970_v5  ;;  %v435_v12 = vrot.slane %v840_v58, %v973_v6 }
  0x1f   : > { %v458_v13 = vunpack.c.l.bf16 %v457_v63  ;;  %v459_v14 = vunpack.c.h.bf16 %v457_v63  ;;  %v466_v15 = vrot.slane %v841_v2, %v970_v5  ;;  %v470_v16 = vrot.slane %v841_v2, %v973_v6 }
  0x20   : > { %v414_v17 = vsel %vm411_vm2, %v412_v61, %v413_v9  ;;  %v417_v18 = vsel %vm411_vm2, %v415_v62, %v416_v10  ;;  %v438_v19 = vmul.f32 %v431_v11, %v386_v26  ;;  %v439_v20 = vmul.f32 %v435_v12, %v387_v27  ;;  %v842_v26 = vld [vmem:[%s1066_s1 + $0xc] sm:$0x3] }
  0x21   : > { %v420_v21 = vadd.f32 %v414_v17, %v382_v3  ;;  %v421_v22 = vadd.f32 %v417_v18, %v383_v4  ;;  %v440_v23 = vmul.f32 %v431_v11, %v423_v7  ;;  %v441_v24 = vmul.f32 %v435_v12, %v424_v8 }
  0x22   : > { %v447_v28 = vrot.slane %v438_v19, 5  ;;  %v450_v29 = vrot.slane %v439_v20, 5  ;;  %v473_v30 = vmul.f32 %v466_v15, %v458_v13  ;;  %v474_v31 = vmul.f32 %v470_v16, %v459_v14 }
  0x23   : > { %v448_v32 = vrot.slane %v440_v23, 5  ;;  %v451_v33 = vrot.slane %v441_v24, 5  ;;  %v475_v34 = vmul.f32 %v466_v15, %v423_v7  ;;  %v476_v35 = vmul.f32 %v470_v16, %v424_v8  ;;  %v580_v15 = vld [vmem:[%s1067_s2] sm:$0x3] }
  0x24   : > { %v482_v27 = vrot.slane %v473_v30, 6  ;;  %v485_v36 = vrot.slane %v474_v31, 6  ;;  %v493_v37 = vunpack.c.l.bf16 %v492_v25  ;;  %v494_v38 = vunpack.c.h.bf16 %v492_v25 }
  0x25   : > { %v449_v40 = vsel %vm446_vm3, %v447_v28, %v448_v32  ;;  %v452_v41 = vsel %vm446_vm3, %v450_v29, %v451_v33  ;;  %v483_v42 = vrot.slane %v475_v34, 6  ;;  %v486_v43 = vrot.slane %v476_v35, 6 }
  0x26   : > { %v455_v44 = vadd.f32 %v449_v40, %v420_v21  ;;  %v456_v45 = vadd.f32 %v452_v41, %v421_v22  ;;  %v501_v46 = vrot.slane %v842_v26, %v970_v5  ;;  %v505_v47 = vrot.slane %v842_v26, %v973_v6 }
  0x27   : > { %v484_v50 = vsel %vm481_vm4, %v482_v27, %v483_v42  ;;  %v487_v51 = vsel %vm481_vm4, %v485_v36, %v486_v43  ;;  %v513_v52 = vunpack.c.l.bf16 %v512_v39  ;;  %v514_v53 = vunpack.c.h.bf16 %v512_v39 }
  0x28   : > { %v490_v55 = vadd.f32 %v484_v50, %v455_v44  ;;  %v491_v56 = vadd.f32 %v487_v51, %v456_v45  ;;  %v508_v57 = vmul.f32 %v501_v46, %v493_v37  ;;  %v509_v58 = vmul.f32 %v505_v47, %v494_v38 }
  0x29   : > { %v521_v59 = vrot.slane %v843_v48, %v970_v5  ;;  %v525_v60 = vrot.slane %v843_v48, %v973_v6  ;;  %v547_v61 = vunpack.c.l.bf16 %v546_v49  ;;  %v548_v62 = vunpack.c.h.bf16 %v546_v49 }
  0x2a   : > { %v510_v63 = vadd.f32 %v508_v57, %v490_v55  ;;  %v511_v2 = vadd.f32 %v509_v58, %v491_v56  ;;  %v555_v3 = vrot.slane %v844_v54, %v970_v5  ;;  %v559_v4 = vrot.slane %v844_v54, %v973_v6 }
  0x2b   : > { %v528_v7 = vmul.f32 %v521_v59, %v493_v37  ;;  %v529_v8 = vmul.f32 %v525_v60, %v494_v38  ;;  %v530_v9 = vmul.f32 %v521_v59, %v513_v52  ;;  %v531_v10 = vmul.f32 %v525_v60, %v514_v53 }
  0x2c   : > { %v562_v11 = vmul.f32 %v555_v3, %v547_v61  ;;  %v563_v12 = vmul.f32 %v559_v4, %v548_v62  ;;  %v564_v13 = vmul.f32 %v555_v3, %v513_v52  ;;  %v565_v14 = vmul.f32 %v559_v4, %v514_v53 }
  0x2d   : > { %v536_v16 = vrot.slane %v528_v7, 1  ;;  %v537_v17 = vrot.slane %v530_v9, 1  ;;  %v539_v18 = vrot.slane %v529_v8, 1  ;;  %v540_v19 = vrot.slane %v531_v10, 1 }
  0x2e   : > { %v570_v20 = vrot.slane %v562_v11, 2  ;;  %v571_v21 = vrot.slane %v564_v13, 2  ;;  %v573_v22 = vrot.slane %v563_v12, 2  ;;  %v574_v23 = vrot.slane %v565_v14, 2 }
  0x2f   : > { %v538_v24 = vsel %vm338_vm0, %v536_v16, %v537_v17  ;;  %v541_v25 = vsel %vm338_vm0, %v539_v18, %v540_v19  ;;  %v585_v28 = vrot.slane %v580_v15, %v970_v5  ;;  %v589_v29 = vrot.slane %v580_v15, %v973_v6 }
  0x30   : > { %v544_v30 = vadd.f32 %v538_v24, %v510_v63  ;;  %v545_v31 = vadd.f32 %v541_v25, %v511_v2  ;;  %v572_v32 = vsel %vm373_vm1, %v570_v20, %v571_v21  ;;  %v575_v33 = vsel %vm373_vm1, %v573_v22, %v574_v23 }
  0x31   : > { %v623_v6 = vand.u32 3, %v957_v1  ;;  %v910_v52 = vmov 1966171168  }
  0x32   : > { %v578_v34 = vadd.f32 %v572_v32, %v544_v30  ;;  %v579_v35 = vadd.f32 %v575_v33, %v545_v31  ;;  %v652_v53 = vunpack.c.l.s4 %v910_v52 }
  0x33   : > { %vm631_vm5 = vcmp.lt.s32.totalorder %v623_v6, 2 }
  0x34   : > { %v592_v26 = vadd.f32 %v585_v28, %v578_v34  ;;  %v593_v27 = vadd.f32 %v589_v29, %v579_v35  ;;  %v653_v58 = vunpack.c.0.s8 %v652_v53 }
  0x36   : > { %v845_v36 = vmul.f32 -1.442695, %v592_v26  ;;  %v846_v37 = vmul.f32 -1.442695, %v593_v27  ;;  %v656_v63 = vsub.s32 %v653_v58, %v957_v1 }
  0x38   : > { %878 = vpow2.f32 %v845_v36 }
  0x39   : > { %880 = vpow2.f32 %v846_v37 }
  0x45   : > { %v879_v38 = vpop.eup %878 }
  0x46   : > { %v881_v39 = vpop.eup %880  ;;  %v600_v5 = vadd.f32 1.0, %v879_v38 }
  0x47   : > { %v601_v40 = vadd.f32 1.0, %v881_v39 }
  0x48   : > { %882 = vrcp.f32 %v600_v5 }
  0x49   : > { %884 = vrcp.f32 %v601_v40 }
  0x55   : > { %v883_v41 = vpop.eup %882 }
  0x56   : > { %v885_v42 = vpop.eup %884  ;;  %v606_v43 = vmul.f32 %v883_v41, %v592_v26 }
  0x57   : > { %v607_v44 = vmul.f32 %v885_v42, %v593_v27 }
  0x58   : > { %v634_v45 = vsel %vm631_vm5, %v606_v43, 0.0 }
  0x59   : > { %v851_v46 = vpack.c.bf16 %v607_v44, %v606_v43  ;;  %v635_v47 = vsel %vm631_vm5, %v607_v44, 0.0  ;;  %v636_v48 = vrot.slane %v634_v45, 4 }
  0x5a   : > { %v642_v49 = vrot.slane %v635_v47, 4 }
  0x5b   : > { %616 = vst [vmem:[%s286_s24] sm:$0xff] %v851_v46  ;;  %v637_v50 = vadd.f32 %v636_v48, %v634_v45 }
  0x5c   : > { %v643_v51 = vadd.f32 %v642_v49, %v635_v47 }
  0x5d   : > { %v638_v54 = vrot.slane %v637_v50, 2 }
  0x5e   : > { %v644_v55 = vrot.slane %v643_v51, 2 }
  0x5f   : > { %v639_v56 = vadd.f32 %v638_v54, %v637_v50 }
  0x60   : > { %v645_v57 = vadd.f32 %v644_v55, %v643_v51 }
  0x61   : > { %v640_v59 = vrot.slane %v639_v56, 1 }
  0x62   : > { %v646_v60 = vrot.slane %v645_v57, 1 }
  0x63   : > { %v641_v61 = vadd.f32 %v640_v59, %v639_v56 }
  0x64   : > { %v647_v62 = vadd.f32 %v646_v60, %v645_v57 }
  0x66   : > { %v650_v2 = vcombine.low %v641_v61, %v647_v62 }
  0x68   : > { %v657_v3 = vrot.slane %v650_v2, %v656_v63 }
  0x6a   : > { %v664_v4 = vrot.slane %v657_v3, %v656_v63 }
  0x6c   : > { %670 = vst.msk [vmem:[%s295_s28] sm:$0x3] %vm668_vm6, %v664_v4 }
  0x6d PF: > { %s15_s17 = sadd.s32 1, %s908_s17   ;;  %s1070_s15 = smov %s904_s16 }
  0x6e   : > { %p12_p5 = scmp.ge.s32.totalorder %s15_s17, 4   ;;  %s1071_s16 = smov %s1073_s18 }
  0x70   :  { %14 = sbr.rel (!%p12_p5) target bundleno = 2 (0x2), region = 88 }

// kernel: _lambda_.28
= control target key start
LH: loop header
LB: loop body
LE: loop exit
PB: predicated region body
PF: predicated region fallthrough
CT: control target
= control target key end

     0   :  { %s815_s12 = smov 0   ;;  %s817_s13 = smov 0   ;;  %s908_s0 = inlined_call_operand.vmem [shape: bf16[8,128], index: 0, kind: input, shape index: {}]   ;;  %s909_s1 = inlined_call_operand.vmem [shape: bf16[128,1792], index: 1, kind: input, shape index: {}]   ;;  %s910_s2 = inlined_call_operand.vmem [shape: f32[1,1792], index: 2, kind: input, shape index: {}]   ;;  %s911_s3 = inlined_call_operand.vmem [shape: bf16[8,1792], index: 3, kind: output, shape index: {}]  }
   0x1   :  { %s819_s14 = smov 0   ;;  %s821_s15 = smov 0  }
   0x2   :  { %s823_s16 = smov 0  }
   0x3 LB: > { %s28_s17 = sadd.s32 1, %s788_s15  ;;  %p76_p1 = scmp.ne.s32.totalorder %s780_s13, %s776_s12  ;;  %s792_s16 = sphi %s823_s16, %s13_s16   ;;  %s788_s15 = sphi %s821_s15, %s915_s15   ;;  %s784_s14 = sphi %s819_s14, %s914_s14   ;;  %s780_s13 = sphi %s817_s13, %s913_s13   ;;  %s776_s12 = sphi %s815_s12, %s912_s12  }
   0x4   : > { %p30_p0 = scmp.ge.s32.totalorder %s28_s17, 7  ;;  %p77_p2 = scmp.eq.s32.totalorder %s792_s16, 0 }
   0x5   : > { %s69_s19 = sadd.s32 1, %s780_s13  ;;  %p649_p5 = scmp.ge.s32.totalorder %s792_s16, 7 }
   0x6   : > { %s917_s17 = smov (%p30_p0, %s28_s17), 0  ;;  %p78_p3 = por %p77_p2, %p76_p1 }
   0x7   : > { %s65_s18 = ssub.s32 %s788_s15, %s917_s17  ;;  %166 = sbr.rel (%p649_p5) target bundleno = 24 (0x18), region = 20 }
   0x8   : > { %p67_p4 = scmp.eq.s32.totalorder %s65_s18, 0 }
   0xa   : > { %s850_s20 = scalar_select %p67_p4, %s780_s13, %s69_s19  }
   0xc   : > { %169 = sbr.rel (!%p78_p3) target bundleno = 24 (0x18), region = 24  ;;  %s171_s21 = sand.u32 (%p78_p3), 1, %s780_s13  }
   0xd   : > { %s679_s22 = sshll.u32 (%p78_p3), %s788_s15, 3  ;;  %s650_s23 = sshll.u32 (%p78_p3), %s171_s21, 7 }
   0xe   : > { %s858_s26 = scalar_lea.vmem (%p78_p3), %s909_s1, %s679_s22  ;;  %s173_s27 = scalar_lea.vmem (%p78_p3), [#allocation2], %s650_s23 }
   0xf   : > { %v238_v0 = vld [vmem:[%s858_s26] sm:$0xff] (%p78_p3)  ;;  %v240_v1 = vld [vmem:[%s858_s26 + $0x38] sm:$0xff] (%p78_p3)  ;;  %v242_v2 = vld [vmem:[%s858_s26 + $0x70] sm:$0xff] (%p78_p3) }
  0x10   : > { %239 = vst [vmem:[%s173_s27] sm:$0xff] (%p78_p3), %v238_v0  ;;  %241 = vst [vmem:[%s173_s27 + $0x8] sm:$0xff] (%p78_p3), %v240_v1  ;;  %v244_v3 = vld [vmem:[%s858_s26 + $0xa8] sm:$0xff] (%p78_p3)  ;;  %v246_v4 = vld [vmem:[%s858_s26 + $0xe0] sm:$0xff] (%p78_p3) }
  0x11   : > { %243 = vst [vmem:[%s173_s27 + $0x10] sm:$0xff] %v242_v2  ;;  %v248_v5 = vld [vmem:[%s858_s26 + $0x118] sm:$0xff]  ;;  %245 = vst [vmem:[%s173_s27 + $0x18] sm:$0xff] %v244_v3  ;;  %v250_v6 = vld [vmem:[%s858_s26 + $0x150] sm:$0xff] }
  0x12   : > { %247 = vst [vmem:[%s173_s27 + $0x20] sm:$0xff] %v246_v4  ;;  %249 = vst [vmem:[%s173_s27 + $0x28] sm:$0xff] %v248_v5  ;;  %v252_v7 = vld [vmem:[%s858_s26 + $0x188] sm:$0xff]  ;;  %v254_v8 = vld [vmem:[%s858_s26 + $0x1c0] sm:$0xff] }
  0x13   : > { %251 = vst [vmem:[%s173_s27 + $0x30] sm:$0xff] %v250_v6  ;;  %253 = vst [vmem:[%s173_s27 + $0x38] sm:$0xff] %v252_v7  ;;  %v256_v9 = vld [vmem:[%s858_s26 + $0x1f8] sm:$0xff]  ;;  %v258_v10 = vld [vmem:[%s858_s26 + $0x230] sm:$0xff] }
  0x14   : > { %255 = vst [vmem:[%s173_s27 + $0x40] sm:$0xff] %v254_v8  ;;  %v260_v11 = vld [vmem:[%s858_s26 + $0x268] sm:$0xff]  ;;  %257 = vst [vmem:[%s173_s27 + $0x48] sm:$0xff] %v256_v9  ;;  %v262_v12 = vld [vmem:[%s858_s26 + $0x2a0] sm:$0xff] }
  0x15   : > { %259 = vst [vmem:[%s173_s27 + $0x50] sm:$0xff] %v258_v10  ;;  %261 = vst [vmem:[%s173_s27 + $0x58] sm:$0xff] %v260_v11  ;;  %v264_v13 = vld [vmem:[%s858_s26 + $0x2d8] sm:$0xff]  ;;  %v266_v14 = vld [vmem:[%s858_s26 + $0x310] sm:$0xff] }
  0x16   : > { %263 = vst [vmem:[%s173_s27 + $0x60] sm:$0xff] %v262_v12  ;;  %265 = vst [vmem:[%s173_s27 + $0x68] sm:$0xff] %v264_v13  ;;  %v268_v15 = vld [vmem:[%s858_s26 + $0x348] sm:$0xff] }
  0x17   : > { %267 = vst [vmem:[%s173_s27 + $0x70] sm:$0xff] %v266_v14  ;;  %269 = vst [vmem:[%s173_s27 + $0x78] sm:$0xff] %v268_v15 }
  0x18 PF: > { %p653_p6 = scmp.ge.s32.totalorder %s792_s16, 1  ;;  %p282_p7 = scmp.lt.s32.totalorder %s792_s16, 8 }
  0x1a   : > { %p283_p8 = pnand %p653_p6, %p282_p7 }
  0x1b   : > { %s289_s28 = sand.u32 (!%p283_p8), 1, %s776_s12   ;;  %s655_s6 = sshll.u32 (!%p283_p8), %s784_s14, 1 }
  0x1c   : > { %286 = sbr.rel (%p283_p8) target bundleno = 300 (0x12c), region = 66  ;;  %s654_s29 = sshll.u32 (!%p283_p8), %s289_s28, 7 }
  0x1d   : > { %s291_s30 = scalar_lea.vmem (!%p283_p8), [#allocation2], %s654_s29  ;;  %p337_p9 = scmp.lt.s32.totalorder (!%p283_p8), %s655_s6, 13 }
  0x21   : > { %v794_v16 = vmov 0   ;;  %v722_v17 = vld [vmem:[%s291_s30 + $0x74] ss:$8 sps:$4 sm:$0xff]   ;;  %v724_v18 = vld [vmem:[%s291_s30 + $0x70] ss:$8 sps:$4 sm:$0xff]   ;;  %v371_v34 = vlaneseq  ;;  %s919_s6 = smov (!%p337_p9, %s655_s6), 13 }
  0x22   : > { %493 = vmatprep.mubr.bf16.mxu0 %v794_v16  ;;  %461 = vmatprep.subr.bf16.mxu0 %v722_v17  ;;  %v725_v19 = vld [vmem:[%s291_s30 + $0x64] ss:$8 sps:$4 sm:$0xff]   ;;  %v727_v20 = vld [vmem:[%s291_s30 + $0x60] ss:$8 sps:$4 sm:$0xff]   ;;  %v728_v21 = vld [vmem:[%s291_s30 + $0x54] ss:$8 sps:$4 sm:$0xff]   ;;  %s339_s9 = scalar_lea.vmem %s910_s2, %s919_s6 }
  0x23   : > { %462 = vmatpush1.bf16.msra.mxu0 %v724_v18  ;;  %v730_v22 = vld [vmem:[%s291_s30 + $0x50] ss:$8 sps:$4 sm:$0xff]   ;;  %v731_v23 = vld [vmem:[%s291_s30 + $0x44] ss:$8 sps:$4 sm:$0xff]   ;;  %v733_v24 = vld [vmem:[%s291_s30 + $0x40] ss:$8 sps:$4 sm:$0xff]  }
  0x24   : > { %463 = vmatprep.subr.bf16.mxu0 %v725_v19  ;;  %v734_v25 = vld [vmem:[%s291_s30 + $0x34] ss:$8 sps:$4 sm:$0xff]   ;;  %v736_v26 = vld [vmem:[%s291_s30 + $0x30] ss:$8 sps:$4 sm:$0xff]   ;;  %v737_v27 = vld [vmem:[%s291_s30 + $0x24] ss:$8 sps:$4 sm:$0xff]  }
  0x25   : > { %v739_v28 = vld [vmem:[%s291_s30 + $0x20] ss:$8 sps:$4 sm:$0xff]   ;;  %v740_v29 = vld [vmem:[%s291_s30 + $0x14] ss:$8 sps:$4 sm:$0xff]   ;;  %v742_v30 = vld [vmem:[%s291_s30 + $0x10] ss:$8 sps:$4 sm:$0xff]  }
  0x26   : > { %v743_v31 = vld [vmem:[%s291_s30 + $0x4] ss:$8 sps:$4 sm:$0xff]   ;;  %v745_v32 = vld [vmem:[%s291_s30] ss:$8 sps:$4 sm:$0xff]   ;;  %v352_v33 = vld [vmem:[%s908_s0] sm:$0xf] }
  0x27   : > { %464 = vmatpush1.bf16.msra.mxu0 %v727_v20  ;;  %v372_v35 = vshrl.u32 %v371_v34, 7  ;;  %v369_v37 = vld [vmem:[%s339_s9] sm:$0x3]  ;;  %s657_s10 = sshll.u32 %s919_s6, 2 }
  0x28   : > { %465 = vmatprep.subr.bf16.mxu0 %v728_v21  ;;  %s349_s14 = scalar_lea.vmem %s911_s3, %s657_s10 }
  0x29   : > { %v373_v36 = vsub.s32 0, %v372_v35  ;;  %v377_v38 = vsub.s32 1, %v372_v35 }
  0x2b   : > { %466 = vmatpush1.bf16.msra.mxu0 %v730_v22  ;;  %v374_v39 = vrot.slane %v369_v37, %v373_v36  ;;  %v378_v40 = vrot.slane %v369_v37, %v377_v38 }
  0x2c   : > { %467 = vmatprep.subr.bf16.mxu0 %v731_v23 }
  0x2f   : > { %468 = vmatpush1.bf16.msra.mxu0 %v733_v24 }
  0x30   : > { %469 = vmatprep.subr.bf16.mxu0 %v734_v25 }
  0x33   : > { %470 = vmatpush1.bf16.msra.mxu0 %v736_v26 }
  0x34   : > { %471 = vmatprep.subr.bf16.mxu0 %v737_v27 }
  0x37   : > { %472 = vmatpush1.bf16.msra.mxu0 %v739_v28 }
  0x38   : > { %473 = vmatprep.subr.bf16.mxu0 %v740_v29 }
  0x3b   : > { %474 = vmatpush1.bf16.msra.mxu0 %v742_v30 }
  0x3c   : > { %475 = vmatprep.subr.bf16.mxu0 %v743_v31 }
  0x3f   : > { %476 = vmatpush1.bf16.msra.mxu0 %v745_v32 }
  0x42   : > { %494 = vmatmul.mubr.bf16.vlgmr.msra.gmra.mxu0 %v352_v33 }
 0x102   : > { %v495_v41 = vpop.f32.mrf.mxu0 }
 0x103   : > { %v496_v42 = vadd.f32 %v495_v41, %v374_v39 }
 0x104   : > { %v497_v43 = vpop.f32.mrf.mxu0 }
 0x105   : > { %v674_v44 = vmul.f32 -1.442695, %v496_v42  ;;  %v498_v45 = vadd.f32 %v497_v43, %v378_v40 }
 0x106   : > { %v499_v46 = vpop.f32.mrf.mxu0 }
 0x107   : > { %746 = vpow2.f32 %v674_v44  ;;  %v675_v47 = vmul.f32 -1.442695, %v498_v45 }
 0x108   : > { %v500_v48 = vpop.f32.mrf.mxu0 }
 0x109   : > { %748 = vpow2.f32 %v675_v47 }
 0x114   : > { %v747_v49 = vpop.eup %746 }
 0x115   : > { %v508_v50 = vadd.f32 1.0, %v747_v49 }
 0x116   : > { %v749_v51 = vpop.eup %748 }
 0x117   : > { %750 = vrcp.f32 %v508_v50  ;;  %v509_v52 = vadd.f32 1.0, %v749_v51 }
 0x119   : > { %752 = vrcp.f32 %v509_v52 }
 0x124   : > { %v751_v53 = vpop.eup %750 }
 0x125   : > { %v514_v55 = vmul.f32 %v751_v53, %v496_v42 }
 0x126   : > { %v753_v54 = vpop.eup %752 }
 0x127   : > { %v515_v56 = vmul.f32 %v753_v54, %v498_v45 }
 0x129   : > { %v680_v57 = vpack.c.bf16 %v515_v56, %v514_v55 }
 0x12b   : > { %524 = vst [vmem:[%s349_s14] sm:$0xff] %v680_v57 }
 0x12c PF: > { %s13_s16 = sadd.s32 1, %s792_s16   ;;  %s912_s12 = smov %s780_s13 }
 0x12d   : > { %p10_p10 = scmp.ge.s32.totalorder %s13_s16, 9   ;;  %s913_s13 = smov %s850_s20 }
 0x12e   : > { %s914_s14 = smov %s788_s15  ;;  %s915_s15 = smov %s917_s17 }
 0x12f   :  { %12 = sbr.rel (!%p10_p10) target bundleno = 3 (0x3), region = 111 }

// kernel: _lambda_.27
= control target key start
LH: loop header
LB: loop body
LE: loop exit
PB: predicated region body
PF: predicated region fallthrough
CT: control target
= control target key end

     0   :  { %s365_s1 = inlined_call_operand.vmem [shape: bf16[256,128], index: 1, kind: input, shape index: {}]   ;;  %s366_s0 = inlined_call_operand.vmem [shape: bf16[8,256], index: 0, kind: input, shape index: {}]   ;;  %s367_s3 = inlined_call_operand.vmem [shape: bf16[8,256], index: 3, kind: input, shape index: {}]   ;;  %s368_s4 = inlined_call_operand.vmem [shape: bf16[8,128], index: 4, kind: input, shape index: {}]   ;;  %s369_s2 = inlined_call_operand.vmem [shape: f32[1,128], index: 2, kind: input, shape index: {}]   ;;  %s370_s5 = inlined_call_operand.vmem [shape: bf16[8,128], index: 5, kind: output, shape index: {}]  }
   0x1   :  { %v256_v0 = vld [vmem:[%s365_s1 + $0x78] sm:$0xff]   ;;  %v258_v2 = vld [vmem:[%s365_s1 + $0x70] sm:$0xff]   ;;  %v260_v4 = vld [vmem:[%s365_s1 + $0x68] sm:$0xff]  }
   0x2   :  { %v257_v1 = vld [vmem:[%s365_s1 + $0x38] sm:$0xff]   ;;  %234 = vmatprep.subr.bf16.mxu0 %v256_v0  ;;  %v259_v3 = vld [vmem:[%s365_s1 + $0x30] sm:$0xff]   ;;  %v261_v5 = vld [vmem:[%s365_s1 + $0x28] sm:$0xff]  }
   0x3   :  { %235 = vmatpush3.bf16.msra.mxu0 %v257_v1  ;;  %v262_v6 = vld [vmem:[%s365_s1 + $0x60] sm:$0xff]   ;;  %v264_v8 = vld [vmem:[%s365_s1 + $0x58] sm:$0xff]   ;;  %v266_v10 = vld [vmem:[%s365_s1 + $0x50] sm:$0xff]  }
   0x4   :  { %236 = vmatprep.subr.bf16.mxu0 %v258_v2  ;;  %v263_v7 = vld [vmem:[%s365_s1 + $0x20] sm:$0xff]   ;;  %v265_v9 = vld [vmem:[%s365_s1 + $0x18] sm:$0xff]   ;;  %v267_v14 = vld [vmem:[%s365_s1 + $0x10] sm:$0xff]  }
   0x5   :  { %v21_v11 = vld [vmem:[%s366_s0] sm:$0xff]  ;;  %v268_v16 = vld [vmem:[%s365_s1 + $0x48] sm:$0xff]  }
   0x6   :  { %v22_v12 = vld [vmem:[%s367_s3] sm:$0xff]  ;;  %v269_v17 = vld [vmem:[%s365_s1 + $0x8] sm:$0xff]  }
   0x7   :  { %237 = vmatpush3.bf16.msra.mxu0 %v259_v3  ;;  %v23_v13 = vmul.bf16 %v22_v12, %v21_v11  ;;  %v270_v18 = vld [vmem:[%s365_s1 + $0x40] sm:$0xff]  }
   0x8   :  { %238 = vmatprep.subr.bf16.mxu0 %v260_v4  ;;  %v271_v19 = vld [vmem:[%s365_s1] sm:$0xff]  }
   0x9   :  { %v217_v15 = vcombine.high %v23_v13, %v23_v13  ;;  %v216_v20 = vcombine.low %v23_v13, %v23_v13  ;;  %v206_v22 = vld [vmem:[%s368_s4] sm:$0xf] }
   0xa   :  { %v215_v23 = vld [vmem:[%s369_s2] ss:$0 sm:$0xff]  ;;  %v207_v26 = vunpack.c.l.bf16 %v206_v22 }
   0xb   :  { %239 = vmatpush3.bf16.msra.mxu0 %v261_v5  ;;  %198 = vmatprep.mubr.bf16.mxu0 %v217_v15 }
   0xc   :  { %240 = vmatprep.subr.bf16.mxu0 %v262_v6 }
   0xf   :  { %241 = vmatpush3.bf16.msra.mxu0 %v263_v7 }
  0x10   :  { %242 = vmatprep.subr.bf16.mxu0 %v264_v8 }
  0x13   :  { %243 = vmatpush3.bf16.msra.mxu0 %v265_v9 }
  0x14   :  { %244 = vmatprep.subr.bf16.mxu0 %v266_v10 }
  0x17   :  { %245 = vmatpush3.bf16.msra.mxu0 %v267_v14 }
  0x18   :  { %246 = vmatprep.subr.bf16.mxu0 %v268_v16 }
  0x1b   :  { %247 = vmatpush3.bf16.msra.mxu0 %v269_v17 }
  0x1c   :  { %248 = vmatprep.subr.bf16.mxu0 %v270_v18 }
  0x1f   :  { %249 = vmatpush3.bf16.msra.mxu0 %v271_v19 }
  0x22   :  { %199 = vmatmul.mubr.bf16.vlgmr.msra.gmra.mxu0 %v216_v20 }
  0xe2   :  { %v250_v21 = vpop.f32.mrf.mxu0 }
  0xe4   :  { %v251_v24 = vpop.f32.mrf.mxu0 }
  0xe5   :  { %v252_v25 = vadd.f32 %v251_v24, %v250_v21 }
  0xe6   :  { %v253_v27 = vpop.f32.mrf.mxu0 }
  0xe7   :  { %v201_v28 = vadd.f32 %v252_v25, %v215_v23 }
  0xe8   :  { %v254_v29 = vpop.f32.mrf.mxu0 }
  0xe9   :  { %v208_v30 = vadd.f32 %v207_v26, %v201_v28 }
  0xeb   :  { %v209_v31 = vpack.c.bf16 %v208_v30, %v208_v30 }
  0xed   :  { %210 = vst [vmem:[%s370_s5] sm:$0xf] %v209_v31 }

// kernel: _lambda_.29
= control target key start
LH: loop header
LB: loop body
LE: loop exit
PB: predicated region body
PF: predicated region fallthrough
CT: control target
= control target key end

     0   :  { %vm79_vm0 = vcmask 1043456   ;;  %vm563_vm1 = vcmask 1041409   ;;  %s2142_s0 = inlined_call_operand.vmem [shape: bf16[2,4,1792], index: 0, kind: input, shape index: {}]   ;;  %s2143_s1 = inlined_call_operand.vmem [shape: f32[1792,128], index: 1, kind: input, shape index: {}]   ;;  %s2144_s2 = inlined_call_operand.vmem [shape: f32[1,128], index: 2, kind: input, shape index: {}]   ;;  %s2145_s3 = inlined_call_operand.hbm [shape: f32[2,128], index: 3, kind: output, shape index: {}]  }
   0x1   :  { %v335_v0 = vld [vmem:[%s2143_s1 + $0xf8] sm:$0xff]  ;;  %v334_v2 = vld [vmem:[%s2143_s1 + $0xf0] sm:$0xff]  ;;  %v333_v6 = vld [vmem:[%s2143_s1 + $0xe8] sm:$0xff] }
   0x2   :  { %v319_v1 = vld [vmem:[%s2143_s1 + $0x78] sm:$0xff]  ;;  %1098 = vmatprep.subr.mxu0 %v335_v0  ;;  %v318_v4 = vld [vmem:[%s2143_s1 + $0x70] sm:$0xff]  ;;  %v317_v8 = vld [vmem:[%s2143_s1 + $0x68] sm:$0xff] }
   0x3   :  { %v367_v3 = vld [vmem:[%s2143_s1 + $0x1f8] sm:$0xff]  ;;  %1099 = vmatpush3.msra.mxu0 %v319_v1  ;;  %v366_v7 = vld [vmem:[%s2143_s1 + $0x1f0] sm:$0xff]  ;;  %v365_v10 = vld [vmem:[%s2143_s1 + $0x1e8] sm:$0xff] }
   0x4   :  { %v351_v5 = vld [vmem:[%s2143_s1 + $0x178] sm:$0xff]  ;;  %1133 = vmatprep.subr.mxu1 %v367_v3  ;;  %1100 = vmatprep.subr.mxu0 %v334_v2  ;;  %v350_v9 = vld [vmem:[%s2143_s1 + $0x170] sm:$0xff]  ;;  %v332_v11 = vld [vmem:[%s2143_s1 + $0xe0] sm:$0xff] }
   0x5   :  { %1134 = vmatpush3.msra.mxu1 %v351_v5  ;;  %1101 = vmatpush3.msra.mxu0 %v318_v4  ;;  %v349_v12 = vld [vmem:[%s2143_s1 + $0x168] sm:$0xff]  ;;  %v316_v13 = vld [vmem:[%s2143_s1 + $0x60] sm:$0xff]  ;;  %v331_v15 = vld [vmem:[%s2143_s1 + $0xd8] sm:$0xff] }
   0x6   :  { %1135 = vmatprep.subr.mxu1 %v366_v7  ;;  %1102 = vmatprep.subr.mxu0 %v333_v6  ;;  %v364_v14 = vld [vmem:[%s2143_s1 + $0x1e0] sm:$0xff]  ;;  %v315_v17 = vld [vmem:[%s2143_s1 + $0x58] sm:$0xff]  ;;  %v330_v19 = vld [vmem:[%s2143_s1 + $0xd0] sm:$0xff] }
   0x7   :  { %1136 = vmatpush3.msra.mxu1 %v350_v9  ;;  %1103 = vmatpush3.msra.mxu0 %v317_v8  ;;  %v348_v16 = vld [vmem:[%s2143_s1 + $0x160] sm:$0xff]  ;;  %v363_v18 = vld [vmem:[%s2143_s1 + $0x1d8] sm:$0xff]  ;;  %v314_v21 = vld [vmem:[%s2143_s1 + $0x50] sm:$0xff] }
   0x8   :  { %1137 = vmatprep.subr.mxu1 %v365_v10  ;;  %1104 = vmatprep.subr.mxu0 %v332_v11  ;;  %v347_v20 = vld [vmem:[%s2143_s1 + $0x158] sm:$0xff]  ;;  %v362_v22 = vld [vmem:[%s2143_s1 + $0x1d0] sm:$0xff]  ;;  %v329_v23 = vld [vmem:[%s2143_s1 + $0xc8] sm:$0xff] }
   0x9   :  { %1138 = vmatpush3.msra.mxu1 %v349_v12  ;;  %1105 = vmatpush3.msra.mxu0 %v316_v13  ;;  %v346_v24 = vld [vmem:[%s2143_s1 + $0x150] sm:$0xff]  ;;  %v313_v25 = vld [vmem:[%s2143_s1 + $0x48] sm:$0xff]  ;;  %v328_v27 = vld [vmem:[%s2143_s1 + $0xc0] sm:$0xff] }
   0xa   :  { %1139 = vmatprep.subr.mxu1 %v364_v14  ;;  %1106 = vmatprep.subr.mxu0 %v331_v15  ;;  %v361_v26 = vld [vmem:[%s2143_s1 + $0x1c8] sm:$0xff]  ;;  %v312_v29 = vld [vmem:[%s2143_s1 + $0x40] sm:$0xff]  ;;  %v327_v31 = vld [vmem:[%s2143_s1 + $0xb8] sm:$0xff] }
   0xb   :  { %1140 = vmatpush3.msra.mxu1 %v348_v16  ;;  %1107 = vmatpush3.msra.mxu0 %v315_v17  ;;  %v345_v28 = vld [vmem:[%s2143_s1 + $0x148] sm:$0xff]  ;;  %v360_v30 = vld [vmem:[%s2143_s1 + $0x1c0] sm:$0xff]  ;;  %v311_v33 = vld [vmem:[%s2143_s1 + $0x38] sm:$0xff] }
   0xc   :  { %1141 = vmatprep.subr.mxu1 %v363_v18  ;;  %1108 = vmatprep.subr.mxu0 %v330_v19  ;;  %v344_v32 = vld [vmem:[%s2143_s1 + $0x140] sm:$0xff]  ;;  %v359_v34 = vld [vmem:[%s2143_s1 + $0x1b8] sm:$0xff]  ;;  %v326_v35 = vld [vmem:[%s2143_s1 + $0xb0] sm:$0xff] }
   0xd   :  { %1142 = vmatpush3.msra.mxu1 %v347_v20  ;;  %1109 = vmatpush3.msra.mxu0 %v314_v21  ;;  %v343_v36 = vld [vmem:[%s2143_s1 + $0x138] sm:$0xff]  ;;  %v310_v37 = vld [vmem:[%s2143_s1 + $0x30] sm:$0xff]  ;;  %v325_v39 = vld [vmem:[%s2143_s1 + $0xa8] sm:$0xff] }
   0xe   :  { %1143 = vmatprep.subr.mxu1 %v362_v22  ;;  %1110 = vmatprep.subr.mxu0 %v329_v23  ;;  %v358_v38 = vld [vmem:[%s2143_s1 + $0x1b0] sm:$0xff]  ;;  %v309_v41 = vld [vmem:[%s2143_s1 + $0x28] sm:$0xff]  ;;  %v324_v42 = vld [vmem:[%s2143_s1 + $0xa0] sm:$0xff] }
   0xf   :  { %1144 = vmatpush3.msra.mxu1 %v346_v24  ;;  %1111 = vmatpush3.msra.mxu0 %v313_v25  ;;  %v342_v40 = vld [vmem:[%s2143_s1 + $0x130] sm:$0xff]  ;;  %v357_v43 = vld [vmem:[%s2143_s1 + $0x1a8] sm:$0xff]  ;;  %v15_v45 = vld [vmem:[%s2142_s0] sm:$0xff] }
  0x10   :  { %1145 = vmatprep.subr.mxu1 %v361_v26  ;;  %1112 = vmatprep.subr.mxu0 %v328_v27  ;;  %v341_v44 = vld [vmem:[%s2143_s1 + $0x128] sm:$0xff]  ;;  %v19_v46 = vld [vmem:[%s2142_s0 + $0x1c] sm:$0xff]  ;;  %v23_v49 = vunpack.c.l.bf16 %v15_v45  ;;  %v24_v51 = vunpack.c.h.bf16 %v15_v45  ;;  %v322_v61 = vld [vmem:[%s2143_s1 + $0x90] sm:$0xff] }
  0x11   :  { %1146 = vmatpush3.msra.mxu1 %v345_v28  ;;  %1113 = vmatpush3.msra.mxu0 %v312_v29  ;;  %v308_v47 = vld [vmem:[%s2143_s1 + $0x20] sm:$0xff]  ;;  %v30_v50 = vunpack.c.l.bf16 %v19_v46  ;;  %v31_v52 = vunpack.c.h.bf16 %v19_v46  ;;  %v323_v53 = vld [vmem:[%s2143_s1 + $0x98] sm:$0xff]  ;;  %v306_v3 = vld [vmem:[%s2143_s1 + $0x10] sm:$0xff] }
  0x12   :  { %1147 = vmatprep.subr.mxu1 %v360_v30  ;;  %1114 = vmatprep.subr.mxu0 %v327_v31  ;;  %v356_v48 = vld [vmem:[%s2143_s1 + $0x1a0] sm:$0xff]  ;;  %v307_v55 = vld [vmem:[%s2143_s1 + $0x18] sm:$0xff]  ;;  %v51_v57 = vcombine.high %v23_v49, %v23_v49  ;;  %v80_v59 = vsel %vm79_vm0, %v23_v49, 0.0  ;;  %v52_v1 = vcombine.high %v24_v51, %v24_v51  ;;  %v354_v4 = vld [vmem:[%s2143_s1 + $0x190] sm:$0xff]  ;;  %v94_v7 = vsel %vm79_vm0, %v24_v51, 0.0 }
  0x13   :  { %1148 = vmatpush3.msra.mxu1 %v344_v32  ;;  %1115 = vmatpush3.msra.mxu0 %v311_v33  ;;  %v340_v54 = vld [vmem:[%s2143_s1 + $0x120] sm:$0xff]  ;;  %v355_v56 = vld [vmem:[%s2143_s1 + $0x198] sm:$0xff]  ;;  %v58_v58 = vcombine.high %v30_v50, %v30_v50  ;;  %v178_v60 = vsel %vm79_vm0, %v30_v50, 0.0  ;;  %v81_v63 = vrot.slane %v80_v59, 4  ;;  %v59_v2 = vcombine.high %v31_v52, %v31_v52  ;;  %v321_v9 = vld [vmem:[%s2143_s1 + $0x88] sm:$0xff] }
  0x14   :  { %1149 = vmatprep.subr.mxu1 %v359_v34  ;;  %1116 = vmatprep.subr.mxu0 %v326_v35  ;;  %v339_v62 = vld [vmem:[%s2143_s1 + $0x118] sm:$0xff]  ;;  %v179_v0 = vrot.slane %v178_v60, 4  ;;  %v87_v5 = vsel %vm79_vm0, %v51_v57, 0.0  ;;  %v192_v8 = vsel %vm79_vm0, %v31_v52, 0.0  ;;  %v338_v10 = vld [vmem:[%s2143_s1 + $0x110] sm:$0xff]  ;;  %v305_v15 = vld [vmem:[%s2143_s1 + $0x8] sm:$0xff] }
  0x15   :  { %1150 = vmatpush3.msra.mxu1 %v343_v36  ;;  %1117 = vmatpush3.msra.mxu0 %v310_v37  ;;  %v185_v6 = vsel %vm79_vm0, %v58_v58, 0.0  ;;  %v88_v11 = vrot.slane %v87_v5, 4  ;;  %v82_v13 = vadd.f32 %v81_v63, %v80_v59  ;;  %v353_v16 = vld [vmem:[%s2143_s1 + $0x188] sm:$0xff]  ;;  %v101_v17 = vsel %vm79_vm0, %v52_v1, 0.0  ;;  %v320_v21 = vld [vmem:[%s2143_s1 + $0x80] sm:$0xff]  ;;  %v399_v37 = vld [vmem:[%s2143_s1 + $0x2f8] sm:$0xff] }
  0x16   :  { %1151 = vmatprep.subr.mxu1 %v358_v38  ;;  %1118 = vmatprep.subr.mxu0 %v325_v39  ;;  %v186_v12 = vrot.slane %v185_v6, 4  ;;  %v180_v14 = vadd.f32 %v179_v0, %v178_v60  ;;  %v199_v18 = vsel %vm79_vm0, %v59_v2, 0.0  ;;  %v95_v19 = vrot.slane %v94_v7, 4  ;;  %v337_v24 = vld [vmem:[%s2143_s1 + $0x108] sm:$0xff]  ;;  %v304_v27 = vld [vmem:[%s2143_s1] sm:$0xff] }
  0x17   :  { %1152 = vmatpush3.msra.mxu1 %v342_v40  ;;  %1119 = vmatpush3.msra.mxu0 %v309_v41  ;;  %v193_v20 = vrot.slane %v192_v8, 4  ;;  %v89_v22 = vadd.f32 %v88_v11, %v87_v5  ;;  %v83_v25 = vrot.slane %v82_v13, 2  ;;  %v352_v28 = vld [vmem:[%s2143_s1 + $0x180] sm:$0xff]  ;;  %v102_v29 = vrot.slane %v101_v17, 4 }
  0x18   :  { %1153 = vmatprep.subr.mxu1 %v357_v43  ;;  %1120 = vmatprep.subr.mxu0 %v324_v42  ;;  %v187_v23 = vadd.f32 %v186_v12, %v185_v6  ;;  %v181_v26 = vrot.slane %v180_v14, 2  ;;  %v200_v30 = vrot.slane %v199_v18, 4  ;;  %v96_v31 = vadd.f32 %v95_v19, %v94_v7  ;;  %v336_v38 = vld [vmem:[%s2143_s1 + $0x100] sm:$0xff]  ;;  %v431_v43 = vld [vmem:[%s2143_s1 + $0x3f8] sm:$0xff] }
  0x19   :  { %1154 = vmatpush3.msra.mxu1 %v341_v44  ;;  %1121 = vmatpush3.msra.mxu0 %v308_v47  ;;  %v194_v32 = vadd.f32 %v193_v20, %v192_v8  ;;  %v90_v33 = vrot.slane %v89_v22, 2  ;;  %v84_v35 = vadd.f32 %v83_v25, %v82_v13  ;;  %v103_v39 = vadd.f32 %v102_v29, %v101_v17  ;;  %v383_v12 = vld [vmem:[%s2143_s1 + $0x278] sm:$0xff]  ;;  %v382_v17 = vld [vmem:[%s2143_s1 + $0x270] sm:$0xff]  ;;  %v397_v20 = vld [vmem:[%s2143_s1 + $0x2e8] sm:$0xff] }
  0x1a   :  { %1155 = vmatprep.subr.mxu1 %v356_v48  ;;  %1122 = vmatprep.subr.mxu0 %v323_v53  ;;  %v188_v34 = vrot.slane %v187_v23, 2  ;;  %v182_v36 = vadd.f32 %v181_v26, %v180_v14  ;;  %v201_v40 = vadd.f32 %v200_v30, %v199_v18  ;;  %v97_v41 = vrot.slane %v96_v31, 2  ;;  %v415_v18 = vld [vmem:[%s2143_s1 + $0x378] sm:$0xff]  ;;  %v414_v29 = vld [vmem:[%s2143_s1 + $0x370] sm:$0xff]  ;;  %v396_v30 = vld [vmem:[%s2143_s1 + $0x2e0] sm:$0xff] }
  0x1b   :  { %1156 = vmatpush3.msra.mxu1 %v340_v54  ;;  %1123 = vmatpush3.msra.mxu0 %v307_v55  ;;  %v195_v42 = vrot.slane %v194_v32, 2  ;;  %v91_v44 = vadd.f32 %v90_v33, %v89_v22  ;;  %v85_v46 = vrot.slane %v84_v35, 1  ;;  %v104_v48 = vrot.slane %v103_v39, 2  ;;  %v20_v22 = vld [vmem:[%s2142_s0 + $0x24] sm:$0xff] }
  0x1c   :  { %1157 = vmatprep.subr.mxu1 %v355_v56  ;;  %1124 = vmatprep.subr.mxu0 %v322_v61  ;;  %v189_v45 = vadd.f32 %v188_v34, %v187_v23  ;;  %v183_v47 = vrot.slane %v182_v36, 1  ;;  %v202_v49 = vrot.slane %v201_v40, 2  ;;  %v98_v50 = vadd.f32 %v97_v41, %v96_v31  ;;  %v430_v23 = vld [vmem:[%s2143_s1 + $0x3f0] sm:$0xff]  ;;  %v429_v31 = vld [vmem:[%s2143_s1 + $0x3e8] sm:$0xff] }
  0x1d   :  { %1158 = vmatpush3.msra.mxu1 %v339_v62  ;;  %1125 = vmatpush3.msra.mxu0 %v306_v3  ;;  %v196_v51 = vadd.f32 %v195_v42, %v194_v32  ;;  %v92_v52 = vrot.slane %v91_v44, 1  ;;  %v86_v54 = vadd.f32 %v85_v46, %v84_v35  ;;  %v105_v56 = vadd.f32 %v104_v48, %v103_v39  ;;  %v380_v32 = vld [vmem:[%s2143_s1 + $0x260] sm:$0xff] }
  0x1e   :  { %1159 = vmatprep.subr.mxu1 %v354_v4  ;;  %1126 = vmatprep.subr.mxu0 %v321_v9  ;;  %v190_v53 = vrot.slane %v189_v45, 1  ;;  %v184_v55 = vadd.f32 %v183_v47, %v182_v36  ;;  %v203_v57 = vadd.f32 %v202_v49, %v201_v40  ;;  %v99_v58 = vrot.slane %v98_v50, 1  ;;  %v412_v49 = vld [vmem:[%s2143_s1 + $0x360] sm:$0xff] }
  0x1f   :  { %1160 = vmatpush3.msra.mxu1 %v338_v10  ;;  %1127 = vmatpush3.msra.mxu0 %v305_v15  ;;  %v197_v59 = vrot.slane %v196_v51, 1  ;;  %v93_v60 = vadd.f32 %v92_v52, %v91_v44  ;;  %v276_v62 = vmul.f32 0.25, %v86_v54  ;;  %v106_v0 = vrot.slane %v105_v56, 1  ;;  %v398_v15 = vld [vmem:[%s2143_s1 + $0x2f0] sm:$0xff]  ;;  %v379_v44 = vld [vmem:[%s2143_s1 + $0x258] sm:$0xff] }
  0x20   :  { %1161 = vmatprep.subr.mxu1 %v353_v16  ;;  %1128 = vmatprep.subr.mxu0 %v320_v21  ;;  %v191_v61 = vadd.f32 %v190_v53, %v189_v45  ;;  %v290_v63 = vmul.f32 0.25, %v184_v55  ;;  %v204_v1 = vrot.slane %v203_v57, 1  ;;  %v100_v2 = vadd.f32 %v99_v58, %v98_v50  ;;  %v16_v21 = vld [vmem:[%s2142_s0 + $0x8] sm:$0xff]  ;;  %v394_v50 = vld [vmem:[%s2143_s1 + $0x2d0] sm:$0xff]  ;;  %v427_v55 = vld [vmem:[%s2143_s1 + $0x3d8] sm:$0xff] }
  0x21   :  { %1162 = vmatpush3.msra.mxu1 %v337_v24  ;;  %1129 = vmatpush3.msra.mxu0 %v304_v27  ;;  %v198_v3 = vadd.f32 %v197_v59, %v196_v51  ;;  %v277_v4 = vmul.f32 0.25, %v93_v60  ;;  %v107_v7 = vadd.f32 %v106_v0, %v105_v56  ;;  %v381_v24 = vld [vmem:[%s2143_s1 + $0x268] sm:$0xff]  ;;  %v25_v25 = vunpack.c.l.bf16 %v16_v21  ;;  %v378_v56 = vld [vmem:[%s2143_s1 + $0x250] sm:$0xff] }
  0x22   :  { %1163 = vmatprep.subr.mxu1 %v352_v28  ;;  %1168 = vmatprep.subr.mxu0 %v399_v37  ;;  %v291_v5 = vmul.f32 0.25, %v191_v61  ;;  %v564_v6 = vsel %vm563_vm1, %v290_v63, %v276_v62  ;;  %v205_v8 = vadd.f32 %v204_v1, %v203_v57  ;;  %v278_v9 = vmul.f32 0.25, %v100_v2  ;;  %v413_v37 = vld [vmem:[%s2143_s1 + $0x368] sm:$0xff]  ;;  %v411_v61 = vld [vmem:[%s2143_s1 + $0x358] sm:$0xff] }
  0x23   :  { %1164 = vmatpush3.msra.mxu1 %v336_v38  ;;  %v292_v10 = vmul.f32 0.25, %v198_v3  ;;  %v279_v13 = vmul.f32 0.25, %v107_v7  ;;  %v32_v26 = vunpack.c.l.bf16 %v20_v22  ;;  %v26_v27 = vunpack.c.h.bf16 %v16_v21  ;;  %v395_v38 = vld [vmem:[%s2143_s1 + $0x2d8] sm:$0xff]  ;;  %v393_v62 = vld [vmem:[%s2143_s1 + $0x2c8] sm:$0xff]  ;;  %v426_v3 = vld [vmem:[%s2143_s1 + $0x3d0] sm:$0xff] }
  0x24   :  { %1203 = vmatprep.subr.mxu1 %v431_v43  ;;  %v565_v11 = vsel %vm563_vm1, %v291_v5, %v277_v4  ;;  %v293_v14 = vmul.f32 0.25, %v205_v8  ;;  %v33_v28 = vunpack.c.h.bf16 %v20_v22  ;;  %v53_v33 = vcombine.high %v25_v25, %v25_v25  ;;  %v428_v43 = vld [vmem:[%s2143_s1 + $0x3e0] sm:$0xff]  ;;  %v377_v4 = vld [vmem:[%s2143_s1 + $0x248] sm:$0xff] }
  0x25   :  { %656 = vmatprep.mubr.f32.mxu0 %v565_v11  ;;  %v566_v16 = vsel %vm563_vm1, %v292_v10, %v278_v9  ;;  %v60_v34 = vcombine.high %v32_v26, %v32_v26  ;;  %v108_v35 = vsel %vm79_vm0, %v25_v25, 0.0  ;;  %v206_v36 = vsel %vm79_vm0, %v32_v26, 0.0  ;;  %v410_v9 = vld [vmem:[%s2143_s1 + $0x350] sm:$0xff]  ;;  %v392_v10 = vld [vmem:[%s2143_s1 + $0x2c0] sm:$0xff] }
  0x26   :  { %657 = vmatmul.mubr.f32.vlgmr.msra.gmra.mxu0 %v564_v6  ;;  %v567_v19 = vsel %vm563_vm1, %v293_v14, %v279_v13  ;;  %v109_v39 = vrot.slane %v108_v35, 4  ;;  %v207_v40 = vrot.slane %v206_v36, 4  ;;  %v54_v41 = vcombine.high %v26_v27, %v26_v27  ;;  %v425_v13 = vld [vmem:[%s2143_s1 + $0x3c8] sm:$0xff]  ;;  %v376_v14 = vld [vmem:[%s2143_s1 + $0x240] sm:$0xff] }
  0x27   :  { %1169 = vmatpush3.msra.mxu0 %v383_v12  ;;  %726 = vmatprep.mubr.f32.mxu1 %v567_v19  ;;  %v61_v42 = vcombine.high %v33_v28, %v33_v28  ;;  %v115_v45 = vsel %vm79_vm0, %v53_v33, 0.0  ;;  %v213_v46 = vsel %vm79_vm0, %v60_v34, 0.0  ;;  %v122_v47 = vsel %vm79_vm0, %v26_v27, 0.0  ;;  %v391_v19 = vld [vmem:[%s2143_s1 + $0x2b8] sm:$0xff] }
  0x28   :  { %1170 = vmatprep.subr.mxu0 %v398_v15  ;;  %727 = vmatmul.mubr.f32.vlgmr.msra.gmra.mxu1 %v566_v16  ;;  %v220_v48 = vsel %vm79_vm0, %v33_v28, 0.0  ;;  %v116_v51 = vrot.slane %v115_v45, 4  ;;  %v214_v52 = vrot.slane %v213_v46, 4  ;;  %v110_v53 = vadd.f32 %v109_v39, %v108_v35 }
  0x29   :  { %1171 = vmatpush3.msra.mxu0 %v382_v17  ;;  %1204 = vmatpush3.msra.mxu1 %v415_v18  ;;  %v208_v54 = vadd.f32 %v207_v40, %v206_v36  ;;  %v129_v57 = vsel %vm79_vm0, %v54_v41, 0.0  ;;  %v227_v58 = vsel %vm79_vm0, %v61_v42, 0.0  ;;  %v123_v59 = vrot.slane %v122_v47, 4  ;;  %v409_v18 = vld [vmem:[%s2143_s1 + $0x348] sm:$0xff]  ;;  %v407_v36 = vld [vmem:[%s2143_s1 + $0x338] sm:$0xff]  ;;  %v422_v41 = vld [vmem:[%s2143_s1 + $0x3b0] sm:$0xff] }
  0x2a   :  { %1172 = vmatprep.subr.mxu0 %v397_v20  ;;  %1205 = vmatprep.subr.mxu1 %v430_v23  ;;  %v221_v60 = vrot.slane %v220_v48, 4  ;;  %v117_v63 = vadd.f32 %v116_v51, %v115_v45  ;;  %v215_v0 = vadd.f32 %v214_v52, %v213_v46  ;;  %v111_v1 = vrot.slane %v110_v53, 2  ;;  %v424_v23 = vld [vmem:[%s2143_s1 + $0x3c0] sm:$0xff]  ;;  %v373_v42 = vld [vmem:[%s2143_s1 + $0x228] sm:$0xff]  ;;  %v406_v45 = vld [vmem:[%s2143_s1 + $0x330] sm:$0xff] }
  0x2b   :  { %1173 = vmatpush3.msra.mxu0 %v381_v24  ;;  %1206 = vmatpush3.msra.mxu1 %v414_v29  ;;  %v209_v2 = vrot.slane %v208_v54, 2  ;;  %v130_v5 = vrot.slane %v129_v57, 4  ;;  %v228_v6 = vrot.slane %v227_v58, 4  ;;  %v124_v7 = vadd.f32 %v123_v59, %v122_v47  ;;  %v375_v24 = vld [vmem:[%s2143_s1 + $0x238] sm:$0xff]  ;;  %v408_v29 = vld [vmem:[%s2143_s1 + $0x340] sm:$0xff]  ;;  %v421_v47 = vld [vmem:[%s2143_s1 + $0x3a8] sm:$0xff] }
  0x2c   :  { %1174 = vmatprep.subr.mxu0 %v396_v30  ;;  %1207 = vmatprep.subr.mxu1 %v429_v31  ;;  %v222_v8 = vadd.f32 %v221_v60, %v220_v48  ;;  %v118_v11 = vrot.slane %v117_v63, 2  ;;  %v216_v12 = vrot.slane %v215_v0, 2  ;;  %v112_v25 = vadd.f32 %v111_v1, %v110_v53  ;;  %v390_v30 = vld [vmem:[%s2143_s1 + $0x2b0] sm:$0xff]  ;;  %v423_v31 = vld [vmem:[%s2143_s1 + $0x3b8] sm:$0xff]  ;;  %v388_v46 = vld [vmem:[%s2143_s1 + $0x2a0] sm:$0xff] }
  0x2d   :  { %1175 = vmatpush3.msra.mxu0 %v380_v32  ;;  %1208 = vmatpush3.msra.mxu1 %v413_v37  ;;  %v131_v15 = vadd.f32 %v130_v5, %v129_v57  ;;  %v229_v16 = vadd.f32 %v228_v6, %v227_v58  ;;  %v125_v17 = vrot.slane %v124_v7, 2  ;;  %v210_v26 = vadd.f32 %v209_v2, %v208_v54  ;;  %v374_v32 = vld [vmem:[%s2143_s1 + $0x230] sm:$0xff]  ;;  %v389_v37 = vld [vmem:[%s2143_s1 + $0x2a8] sm:$0xff]  ;;  %v372_v48 = vld [vmem:[%s2143_s1 + $0x220] sm:$0xff] }
  0x2e   :  { %1176 = vmatprep.subr.mxu0 %v395_v38  ;;  %1209 = vmatprep.subr.mxu1 %v428_v43  ;;  %v119_v20 = vadd.f32 %v118_v11, %v117_v63  ;;  %v217_v21 = vadd.f32 %v216_v12, %v215_v0  ;;  %v223_v22 = vrot.slane %v222_v8, 2  ;;  %v113_v43 = vrot.slane %v112_v25, 1  ;;  %v405_v52 = vld [vmem:[%s2143_s1 + $0x328] sm:$0xff]  ;;  %v387_v53 = vld [vmem:[%s2143_s1 + $0x298] sm:$0xff]  ;;  %v420_v57 = vld [vmem:[%s2143_s1 + $0x3a0] sm:$0xff] }
  0x2f   :  { %1177 = vmatpush3.msra.mxu0 %v379_v44  ;;  %1210 = vmatpush3.msra.mxu1 %v412_v49  ;;  %v132_v27 = vrot.slane %v131_v15, 2  ;;  %v230_v28 = vrot.slane %v229_v16, 2  ;;  %v126_v35 = vadd.f32 %v125_v17, %v124_v7  ;;  %v211_v44 = vrot.slane %v210_v26, 1  ;;  %v371_v58 = vld [vmem:[%s2143_s1 + $0x218] sm:$0xff]  ;;  %v17_v63 = vld [vmem:[%s2142_s0 + $0x10] sm:$0xff] }
  0x30   :  { %1178 = vmatprep.subr.mxu0 %v394_v50  ;;  %1211 = vmatprep.subr.mxu1 %v427_v55  ;;  %v120_v38 = vrot.slane %v119_v20, 1  ;;  %v218_v39 = vrot.slane %v217_v21, 1  ;;  %v224_v40 = vadd.f32 %v223_v22, %v222_v8  ;;  %v114_v59 = vadd.f32 %v113_v43, %v112_v25  ;;  %v419_v0 = vld [vmem:[%s2143_s1 + $0x398] sm:$0xff]  ;;  %v370_v1 = vld [vmem:[%s2143_s1 + $0x210] sm:$0xff]  ;;  %v385_v8 = vld [vmem:[%s2143_s1 + $0x288] sm:$0xff] }
  0x31   :  { %1179 = vmatpush3.msra.mxu0 %v378_v56  ;;  %1212 = vmatpush3.msra.mxu1 %v411_v61  ;;  %v133_v33 = vadd.f32 %v132_v27, %v131_v15  ;;  %v231_v34 = vadd.f32 %v230_v28, %v229_v16  ;;  %v127_v51 = vrot.slane %v126_v35, 1  ;;  %v212_v60 = vadd.f32 %v211_v44, %v210_v26  ;;  %v404_v61 = vld [vmem:[%s2143_s1 + $0x320] sm:$0xff]  ;;  %v21_v5 = vld [vmem:[%s2142_s0 + $0x2c] sm:$0xff]  ;;  %v403_v7 = vld [vmem:[%s2143_s1 + $0x318] sm:$0xff] }
  0x32   :  { %1180 = vmatprep.subr.mxu0 %v393_v62  ;;  %1213 = vmatprep.subr.mxu1 %v426_v3  ;;  %v121_v54 = vadd.f32 %v120_v38, %v119_v20  ;;  %v219_v55 = vadd.f32 %v218_v39, %v217_v21  ;;  %v225_v56 = vrot.slane %v224_v40, 1  ;;  %v386_v62 = vld [vmem:[%s2143_s1 + $0x290] sm:$0xff]  ;;  %v27_v6 = vunpack.c.l.bf16 %v17_v63  ;;  %v417_v21 = vld [vmem:[%s2143_s1 + $0x388] sm:$0xff]  ;;  %v368_v22 = vld [vmem:[%s2143_s1 + $0x200] sm:$0xff] }
  0x33   :  { %1181 = vmatpush3.msra.mxu0 %v377_v4  ;;  %1214 = vmatpush3.msra.mxu1 %v410_v9  ;;  %v134_v49 = vrot.slane %v133_v33, 1  ;;  %v232_v50 = vrot.slane %v231_v34, 1  ;;  %v128_v4 = vadd.f32 %v127_v51, %v126_v35  ;;  %v34_v12 = vunpack.c.l.bf16 %v21_v5  ;;  %v402_v17 = vld [vmem:[%s2143_s1 + $0x310] sm:$0xff]  ;;  %v401_v28 = vld [vmem:[%s2143_s1 + $0x308] sm:$0xff]  ;;  %v447_v38 = vld [vmem:[%s2143_s1 + $0x478] sm:$0xff] }
  0x34   :  { %1182 = vmatprep.subr.mxu0 %v392_v10  ;;  %1215 = vmatprep.subr.mxu1 %v425_v13  ;;  %v281_v9 = vmul.f32 0.25, %v121_v54  ;;  %v295_v10 = vmul.f32 0.25, %v219_v55  ;;  %v226_v11 = vadd.f32 %v225_v56, %v224_v40  ;;  %v418_v13 = vld [vmem:[%s2143_s1 + $0x390] sm:$0xff]  ;;  %v280_v15 = vmul.f32 0.25, %v114_v59  ;;  %v445_v55 = vld [vmem:[%s2143_s1 + $0x468] sm:$0xff] }
  0x35   :  { %1183 = vmatpush3.msra.mxu0 %v376_v14  ;;  %1216 = vmatpush3.msra.mxu1 %v409_v18  ;;  %v135_v2 = vadd.f32 %v134_v49, %v133_v33  ;;  %v233_v3 = vadd.f32 %v232_v50, %v231_v34  ;;  %v369_v14 = vld [vmem:[%s2143_s1 + $0x208] sm:$0xff]  ;;  %v294_v16 = vmul.f32 0.25, %v212_v60  ;;  %v384_v18 = vld [vmem:[%s2143_s1 + $0x280] sm:$0xff]  ;;  %v35_v20 = vunpack.c.h.bf16 %v21_v5  ;;  %v463_v33 = vld [vmem:[%s2143_s1 + $0x4f8] sm:$0xff] }
  0x36   :  { %1184 = vmatprep.subr.mxu0 %v391_v19  ;;  %1217 = vmatprep.subr.mxu1 %v424_v23  ;;  %v28_v19 = vunpack.c.h.bf16 %v17_v63  ;;  %v55_v25 = vcombine.high %v27_v6, %v27_v6  ;;  %v62_v26 = vcombine.high %v34_v12, %v34_v12  ;;  %v569_v27 = vsel %vm563_vm1, %v295_v10, %v281_v9  ;;  %v400_v34 = vld [vmem:[%s2143_s1 + $0x300] sm:$0xff]  ;;  %v461_v49 = vld [vmem:[%s2143_s1 + $0x4e8] sm:$0xff]  ;;  %v494_v54 = vld [vmem:[%s2143_s1 + $0x5f0] sm:$0xff] }
  0x37   :  { %1185 = vmatpush3.msra.mxu0 %v375_v24  ;;  %1218 = vmatpush3.msra.mxu1 %v408_v29  ;;  %v283_v23 = vmul.f32 0.25, %v135_v2  ;;  %v297_v24 = vmul.f32 0.25, %v233_v3  ;;  %v282_v29 = vmul.f32 0.25, %v128_v4  ;;  %v136_v43 = vsel %vm79_vm0, %v27_v6, 0.0  ;;  %v478_v59 = vld [vmem:[%s2143_s1 + $0x570] sm:$0xff]  ;;  %v460_v60 = vld [vmem:[%s2143_s1 + $0x4e0] sm:$0xff] }
  0x38   :  { %1186 = vmatprep.subr.mxu0 %v390_v30  ;;  %1219 = vmatprep.subr.mxu1 %v423_v31  ;;  %v296_v30 = vmul.f32 0.25, %v226_v11  ;;  %v568_v31 = vsel %vm563_vm1, %v294_v16, %v280_v15  ;;  %v56_v35 = vcombine.high %v28_v19, %v28_v19  ;;  %v143_v39 = vsel %vm79_vm0, %v55_v25, 0.0 }
  0x39   :  { %1187 = vmatpush3.msra.mxu0 %v374_v32  ;;  %1220 = vmatpush3.msra.mxu1 %v407_v36  ;;  %v416_v32 = vld [vmem:[%s2143_s1 + $0x380] sm:$0xff]  ;;  %v63_v36 = vcombine.high %v35_v20, %v35_v20  ;;  %v241_v40 = vsel %vm79_vm0, %v62_v26, 0.0  ;;  %v234_v44 = vsel %vm79_vm0, %v34_v12, 0.0  ;;  %v144_v50 = vrot.slane %v143_v39, 4 }
  0x3a   :  { %1188 = vmatprep.subr.mxu0 %v389_v37  ;;  %1221 = vmatprep.subr.mxu1 %v422_v41  ;;  %v571_v37 = vsel %vm563_vm1, %v297_v24, %v283_v23  ;;  %v570_v41 = vsel %vm563_vm1, %v296_v30, %v282_v29  ;;  %v242_v51 = vrot.slane %v241_v40, 4  ;;  %v137_v56 = vrot.slane %v136_v43, 4 }
  0x3b   :  { %1189 = vmatpush3.msra.mxu0 %v373_v42  ;;  %1222 = vmatpush3.msra.mxu1 %v406_v45  ;;  %v462_v42 = vld [vmem:[%s2143_s1 + $0x4f0] sm:$0xff]  ;;  %v495_v45 = vld [vmem:[%s2143_s1 + $0x5f8] sm:$0xff] }
  0x3c   :  { %1190 = vmatprep.subr.mxu0 %v388_v46  ;;  %1223 = vmatprep.subr.mxu1 %v421_v47  ;;  %v446_v46 = vld [vmem:[%s2143_s1 + $0x470] sm:$0xff]  ;;  %v150_v47 = vsel %vm79_vm0, %v28_v19, 0.0 }
  0x3d   :  { %1191 = vmatpush3.msra.mxu0 %v372_v48  ;;  %1224 = vmatpush3.msra.mxu1 %v405_v52  ;;  %v479_v48 = vld [vmem:[%s2143_s1 + $0x578] sm:$0xff]  ;;  %v157_v52 = vsel %vm79_vm0, %v56_v35, 0.0 }
  0x3e   :  { %1192 = vmatprep.subr.mxu0 %v387_v53  ;;  %1225 = vmatprep.subr.mxu1 %v420_v57  ;;  %v255_v53 = vsel %vm79_vm0, %v63_v36, 0.0  ;;  %v235_v57 = vrot.slane %v234_v44, 4 }
  0x3f   :  { %1193 = vmatpush3.msra.mxu0 %v371_v58  ;;  %1226 = vmatpush3.msra.mxu1 %v404_v61  ;;  %v248_v58 = vsel %vm79_vm0, %v35_v20, 0.0  ;;  %v151_v61 = vrot.slane %v150_v47, 4 }
  0x40   :  { %1194 = vmatprep.subr.mxu0 %v386_v62  ;;  %1227 = vmatprep.subr.mxu1 %v419_v0 }
  0x41   :  { %1195 = vmatpush3.msra.mxu0 %v370_v1  ;;  %1228 = vmatpush3.msra.mxu1 %v403_v7 }
  0x42   :  { %1196 = vmatprep.subr.mxu0 %v385_v8  ;;  %1229 = vmatprep.subr.mxu1 %v418_v13 }
  0x43   :  { %1197 = vmatpush3.msra.mxu0 %v369_v14  ;;  %1230 = vmatpush3.msra.mxu1 %v402_v17 }
  0x44   :  { %1198 = vmatprep.subr.mxu0 %v384_v18  ;;  %1231 = vmatprep.subr.mxu1 %v417_v21 }
  0x45   :  { %1199 = vmatpush3.msra.mxu0 %v368_v22  ;;  %796 = vmatprep.mubr.f32.mxu0 %v569_v27 }
  0x46   :  { %1232 = vmatpush3.msra.mxu1 %v401_v28  ;;  %797 = vmatmul.mubr.f32.vlgmr.msra.gmra.mxu0 %v568_v31 }
  0x47   :  { %1233 = vmatprep.subr.mxu1 %v416_v32  ;;  %1238 = vmatprep.subr.mxu0 %v463_v33 }
  0x48   :  { %1234 = vmatpush3.msra.mxu1 %v400_v34  ;;  %866 = vmatprep.mubr.f32.mxu1 %v571_v37 }
  0x49   :  { %1239 = vmatpush3.msra.mxu0 %v447_v38  ;;  %867 = vmatmul.mubr.f32.vlgmr.msra.gmra.mxu1 %v570_v41 }
  0x4a   :  { %1240 = vmatprep.subr.mxu0 %v462_v42  ;;  %1273 = vmatprep.subr.mxu1 %v495_v45 }
  0x4b   :  { %1241 = vmatpush3.msra.mxu0 %v446_v46 }
  0x4c   :  { %8 = vsyncpa [#allocation3], 0  ;;  %1274 = vmatpush3.msra.mxu1 %v479_v48  ;;  %1242 = vmatprep.subr.mxu0 %v461_v49  ;;  %v493_v62 = vld [vmem:[%s2143_s1 + $0x5e8] sm:$0xff]  ;;  %v444_v63 = vld [vmem:[%s2143_s1 + $0x460] sm:$0xff]  ;;  %v158_v0 = vrot.slane %v157_v52, 4  ;;  %v256_v1 = vrot.slane %v255_v53, 4  ;;  %v145_v5 = vadd.f32 %v144_v50, %v143_v39  ;;  %v243_v6 = vadd.f32 %v242_v51, %v241_v40 }
  0x4d   :  { %v18_v2 = vld [vmem:[%s2142_s0 + $0x18] ss:$28 sps:$4 sm:$0xff]   ;;  %1275 = vmatprep.subr.mxu1 %v494_v54  ;;  %1243 = vmatpush3.msra.mxu0 %v445_v55  ;;  %v477_v3 = vld [vmem:[%s2143_s1 + $0x568] sm:$0xff]  ;;  %v249_v7 = vrot.slane %v248_v58, 4  ;;  %v492_v8 = vld [vmem:[%s2143_s1 + $0x5e0] sm:$0xff]  ;;  %v138_v10 = vadd.f32 %v137_v56, %v136_v43  ;;  %v236_v11 = vadd.f32 %v235_v57, %v234_v44  ;;  %v1881_v14 = vadd.f32 %v151_v61, %v150_v47 }
  0x4e   :  { %v459_v4 = vld [vmem:[%s2143_s1 + $0x4d8] sm:$0xff]  ;;  %1276 = vmatpush3.msra.mxu1 %v478_v59  ;;  %1244 = vmatprep.subr.mxu0 %v460_v60  ;;  %v476_v12 = vld [vmem:[%s2143_s1 + $0x560] sm:$0xff]  ;;  %v458_v13 = vld [vmem:[%s2143_s1 + $0x4d0] sm:$0xff]  ;;  %v1883_v15 = vunpack.c.l.bf16 %v18_v2  ;;  %v159_v18 = vadd.f32 %v158_v0, %v157_v52  ;;  %v257_v19 = vadd.f32 %v256_v1, %v255_v53  ;;  %v1891_v20 = vunpack.c.h.bf16 %v18_v2 }
  0x4f   :  { %v443_v9 = vld [vmem:[%s2143_s1 + $0x458] sm:$0xff]  ;;  %1277 = vmatprep.subr.mxu1 %v493_v62  ;;  %1245 = vmatpush3.msra.mxu0 %v444_v63  ;;  %v442_v17 = vld [vmem:[%s2143_s1 + $0x450] sm:$0xff]  ;;  %v457_v22 = vld [vmem:[%s2143_s1 + $0x4c8] sm:$0xff]  ;;  %v146_v23 = vrot.slane %v145_v5, 2  ;;  %v244_v24 = vrot.slane %v243_v6, 2  ;;  %v250_v25 = vadd.f32 %v249_v7, %v248_v58  ;;  %v139_v29 = vrot.slane %v138_v10, 2 }
  0x50   :  { %1278 = vmatpush3.msra.mxu1 %v477_v3  ;;  %1246 = vmatprep.subr.mxu0 %v459_v4  ;;  %v491_v16 = vld [vmem:[%s2143_s1 + $0x5d8] sm:$0xff]  ;;  %v57_v26 = vcombine.high %v1883_v15, %v1883_v15  ;;  %v490_v27 = vld [vmem:[%s2143_s1 + $0x5d0] sm:$0xff]  ;;  %v441_v28 = vld [vmem:[%s2143_s1 + $0x448] sm:$0xff]  ;;  %v237_v30 = vrot.slane %v236_v11, 2  ;;  %v64_v31 = vcombine.high %v1891_v20, %v1891_v20  ;;  %v153_v34 = vrot.slane %v1881_v14, 2 }
  0x51   :  { %1279 = vmatprep.subr.mxu1 %v492_v8  ;;  %1247 = vmatpush3.msra.mxu0 %v443_v9  ;;  %v475_v21 = vld [vmem:[%s2143_s1 + $0x558] sm:$0xff]  ;;  %v474_v32 = vld [vmem:[%s2143_s1 + $0x550] sm:$0xff]  ;;  %v456_v33 = vld [vmem:[%s2143_s1 + $0x4c0] sm:$0xff]  ;;  %v160_v38 = vrot.slane %v159_v18, 2  ;;  %v258_v39 = vrot.slane %v257_v19, 2  ;;  %v147_v44 = vadd.f32 %v146_v23, %v145_v5  ;;  %v245_v45 = vadd.f32 %v244_v24, %v243_v6 }
  0x52   :  { %1280 = vmatpush3.msra.mxu1 %v476_v12  ;;  %1248 = vmatprep.subr.mxu0 %v458_v13  ;;  %v171_v35 = vsel %vm79_vm0, %v57_v26, 0.0  ;;  %v489_v36 = vld [vmem:[%s2143_s1 + $0x5c8] sm:$0xff]  ;;  %v440_v37 = vld [vmem:[%s2143_s1 + $0x440] sm:$0xff]  ;;  %v269_v41 = vsel %vm79_vm0, %v64_v31, 0.0  ;;  %v455_v43 = vld [vmem:[%s2143_s1 + $0x4b8] sm:$0xff]  ;;  %v251_v46 = vrot.slane %v250_v25, 2  ;;  %v140_v50 = vadd.f32 %v139_v29, %v138_v10 }
  0x53   :  { %1281 = vmatprep.subr.mxu1 %v491_v16  ;;  %1249 = vmatpush3.msra.mxu0 %v442_v17  ;;  %v172_v40 = vrot.slane %v171_v35, 4  ;;  %v473_v42 = vld [vmem:[%s2143_s1 + $0x548] sm:$0xff]  ;;  %v270_v47 = vrot.slane %v269_v41, 4  ;;  %v488_v48 = vld [vmem:[%s2143_s1 + $0x5c0] sm:$0xff]  ;;  %v439_v49 = vld [vmem:[%s2143_s1 + $0x438] sm:$0xff]  ;;  %v238_v51 = vadd.f32 %v237_v30, %v236_v11  ;;  %v161_v58 = vadd.f32 %v160_v38, %v159_v18 }
  0x54   :  { %1282 = vmatpush3.msra.mxu1 %v475_v21  ;;  %1250 = vmatprep.subr.mxu0 %v457_v22  ;;  %v472_v53 = vld [vmem:[%s2143_s1 + $0x540] sm:$0xff]  ;;  %v454_v54 = vld [vmem:[%s2143_s1 + $0x4b0] sm:$0xff]  ;;  %v487_v56 = vld [vmem:[%s2143_s1 + $0x5b8] sm:$0xff]  ;;  %v259_v59 = vadd.f32 %v258_v39, %v257_v19  ;;  %v154_v60 = vadd.f32 %v153_v34, %v1881_v14  ;;  %v148_v0 = vrot.slane %v147_v44, 1  ;;  %v246_v1 = vrot.slane %v245_v45, 1 }
  0x55   :  { %1283 = vmatprep.subr.mxu1 %v490_v27  ;;  %1251 = vmatpush3.msra.mxu0 %v441_v28  ;;  %v173_v52 = vadd.f32 %v172_v40, %v171_v35  ;;  %v271_v55 = vadd.f32 %v270_v47, %v269_v41  ;;  %v438_v57 = vld [vmem:[%s2143_s1 + $0x430] sm:$0xff]  ;;  %v471_v62 = vld [vmem:[%s2143_s1 + $0x538] sm:$0xff]  ;;  %v453_v63 = vld [vmem:[%s2143_s1 + $0x4a8] sm:$0xff]  ;;  %v252_v2 = vadd.f32 %v251_v46, %v250_v25  ;;  %v141_v6 = vrot.slane %v140_v50, 1 }
  0x56   :  { %1284 = vmatpush3.msra.mxu1 %v474_v32  ;;  %1252 = vmatprep.subr.mxu0 %v456_v33  ;;  %v486_v4 = vld [vmem:[%s2143_s1 + $0x5b0] sm:$0xff]  ;;  %v437_v5 = vld [vmem:[%s2143_s1 + $0x428] sm:$0xff]  ;;  %v239_v7 = vrot.slane %v238_v51, 1  ;;  %v452_v10 = vld [vmem:[%s2143_s1 + $0x4a0] sm:$0xff]  ;;  %v162_v14 = vrot.slane %v161_v58, 1  ;;  %v260_v16 = vrot.slane %v259_v59, 1  ;;  %v149_v19 = vadd.f32 %v148_v0, %v147_v44 }
  0x57   :  { %1285 = vmatprep.subr.mxu1 %v489_v36  ;;  %1253 = vmatpush3.msra.mxu0 %v440_v37  ;;  %v174_v61 = vrot.slane %v173_v52, 2  ;;  %v272_v3 = vrot.slane %v271_v55, 2  ;;  %v470_v9 = vld [vmem:[%s2143_s1 + $0x530] sm:$0xff]  ;;  %v485_v12 = vld [vmem:[%s2143_s1 + $0x5a8] sm:$0xff]  ;;  %v436_v13 = vld [vmem:[%s2143_s1 + $0x420] sm:$0xff]  ;;  %v247_v21 = vadd.f32 %v246_v1, %v245_v45  ;;  %v155_v22 = vrot.slane %v154_v60, 1 }
  0x58   :  { %1286 = vmatpush3.msra.mxu1 %v473_v42  ;;  %1254 = vmatprep.subr.mxu0 %v455_v43  ;;  %v469_v17 = vld [vmem:[%s2143_s1 + $0x528] sm:$0xff]  ;;  %v451_v18 = vld [vmem:[%s2143_s1 + $0x498] sm:$0xff]  ;;  %v253_v23 = vrot.slane %v252_v2, 1  ;;  %v484_v24 = vld [vmem:[%s2143_s1 + $0x5a0] sm:$0xff]  ;;  %v142_v26 = vadd.f32 %v141_v6, %v140_v50  ;;  %v240_v27 = vadd.f32 %v239_v7, %v238_v51  ;;  %v163_v34 = vadd.f32 %v162_v14, %v161_v58 }
  0x59   :  { %1287 = vmatprep.subr.mxu1 %v488_v48  ;;  %1255 = vmatpush3.msra.mxu0 %v439_v49  ;;  %v175_v8 = vadd.f32 %v174_v61, %v173_v52  ;;  %v273_v11 = vadd.f32 %v272_v3, %v271_v55  ;;  %v435_v25 = vld [vmem:[%s2143_s1 + $0x418] sm:$0xff]  ;;  %v468_v30 = vld [vmem:[%s2143_s1 + $0x520] sm:$0xff]  ;;  %v450_v31 = vld [vmem:[%s2143_s1 + $0x490] sm:$0xff]  ;;  %v261_v35 = vadd.f32 %v260_v16, %v259_v59  ;;  %v285_v38 = vmul.f32 0.25, %v149_v19 }
  0x5a   :  { %1288 = vmatpush3.msra.mxu1 %v472_v53  ;;  %1256 = vmatprep.subr.mxu0 %v454_v54  ;;  %v483_v32 = vld [vmem:[%s2143_s1 + $0x598] sm:$0xff]  ;;  %v434_v33 = vld [vmem:[%s2143_s1 + $0x410] sm:$0xff]  ;;  %v449_v37 = vld [vmem:[%s2143_s1 + $0x488] sm:$0xff]  ;;  %v299_v39 = vmul.f32 0.25, %v247_v21  ;;  %v156_v40 = vadd.f32 %v155_v22, %v154_v60  ;;  %v254_v41 = vadd.f32 %v253_v23, %v252_v2  ;;  %v284_v44 = vmul.f32 0.25, %v142_v26 }
  0x5b   :  { %1289 = vmatprep.subr.mxu1 %v487_v56  ;;  %1257 = vmatpush3.msra.mxu0 %v438_v57  ;;  %v176_v28 = vrot.slane %v175_v8, 1  ;;  %v274_v29 = vrot.slane %v273_v11, 1  ;;  %v467_v36 = vld [vmem:[%s2143_s1 + $0x518] sm:$0xff]  ;;  %v482_v42 = vld [vmem:[%s2143_s1 + $0x590] sm:$0xff]  ;;  %v433_v43 = vld [vmem:[%s2143_s1 + $0x408] sm:$0xff]  ;;  %v298_v45 = vmul.f32 0.25, %v240_v27 }
  0x5c   :  { %1290 = vmatpush3.msra.mxu1 %v471_v62  ;;  %1258 = vmatprep.subr.mxu0 %v453_v63  ;;  %v466_v48 = vld [vmem:[%s2143_s1 + $0x510] sm:$0xff]  ;;  %v448_v49 = vld [vmem:[%s2143_s1 + $0x480] sm:$0xff]  ;;  %v481_v50 = vld [vmem:[%s2143_s1 + $0x588] sm:$0xff]  ;;  %v287_v52 = vmul.f32 0.25, %v163_v34  ;;  %v301_v53 = vmul.f32 0.25, %v261_v35  ;;  %v573_v54 = vsel %vm563_vm1, %v299_v39, %v285_v38  ;;  %v286_v56 = vmul.f32 0.25, %v156_v40 }
  0x5d   :  { %1291 = vmatprep.subr.mxu1 %v486_v4  ;;  %1259 = vmatpush3.msra.mxu0 %v437_v5  ;;  %v177_v46 = vadd.f32 %v176_v28, %v175_v8  ;;  %v275_v47 = vadd.f32 %v274_v29, %v273_v11  ;;  %v432_v51 = vld [vmem:[%s2143_s1 + $0x400] sm:$0xff]  ;;  %v465_v55 = vld [vmem:[%s2143_s1 + $0x508] sm:$0xff]  ;;  %v300_v57 = vmul.f32 0.25, %v254_v41  ;;  %v572_v58 = vsel %vm563_vm1, %v298_v45, %v284_v44  ;;  %v527_v62 = vld [vmem:[%s2143_s1 + $0x6f8] sm:$0xff] }
  0x5e   :  { %1292 = vmatpush3.msra.mxu1 %v470_v9  ;;  %1260 = vmatprep.subr.mxu0 %v452_v10  ;;  %v480_v59 = vld [vmem:[%s2143_s1 + $0x580] sm:$0xff]  ;;  %v575_v0 = vsel %vm563_vm1, %v301_v53, %v287_v52  ;;  %v511_v1 = vld [vmem:[%s2143_s1 + $0x678] sm:$0xff]  ;;  %v164_v2 = vsel %vm79_vm0, %v1883_v15, 0.0  ;;  %v262_v3 = vsel %vm79_vm0, %v1891_v20, 0.0  ;;  %v526_v5 = vld [vmem:[%s2143_s1 + $0x6f0] sm:$0xff] }
  0x5f   :  { %1293 = vmatprep.subr.mxu1 %v485_v12  ;;  %1261 = vmatpush3.msra.mxu0 %v436_v13  ;;  %v289_v60 = vmul.f32 0.25, %v177_v46  ;;  %v303_v61 = vmul.f32 0.25, %v275_v47  ;;  %v464_v63 = vld [vmem:[%s2143_s1 + $0x500] sm:$0xff]  ;;  %v574_v4 = vsel %vm563_vm1, %v300_v57, %v286_v56  ;;  %v510_v6 = vld [vmem:[%s2143_s1 + $0x670] sm:$0xff]  ;;  %v525_v15 = vld [vmem:[%s2143_s1 + $0x6e8] sm:$0xff]  ;;  %v165_v20 = vrot.slane %v164_v2, 4 }
  0x60   :  { %1294 = vmatpush3.msra.mxu1 %v469_v17  ;;  %1262 = vmatprep.subr.mxu0 %v451_v18  ;;  %v263_v8 = vrot.slane %v262_v3, 4  ;;  %v509_v9 = vld [vmem:[%s2143_s1 + $0x668] sm:$0xff]  ;;  %v524_v10 = vld [vmem:[%s2143_s1 + $0x6e0] sm:$0xff]  ;;  %v523_v12 = vld [vmem:[%s2143_s1 + $0x6d8] sm:$0xff] }
  0x61   :  { %1295 = vmatprep.subr.mxu1 %v484_v24  ;;  %1263 = vmatpush3.msra.mxu0 %v435_v25  ;;  %v577_v7 = vsel %vm563_vm1, %v303_v61, %v289_v60  ;;  %v508_v11 = vld [vmem:[%s2143_s1 + $0x660] sm:$0xff]  ;;  %v166_v13 = vadd.f32 %v165_v20, %v164_v2  ;;  %v507_v16 = vld [vmem:[%s2143_s1 + $0x658] sm:$0xff]  ;;  %v522_v17 = vld [vmem:[%s2143_s1 + $0x6d0] sm:$0xff] }
  0x62   :  { %1296 = vmatpush3.msra.mxu1 %v468_v30  ;;  %1264 = vmatprep.subr.mxu0 %v450_v31  ;;  %v264_v14 = vadd.f32 %v263_v8, %v262_v3  ;;  %v506_v18 = vld [vmem:[%s2143_s1 + $0x650] sm:$0xff]  ;;  %v521_v19 = vld [vmem:[%s2143_s1 + $0x6c8] sm:$0xff]  ;;  %v520_v24 = vld [vmem:[%s2143_s1 + $0x6c0] sm:$0xff] }
  0x63   :  { %1297 = vmatprep.subr.mxu1 %v483_v32  ;;  %1265 = vmatpush3.msra.mxu0 %v434_v33  ;;  %v167_v21 = vrot.slane %v166_v13, 2  ;;  %v505_v23 = vld [vmem:[%s2143_s1 + $0x648] sm:$0xff]  ;;  %v504_v25 = vld [vmem:[%s2143_s1 + $0x640] sm:$0xff]  ;;  %v519_v26 = vld [vmem:[%s2143_s1 + $0x6b8] sm:$0xff] }
  0x64   :  { %1298 = vmatpush3.msra.mxu1 %v467_v36  ;;  %1266 = vmatprep.subr.mxu0 %v449_v37  ;;  %v265_v22 = vrot.slane %v264_v14, 2  ;;  %v503_v29 = vld [vmem:[%s2143_s1 + $0x638] sm:$0xff]  ;;  %v518_v30 = vld [vmem:[%s2143_s1 + $0x6b0] sm:$0xff]  ;;  %v517_v32 = vld [vmem:[%s2143_s1 + $0x6a8] sm:$0xff] }
  0x65   :  { %1299 = vmatprep.subr.mxu1 %v482_v42  ;;  %1267 = vmatpush3.msra.mxu0 %v433_v43  ;;  %v168_v27 = vadd.f32 %v167_v21, %v166_v13  ;;  %v502_v31 = vld [vmem:[%s2143_s1 + $0x630] sm:$0xff]  ;;  %v501_v35 = vld [vmem:[%s2143_s1 + $0x628] sm:$0xff]  ;;  %v516_v36 = vld [vmem:[%s2143_s1 + $0x6a0] sm:$0xff] }
  0x66   :  { %1300 = vmatpush3.msra.mxu1 %v466_v48  ;;  %1268 = vmatprep.subr.mxu0 %v448_v49  ;;  %v266_v28 = vadd.f32 %v265_v22, %v264_v14  ;;  %v500_v37 = vld [vmem:[%s2143_s1 + $0x620] sm:$0xff]  ;;  %v515_v38 = vld [vmem:[%s2143_s1 + $0x698] sm:$0xff]  ;;  %v514_v42 = vld [vmem:[%s2143_s1 + $0x690] sm:$0xff] }
  0x67   :  { %1301 = vmatprep.subr.mxu1 %v481_v50  ;;  %1269 = vmatpush3.msra.mxu0 %v432_v51  ;;  %v169_v33 = vrot.slane %v168_v27, 1  ;;  %v499_v41 = vld [vmem:[%s2143_s1 + $0x618] sm:$0xff]  ;;  %v498_v43 = vld [vmem:[%s2143_s1 + $0x610] sm:$0xff]  ;;  %v513_v44 = vld [vmem:[%s2143_s1 + $0x688] sm:$0xff] }
  0x68   :  { %936 = vmatprep.mubr.f32.mxu0 %v573_v54  ;;  %1302 = vmatpush3.msra.mxu1 %v465_v55  ;;  %v267_v34 = vrot.slane %v266_v28, 1  ;;  %v497_v47 = vld [vmem:[%s2143_s1 + $0x608] sm:$0xff]  ;;  %v512_v48 = vld [vmem:[%s2143_s1 + $0x680] sm:$0xff] }
  0x69   :  { %937 = vmatmul.mubr.f32.vlgmr.msra.gmra.mxu0 %v572_v58  ;;  %1303 = vmatprep.subr.mxu1 %v480_v59  ;;  %v170_v39 = vadd.f32 %v169_v33, %v168_v27  ;;  %v496_v49 = vld [vmem:[%s2143_s1 + $0x600] sm:$0xff]  ;;  %s1366_s1 = smov [#allocation2]  }
  0x6a   :  { %1308 = vmatprep.subr.mxu0 %v527_v62  ;;  %1304 = vmatpush3.msra.mxu1 %v464_v63  ;;  %v268_v40 = vadd.f32 %v267_v34, %v266_v28  ;;  %v1097_v56 = vld [vmem:[%s2144_s2] ss:$0 sm:$0xff]  ;;  %s1089_s2 = sshll.u32 %s1366_s1, 4  ;;  %s1090_s2 = int_to_ptr.vmem [resolvable:$true] %s1089_s2 }
  0x6b   :  { %1006 = vmatprep.mubr.f32.mxu1 %v575_v0  ;;  %1309 = vmatpush3.msra.mxu0 %v511_v1  ;;  %v288_v45 = vmul.f32 0.25, %v170_v39  ;;  %s1344_s11 = scalar_lea.vmem %s1090_s2, 32  ;;  %p1349_p1 = scmp.lt.s32.totalorder %s1090_s2, %s1090_s2 }
  0x6c   :  { %1007 = vmatmul.mubr.f32.vlgmr.msra.gmra.mxu1 %v574_v4  ;;  %1310 = vmatprep.subr.mxu0 %v526_v5  ;;  %v302_v46 = vmul.f32 0.25, %v268_v40  ;;  %p1345_p0 = scmp.ne.s32.totalorder %s1090_s2, %s1344_s11  ;;  %p1350_p2 = scmp.lt.s32.totalorder %s1344_s11, %s1344_s11 }
  0x6d   :  { %1311 = vmatpush3.msra.mxu0 %v510_v6  ;;  %1076 = vmatprep.mubr.f32.mxu0 %v577_v7 }
  0x6e   :  { %1312 = vmatprep.subr.mxu0 %v525_v15  ;;  %v576_v50 = vsel %vm563_vm1, %v302_v46, %v288_v45  ;;  %p1351_p3 = por %p1350_p2, %p1349_p1 }
  0x6f   :  { %1313 = vmatpush3.msra.mxu0 %v509_v9 }
  0x70   :  { %1314 = vmatprep.subr.mxu0 %v524_v10  ;;  %p1352_p4 = pnand %p1351_p3, %p1345_p0 }
  0x71   :  { %1315 = vmatpush3.msra.mxu0 %v508_v11 }
  0x72   :  { %1316 = vmatprep.subr.mxu0 %v523_v12 }
  0x73   :  { %1317 = vmatpush3.msra.mxu0 %v507_v16 }
  0x74   :  { %1318 = vmatprep.subr.mxu0 %v522_v17 }
  0x75   :  { %1319 = vmatpush3.msra.mxu0 %v506_v18 }
  0x76   :  { %1320 = vmatprep.subr.mxu0 %v521_v19 }
  0x77   :  { %1321 = vmatpush3.msra.mxu0 %v505_v23 }
  0x78   :  { %1322 = vmatprep.subr.mxu0 %v520_v24 }
  0x79   :  { %1323 = vmatpush3.msra.mxu0 %v504_v25 }
  0x7a   :  { %1324 = vmatprep.subr.mxu0 %v519_v26 }
  0x7b   :  { %1325 = vmatpush3.msra.mxu0 %v503_v29 }
  0x7c   :  { %1326 = vmatprep.subr.mxu0 %v518_v30 }
  0x7d   :  { %1327 = vmatpush3.msra.mxu0 %v502_v31 }
  0x7e   :  { %1328 = vmatprep.subr.mxu0 %v517_v32 }
  0x7f   :  { %1329 = vmatpush3.msra.mxu0 %v501_v35 }
  0x80   :  { %1330 = vmatprep.subr.mxu0 %v516_v36 }
  0x81   :  { %1331 = vmatpush3.msra.mxu0 %v500_v37 }
  0x82   :  { %1332 = vmatprep.subr.mxu0 %v515_v38 }
  0x83   :  { %1333 = vmatpush3.msra.mxu0 %v499_v41 }
  0x84   :  { %1334 = vmatprep.subr.mxu0 %v514_v42 }
  0x85   :  { %1335 = vmatpush3.msra.mxu0 %v498_v43 }
  0x86   :  { %1336 = vmatprep.subr.mxu0 %v513_v44 }
  0x87   :  { %1337 = vmatpush3.msra.mxu0 %v497_v47 }
  0x88   :  { %1338 = vmatprep.subr.mxu0 %v512_v48 }
  0x89   :  { %1339 = vmatpush3.msra.mxu0 %v496_v49 }
  0x8a   :  { %1077 = vmatmul.mubr.f32.vlgmr.msra.gmra.mxu0 %v576_v50 }
  0xe6   :  { %v1130_v51 = vpop.f32.mrf.mxu0 }
  0xe8   :  { %v1131_v52 = vpop.f32.mrf.mxu0  ;;  %v1165_v53 = vpop.f32.mrf.mxu1 }
  0xe9   :  { %v1132_v55 = vadd.f32 %v1131_v52, %v1130_v51 }
  0xea   :  { %v1166_v57 = vpop.f32.mrf.mxu1 }
  0xeb   :  { %v659_v60 = vadd.f32 %v1132_v55, %v1097_v56  ;;  %v1167_v61 = vadd.f32 %v1166_v57, %v1165_v53 }
  0xed   :  { %v729_v1 = vadd.f32 %v1167_v61, %v659_v60 }
 0x106   :  { %v1200_v54 = vpop.f32.mrf.mxu0 }
 0x108   :  { %v1201_v58 = vpop.f32.mrf.mxu0 }
 0x109   :  { %v1235_v59 = vpop.f32.mrf.mxu1  ;;  %v1202_v63 = vadd.f32 %v1201_v58, %v1200_v54 }
 0x10b   :  { %v1236_v0 = vpop.f32.mrf.mxu1  ;;  %v799_v4 = vadd.f32 %v1202_v63, %v729_v1 }
 0x10c   :  { %v1237_v5 = vadd.f32 %v1236_v0, %v1235_v59 }
 0x10e   :  { %v869_v15 = vadd.f32 %v1237_v5, %v799_v4 }
 0x129   :  { %v1270_v62 = vpop.f32.mrf.mxu0 }
 0x12b   :  { %v1271_v2 = vpop.f32.mrf.mxu0 }
 0x12c   :  { %v1305_v3 = vpop.f32.mrf.mxu1  ;;  %v1272_v6 = vadd.f32 %v1271_v2, %v1270_v62 }
 0x12e   :  { %v1306_v7 = vpop.f32.mrf.mxu1  ;;  %v939_v20 = vadd.f32 %v1272_v6, %v869_v15 }
 0x12f   :  { %v1307_v8 = vadd.f32 %v1306_v7, %v1305_v3 }
 0x131   :  { %v1009_v11 = vadd.f32 %v1307_v8, %v939_v20 }
 0x14a   :  { %v1340_v9 = vpop.f32.mrf.mxu0 }
 0x14c   :  { %v1341_v10 = vpop.f32.mrf.mxu0 }
 0x14d   :  { %v1342_v12 = vadd.f32 %v1341_v10, %v1340_v9 }
 0x14f   :  { %v1079_v13 = vadd.f32 %v1342_v12, %v1009_v11 }
 0x151   :  { %1082 = vst [vmem:[#allocation2] sm:$0x3] %v1079_v13 }
 0x152   :  { %1355 = shalt.err (!%p1352_p4)
}
 0x153   :  { %1092 = dma.vmem_to_hbm [thread:$0]  %s1090_s2, 32, %s2145_s3, [#allocation3]  }
 0x154   :  { %1364 = dma.done.wait [#allocation3], 32  }
 0x155   :  { %1365 = vsyncadd [#allocation3], 4294967264 }
 0x156   :  { %1096 = vsyncpa [#allocation3], 1 }

</bundles_post_ra>
